<compile_context>
chip_gen: v7x
topology: tpu7x:2x2x1
jax: 0.10.0
libtpu: 0.0.40
codegen_flags: <defaults>
</compile_context>

<pallas_src>
import functools

import jax
import jax.numpy as jnp
from jax.experimental import pallas as pl
from jax.experimental.pallas import tpu as pltpu

W0 = 30.0
C_SIREN = 6.0


def _film_siren_nerf_kernel(
    x_ref,      # (6, TN)       rows 0:3 = pos, rows 3:6 = dir (points on lanes)
    w6_ref,     # (2, H, 6)     [0] = folded input weight (cols 3:6 zero)
                #               [1] = folded rgb dir weight (cols 0:3 zero)
    wsq_ref,    # (LH+1, H, H)  [0:LH] folded hidden weights, [LH] folded rgb h-part
    beta_ref,   # (LH+3, H, 1)  [0:LH+2] beta' per FiLM layer,
                #               [LH+2]   head biases: rows 0:3 = b_rgb_out, row 3 = b_sigma
    whead_ref,  # (4, H)        rows 0:3 = w_rgb_out, row 3 = w_sigma
    o_ref,      # (4, TN)       rows 0:3 = rgb, row 3 = sigma
    *,
    n_hidden: int,
):
    x = x_ref[...]                                                          # (6, TN)

    # --- input FilmSiren (W0, gamma, bias folded into weight / beta') ---
    h = jnp.dot(w6_ref[0], x, preferred_element_type=jnp.float32)          # (H, TN)
    h = jnp.sin(h + beta_ref[0])

    # --- hidden FilmSiren layers (static unroll) ---
    for i in range(n_hidden):
        h = jnp.dot(wsq_ref[i], h, preferred_element_type=jnp.float32)
        h = jnp.sin(h + beta_ref[i + 1])

    head_b = beta_ref[n_hidden + 2]                                         # (H, 1)

    # --- sigma head: Linear(H, 1) + ReLU ---
    sigma = (jnp.dot(whead_ref[3:4, :], h, preferred_element_type=jnp.float32)
             + head_b[3:4])
    sigma = jnp.maximum(sigma, 0.0)                                         # (1, TN)

    # --- rgb FilmSiren on [h, dir]: concat expressed as two matmuls ---
    h2 = (jnp.dot(wsq_ref[n_hidden], h, preferred_element_type=jnp.float32)
          + jnp.dot(w6_ref[1], x, preferred_element_type=jnp.float32))
    h2 = jnp.sin(h2 + beta_ref[n_hidden + 1])

    # --- rgb head: Linear(H, 3) + Sigmoid ---
    rgb = (jnp.dot(whead_ref[0:3, :], h2, preferred_element_type=jnp.float32)
           + head_b[0:3])
    rgb = jax.nn.sigmoid(rgb)                                               # (3, TN)

    # Lane-dense sub-slice stores (no concat temp).
    o_ref[0:3, :] = rgb
    o_ref[3:4, :] = sigma


def _round_up(a, b):
    return -(-a // b) * b


def film_siren_nerf_planar(x_t, params, *, tile_n=8192):
    """Feature-major entry point: x_t is [6, N] (pos ++ dir), returns [4, N]
    (rgb ++ sigma).  No layout adapters around the kernel."""
    N = x_t.shape[1]
    H = params["w_in"].shape[0]
    LH = params["w_hidden"].shape[0]            # number of hidden FilmSiren layers

    # Lane-aligned tile; clamp for tiny N; prefer >= 2 tiles (v7x has 2 TCs).
    n128 = _round_up(max(N, 1), 128)
    tile_n = _round_up(max(128, min(int(tile_n), n128)), 128)
    if n128 >= 256 and n128 // tile_n < 2:
        tile_n = _round_up(n128 // 2, 128)
    n_pad = _round_up(N, tile_n)
    grid = n_pad // tile_n

    x_t = x_t.astype(jnp.float32)
    if n_pad != N:
        x_t = jnp.pad(x_t, ((0, 0), (0, n_pad - N)))

    # ---- host-side folding: gamma & W0 into weight rows, biases into beta' ----
    biases = jnp.concatenate(
        [params["b_in"][None], params["b_hidden"], params["b_rgb_film"][None]], axis=0)
    g = W0 * params["gamma"]                                             # (LH+2, H)
    beta_f = W0 * (params["gamma"] * biases + params["beta"])            # (LH+2, H)

    w_in_g = g[0][:, None] * params["w_in"]                              # (H, 3)
    w_hidden_g = g[1:LH + 1][:, :, None] * params["w_hidden"]            # (LH, H, H)
    w_rgb_h_g = g[LH + 1][:, None] * params["w_rgb_film"][:, :H]         # (H, H)
    w_rgb_d_g = g[LH + 1][:, None] * params["w_rgb_film"][:, H:]         # (H, 3)

    zeros3 = jnp.zeros((H, 3), jnp.float32)
    w6 = jnp.stack([jnp.concatenate([w_in_g, zeros3], axis=1),
                    jnp.concatenate([zeros3, w_rgb_d_g], axis=1)], axis=0)   # (2, H, 6)
    w_sq = jnp.concatenate([w_hidden_g, w_rgb_h_g[None]], axis=0)            # (LH+1, H, H)

    # Head biases packed into an extra beta row (rows 0:3 = b_rgb_out, row 3 = b_sigma).
    head_b = jnp.zeros((1, H), jnp.float32)
    head_b = head_b.at[0, 0:3].set(params["b_rgb_out"])
    head_b = head_b.at[0, 3].set(params["b_sigma"][0])
    beta_all = jnp.concatenate([beta_f, head_b], axis=0)[..., None]          # (LH+3, H, 1)

    w_head = jnp.concatenate([params["w_rgb_out"], params["w_sigma"]], axis=0)  # (4, H)

    in_specs = [
        pl.BlockSpec((6, tile_n), lambda i: (0, i)),          # x (per-tile stream)
        pl.BlockSpec((2, H, 6), lambda i: (0, 0, 0)),         # w6 (resident)
        pl.BlockSpec((LH + 1, H, H), lambda i: (0, 0, 0)),    # w_sq (resident)
        pl.BlockSpec((LH + 3, H, 1), lambda i: (0, 0, 0)),    # beta' + head biases
        pl.BlockSpec((4, H), lambda i: (0, 0)),               # head weights
    ]

    kernel = functools.partial(_film_siren_nerf_kernel, n_hidden=LH)
    out_t = pl.pallas_call(
        kernel,
        out_shape=jax.ShapeDtypeStruct((4, n_pad), jnp.float32),
        grid_spec=pltpu.PrefetchScalarGridSpec(
            num_scalar_prefetch=0,
            grid=(grid,),
            in_specs=in_specs,
            out_specs=pl.BlockSpec((4, tile_n), lambda i: (0, i)),
        ),
        compiler_params=pltpu.CompilerParams(dimension_semantics=("parallel",)),
    )(x_t, w6, w_sq, beta_all, w_head)

    return out_t[:, :N]                          # [4, N]


def film_siren_nerf(x, params, *, tile_n=8192):
    """Torch-compatible layout: x [N, 6] (pos ++ dir) -> [N, 4] (rgb ++ sigma).

    The two boundary transposes below are the only out-of-kernel relayouts;
    callers that can keep data feature-major should use film_siren_nerf_planar.
    """
    return film_siren_nerf_planar(x.T, params, tile_n=tile_n).T


def init_params(key, hidden_dim=32, hidden_layers=4):
    """Deterministic init mirroring FilmSiren.reset_parameters.

    Weights stored in torch [out, in] layout (kernel computes W @ x with
    points-on-lanes activations)."""
    H = hidden_dim
    LH = hidden_layers - 1  # number of hidden FilmSiren layers
    ks = jax.random.split(key, 16)

    def unif(k, shape, r):
        return jax.random.uniform(k, shape, jnp.float32, minval=-r, maxval=r)

    # input FilmSiren(3, H), is_first_layer=True
    w_in = unif(ks[0], (H, 3), 1.0 / 3.0)
    b_in = unif(ks[1], (H,), (1.0 / 3.0) ** 0.5)

    # hidden FilmSiren(H, H)
    wr = (C_SIREN / H) ** 0.5 / W0
    br = (1.0 / H) ** 0.5
    w_hidden = unif(ks[2], (LH, H, H), wr)
    b_hidden = unif(ks[3], (LH, H), br)

    # FiLM params: (LH + 2) (gamma, beta) pairs, one per FilmSiren layer
    gamma = 1.0 + 0.1 * jax.random.normal(ks[4], (LH + 2, H), jnp.float32)
    beta = 0.1 * jax.random.normal(ks[5], (LH + 2, H), jnp.float32)

    # sigma head: Linear(H, 1)
    r = (1.0 / H) ** 0.5
    w_sigma = unif(ks[6], (1, H), r)
    b_sigma = unif(ks[7], (1,), r)

    # rgb FilmSiren(H + 3, H)
    wr2 = (C_SIREN / (H + 3)) ** 0.5 / W0
    br2 = (1.0 / (H + 3)) ** 0.5
    w_rgb_film = unif(ks[8], (H, H + 3), wr2)
    b_rgb_film = unif(ks[9], (H,), br2)

    # rgb head: Linear(H, 3)
    w_rgb_out = unif(ks[10], (3, H), r)
    b_rgb_out = unif(ks[11], (3,), r)

    return dict(
        w_in=w_in, b_in=b_in,
        w_hidden=w_hidden, b_hidden=b_hidden,
        gamma=gamma, beta=beta,
        w_sigma=w_sigma, b_sigma=b_sigma,
        w_rgb_film=w_rgb_film, b_rgb_film=b_rgb_film,
        w_rgb_out=w_rgb_out, b_rgb_out=b_rgb_out,
    )


def film_siren_nerf_ref(x, p):
    """Pure-JAX reference mirroring the torch forward pass (unfolded params)."""
    pos, dirs = x[:, :3], x[:, 3:6]
    h = jnp.sin(W0 * (p["gamma"][0] * (pos @ p["w_in"].T + p["b_in"]) + p["beta"][0]))
    n_hidden = p["w_hidden"].shape[0]
    for i in range(n_hidden):
        h = jnp.sin(W0 * (p["gamma"][i + 1] * (h @ p["w_hidden"][i].T + p["b_hidden"][i])
                          + p["beta"][i + 1]))
    sigma = jnp.maximum(h @ p["w_sigma"].T + p["b_sigma"], 0.0)
    hc = jnp.concatenate([h, dirs], axis=-1)
    h2 = jnp.sin(W0 * (p["gamma"][n_hidden + 1] * (hc @ p["w_rgb_film"].T + p["b_rgb_film"])
                       + p["beta"][n_hidden + 1]))
    rgb = jax.nn.sigmoid(h2 @ p["w_rgb_out"].T + p["b_rgb_out"])
    return jnp.concatenate([rgb, sigma], axis=-1)


if __name__ == "__main__":
    key = jax.random.PRNGKey(0)
    k_param, k_x = jax.random.split(key)

    hidden_dim = 32
    hidden_layers = 4   # => 3 hidden FilmSiren layers, 5 FiLM (gamma, beta) pairs
    N = 512             # number of sample points (rays x samples, flattened)

    params = init_params(k_param, hidden_dim=hidden_dim, hidden_layers=hidden_layers)
    x = jax.random.uniform(k_x, (N, 6), jnp.float32, minval=-1.0, maxval=1.0)

    # Default tile_n (8192) clamps to N and then splits into 2 equal 256-point
    # tiles so the ("parallel",) grid axis exercises both v7x TensorCores.
    out = film_siren_nerf(x, params)
    out = jax.block_until_ready(out)

    ref = film_siren_nerf_ref(x, params)
    assert out.shape == (N, 4)
    assert jnp.allclose(out, ref, atol=1e-4, rtol=1e-4), float(jnp.max(jnp.abs(out - ref)))

    print("KERNEL_OK")
</pallas_src>

<mosaic_0001>
module attributes {stable_mosaic.version = 11 : i64} {
  func.func @_film_siren_nerf_kernel(%arg0: i32, %arg1: memref<6x256xf32, #tpu.memory_space<vmem>>, %arg2: memref<2x32x6xf32, #tpu.memory_space<vmem>>, %arg3: memref<4x32x32xf32, #tpu.memory_space<vmem>>, %arg4: memref<6x32x1xf32, #tpu.memory_space<vmem>>, %arg5: memref<4x32xf32, #tpu.memory_space<vmem>>, %arg6: memref<4x256xf32, #tpu.memory_space<vmem>>) attributes {dimension_semantics = [#tpu.dimension_semantics<parallel>], iteration_bounds = array<i64: 2>, scalar_prefetch = 0 : i64, scratch_operands = 0 : i64, tpu.core_type = #tpu.core_type<tc>, window_params = [{transform_indices = @transform_0, window_bounds = array<i64: 6, 256>}, {pipeline_mode = #tpu.pipeline_mode<synchronous>, transform_indices = @transform_1, window_bounds = array<i64: 2, 32, 6>}, {pipeline_mode = #tpu.pipeline_mode<synchronous>, transform_indices = @transform_2, window_bounds = array<i64: 4, 32, 32>}, {pipeline_mode = #tpu.pipeline_mode<synchronous>, transform_indices = @transform_3, window_bounds = array<i64: 6, 32, 1>}, {pipeline_mode = #tpu.pipeline_mode<synchronous>, transform_indices = @transform_4, window_bounds = array<i64: 4, 32>}, {transform_indices = @transform_5, window_bounds = array<i64: 4, 256>}]} {
    %c0 = arith.constant 0 : index
    %c0_0 = arith.constant 0 : index
    %0 = vector.load %arg1[%c0, %c0_0] : memref<6x256xf32, #tpu.memory_space<vmem>>, vector<6x256xf32>
    %c0_1 = arith.constant 0 : index
    %c0_2 = arith.constant 0 : index
    %c0_3 = arith.constant 0 : index
    %1 = vector.load %arg2[%c0_1, %c0_2, %c0_3] : memref<2x32x6xf32, #tpu.memory_space<vmem>>, vector<1x32x6xf32>
    %2 = vector.shape_cast %1 : vector<1x32x6xf32> to vector<32x6xf32>
    %cst = arith.constant dense<0.000000e+00> : vector<32x256xf32>
    %3 = tpu.matmul %2, %0, %cst {dimension_numbers = #tpu.dot_dimension_numbers<[1], [0], [0], [1], [0, 0, 1, 1], [], []>} : vector<32x6xf32>, vector<6x256xf32>, vector<32x256xf32> -> vector<32x256xf32>
    %c0_4 = arith.constant 0 : index
    %c0_5 = arith.constant 0 : index
    %c0_6 = arith.constant 0 : index
    %4 = vector.load %arg4[%c0_4, %c0_5, %c0_6] : memref<6x32x1xf32, #tpu.memory_space<vmem>>, vector<1x32x1xf32>
    %5 = vector.shape_cast %4 : vector<1x32x1xf32> to vector<32x1xf32>
    %6 = vector.broadcast %5 : vector<32x1xf32> to vector<32x256xf32>
    %7 = arith.addf %3, %6 : vector<32x256xf32>
    %8 = math.sin %7 : vector<32x256xf32>
    %c0_7 = arith.constant 0 : index
    %c0_8 = arith.constant 0 : index
    %c0_9 = arith.constant 0 : index
    %9 = vector.load %arg3[%c0_7, %c0_8, %c0_9] : memref<4x32x32xf32, #tpu.memory_space<vmem>>, vector<1x32x32xf32>
    %10 = vector.shape_cast %9 : vector<1x32x32xf32> to vector<32x32xf32>
    %cst_10 = arith.constant dense<0.000000e+00> : vector<32x256xf32>
    %11 = tpu.matmul %10, %8, %cst_10 {dimension_numbers = #tpu.dot_dimension_numbers<[1], [0], [0], [1], [0, 0, 1, 1], [], []>} : vector<32x32xf32>, vector<32x256xf32>, vector<32x256xf32> -> vector<32x256xf32>
    %c1 = arith.constant 1 : index
    %c0_11 = arith.constant 0 : index
    %c0_12 = arith.constant 0 : index
    %12 = vector.load %arg4[%c1, %c0_11, %c0_12] : memref<6x32x1xf32, #tpu.memory_space<vmem>>, vector<1x32x1xf32>
    %13 = vector.shape_cast %12 : vector<1x32x1xf32> to vector<32x1xf32>
    %14 = vector.broadcast %13 : vector<32x1xf32> to vector<32x256xf32>
    %15 = arith.addf %11, %14 : vector<32x256xf32>
    %16 = math.sin %15 : vector<32x256xf32>
    %c1_13 = arith.constant 1 : index
    %c0_14 = arith.constant 0 : index
    %c0_15 = arith.constant 0 : index
    %17 = vector.load %arg3[%c1_13, %c0_14, %c0_15] : memref<4x32x32xf32, #tpu.memory_space<vmem>>, vector<1x32x32xf32>
    %18 = vector.shape_cast %17 : vector<1x32x32xf32> to vector<32x32xf32>
    %cst_16 = arith.constant dense<0.000000e+00> : vector<32x256xf32>
    %19 = tpu.matmul %18, %16, %cst_16 {dimension_numbers = #tpu.dot_dimension_numbers<[1], [0], [0], [1], [0, 0, 1, 1], [], []>} : vector<32x32xf32>, vector<32x256xf32>, vector<32x256xf32> -> vector<32x256xf32>
    %c2 = arith.constant 2 : index
    %c0_17 = arith.constant 0 : index
    %c0_18 = arith.constant 0 : index
    %20 = vector.load %arg4[%c2, %c0_17, %c0_18] : memref<6x32x1xf32, #tpu.memory_space<vmem>>, vector<1x32x1xf32>
    %21 = vector.shape_cast %20 : vector<1x32x1xf32> to vector<32x1xf32>
    %22 = vector.broadcast %21 : vector<32x1xf32> to vector<32x256xf32>
    %23 = arith.addf %19, %22 : vector<32x256xf32>
    %24 = math.sin %23 : vector<32x256xf32>
    %c2_19 = arith.constant 2 : index
    %c0_20 = arith.constant 0 : index
    %c0_21 = arith.constant 0 : index
    %25 = vector.load %arg3[%c2_19, %c0_20, %c0_21] : memref<4x32x32xf32, #tpu.memory_space<vmem>>, vector<1x32x32xf32>
    %26 = vector.shape_cast %25 : vector<1x32x32xf32> to vector<32x32xf32>
    %cst_22 = arith.constant dense<0.000000e+00> : vector<32x256xf32>
    %27 = tpu.matmul %26, %24, %cst_22 {dimension_numbers = #tpu.dot_dimension_numbers<[1], [0], [0], [1], [0, 0, 1, 1], [], []>} : vector<32x32xf32>, vector<32x256xf32>, vector<32x256xf32> -> vector<32x256xf32>
    %c3 = arith.constant 3 : index
    %c0_23 = arith.constant 0 : index
    %c0_24 = arith.constant 0 : index
    %28 = vector.load %arg4[%c3, %c0_23, %c0_24] : memref<6x32x1xf32, #tpu.memory_space<vmem>>, vector<1x32x1xf32>
    %29 = vector.shape_cast %28 : vector<1x32x1xf32> to vector<32x1xf32>
    %30 = vector.broadcast %29 : vector<32x1xf32> to vector<32x256xf32>
    %31 = arith.addf %27, %30 : vector<32x256xf32>
    %32 = math.sin %31 : vector<32x256xf32>
    %c5 = arith.constant 5 : index
    %c0_25 = arith.constant 0 : index
    %c0_26 = arith.constant 0 : index
    %33 = vector.load %arg4[%c5, %c0_25, %c0_26] : memref<6x32x1xf32, #tpu.memory_space<vmem>>, vector<1x32x1xf32>
    %34 = vector.shape_cast %33 : vector<1x32x1xf32> to vector<32x1xf32>
    %c3_27 = arith.constant 3 : index
    %c0_28 = arith.constant 0 : index
    %35 = vector.load %arg5[%c3_27, %c0_28] : memref<4x32xf32, #tpu.memory_space<vmem>>, vector<1x32xf32>
    %cst_29 = arith.constant dense<0.000000e+00> : vector<1x256xf32>
    %36 = tpu.matmul %35, %32, %cst_29 {dimension_numbers = #tpu.dot_dimension_numbers<[1], [0], [0], [1], [0, 0, 1, 1], [], []>} : vector<1x32xf32>, vector<32x256xf32>, vector<1x256xf32> -> vector<1x256xf32>
    %37 = vector.extract_strided_slice %34 {offsets = [3, 0], sizes = [1, 1], strides = [1, 1]} : vector<32x1xf32> to vector<1x1xf32>
    %38 = vector.broadcast %37 : vector<1x1xf32> to vector<1x256xf32>
    %39 = arith.addf %36, %38 : vector<1x256xf32>
    %cst_30 = arith.constant 0.000000e+00 : f32
    %40 = vector.broadcast %cst_30 : f32 to vector<1x256xf32>
    %41 = arith.maximumf %39, %40 : vector<1x256xf32>
    %c3_31 = arith.constant 3 : index
    %c0_32 = arith.constant 0 : index
    %c0_33 = arith.constant 0 : index
    %42 = vector.load %arg3[%c3_31, %c0_32, %c0_33] : memref<4x32x32xf32, #tpu.memory_space<vmem>>, vector<1x32x32xf32>
    %43 = vector.shape_cast %42 : vector<1x32x32xf32> to vector<32x32xf32>
    %cst_34 = arith.constant dense<0.000000e+00> : vector<32x256xf32>
    %44 = tpu.matmul %43, %32, %cst_34 {dimension_numbers = #tpu.dot_dimension_numbers<[1], [0], [0], [1], [0, 0, 1, 1], [], []>} : vector<32x32xf32>, vector<32x256xf32>, vector<32x256xf32> -> vector<32x256xf32>
    %c1_35 = arith.constant 1 : index
    %c0_36 = arith.constant 0 : index
    %c0_37 = arith.constant 0 : index
    %45 = vector.load %arg2[%c1_35, %c0_36, %c0_37] : memref<2x32x6xf32, #tpu.memory_space<vmem>>, vector<1x32x6xf32>
    %46 = vector.shape_cast %45 : vector<1x32x6xf32> to vector<32x6xf32>
    %cst_38 = arith.constant dense<0.000000e+00> : vector<32x256xf32>
    %47 = tpu.matmul %46, %0, %cst_38 {dimension_numbers = #tpu.dot_dimension_numbers<[1], [0], [0], [1], [0, 0, 1, 1], [], []>} : vector<32x6xf32>, vector<6x256xf32>, vector<32x256xf32> -> vector<32x256xf32>
    %48 = arith.addf %44, %47 : vector<32x256xf32>
    %c4 = arith.constant 4 : index
    %c0_39 = arith.constant 0 : index
    %c0_40 = arith.constant 0 : index
    %49 = vector.load %arg4[%c4, %c0_39, %c0_40] : memref<6x32x1xf32, #tpu.memory_space<vmem>>, vector<1x32x1xf32>
    %50 = vector.shape_cast %49 : vector<1x32x1xf32> to vector<32x1xf32>
    %51 = vector.broadcast %50 : vector<32x1xf32> to vector<32x256xf32>
    %52 = arith.addf %48, %51 : vector<32x256xf32>
    %53 = math.sin %52 : vector<32x256xf32>
    %c0_41 = arith.constant 0 : index
    %c0_42 = arith.constant 0 : index
    %54 = vector.load %arg5[%c0_41, %c0_42] : memref<4x32xf32, #tpu.memory_space<vmem>>, vector<3x32xf32>
    %cst_43 = arith.constant dense<0.000000e+00> : vector<3x256xf32>
    %55 = tpu.matmul %54, %53, %cst_43 {dimension_numbers = #tpu.dot_dimension_numbers<[1], [0], [0], [1], [0, 0, 1, 1], [], []>} : vector<3x32xf32>, vector<32x256xf32>, vector<3x256xf32> -> vector<3x256xf32>
    %56 = vector.extract_strided_slice %34 {offsets = [0, 0], sizes = [3, 1], strides = [1, 1]} : vector<32x1xf32> to vector<3x1xf32>
    %57 = vector.broadcast %56 : vector<3x1xf32> to vector<3x256xf32>
    %58 = arith.addf %55, %57 : vector<3x256xf32>
    %59 = arith.negf %58 : vector<3x256xf32>
    %60 = math.exp %59 : vector<3x256xf32>
    %cst_44 = arith.constant 1.000000e+00 : f32
    %61 = vector.broadcast %cst_44 : f32 to vector<3x256xf32>
    %62 = arith.addf %61, %60 : vector<3x256xf32>
    %63 = arith.divf %61, %62 : vector<3x256xf32>
    %c0_45 = arith.constant 0 : index
    %c0_46 = arith.constant 0 : index
    %64 = vector.load %arg6[%c0_45, %c0_46] : memref<4x256xf32, #tpu.memory_space<vmem>>, vector<3x256xf32>
    tpu.vector_store %arg6[%c0_45, %c0_46], %63 {strides = array<i32>} : memref<4x256xf32, #tpu.memory_space<vmem>>, vector<3x256xf32>,
    %c3_47 = arith.constant 3 : index
    %c0_48 = arith.constant 0 : index
    %65 = vector.load %arg6[%c3_47, %c0_48] : memref<4x256xf32, #tpu.memory_space<vmem>>, vector<1x256xf32>
    tpu.vector_store %arg6[%c3_47, %c0_48], %41 {strides = array<i32>} : memref<4x256xf32, #tpu.memory_space<vmem>>, vector<1x256xf32>,
    return
  }
  func.func @transform_0(%arg0: i32) -> (i32, i32) {
    %c0_i32 = arith.constant 0 : i32
    %c0_i32_0 = arith.constant 0 : i32
    return %c0_i32, %arg0 : i32, i32
  }
  func.func @transform_1(%arg0: i32) -> (i32, i32, i32) {
    %c0_i32 = arith.constant 0 : i32
    %c0_i32_0 = arith.constant 0 : i32
    %c0_i32_1 = arith.constant 0 : i32
    %c0_i32_2 = arith.constant 0 : i32
    return %c0_i32, %c0_i32_0, %c0_i32_1 : i32, i32, i32
  }
  func.func @transform_2(%arg0: i32) -> (i32, i32, i32) {
    %c0_i32 = arith.constant 0 : i32
    %c0_i32_0 = arith.constant 0 : i32
    %c0_i32_1 = arith.constant 0 : i32
    %c0_i32_2 = arith.constant 0 : i32
    return %c0_i32, %c0_i32_0, %c0_i32_1 : i32, i32, i32
  }
  func.func @transform_3(%arg0: i32) -> (i32, i32, i32) {
    %c0_i32 = arith.constant 0 : i32
    %c0_i32_0 = arith.constant 0 : i32
    %c0_i32_1 = arith.constant 0 : i32
    %c0_i32_2 = arith.constant 0 : i32
    return %c0_i32, %c0_i32_0, %c0_i32_1 : i32, i32, i32
  }
  func.func @transform_4(%arg0: i32) -> (i32, i32) {
    %c0_i32 = arith.constant 0 : i32
    %c0_i32_0 = arith.constant 0 : i32
    %c0_i32_1 = arith.constant 0 : i32
    return %c0_i32, %c0_i32_0 : i32, i32
  }
  func.func @transform_5(%arg0: i32) -> (i32, i32) {
    %c0_i32 = arith.constant 0 : i32
    %c0_i32_0 = arith.constant 0 : i32
    return %c0_i32, %arg0 : i32, i32
  }
}

</mosaic_0001>

<bundles_post_ra>
// kernel: tpu_custom_call.1
= control target key start
LH: loop header
LB: loop body
LE: loop exit
PB: predicated region body
PF: predicated region fallthrough
CT: control target
= control target key end

     0   :  { %10 = vsyncpa [#allocation3], 0  ;;  %s10104_s0 = inlined_call_operand.vmem [shape: f32[6,512], index: 0, kind: input, shape index: {}]   ;;  %s10105_s1 = inlined_call_operand.vmem [shape: f32[2,32,6], index: 1, kind: input, shape index: {}]   ;;  %s10106_s2 = inlined_call_operand.vmem [shape: f32[4,32,32], index: 2, kind: input, shape index: {}]   ;;  %s10107_s3 = inlined_call_operand.vmem [shape: f32[6,32,1], index: 3, kind: input, shape index: {}]   ;;  %s10108_s4 = inlined_call_operand.vmem [shape: f32[4,32], index: 4, kind: input, shape index: {}]   ;;  %s10109_s5 = inlined_call_operand.hbm [shape: f32[4,512], index: 5, kind: output, shape index: {}]  }
   0x1   :  { %12 = vsyncpa [#allocation3 + $0x1], 0  ;;  %s6222_s18 = smov 0   ;;  %s6224_s19 = smov 0  }
   0x2   :  { %s6226_s20 = smov 0   ;;  %s6228_s21 = smov 0  }
   0x3 LB: > { %s6243_s22 = sadd.s32 4294967295, %s6180_s21   ;;  %s5439_s23 = sadd.s32 4294967294, %s6180_s21   ;;  %s6180_s21 = sphi %s6228_s21, %s10428_s21   ;;  %s6176_s20 = sphi %s6226_s20, %s10427_s20   ;;  %s6172_s19 = sphi %s6224_s19, %s10426_s19   ;;  %s6168_s18 = sphi %s6222_s18, %s10425_s18  }
   0x4   : > { %s6247_s24 = sadd.s32 1, %s6180_s21   ;;  %s135_s25 = sadd.s32 1, %s6176_s20 }
   0x5   : > { %s132_s26 = ssub.s32 %s6180_s21, %s6247_s24  ;;  %p145_p0 = scmp.ne.s32.totalorder %s6176_s20, %s6172_s19 }
   0x6   : > { %p133_p1 = scmp.eq.s32.totalorder %s132_s26, 0  ;;  %p146_p2 = scmp.eq.s32.totalorder %s6243_s22, 1 }
   0x7   : > { %p151_p3 = scmp.ne.s32.totalorder %s6172_s19, %s6168_s18  ;;  %p152_p4 = scmp.eq.s32.totalorder %s5439_s23, 1 }
   0x8   : > { %s6258_s27 = scalar_select %p133_p1, %s6176_s20, %s135_s25  }
   0x9   : > { %p6260_p5 = por %p146_p2, %p145_p0  ;;  %p6264_p6 = por %p152_p4, %p151_p3 }
   0xa   : > { %p5442_p7 = scmp.ge.s32.totalorder %s6180_s21, 1  ;;  %p191_p8 = scmp.lt.s32.totalorder %s6180_s21, 3 }
   0xc   : > { %p192_p9 = pnand %p5442_p7, %p191_p8 }
   0xe   : > { %195 = sbr.rel (%p192_p9) target bundleno = 2466 (0x9a2), region = 40 }
  0x15   : > { %s5444_s30 = sshll.u32 %s6243_s22, 1  ;;  %v10110_v0 = vmov 0.0   ;;  %v232_v1 = vld [vmem:[%s10107_s3] sm:$0xff]  ;;  %v6183_v2 = vmov 0   ;;  %v234_v3 = vld [vmem:[%s10107_s3 + $0x10] sm:$0xff]  ;;  %v233_v4 = vld [vmem:[%s10107_s3 + $0x8] sm:$0xff] }
  0x16   : > { %p220_p10 = scmp.lt.s32.totalorder %s5444_s30, 3  ;;  %340 = vmatprep.mubr.f32.mxu0 %v10110_v0  ;;  %1303 = vmatprep.mubr.f32.mxu1 %v10110_v0  ;;  %v235_v5 = vld [vmem:[%s10107_s3 + $0x18] sm:$0xff]  ;;  %vm10160_vm0 = vcmask 1045504   ;;  %v228_v8 = vld [vmem:[%s10105_s1] sm:$0xff]  ;;  %vm10159_vm1 = vcmask 48128   ;;  %v5485_v10 = vld [vmem:[%s10107_s3 + $0x28] sm:$0xff] }
  0x17   : > { %5946 = vset.pattern.permute.xlu0 %v6183_v2  ;;  %5947 = vset.pattern.permute.xlu1 %v6183_v2  ;;  %v5484_v9 = vld [vmem:[%s10107_s3 + $0x20] sm:$0xff]  ;;  %v229_v11 = vld [vmem:[%s10105_s1 + $0x8] sm:$0xff]  ;;  %v5486_v12 = vld [vmem:[%s10107_s3 + $0x30] sm:$0xff]  ;;  %v10157_v55 = vmov 683565275   ;;  %s216_s10 = sand.u32 1, %s6172_s19  }
  0x18   : > { %s10430_s30 = smov (!%p220_p10, %s5444_s30), 3  ;;  %238 = vperm.xlu0 %5946, %v232_v1   ;;  %248 = vperm.xlu1 %5947, %v234_v3   ;;  %v5487_v13 = vld [vmem:[%s10107_s3 + $0x38] sm:$0xff]  ;;  %v230_v14 = vld [vmem:[%s10105_s1 + $0x10] sm:$0xff]  ;;  %v5528_v15 = vld [vmem:[%s10107_s3 + $0x40] sm:$0xff]  ;;  %v10122_v57 = vmov 2475754826  }
  0x19   : > { %s5445_s14 = sshll.u32 %s10430_s30, 3  ;;  %v5529_v16 = vld [vmem:[%s10107_s3 + $0x48] sm:$0xff]  ;;  %v231_v17 = vld [vmem:[%s10105_s1 + $0x18] sm:$0xff]  ;;  %v5530_v18 = vld [vmem:[%s10107_s3 + $0x50] sm:$0xff]  ;;  %v10120_v61 = vmov 2131351028  }
  0x1a   : > { %s6288_s17 = scalar_lea.vmem %s10104_s0, %s5445_s14  ;;  %v5531_v19 = vld [vmem:[%s10107_s3 + $0x58] sm:$0xff]  ;;  %v5572_v20 = vld [vmem:[%s10107_s3 + $0x60] sm:$0xff]  ;;  %v5573_v21 = vld [vmem:[%s10107_s3 + $0x68] sm:$0xff]  ;;  %v10126_v1 = vmov 2102212464   ;;  %s5443_s11 = sshll.u32 %s216_s10, 3 }
  0x1b   : > { %v227_v6 = vld [vmem:[%s6288_s17 + $0x8] sm:$0x3f]  ;;  %v226_v7 = vld [vmem:[%s6288_s17] sm:$0x3f]  ;;  %v5574_v22 = vld [vmem:[%s10107_s3 + $0x70] sm:$0xff]  ;;  %s9955_s12 = scalar_lea.vmem [#allocation2], %s5443_s11 }
  0x1c   : > { %243 = vperm.xlu0 %5946, %v233_v4   ;;  %253 = vperm.xlu1 %5947, %v235_v5   ;;  %v5575_v23 = vld [vmem:[%s10107_s3 + $0x78] sm:$0xff]  ;;  %v5632_v24 = vld [vmem:[%s10107_s3 + $0x80] sm:$0xff]  ;;  %v5633_v25 = vld [vmem:[%s10107_s3 + $0x88] sm:$0xff]  ;;  %v10124_v4 = vmov 920167782   ;;  %s5677_s15 = sshll.u32 %s6243_s22, 7 }
  0x1d   : > { %5446 = vmatprep.subr.msk.mxu0 %vm10160_vm0, %v227_v6  ;;  %v5634_v26 = vld [vmem:[%s10107_s3 + $0x90] sm:$0xff]  ;;  %v5635_v27 = vld [vmem:[%s10107_s3 + $0x98] sm:$0xff]  ;;  %v5612_v28 = vld [vmem:[%s10107_s3 + $0xa0] sm:$0xff]  ;;  %s10059_s25 = scalar_lea.hbm %s10109_s5, %s5677_s15  ;;  %s5366_s26 = scalar_lea.sflag [#allocation3], %s216_s10 }
  0x1e   : > { %5447 = vmatpush1.msk.msra.mxu0 %vm10160_vm0, %v226_v7  ;;  %v10117_v7 = vmov 1326507024   ;;  %s6191_s22 = smov [#allocation2]  }
  0x1f   : > { %5448 = vmatmul.mubr.msk.f32.vlgmr.msra.gmra.mrb[0].mxu0 %vm10159_vm1, %v228_v8  ;;  %s6122_s6 = sshll.u32 %s6191_s22, 4  ;;  %s6123_s6 = int_to_ptr.vmem [resolvable:$false] %s6122_s6 }
  0x20   : > { %346 = vmatprep.mubr.f32.mxu0 %v10110_v0  ;;  %1208 = vperm.xlu0 %5946, %v5484_v9   ;;  %s6124_s7 = scalar_lea.vmem %s6123_s6, 256 }
  0x21   : > { %1213 = vperm.xlu1 %5947, %v5485_v10  }
  0x23   : > { %5449 = vmatmul.mubr.msk.f32.gmra.mrb[2].mxu0 %vm10159_vm1, %v229_v11 }
  0x24   : > { %352 = vmatprep.mubr.f32.mxu0 %v10110_v0  ;;  %1218 = vperm.xlu0 %5946, %v5486_v12  }
  0x25   : > { %1223 = vperm.xlu1 %5947, %v5487_v13  }
  0x27   : > { %5450 = vmatmul.mubr.msk.f32.gmra.mrb[4].mxu0 %vm10159_vm1, %v230_v14 }
  0x28   : > { %358 = vmatprep.mubr.f32.mxu0 %v10110_v0  ;;  %2172 = vperm.xlu0 %5946, %v5528_v15  }
  0x29   : > { %2177 = vperm.xlu1 %5947, %v5529_v16  }
  0x2b   : > { %5451 = vmatmul.mubr.msk.f32.gmra.mrb[6].mxu0 %vm10159_vm1, %v231_v17 }
  0x2c   : > { %2182 = vperm.xlu0 %5946, %v5530_v18   ;;  %2266 = vmatprep.mubr.f32.mxu0 %v10110_v0 }
  0x2d   : > { %2187 = vperm.xlu1 %5947, %v5531_v19  }
  0x30   : > { %3135 = vperm.xlu0 %5946, %v5572_v20  }
  0x31   : > { %3140 = vperm.xlu1 %5947, %v5573_v21  }
  0x34   : > { %3145 = vperm.xlu0 %5946, %v5574_v22  }
  0x35   : > { %3150 = vperm.xlu1 %5947, %v5575_v23  }
  0x38   : > { %4390 = vperm.xlu0 %5946, %v5632_v24  }
  0x39   : > { %4395 = vperm.xlu1 %5947, %v5633_v25  }
  0x3c   : > { %4400 = vperm.xlu0 %5946, %v5634_v26  }
  0x3d   : > { %4405 = vperm.xlu1 %5947, %v5635_v27  }
  0x40   : > { %4091 = vperm.xlu0 %5946, %v5612_v28  }
  0x97   : > { %v239_v29 = vpop.permute.xlu0 %238 }
  0x9b   : > { %v6368_v34 = vpop.permute.xlu0 %243 }
  0xf2   : > { %v342_v30 = vpop.f32.mrb[0].mxu0 }
  0xf3   : > { %v6365_v31 = vadd.f32 %v342_v30, %v239_v29  ;;  %v344_v32 = vpop.f32.mrb[1].mxu0 }
  0xf4   : > { %v6379_v45 = vadd.f32 %v344_v32, %v239_v29 }
  0xf5   : > { %10207 = vst [vmem:[#allocation5_spill] sm:$0xff] %v6365_v31  ;;  %v368_v33 = vand.u32 2139095040, %v6365_v31  ;;  %v10114_v44 = vand.u32 2147483647, %v6365_v31 }
  0xf6   : > { %v348_v35 = vpop.f32.mrb[2].mxu0  ;;  %10209 = vst [vmem:[#allocation7_spill] sm:$0xff] %v6379_v45  ;;  %v472_v53 = vand.u32 2139095040, %v6379_v45 }
  0xf7   : > { %v369_v36 = vshrl.u32 %v368_v33, 23  ;;  %v6371_v37 = vadd.f32 %v348_v35, %v6368_v34  ;;  %v350_v38 = vpop.f32.mrb[3].mxu0  ;;  %v372_v51 = vand.u32 8388607, %v10114_v44 }
  0xf8   : > { %v473_v17 = vshrl.u32 %v472_v53, 23  ;;  %v6414_v35 = vadd.f32 %v350_v38, %v6368_v34 }
  0xf9   : > { %10208 = vst [vmem:[#allocation6_spill] sm:$0xff] %v6371_v37  ;;  %v5452_v39 = vadd.s32 4294967169, %v369_v36  ;;  %v576_v40 = vand.u32 2139095040, %v6371_v37  ;;  %v373_v9 = vor.u32 8388608, %v372_v51  ;;  %v10112_v33 = vand.u32 2147483647, %v6371_v37 }
  0xfa   : > { %v6374_v41 = vpop.f32.mrb[4].mxu0  ;;  %v680_v34 = vand.u32 2139095040, %v6414_v35 }
  0xfb   : > { %v375_v42 = vadd.s32 1, %v5452_v39  ;;  %v6376_v43 = vpop.f32.mrb[5].mxu0  ;;  %v577_v47 = vshrl.u32 %v576_v40, 23  ;;  %v413_v23 = vshll.u32 %v373_v9, 8  ;;  %v580_v51 = vand.u32 8388607, %v10112_v33 }
  0xfd   : > { %vm376_vm2 = vcmp.gt.s32.totalorder %v375_v42, 0  ;;  %v5460_v59 = vadd.s32 4294967169, %v577_v47  ;;  %v5456_v47 = vadd.s32 4294967169, %v473_v17 }
  0xfe   : > { %v377_v46 = vsel %vm376_vm2, %v375_v42, 0  ;;  %v6381_v48 = vpop.f32.mrb[6].mxu0 }
  0xff   : > { %v379_v49 = vand.u32 31, %v377_v46  ;;  %v6383_v50 = vpop.f32.mrb[7].mxu0  ;;  %v378_v54 = vshrl.u32 %v377_v46, 5  ;;  %v583_v20 = vadd.s32 1, %v5460_v59 }
 0x101   : > { %v380_v52 = vsub.s32 32, %v379_v49  ;;  %v382_v56 = vshll.u32 %v10157_v55, %v379_v49  ;;  %v385_v58 = vshll.u32 %v10122_v57, %v379_v49  ;;  %v388_v63 = vshll.u32 %v10120_v61, %v379_v49 }
 0x102   : > { %v391_v3 = vshll.u32 %v10126_v1, %v379_v49  ;;  %v394_v6 = vshll.u32 %v10124_v4, %v379_v49  ;;  %vm397_vm3 = vcmp.lt.s32.totalorder %v378_v54, 1  ;;  %vm400_vm4 = vcmp.lt.s32.totalorder %v378_v54, 4 }
 0x103   : > { %v383_v60 = vshrl.u32 %v10122_v57, %v380_v52  ;;  %v386_v62 = vshrl.u32 %v10120_v61, %v380_v52  ;;  %v389_v2 = vshrl.u32 %v10126_v1, %v380_v52  ;;  %v392_v5 = vshrl.u32 %v10124_v4, %v380_v52 }
 0x104   : > { %v395_v8 = vshrl.u32 %v10117_v7, %v380_v52  ;;  %vm399_vm5 = vcmp.lt.s32.totalorder %v378_v54, 3  ;;  %vm398_vm6 = vcmp.lt.s32.totalorder %v378_v54, 2  ;;  %v381_v24 = vshrl.u32 %v10157_v55, %v380_v52 }
 0x105   : > { %v384_v10 = vor.u32 %v383_v60, %v382_v56  ;;  %v387_v11 = vor.u32 %v386_v62, %v385_v58  ;;  %v390_v12 = vor.u32 %v389_v2, %v388_v63  ;;  %v393_v13 = vor.u32 %v392_v5, %v391_v3 }
 0x106   : > { %v396_v14 = vor.u32 %v395_v8, %v394_v6  ;;  %vm584_vm7 = vcmp.gt.s32.totalorder %v583_v20, 0  ;;  %v581_v8 = vor.u32 8388608, %v580_v51 }
 0x107   : > { %v405_v15 = vsel %vm397_vm3, %v384_v10, %v387_v11  ;;  %v409_v16 = vsel %vm397_vm3, %v387_v11, %v390_v12  ;;  %v406_v18 = vsel %vm400_vm4, %v393_v13, 920167782  ;;  %v402_v25 = vsel %vm400_vm4, %v390_v12, 2102212464 }
 0x108   : > { %v410_v19 = vsel %vm400_vm4, %v396_v14, 1326507024  ;;  %v407_v21 = vsel %vm399_vm5, %v390_v12, %v406_v18  ;;  %v401_v36 = vsel %vm397_vm3, %v381_v24, %v384_v10  ;;  %v403_v39 = vsel %vm399_vm5, %v387_v11, %v402_v25  ;;  %v249_v11 = vpop.permute.xlu1 %248 }
 0x109   : > { %v411_v22 = vsel %vm399_vm5, %v393_v13, %v410_v19  ;;  %v408_v26 = vsel %vm398_vm6, %v405_v15, %v407_v21  ;;  %v585_v40 = vsel %vm584_vm7, %v583_v20, 0  ;;  %v404_v49 = vsel %vm398_vm6, %v401_v36, %v403_v39 }
 0x10a   : > { %v412_v27 = vsel %vm398_vm6, %v409_v16, %v411_v22  ;;  %v6408_v30 = vmul.u32.u64.low %v413_v23, %v408_v26  ;;  %v6409_v32 = vmul.u32.u64.high %v413_v23, %v408_v26, %v6408_v30  ;;  %v587_v42 = vand.u32 31, %v585_v40 }
 0x10b   : > { %v6405_v28 = vmul.u32.u64.low %v413_v23, %v412_v27  ;;  %v6406_v29 = vmul.u32.u64.high %v413_v23, %v412_v27, %v6405_v28  ;;  %v6425_v38 = vshrl.u32 %v585_v40, 5  ;;  %v420_v6 = vmul.u32 %v413_v23, %v404_v49 }
 0x10c   : > { %v423_v46 = vadd.s32 1, %v6409_v32  ;;  %v588_v52 = vsub.s32 32, %v587_v42  ;;  %v590_v53 = vshll.u32 %v10157_v55, %v587_v42  ;;  %v593_v56 = vshll.u32 %v10122_v57, %v587_v42 }
 0x10d   : > { %vm422_vm8 = vc.u32 %v6406_v29, %v6408_v30  ;;  %v596_v58 = vshll.u32 %v10120_v61, %v587_v42  ;;  %v599_v62 = vshll.u32 %v10126_v1, %v587_v42  ;;  %v602_v3 = vshll.u32 %v10124_v4, %v587_v42 }
 0x10e   : > { %v424_v59 = vsel %vm422_vm8, %v423_v46, %v6409_v32  ;;  %v591_v60 = vshrl.u32 %v10122_v57, %v588_v52  ;;  %v594_v54 = vshrl.u32 %v10120_v61, %v588_v52  ;;  %v597_v63 = vshrl.u32 %v10126_v1, %v588_v52 }
 0x10f   : > { %v600_v2 = vshrl.u32 %v10124_v4, %v588_v52  ;;  %v603_v5 = vshrl.u32 %v10117_v7, %v588_v52  ;;  %vm605_vm9 = vcmp.lt.s32.totalorder %v6425_v38, 1  ;;  %v425_v15 = vadd.s32 %v424_v59, %v420_v6 }
 0x110   : > { %v592_v9 = vor.u32 %v591_v60, %v590_v53  ;;  %v595_v10 = vor.u32 %v594_v54, %v593_v56  ;;  %v598_v12 = vor.u32 %v597_v63, %v596_v58  ;;  %vm608_vm10 = vcmp.lt.s32.totalorder %v6425_v38, 4 }
 0x111   : > { %v601_v13 = vor.u32 %v600_v2, %v599_v62  ;;  %v604_v14 = vor.u32 %v603_v5, %v602_v3  ;;  %v6443_v17 = vadd.f32 %v6374_v41, %v249_v11  ;;  %vm607_vm11 = vcmp.lt.s32.totalorder %v6425_v38, 3 }
 0x112   : > { %v613_v16 = vsel %vm605_vm9, %v592_v9, %v595_v10  ;;  %v617_v19 = vsel %vm605_vm9, %v595_v10, %v598_v12  ;;  %v479_v21 = vadd.s32 1, %v5456_v47  ;;  %vm606_vm12 = vcmp.lt.s32.totalorder %v6425_v38, 2 }
 0x113   : > { %10210 = vst [vmem:[#allocation8_spill] sm:$0xff] %v6443_v17  ;;  %v614_v18 = vsel %vm608_vm10, %v601_v13, 920167782  ;;  %v618_v20 = vsel %vm608_vm10, %v604_v14, 1326507024  ;;  %v621_v25 = vshll.u32 %v581_v8, 8  ;;  %v589_v51 = vshrl.u32 %v10157_v55, %v588_v52 }
 0x114   : > { %v615_v22 = vsel %vm607_vm11, %v598_v12, %v614_v18  ;;  %v619_v41 = vsel %vm607_vm11, %v601_v13, %v618_v20  ;;  %v426_v26 = vadd.s32 536870912, %v425_v15  ;;  %v681_v32 = vshrl.u32 %v680_v34, 23 }
 0x115   : > { %v616_v23 = vsel %vm606_vm12, %v613_v16, %v615_v22  ;;  %v620_v24 = vsel %vm606_vm12, %v617_v19, %v619_v41  ;;  %vm480_vm13 = vcmp.gt.s32.totalorder %v479_v21, 0  ;;  %v784_v40 = vand.u32 2139095040, %v6443_v17 }
 0x116   : > { %v6461_v27 = vmul.u32.u64.low %v621_v25, %v616_v23  ;;  %v6462_v28 = vmul.u32.u64.high %v621_v25, %v616_v23, %v6461_v27  ;;  %v6465_v36 = vmul.u32.u64.low %v621_v25, %v620_v24  ;;  %v6466_v39 = vmul.u32.u64.high %v621_v25, %v620_v24, %v6465_v36 }
 0x117   : > { %v6469_v42 = vshrl.u32 %v426_v26, 30  ;;  %v6471_v46 = vsel %vm480_vm13, %v479_v21, 0  ;;  %v610_v47 = vsel %vm608_vm10, %v598_v12, 2102212464  ;;  %v785_v49 = vshrl.u32 %v784_v40, 23 }
 0x118   : > { %v5464_v53 = vadd.s32 4294967169, %v681_v32  ;;  %v6477_v56 = vadd.f32 %v6376_v43, %v249_v11  ;;  %v6480_v58 = vand.u32 31, %v6471_v46  ;;  %v609_v59 = vsel %vm605_vm9, %v589_v51, %v592_v9  ;;  %v6530_v51 = vpop.permute.xlu1 %253 }
 0x119   : > { %10211 = vst [vmem:[#allocation9_spill] sm:$0xff] %v6469_v42  ;;  %v5468_v34 = vadd.s32 4294967169, %v785_v49  ;;  %v611_v60 = vsel %vm607_vm11, %v595_v10, %v610_v47  ;;  %v428_v54 = vshll.u32 %v6469_v42, 30  ;;  %v631_v62 = vadd.s32 1, %v6462_v28 }
 0x11a   : > { %10212 = vst [vmem:[#allocation10_spill] sm:$0xff] %v6477_v56  ;;  %vm630_vm14 = vc.u32 %v6466_v39, %v6461_v27  ;;  %v687_v43 = vadd.s32 1, %v5464_v53  ;;  %v888_v52 = vand.u32 2139095040, %v6477_v56  ;;  %v612_v2 = vsel %vm606_vm12, %v609_v59, %v611_v60 }
 0x11b   : > { %v791_v63 = vadd.s32 1, %v5468_v34  ;;  %v6494_v3 = vsub.s32 32, %v6480_v58  ;;  %v6496_v5 = vsub.s32 %v425_v15, %v428_v54  ;;  %v632_v6 = vsel %vm630_vm14, %v631_v62, %v6462_v28 }
 0x11c   : > { %v10116_v8 = vand.u32 2147483647, %v6443_v17  ;;  %v628_v10 = vmul.u32 %v621_v25, %v612_v2  ;;  %vm688_vm2 = vcmp.gt.s32.totalorder %v687_v43, 0  ;;  %v889_v11 = vshrl.u32 %v888_v52, 23 }
 0x11d   : > { %vm792_vm15 = vcmp.gt.s32.totalorder %v791_v63, 0  ;;  %v10113_v13 = vand.u32 2147483647, %v6379_v45  ;;  %v6503_v38 = vshll.u32 %v10126_v1, %v6480_v58  ;;  %v6507_v14 = vshrl.u32 %v10124_v4, %v6494_v3 }
 0x11e   : > { %v793_v9 = vsel %vm792_vm15, %v791_v63, 0  ;;  %v6511_v15 = vshrl.u32 %v10117_v7, %v6494_v3  ;;  %v6513_v16 = vadd.s32 %v632_v6, %v628_v10  ;;  %v431_v18 = vsub.s32 0, %v6496_v5 }
 0x11f   : > { %v795_v12 = vand.u32 31, %v793_v9  ;;  %v6516_v19 = vsel %vm688_vm2, %v687_v43, 0  ;;  %v788_v20 = vand.u32 8388607, %v10116_v8  ;;  %v794_v22 = vshrl.u32 %v793_v9, 5 }
 0x120   : > { %v5472_v24 = vadd.s32 4294967169, %v889_v11  ;;  %v634_v36 = vadd.s32 536870912, %v6513_v16  ;;  %v6534_v54 = vmin.u32 %v431_v18, %v6496_v5  ;;  %v10115_v63 = vand.u32 2147483647, %v6477_v56 }
 0x121   : > { %v796_v21 = vsub.s32 32, %v795_v12  ;;  %v798_v41 = vshll.u32 %v10157_v55, %v795_v12  ;;  %v801_v23 = vshll.u32 %v10122_v57, %v795_v12  ;;  %v804_v28 = vshll.u32 %v10120_v61, %v795_v12 }
 0x122   : > { %v807_v40 = vshll.u32 %v10126_v1, %v795_v12  ;;  %v810_v49 = vshll.u32 %v10124_v4, %v795_v12  ;;  %v6539_v43 = vadd.f32 %v6381_v48, %v6530_v51  ;;  %v789_v52 = vor.u32 8388608, %v788_v20 }
 0x123   : > { %v799_v25 = vshrl.u32 %v10122_v57, %v796_v21  ;;  %v802_v26 = vshrl.u32 %v10120_v61, %v796_v21  ;;  %v805_v32 = vshrl.u32 %v10126_v1, %v796_v21  ;;  %v808_v47 = vshrl.u32 %v10124_v4, %v796_v21 }
 0x124   : > { %v811_v60 = vshrl.u32 %v10117_v7, %v796_v21  ;;  %10213 = vst [vmem:[#allocation11_spill] sm:$0xff] %v6539_v43  ;;  %vm813_vm3 = vcmp.lt.s32.totalorder %v794_v22, 1  ;;  %v895_v6 = vadd.s32 1, %v5472_v24  ;;  %v6541_v9 = vshrl.u32 %v634_v36, 30 }
 0x125   : > { %v800_v53 = vor.u32 %v799_v25, %v798_v41  ;;  %v803_v34 = vor.u32 %v802_v26, %v801_v23  ;;  %v806_v59 = vor.u32 %v805_v32, %v804_v28  ;;  %v809_v62 = vor.u32 %v808_v47, %v807_v40 }
 0x126   : > { %v812_v2 = vor.u32 %v811_v60, %v810_v49  ;;  %10214 = vst [vmem:[#allocation12_spill] sm:$0xff] %v6541_v9  ;;  %vm815_vm4 = vcmp.lt.s32.totalorder %v794_v22, 3  ;;  %vm816_vm5 = vcmp.lt.s32.totalorder %v794_v22, 4  ;;  %v797_v23 = vshrl.u32 %v10157_v55, %v796_v21 }
 0x127   : > { %v821_v10 = vsel %vm813_vm3, %v800_v53, %v803_v34  ;;  %v818_v11 = vsel %vm816_vm5, %v806_v59, 2102212464  ;;  %v822_v12 = vsel %vm816_vm5, %v809_v62, 920167782  ;;  %v825_v18 = vsel %vm813_vm3, %v803_v34, %v806_v59 }
 0x128   : > { %v826_v41 = vsel %vm816_vm5, %v812_v2, 1326507024  ;;  %vm814_vm6 = vcmp.lt.s32.totalorder %v794_v22, 2  ;;  %v823_v48 = vsel %vm815_vm4, %v806_v59, %v822_v12  ;;  %v992_v20 = vand.u32 2139095040, %v6539_v43 }
 0x129   : > { %v824_v24 = vsel %vm814_vm6, %v821_v10, %v823_v48  ;;  %v827_v25 = vsel %vm815_vm4, %v809_v62, %v826_v41  ;;  %v829_v26 = vshll.u32 %v789_v52, 8  ;;  %vm896_vm7 = vcmp.gt.s32.totalorder %v895_v6, 0 }
 0x12a   : > { %v817_v28 = vsel %vm813_vm3, %v797_v23, %v800_v53  ;;  %v819_v32 = vsel %vm815_vm4, %v803_v34, %v818_v11  ;;  %v828_v36 = vsel %vm814_vm6, %v825_v18, %v827_v25  ;;  %v892_v21 = vand.u32 8388607, %v10115_v63 }
 0x12b   : > { %v6555_v40 = vmul.u32.u64.low %v829_v26, %v828_v36  ;;  %v6556_v47 = vmul.u32.u64.high %v829_v26, %v828_v36, %v6555_v40  ;;  %v6558_v49 = vmul.u32.u64.low %v829_v26, %v824_v24  ;;  %v6559_v59 = vmul.u32.u64.high %v829_v26, %v824_v24, %v6558_v49 }
 0x12c   : > { %v6564_v60 = vshll.u32 %v10124_v4, %v6480_v58  ;;  %v636_v53 = vshll.u32 %v6541_v9, 30  ;;  %v897_v62 = vsel %vm896_vm7, %v895_v6, 0  ;;  %v993_v34 = vshrl.u32 %v992_v20, 23 }
 0x12d   : > { %v6568_v52 = vshrl.u32 %v6471_v46, 5  ;;  %v820_v2 = vsel %vm814_vm6, %v817_v28, %v819_v32  ;;  %v899_v10 = vand.u32 31, %v897_v62  ;;  %v6573_v11 = vand.u32 8388607, %v10113_v13 }
 0x12e   : > { %v433_v12 = vclz %v6534_v54  ;;  %v6578_v18 = vor.u32 %v6507_v14, %v6503_v38  ;;  %v500_v6 = vor.u32 %v6511_v15, %v6564_v60  ;;  %v6583_v41 = vand.u32 31, %v6516_v19 }
 0x12f   : > { %vm838_vm8 = vc.u32 %v6556_v47, %v6558_v49  ;;  %v839_v46 = vadd.s32 1, %v6559_v59  ;;  %v893_v22 = vor.u32 8388608, %v892_v21  ;;  %v900_v23 = vsub.s32 32, %v899_v10 }
 0x130   : > { %v6589_v48 = vsub.s32 %v6513_v16, %v636_v53  ;;  %v836_v20 = vmul.u32 %v829_v26, %v820_v2  ;;  %v902_v38 = vshll.u32 %v10157_v55, %v899_v10  ;;  %v5476_v14 = vadd.s32 4294967169, %v993_v34 }
 0x131   : > { %v840_v24 = vsel %vm838_vm8, %v839_v46, %v6559_v59  ;;  %v903_v15 = vshrl.u32 %v10122_v57, %v900_v23  ;;  %v905_v25 = vshll.u32 %v10122_v57, %v899_v10  ;;  %v906_v28 = vshrl.u32 %v10120_v61, %v900_v23 }
 0x132   : > { %10215 = vst [vmem:[#allocation13_spill] sm:$0xff] %v6589_v48  ;;  %v841_v32 = vadd.s32 %v840_v24, %v836_v20  ;;  %v898_v36 = vshrl.u32 %v897_v62, 5  ;;  %v908_v21 = vshll.u32 %v10120_v61, %v899_v10  ;;  %v909_v40 = vshrl.u32 %v10126_v1, %v900_v23 }
 0x133   : > { %v904_v16 = vor.u32 %v903_v15, %v902_v38  ;;  %v907_v60 = vor.u32 %v906_v28, %v905_v25  ;;  %v911_v26 = vshll.u32 %v10126_v1, %v899_v10  ;;  %v912_v53 = vshrl.u32 %v10124_v4, %v900_v23 }
 0x134   : > { %v842_v34 = vadd.s32 536870912, %v841_v32  ;;  %v910_v59 = vor.u32 %v909_v40, %v908_v21  ;;  %v933_v2 = vshll.u32 %v893_v22, 8  ;;  %v10119_v46 = vand.u32 2147483647, %v6539_v43 }
 0x135   : > { %v639_v0 = vsub.s32 0, %v6589_v48  ;;  %v913_v33 = vor.u32 %v912_v53, %v911_v26  ;;  %v914_v62 = vshll.u32 %v10124_v4, %v899_v10  ;;  %v915_v20 = vshrl.u32 %v10117_v7, %v900_v23 }
 0x136   : > { %v6604_v24 = vshrl.u32 %v842_v34, 30  ;;  %vm917_vm9 = vcmp.lt.s32.totalorder %v898_v36, 1  ;;  %vm920_vm10 = vcmp.lt.s32.totalorder %v898_v36, 4  ;;  %v999_v38 = vadd.s32 1, %v5476_v14 }
 0x137   : > { %v901_v15 = vshrl.u32 %v10157_v55, %v900_v23  ;;  %v916_v25 = vor.u32 %v915_v20, %v914_v62  ;;  %v922_v28 = vsel %vm920_vm10, %v910_v59, 2102212464  ;;  %v925_v21 = vsel %vm917_vm9, %v904_v16, %v907_v60 }
 0x138   : > { %10216 = vst [vmem:[#allocation14_spill] sm:$0xff] %v6604_v24  ;;  %v844_v22 = vshll.u32 %v6604_v24, 30  ;;  %vm918_vm11 = vcmp.lt.s32.totalorder %v898_v36, 2  ;;  %vm919_vm12 = vcmp.lt.s32.totalorder %v898_v36, 3  ;;  %v926_v40 = vsel %vm920_vm10, %v913_v33, 920167782 }
 0x139   : > { %v921_v26 = vsel %vm917_vm9, %v901_v15, %v904_v16  ;;  %v927_v53 = vsel %vm919_vm12, %v910_v59, %v926_v40  ;;  %v929_v10 = vsel %vm917_vm9, %v907_v60, %v910_v59  ;;  %v930_v13 = vsel %vm920_vm10, %v916_v25, 1326507024 }
 0x13a   : > { %v6608_v44 = vsub.s32 %v841_v32, %v844_v22  ;;  %v923_v34 = vsel %vm919_vm12, %v907_v60, %v922_v28  ;;  %v928_v63 = vsel %vm918_vm11, %v925_v21, %v927_v53  ;;  %v931_v14 = vsel %vm919_vm12, %v913_v33, %v930_v13 }
 0x13b   : > { %v932_v23 = vsel %vm918_vm11, %v929_v10, %v931_v14  ;;  %v6612_v62 = vmul.u32.u64.low %v933_v2, %v928_v63  ;;  %v6613_v20 = vmul.u32.u64.high %v933_v2, %v928_v63, %v6612_v62  ;;  %vm1000_vm13 = vcmp.gt.s32.totalorder %v999_v38, 0 }
 0x13c   : > { %v5461_v8 = vmin.u32 %v639_v0, %v6589_v48  ;;  %v6617_v7 = vmul.u32.u64.low %v933_v2, %v932_v23  ;;  %v6618_v16 = vmul.u32.u64.high %v933_v2, %v932_v23, %v6617_v7  ;;  %v1001_v59 = vsel %vm1000_vm13, %v999_v38, 0 }
 0x13d   : > { %vm504_vm14 = vcmp.lt.s32.totalorder %v6568_v52, 4  ;;  %v924_v32 = vsel %vm918_vm11, %v921_v26, %v923_v34  ;;  %v996_v33 = vand.u32 8388607, %v10119_v46  ;;  %v1003_v13 = vand.u32 31, %v1001_v59 }
 0x13e   : > { %v6627_v63 = vsel %vm504_vm14, %v6578_v18, 920167782  ;;  %v6631_v0 = vsel %vm504_vm14, %v500_v6, 1326507024  ;;  %v847_v7 = vsub.s32 0, %v6608_v44  ;;  %v6637_v36 = vadd.s32 4294967294, %v433_v12 }
 0x13f   : > { %v6640_v38 = vsub.s32 32, %v6583_v41  ;;  %v943_v15 = vadd.s32 1, %v6613_v20  ;;  %v1004_v25 = vsub.s32 32, %v1003_v13  ;;  %v641_v28 = vclz %v5461_v8 }
 0x140   : > { %v940_v21 = vmul.u32 %v933_v2, %v924_v32  ;;  %vm942_vm15 = vc.u32 %v6618_v16, %v6612_v62  ;;  %v6647_v6 = vadd.f32 %v6383_v50, %v6530_v51  ;;  %v997_v54 = vor.u32 8388608, %v996_v33 }
 0x141   : > { %v944_v22 = vsel %vm942_vm15, %v943_v15, %v6613_v20  ;;  %v1007_v12 = vshrl.u32 %v10122_v57, %v1004_v25  ;;  %v1010_v40 = vshrl.u32 %v10120_v61, %v1004_v25  ;;  %v5469_v26 = vmin.u32 %v847_v7, %v6608_v44 }
 0x142   : > { %10217 = vst [vmem:[#allocation15_spill] sm:$0xff] %v6647_v6  ;;  %v945_v53 = vadd.s32 %v944_v22, %v940_v21  ;;  %v1006_v8 = vshll.u32 %v10157_v55, %v1003_v13  ;;  %v1013_v2 = vshrl.u32 %v10126_v1, %v1004_v25  ;;  %v1009_v10 = vshll.u32 %v10122_v57, %v1003_v13 }
 0x143   : > { %v1012_v34 = vshll.u32 %v10120_v61, %v1003_v13  ;;  %v1015_v50 = vshll.u32 %v10126_v1, %v1003_v13  ;;  %v1016_v51 = vshrl.u32 %v10124_v4, %v1004_v25  ;;  %v1002_v23 = vshrl.u32 %v1001_v59, 5 }
 0x144   : > { %v946_v14 = vadd.s32 536870912, %v945_v53  ;;  %v1008_v20 = vor.u32 %v1007_v12, %v1006_v8  ;;  %v10218_v32 = vmov 1326507024   ;;  %v1011_v15 = vor.u32 %v1010_v40, %v1009_v10 }
 0x145   : > { %v1019_v33 = vshrl.u32 %v10218_v32, %v1004_v25  ;;  %v1014_v7 = vor.u32 %v1013_v2, %v1012_v34  ;;  %v1017_v21 = vor.u32 %v1016_v51, %v1015_v50  ;;  %v1018_v22 = vshll.u32 %v10124_v4, %v1003_v13 }
 0x146   : > { %v6663_v46 = vadd.s32 %v6408_v30, %v6406_v29  ;;  %v6666_v60 = vshrl.u32 %v6516_v19, 5  ;;  %v704_v61 = vshrl.u32 %v10124_v4, %v6640_v38  ;;  %v849_v57 = vclz %v5469_v26 }
 0x147   : > { %vm5455_vm2 = vcmp.lt.s32.totalorder %v6637_v36, 0  ;;  %v707_v59 = vshrl.u32 %v10218_v32, %v6640_v38  ;;  %v1020_v12 = vor.u32 %v1019_v33, %v1018_v22  ;;  %v1096_v40 = vand.u32 2139095040, %v6647_v6 }
 0x148   : > { %v5462_v13 = vadd.s32 4294967294, %v641_v28  ;;  %v6674_v8 = vshrl.u32 %v946_v14, 30  ;;  %vm1021_vm3 = vcmp.lt.s32.totalorder %v1002_v23, 1  ;;  %vm1024_vm4 = vcmp.lt.s32.totalorder %v1002_v23, 4 }
 0x149   : > { %v1026_v29 = vsel %vm1024_vm4, %v1014_v7, 2102212464  ;;  %v1029_v30 = vsel %vm1021_vm3, %v1008_v20, %v1011_v15  ;;  %v1030_v19 = vsel %vm1024_vm4, %v1017_v21, 920167782  ;;  %v1037_v2 = vshll.u32 %v997_v54, 8 }
 0x14a   : > { %10219 = vst [vmem:[#allocation16_spill] sm:$0xff] %v6674_v8  ;;  %v5470_v10 = vadd.s32 4294967294, %v849_v57  ;;  %v1005_v26 = vshrl.u32 %v10157_v55, %v1004_v25  ;;  %vm1022_vm5 = vcmp.lt.s32.totalorder %v1002_v23, 2  ;;  %vm1023_vm6 = vcmp.lt.s32.totalorder %v1002_v23, 3 }
 0x14b   : > { %v1031_v34 = vsel %vm1023_vm6, %v1014_v7, %v1030_v19  ;;  %v1033_v50 = vsel %vm1021_vm3, %v1011_v15, %v1014_v7  ;;  %v1034_v51 = vsel %vm1024_vm4, %v1020_v12, 1326507024  ;;  %v1097_v33 = vshrl.u32 %v1096_v40, 23 }
 0x14c   : > { %v948_v22 = vshll.u32 %v6674_v8, 30  ;;  %v1025_v28 = vsel %vm1021_vm3, %v1005_v26, %v1008_v20  ;;  %v1027_v14 = vsel %vm1023_vm6, %v1011_v15, %v1026_v29  ;;  %v1032_v4 = vsel %vm1022_vm5, %v1029_v30, %v1031_v34 }
 0x14d   : > { %v1035_v1 = vsel %vm1023_vm6, %v1017_v21, %v1034_v51  ;;  %v6679_v24 = vmul.u32.u64.low %v1037_v2, %v1032_v4  ;;  %v6680_v9 = vmul.u32.u64.high %v1037_v2, %v1032_v4, %v6679_v24  ;;  %v5480_v57 = vadd.s32 4294967169, %v1097_v33 }
 0x14e   : > { %v10221_v25 = vmov 2102212464   ;;  %v10222_v19 = vmov 920167782   ;;  %vm712_vm7 = vcmp.lt.s32.totalorder %v6666_v60, 4  ;;  %v1036_v12 = vsel %vm1022_vm5, %v1033_v50, %v1035_v1 }
 0x14f   : > { %10220 = vst [vmem:[#allocation17_spill] sm:$0xff] %v6679_v24  ;;  %v703_v54 = vshll.u32 %v10221_v25, %v6583_v41  ;;  %v706_v7 = vshll.u32 %v10222_v19, %v6583_v41  ;;  %v6692_v20 = vsel %vm5455_vm2, 0, %v6637_v36  ;;  %v1103_v21 = vadd.s32 1, %v5480_v57 }
 0x150   : > { %10223 = vst [vmem:[#allocation18_spill] sm:$0xff] %v6692_v20  ;;  %v6694_v15 = vmul.u32.u64.low %v1037_v2, %v1036_v12  ;;  %v6695_v4 = vmul.u32.u64.high %v1037_v2, %v1036_v12, %v6694_v15  ;;  %v6699_v30 = vsub.s32 %v945_v53, %v948_v22  ;;  %v1028_v26 = vsel %vm1022_vm5, %v1025_v28, %v1027_v14 }
 0x151   : > { %v6697_v40 = vor.u32 %v704_v61, %v703_v54  ;;  %v708_v29 = vor.u32 %v707_v59, %v706_v7  ;;  %vm5463_vm8 = vcmp.lt.s32.totalorder %v5462_v13, 0  ;;  %vm5471_vm9 = vcmp.lt.s32.totalorder %v5470_v10, 0 }
 0x152   : > { %10224 = vst [vmem:[#allocation19_spill] sm:$0xff] %v6695_v4  ;;  %v1047_v1 = vadd.s32 1, %v6680_v9  ;;  %vm1104_vm10 = vcmp.gt.s32.totalorder %v1103_v21, 0  ;;  %v437_v34 = vsub.s32 32, %v6692_v20  ;;  %v6706_v36 = vadd.s32 %v6461_v27, %v6466_v39 }
 0x153   : > { %v10132_v50 = vand.u32 2147483647, %v6647_v6  ;;  %v1105_v61 = vsel %vm1104_vm10, %v1103_v21, 0  ;;  %v441_v59 = vsub.s32 4294967266, %v6692_v20  ;;  %v1044_v53 = vmul.u32 %v1037_v2, %v1028_v26 }
 0x154   : > { %vm1046_vm11 = vc.u32 %v6695_v4, %v6679_v24  ;;  %v1107_v23 = vand.u32 31, %v1105_v61  ;;  %v6712_v51 = vsel %vm5463_vm8, 0, %v5462_v13  ;;  %v6714_v33 = vsel %vm5471_vm9, 0, %v5470_v10 }
 0x155   : > { %v951_v22 = vsub.s32 0, %v6699_v30  ;;  %v1048_v28 = vsel %vm1046_vm11, %v1047_v1, %v6680_v9  ;;  %v6721_v27 = vsel %vm712_vm7, %v6697_v40, 920167782  ;;  %v6725_v39 = vsel %vm712_vm7, %v708_v29, 1326507024 }
 0x156   : > { %v1049_v2 = vadd.s32 %v1048_v28, %v1044_v53  ;;  %v1108_v14 = vsub.s32 32, %v1107_v23  ;;  %v6730_v10 = vshrl.u32 %v6663_v46, %v437_v34  ;;  %v1100_v9 = vand.u32 8388607, %v10132_v50 }
 0x157   : > { %v6736_v57 = vshrl.u32 %v10157_v55, %v6494_v3  ;;  %v6738_v54 = vadd.s32 127, %v441_v59  ;;  %v649_v7 = vsub.s32 4294967266, %v6712_v51  ;;  %v6743_v12 = vadd.s32 %v6558_v49, %v6556_v47 }
 0x158   : > { %10225 = vst [vmem:[#allocation20_spill] sm:$0xff] %v6730_v10  ;;  %v857_v15 = vsub.s32 4294967266, %v6714_v33  ;;  %v5473_v46 = vmin.u32 %v951_v22, %v6699_v30  ;;  %v1050_v21 = vadd.s32 536870912, %v1049_v2  ;;  %v1110_v29 = vshll.u32 %v10157_v55, %v1107_v23 }
 0x159   : > { %v10226_v26 = vmov 2475754826   ;;  %v10227_v53 = vmov 2131351028   ;;  %v1117_v50 = vshrl.u32 %v10221_v25, %v1108_v14  ;;  %v1101_v13 = vor.u32 8388608, %v1100_v9 }
 0x15a   : > { %v1111_v1 = vshrl.u32 %v10226_v26, %v1108_v14  ;;  %v1113_v34 = vshll.u32 %v10226_v26, %v1107_v23  ;;  %v1114_v59 = vshrl.u32 %v10227_v53, %v1108_v14  ;;  %v1116_v28 = vshll.u32 %v10227_v53, %v1107_v23 }
 0x15b   : > { %v1106_v47 = vshrl.u32 %v1105_v61, 5  ;;  %v486_v8 = vshll.u32 %v10157_v55, %v6480_v58  ;;  %v1119_v45 = vshll.u32 %v10221_v25, %v1107_v23  ;;  %v1120_v43 = vshrl.u32 %v10222_v19, %v1108_v14 }
 0x15c   : > { %v1112_v49 = vor.u32 %v1111_v1, %v1110_v29  ;;  %v1115_v22 = vor.u32 %v1114_v59, %v1113_v34  ;;  %v1118_v6 = vor.u32 %v1117_v50, %v1116_v28  ;;  %v853_v42 = vsub.s32 32, %v6714_v33 }
 0x15d   : > { %v858_v37 = vadd.s32 127, %v857_v15  ;;  %v1122_v31 = vshll.u32 %v10222_v19, %v1107_v23  ;;  %v1123_v24 = vshrl.u32 %v10218_v32, %v1108_v14  ;;  %v953_v4 = vclz %v5473_v46 }
 0x15e   : > { %v6760_v9 = vshrl.u32 %v1050_v21, 30  ;;  %v1121_v61 = vor.u32 %v1120_v43, %v1119_v45  ;;  %v487_v29 = vshrl.u32 %v10226_v26, %v6494_v3  ;;  %vm1125_vm12 = vcmp.lt.s32.totalorder %v1106_v47, 1 }
 0x15f   : > { %v1124_v1 = vor.u32 %v1123_v24, %v1122_v31  ;;  %vm1128_vm13 = vcmp.lt.s32.totalorder %v1106_v47, 4  ;;  %v1141_v50 = vshll.u32 %v1101_v13, 8  ;;  %v1133_v59 = vsel %vm1125_vm12, %v1112_v49, %v1115_v22 }
 0x160   : > { %v1130_v34 = vsel %vm1128_vm13, %v1118_v6, 2102212464  ;;  %v489_v15 = vshll.u32 %v10226_v26, %v6480_v58  ;;  %v490_v23 = vshrl.u32 %v10227_v53, %v6494_v3  ;;  %v1109_v46 = vshrl.u32 %v10157_v55, %v1108_v14 }
 0x161   : > { %vm1127_vm15 = vcmp.lt.s32.totalorder %v1106_v47, 3  ;;  %v1134_v21 = vsel %vm1128_vm13, %v1121_v61, 920167782  ;;  %v1137_v45 = vsel %vm1125_vm12, %v1115_v22, %v1118_v6  ;;  %v1052_v43 = vshll.u32 %v6760_v9, 30 }
 0x162   : > { %vm1126_vm2 = vcmp.lt.s32.totalorder %v1106_v47, 2  ;;  %v1135_v31 = vsel %vm1127_vm15, %v1118_v6, %v1134_v21  ;;  %v1138_v24 = vsel %vm1128_vm13, %v1124_v1, 1326507024  ;;  %v1129_v28 = vsel %vm1125_vm12, %v1109_v46, %v1112_v49 }
 0x163   : > { %v1131_v13 = vsel %vm1127_vm15, %v1115_v22, %v1130_v34  ;;  %v1136_v32 = vsel %vm1126_vm2, %v1133_v59, %v1135_v31  ;;  %v1139_v19 = vsel %vm1127_vm15, %v1121_v61, %v1138_v24  ;;  %v5474_v56 = vadd.s32 4294967294, %v953_v4 }
 0x164   : > { %v1140_v17 = vsel %vm1126_vm2, %v1137_v45, %v1139_v19  ;;  %v6770_v48 = vmul.u32.u64.low %v1141_v50, %v1136_v32  ;;  %v6771_v10 = vmul.u32.u64.high %v1141_v50, %v1136_v32, %v6770_v48  ;;  %v492_v55 = vshll.u32 %v10227_v53, %v6480_v58 }
 0x165   : > { %v6774_v20 = vmul.u32.u64.low %v1141_v50, %v1140_v17  ;;  %v6775_v14 = vmul.u32.u64.high %v1141_v50, %v1140_v17, %v6774_v20  ;;  %v493_v6 = vshrl.u32 %v10221_v25, %v6494_v3  ;;  %v6781_v47 = vsub.s32 %v1049_v2, %v1052_v43 }
 0x166   : > { %v1132_v49 = vsel %vm1126_vm2, %v1129_v28, %v1131_v13  ;;  %v488_v22 = vor.u32 %v487_v29, %v486_v8  ;;  %v491_v61 = vor.u32 %v490_v23, %v489_v15  ;;  %v443_v19 = vshll.u32 %v6738_v54, 23 }
 0x167   : > { %v645_v32 = vsub.s32 32, %v6712_v51  ;;  %v6785_v4 = vadd.s32 127, %v649_v7  ;;  %v494_v1 = vor.u32 %v493_v6, %v492_v55  ;;  %v854_v17 = vshll.u32 %v6608_v44, %v6714_v33 }
 0x168   : > { %v855_v58 = vshrl.u32 %v6743_v12, %v853_v42  ;;  %v859_v20 = vshll.u32 %v858_v37, 23  ;;  %v1151_v3 = vadd.s32 1, %v6771_v10  ;;  %vm5475_vm3 = vcmp.lt.s32.totalorder %v5474_v56, 0 }
 0x169   : > { %v1148_v2 = vmul.u32 %v1141_v50, %v1132_v49  ;;  %vm1150_vm4 = vc.u32 %v6775_v14, %v6770_v48  ;;  %vm501_vm5 = vcmp.lt.s32.totalorder %v6568_v52, 1  ;;  %v1055_v8 = vsub.s32 0, %v6781_v47 }
 0x16a   : > { %v1152_v54 = vsel %vm1150_vm4, %v1151_v3, %v6771_v10  ;;  %vm503_vm6 = vcmp.lt.s32.totalorder %v6568_v52, 3  ;;  %v509_v44 = vsel %vm501_vm5, %v488_v22, %v491_v61  ;;  %v506_v37 = vsel %vm504_vm14, %v494_v1, 2102212464 }
 0x16b   : > { %v1153_v55 = vadd.s32 %v1152_v54, %v1148_v2  ;;  %v511_v42 = vsel %vm503_vm6, %v494_v1, %v6627_v63  ;;  %v513_v33 = vsel %vm501_vm5, %v491_v61, %v494_v1  ;;  %v6806_v7 = vor.u32 %v855_v58, %v854_v17 }
 0x16c   : > { %v6808_v12 = vor.u32 4788187, %v859_v20  ;;  %v6810_v10 = vsel %vm5475_vm3, 0, %v5474_v56  ;;  %vm502_vm8 = vcmp.lt.s32.totalorder %v6568_v52, 2  ;;  %v515_v63 = vsel %vm503_vm6, %v6578_v18, %v6631_v0 }
 0x16d   : > { %v1154_v29 = vadd.s32 536870912, %v1153_v55  ;;  %v512_v50 = vsel %vm502_vm8, %v509_v44, %v511_v42  ;;  %v10228_v34 = vor.u32 8388608, %v6573_v11  ;;  %v5477_v15 = vmin.u32 %v1055_v8, %v6781_v47 }
 0x16e   : > { %v505_v56 = vsel %vm501_vm5, %v6736_v57, %v488_v22  ;;  %v507_v23 = vsel %vm503_vm6, %v491_v61, %v506_v37  ;;  %v516_v46 = vsel %vm502_vm8, %v513_v33, %v515_v63  ;;  %v677_v11 = vand.u32 2147483647, %v6414_v35 }
 0x16f   : > { %v517_v59 = vshll.u32 %v10228_v34, 8  ;;  %v6829_v21 = vshrl.u32 %v1154_v29, 30  ;;  %v6835_v18 = vor.u32 4788187, %v443_v19  ;;  %v6838_v0 = vshrl.u32 %v6706_v36, %v645_v32 }
 0x170   : > { %v651_v24 = vshll.u32 %v6785_v4, 23  ;;  %v863_v28 = vcvt.s32.f32 %v6806_v7  ;;  %v941_v13 = vadd.s32 %v6612_v62, %v6618_v16  ;;  %v861_v49 = vand.u32 2147483647, %v6808_v12 }
 0x171   : > { %v6831_v45 = vmul.u32.u64.low %v517_v59, %v516_v46  ;;  %v6832_v43 = vmul.u32.u64.high %v517_v59, %v516_v46, %v6831_v45  ;;  %v6840_v31 = vmul.u32.u64.low %v517_v59, %v512_v50  ;;  %v6841_v57 = vmul.u32.u64.high %v517_v59, %v512_v50, %v6840_v31 }
 0x172   : > { %v1156_v6 = vshll.u32 %v6829_v21, 30  ;;  %v961_v22 = vsub.s32 4294967266, %v6810_v10  ;;  %v508_v36 = vsel %vm502_vm8, %v505_v56, %v507_v23  ;;  %v695_v61 = vshrl.u32 %v10226_v26, %v6640_v38 }
 0x173   : > { %v1057_v19 = vclz %v5477_v15  ;;  %vm526_vm14 = vc.u32 %v6832_v43, %v6840_v31  ;;  %v684_v62 = vand.u32 8388607, %v677_v11  ;;  %v527_v16 = vadd.s32 1, %v6841_v57 }
 0x174   : > { %v6855_v32 = vsub.s32 %v1153_v55, %v1156_v6  ;;  %v10229_v1 = vmov 683565275   ;;  %v697_v52 = vshll.u32 %v10226_v26, %v6583_v41  ;;  %v698_v58 = vshrl.u32 %v10227_v53, %v6640_v38 }
 0x175   : > { %v694_v17 = vshll.u32 %v10229_v1, %v6583_v41  ;;  %v524_v3 = vmul.u32 %v517_v59, %v508_v36  ;;  %v700_v2 = vshll.u32 %v10227_v53, %v6583_v41  ;;  %v701_v8 = vshrl.u32 %v10221_v25, %v6640_v38 }
 0x176   : > { %v1159_v20 = vsub.s32 0, %v6855_v32  ;;  %v962_v54 = vadd.s32 127, %v961_v22  ;;  %v528_v44 = vsel %vm526_vm14, %v527_v16, %v6841_v57  ;;  %v699_v37 = vor.u32 %v698_v58, %v697_v52 }
 0x177   : > { %v696_v55 = vor.u32 %v695_v61, %v694_v17  ;;  %v957_v42 = vsub.s32 32, %v6810_v10  ;;  %v529_v12 = vadd.s32 %v528_v44, %v524_v3  ;;  %v702_v29 = vor.u32 %v701_v8, %v700_v2  ;;  %v10230_v8 = vld [vmem:[#allocation18_spill] sm:$0xff]  ;;  %v10232_v44 = vld [vmem:[#allocation20_spill] sm:$0xff] }
 0x178   : > { %v5481_v33 = vmin.u32 %v1159_v20, %v6855_v32  ;;  %v958_v50 = vshll.u32 %v6699_v30, %v6810_v10  ;;  %v5478_v63 = vadd.s32 4294967294, %v1057_v19  ;;  %v685_v34 = vor.u32 8388608, %v684_v62 }
 0x179   : > { %vm711_vm9 = vcmp.lt.s32.totalorder %v6666_v60, 3  ;;  %v530_v59 = vadd.s32 536870912, %v529_v12  ;;  %vm709_vm10 = vcmp.lt.s32.totalorder %v6666_v60, 1  ;;  %v963_v56 = vshll.u32 %v962_v54, 23 }
 0x17a   : > { %v1161_v41 = vclz %v5481_v33  ;;  %v723_v15 = vsel %vm711_vm9, %v6697_v40, %v6725_v39  ;;  %v717_v23 = vsel %vm709_vm10, %v696_v55, %v699_v37  ;;  %v719_v30 = vsel %vm711_vm9, %v702_v29, %v6721_v27  ;;  %v10233_v33 = vld [vmem:[#allocation13_spill] sm:$0xff] }
 0x17b   : > { %v721_v10 = vsel %vm709_vm10, %v699_v37, %v702_v29  ;;  %v959_v46 = vshrl.u32 %v941_v13, %v957_v42  ;;  %v6891_v57 = vshrl.u32 %v530_v59, 30  ;;  %vm710_vm11 = vcmp.lt.s32.totalorder %v6666_v60, 2 }
 0x17c   : > { %v5482_v45 = vadd.s32 4294967294, %v1161_v41  ;;  %vm5479_vm12 = vcmp.lt.s32.totalorder %v5478_v63, 0  ;;  %v714_v40 = vsel %vm712_vm7, %v702_v29, 2102212464  ;;  %v724_v39 = vsel %vm710_vm11, %v721_v10, %v723_v15  ;;  %v10234_v29 = vld [vmem:[#allocation8_spill] sm:$0xff] }
 0x17d   : > { %v725_v6 = vshll.u32 %v685_v34, 8  ;;  %v532_v27 = vshll.u32 %v6891_v57, 30  ;;  %v693_v22 = vshrl.u32 %v10229_v1, %v6640_v38  ;;  %v720_v13 = vsel %vm710_vm11, %v717_v23, %v719_v30  ;;  %v10238_v30 = vld [vmem:[#allocation10_spill] sm:$0xff] }
 0x17e   : > { %vm5483_vm13 = vcmp.lt.s32.totalorder %v5482_v45, 0  ;;  %v964_v36 = vor.u32 4788187, %v963_v56  ;;  %v6908_v16 = vsel %vm5479_vm12, 0, %v5478_v63  ;;  %v715_v58 = vsel %vm711_vm9, %v699_v37, %v714_v40 }
 0x17f   : > { %v6903_v61 = vsel %vm5483_vm13, 0, %v5482_v45  ;;  %v6905_v19 = vmul.u32.u64.low %v725_v6, %v724_v39  ;;  %v6906_v62 = vmul.u32.u64.high %v725_v6, %v724_v39, %v6905_v19  ;;  %v6910_v17 = vsub.s32 %v529_v12, %v532_v27 }
 0x180   : > { %v713_v52 = vsel %vm709_vm10, %v693_v22, %v696_v55  ;;  %v960_v38 = vor.u32 %v959_v46, %v958_v50  ;;  %v1169_v20 = vsub.s32 4294967266, %v6903_v61  ;;  %v10231_v54 = vshll.u32 %v6496_v5, %v10230_v8 }
 0x181   : > { %v6917_v3 = vmul.u32.u64.low %v725_v6, %v720_v13  ;;  %v6918_v2 = vmul.u32.u64.high %v725_v6, %v720_v13, %v6917_v3  ;;  %v646_v12 = vshll.u32 %v10233_v33, %v6712_v51  ;;  %v864_v55 = vmul.f32 %v863_v28, %v861_v49 }
 0x182   : > { %v440_v42 = vor.u32 %v10232_v44, %v10231_v54  ;;  %v535_v37 = vsub.s32 0, %v6910_v17  ;;  %vm783_vm7 = vcmp.lt.s32.totalorder %v10234_v29, 0  ;;  %v965_v50 = vand.u32 2147483647, %v964_v36 }
 0x183   : > { %v1065_v63 = vsub.s32 4294967266, %v6908_v16  ;;  %v716_v34 = vsel %vm710_vm11, %v713_v52, %v715_v58  ;;  %v445_v5 = vand.u32 2147483647, %v6835_v18  ;;  %v648_v41 = vor.u32 %v6838_v0, %v646_v12  ;;  %v10239_v52 = vld [vmem:[#allocation19_spill] sm:$0xff]  ;;  %v10240_v58 = vld [vmem:[#allocation17_spill] sm:$0xff] }
 0x184   : > { %v5457_v59 = vmin.u32 %v535_v37, %v6910_v17  ;;  %vm734_vm15 = vc.u32 %v6906_v62, %v6917_v3  ;;  %v652_v51 = vor.u32 4788187, %v651_v24  ;;  %v10235_v7 = vand.u32 2147483647, %v10234_v29 }
 0x185   : > { %v967_v60 = vcvt.s32.f32 %v960_v38  ;;  %v1170_v49 = vadd.s32 127, %v1169_v20  ;;  %v735_v18 = vadd.s32 1, %v6918_v2  ;;  %v447_v15 = vcvt.s32.f32 %v440_v42 }
 0x186   : > { %vm6943_vm2 = vcmp.le.f32.partialorder %v10235_v7, 0.7853982  ;;  %v865_v0 = vxor.u32 2147483648, %v864_v55  ;;  %v537_v56 = vclz %v5457_v59  ;;  %v732_v23 = vmul.u32 %v725_v6, %v716_v34 }
 0x187   : > { %vm887_vm3 = vcmp.lt.s32.totalorder %v10238_v30, 0  ;;  %v968_v10 = vmul.f32 %v967_v60, %v965_v50  ;;  %v1066_v46 = vadd.s32 127, %v1065_v63  ;;  %v1165_v4 = vsub.s32 32, %v6903_v61 }
 0x188   : > { %v736_v24 = vsel %vm734_vm15, %v735_v18, %v6918_v2  ;;  %v448_v45 = vmul.f32 %v447_v15, %v445_v5  ;;  %v1061_v40 = vsub.s32 32, %v6908_v16  ;;  %v5458_v39 = vadd.s32 4294967294, %v537_v56  ;;  %v10241_v2 = vld [vmem:[#allocation5_spill] sm:$0xff]  ;;  %v10242_v18 = vld [vmem:[#allocation6_spill] sm:$0xff] }
 0x189   : > { %v737_v27 = vadd.s32 %v736_v24, %v732_v23  ;;  %v653_v22 = vand.u32 2147483647, %v652_v51  ;;  %v655_v13 = vcvt.s32.f32 %v648_v41  ;;  %v1149_v36 = vadd.s32 %v6770_v48, %v6775_v14 }
 0x18a   : > { %v1171_v19 = vshll.u32 %v1170_v49, 23  ;;  %v866_v6 = vsel %vm783_vm7, %v865_v0, %v864_v55  ;;  %v1045_v38 = vadd.s32 %v10240_v58, %v10239_v52  ;;  %vm5459_vm4 = vcmp.lt.s32.totalorder %v5458_v39, 0 }
 0x18b   : > { %v738_v20 = vadd.s32 536870912, %v737_v27  ;;  %vm367_vm5 = vcmp.lt.s32.totalorder %v10241_v2, 0  ;;  %v969_v8 = vxor.u32 2147483648, %v968_v10  ;;  %v1067_v54 = vshll.u32 %v1066_v46, 23 }
 0x18c   : > { %v1167_v44 = vshrl.u32 %v1149_v36, %v1165_v4  ;;  %v540_v42 = vsel %vm5459_vm4, 0, %v5458_v39  ;;  %v1063_v33 = vshrl.u32 %v1045_v38, %v1061_v40  ;;  %v525_v12 = vadd.s32 %v6840_v31, %v6832_v43 }
 0x18d   : > { %v541_v48 = vsub.s32 32, %v540_v42  ;;  %v545_v14 = vsub.s32 4294967266, %v540_v42  ;;  %v656_v37 = vmul.f32 %v655_v13, %v653_v22  ;;  %v1166_v55 = vshll.u32 %v6855_v32, %v6903_v61 }
 0x18e   : > { %v1172_v50 = vor.u32 4788187, %v1171_v19  ;;  %v6963_v63 = vshrl.u32 %v738_v20, 30  ;;  %v869_v34 = vsel %vm6943_vm2, %v10234_v29, %v866_v6  ;;  %v1062_v5 = vshll.u32 %v6781_v47, %v6908_v16  ;;  %v10246_v19 = vld [vmem:[#allocation9_spill] sm:$0xff] }
 0x18f   : > { %v543_v41 = vshrl.u32 %v525_v12, %v541_v48  ;;  %v546_v59 = vadd.s32 127, %v545_v14  ;;  %v1068_v51 = vor.u32 4788187, %v1067_v54  ;;  %v1168_v43 = vor.u32 %v1167_v44, %v1166_v55  ;;  %v10250_v44 = vld [vmem:[#allocation11_spill] sm:$0xff] }
 0x190   : > { %v542_v31 = vshll.u32 %v6910_v17, %v540_v42  ;;  %v740_v7 = vshll.u32 %v6963_v63, 30  ;;  %v449_v60 = vxor.u32 2147483648, %v448_v45  ;;  %v970_v32 = vsel %vm887_vm3, %v969_v8, %v968_v10  ;;  %v10251_v42 = vld [vmem:[#allocation7_spill] sm:$0xff] }
 0x191   : > { %v1064_v61 = vor.u32 %v1063_v33, %v1062_v5  ;;  %v547_v49 = vshll.u32 %v546_v59, 23  ;;  %vm575_vm6 = vcmp.lt.s32.totalorder %v10242_v18, 0  ;;  %v1173_v15 = vand.u32 2147483647, %v1172_v50 }
 0x192   : > { %v544_v0 = vor.u32 %v543_v41, %v542_v31  ;;  %v6975_v56 = vsub.s32 %v737_v27, %v740_v7  ;;  %v657_v47 = vxor.u32 2147483648, %v656_v37  ;;  %5948 = vcosq.f32 %v869_v34 }
 0x193   : > { %v10243_v16 = vand.u32 2147483647, %v10238_v30  ;;  %v548_v23 = vor.u32 4788187, %v547_v49  ;;  %v1069_v46 = vand.u32 2147483647, %v1068_v51  ;;  %v1175_v4 = vcvt.s32.f32 %v1168_v43 }
 0x194   : > { %v743_v24 = vsub.s32 0, %v6975_v56  ;;  %v450_v40 = vsel %vm367_vm5, %v449_v60, %v448_v45  ;;  %5950 = vsinq.f32 %v869_v34  ;;  %v1071_v39 = vcvt.s32.f32 %v1064_v61  ;;  %v10258_v34 = vld [vmem:[#allocation15_spill] sm:$0xff]  ;;  %v10262_v49 = vld [vmem:[#allocation12_spill] sm:$0xff] }
 0x195   : > { %vm6979_vm8 = vcmp.le.f32.partialorder %v10243_v16, 0.7853982  ;;  %v549_v27 = vand.u32 2147483647, %v548_v23  ;;  %v1176_v22 = vmul.f32 %v1175_v4, %v1173_v15  ;;  %v551_v13 = vcvt.s32.f32 %v544_v0 }
 0x196   : > { %v973_v10 = vsel %vm6979_vm8, %v10238_v30, %v970_v32  ;;  %v5465_v36 = vmin.u32 %v743_v24, %v6975_v56  ;;  %v451_v6 = vsub.s32 4, %v10246_v19  ;;  %v658_v52 = vsel %vm575_vm6, %v657_v47, %v656_v37 }
 0x197   : > { %5952 = vcosq.f32 %v973_v10  ;;  %v10247_v58 = vand.u32 2147483647, %v10241_v2  ;;  %v1072_v45 = vmul.f32 %v1071_v39, %v1069_v46  ;;  %v552_v20 = vmul.f32 %v551_v13, %v549_v27 }
 0x198   : > { %v745_v8 = vclz %v5465_v36  ;;  %5954 = vsinq.f32 %v973_v10  ;;  %vm991_vm9 = vcmp.lt.s32.totalorder %v10250_v44, 0  ;;  %v10252_v33 = vand.u32 2147483647, %v10251_v42 }
 0x199   : > { %vm6995_vm14 = vcmp.le.f32.partialorder %v10247_v58, 0.7853982  ;;  %vm471_vm11 = vcmp.lt.s32.totalorder %v10251_v42, 0  ;;  %v1177_v48 = vxor.u32 2147483648, %v1176_v22  ;;  %v452_v37 = vsel %vm367_vm5, %v451_v6, %v10246_v19 }
 0x19a   : > { %v453_v54 = vsel %vm6995_vm14, %v10241_v2, %v450_v40  ;;  %vm7005_vm10 = vcmp.le.f32.partialorder %v10252_v33, 0.7853982  ;;  %v5466_v14 = vadd.s32 4294967294, %v745_v8  ;;  %v10255_v55 = vand.u32 2147483647, %v10242_v18 }
 0x19b   : > { %vm1095_vm13 = vcmp.lt.s32.totalorder %v10258_v34, 0  ;;  %v555_v5 = vsub.s32 4, %v6891_v57  ;;  %5956 = vcosq.f32 %v453_v54  ;;  %v10259_v59 = vand.u32 2147483647, %v10250_v44 }
 0x19c   : > { %vm7015_vm12 = vcmp.le.f32.partialorder %v10255_v55, 0.7853982  ;;  %v1073_v43 = vxor.u32 2147483648, %v1072_v45  ;;  %v553_v31 = vxor.u32 2147483648, %v552_v20  ;;  %vm5467_vm4 = vcmp.lt.s32.totalorder %v5466_v14, 0  ;;  %v7030_v7 = vpop.eup %5948 }
 0x19d   : > { %v661_v41 = vsel %vm7015_vm12, %v10242_v18, %v658_v52  ;;  %vm7026_vm15 = vcmp.le.f32.partialorder %v10259_v59, 0.7853982  ;;  %5958 = vsinq.f32 %v453_v54  ;;  %v733_v60 = vadd.s32 %v6917_v3, %v6906_v62  ;;  %v10266_v52 = vld [vmem:[#allocation16_spill] sm:$0xff] }
 0x19e   : > { %v748_v32 = vsel %vm5467_vm4, 0, %v5466_v14  ;;  %v454_v61 = vsel %vm6995_vm14, 0, %v452_v37  ;;  %v659_v15 = vsub.s32 4, %v10262_v49  ;;  %v1178_v0 = vsel %vm1095_vm13, %v1177_v48, %v1176_v22  ;;  %v7039_v23 = vpop.eup %5950 }
 0x19f   : > { %v749_v47 = vsub.s32 32, %v748_v32  ;;  %v753_v16 = vsub.s32 4294967266, %v748_v32  ;;  %5960 = vcosq.f32 %v661_v41  ;;  %v10263_v10 = vand.u32 2147483647, %v10258_v34 }
 0x1a0   : > { %v556_v62 = vsel %vm471_vm11, %v555_v5, %v6891_v57  ;;  %v763_v3 = vsub.s32 4, %v6963_v63  ;;  %5962 = vsinq.f32 %v661_v41  ;;  %v554_v4 = vsel %vm471_vm11, %v553_v31, %v552_v20 }
 0x1a1   : > { %vm7043_vm5 = vcmp.le.f32.partialorder %v10263_v10, 0.7853982  ;;  %v750_v24 = vshll.u32 %v6975_v56, %v748_v32  ;;  %v751_v40 = vshrl.u32 %v733_v60, %v749_v47  ;;  %v754_v39 = vadd.s32 127, %v753_v16  ;;  %v7054_v27 = vpop.eup %5952 }
 0x1a2   : > { %v1074_v22 = vsel %vm991_vm9, %v1073_v43, %v1072_v45  ;;  %v1181_v13 = vsel %vm7043_vm5, %v10258_v34, %v1178_v0  ;;  %v458_v57 = vadd.s32 3, %v454_v61  ;;  %v660_v36 = vsel %vm575_vm6, %v659_v15, %v10262_v49  ;;  %v7067_v38 = vpop.eup %5954 }
 0x1a3   : > { %v558_v19 = vsel %vm7005_vm10, 0, %v556_v62  ;;  %v752_v56 = vor.u32 %v751_v40, %v750_v24  ;;  %v755_v6 = vshll.u32 %v754_v39, 23  ;;  %v971_v58 = vsub.s32 4, %v10266_v52  ;;  %v10269_v62 = vld [vmem:[#allocation14_spill] sm:$0xff] }
 0x1a4   : > { %v557_v45 = vsel %vm7005_vm10, %v10251_v42, %v554_v4  ;;  %vm7074_vm14 = vcmp.le.f32.partialorder %v677_v11, 0.7853982  ;;  %vm679_vm6 = vcmp.lt.s32.totalorder %v6414_v35, 0  ;;  %v1179_v8 = vsub.s32 4, %v6829_v21 }
 0x1a5   : > { %5964 = vcosq.f32 %v1181_v13  ;;  %v756_v54 = vor.u32 4788187, %v755_v6  ;;  %v764_v33 = vsel %vm679_vm6, %v763_v3, %v6963_v63  ;;  %v662_v12 = vsel %vm7015_vm12, 0, %v660_v36  ;;  %v5957_v48 = vpop.eup %5956 }
 0x1a6   : > { %v1077_v11 = vsel %vm7026_vm15, %v10250_v44, %v1074_v22  ;;  %5966 = vsinq.f32 %v1181_v13  ;;  %v562_v14 = vadd.s32 3, %v558_v19  ;;  %v459_v37 = vand.u32 3, %v458_v57 }
 0x1a7   : > { %v5959_v55 = vpop.eup %5958  ;;  %5968 = vcosq.f32 %v557_v45  ;;  %v757_v5 = vand.u32 2147483647, %v756_v54  ;;  %v759_v41 = vcvt.s32.f32 %v752_v56  ;;  %v972_v59 = vsel %vm887_vm3, %v971_v58, %v10266_v52 }
 0x1a8   : > { %5970 = vsinq.f32 %v557_v45  ;;  %v766_v63 = vsel %vm7074_vm14, 0, %v764_v33  ;;  %v666_v50 = vadd.s32 3, %v662_v12  ;;  %v1180_v43 = vsel %vm1095_vm13, %v1179_v8, %v6829_v21 }
 0x1a9   : > { %v5961_v31 = vpop.eup %5960  ;;  %5972 = vcosq.f32 %v1077_v11  ;;  %v760_v60 = vmul.f32 %v759_v41, %v757_v5  ;;  %v1075_v32 = vsub.s32 4, %v6760_v9  ;;  %v462_v49 = vxor.u32 2147483648, %v5959_v55 }
 0x1aa   : > { %v5963_v61 = vpop.eup %5962  ;;  %5974 = vsinq.f32 %v1077_v11  ;;  %v465_v15 = vxor.u32 2147483648, %v5957_v48  ;;  %v974_v0 = vsel %vm6979_vm8, 0, %v972_v59  ;;  %v770_v16 = vadd.s32 3, %v766_v63 }
 0x1ab   : > { %v761_v47 = vxor.u32 2147483648, %v760_v60  ;;  %v1182_v10 = vsel %vm7043_vm5, 0, %v1180_v43  ;;  %v867_v3 = vsub.s32 4, %v10269_v62  ;;  %v7102_v21 = vand.u32 3, %v562_v14 }
 0x1ac   : > { %vm464_vm3 = vcmp.eq.s32.totalorder %v459_v37, 2  ;;  %v667_v4 = vand.u32 3, %v666_v50  ;;  %v673_v24 = vxor.u32 2147483648, %v5961_v31  ;;  %v670_v39 = vxor.u32 2147483648, %v5963_v61 }
 0x1ad   : > { %v762_v40 = vsel %vm679_vm6, %v761_v47, %v760_v60  ;;  %v978_v22 = vadd.s32 3, %v974_v0  ;;  %v1076_v17 = vsel %vm991_vm9, %v1075_v32, %v6760_v9  ;;  %vm461_vm8 = vcmp.eq.s32.totalorder %v459_v37, 0 }
 0x1ae   : > { %v765_v46 = vsel %vm7074_vm14, %v6414_v35, %v762_v40  ;;  %v466_v13 = vsel %vm464_vm3, %v465_v15, %v5959_v55  ;;  %vm665_vm10 = vweird.f32 %v10242_v18  ;;  %v1186_v57 = vadd.s32 3, %v1182_v10 }
 0x1af   : > { %v5965_v36 = vpop.eup %5964  ;;  %5976 = vcosq.f32 %v765_v46  ;;  %v7113_v19 = vand.u32 3, %v770_v16  ;;  %v463_v56 = vsel %vm461_vm8, %v5957_v48, %v462_v49  ;;  %v868_v6 = vsel %vm783_vm7, %v867_v3, %v10269_v62 }
 0x1b0   : > { %v5967_v52 = vpop.eup %5966  ;;  %vm565_vm9 = vcmp.eq.s32.totalorder %v7102_v21, 0  ;;  %vm568_vm11 = vcmp.eq.s32.totalorder %v7102_v21, 2  ;;  %5978 = vsinq.f32 %v765_v46  ;;  %vm669_vm12 = vcmp.eq.s32.totalorder %v667_v4, 0 }
 0x1b1   : > { %vm672_vm13 = vcmp.eq.s32.totalorder %v667_v4, 2  ;;  %v1078_v9 = vsel %vm7026_vm15, 0, %v1076_v17  ;;  %v5969_v58 = vpop.eup %5968  ;;  %vm460_vm4 = vcmp.lt.s32.totalorder %v459_v37, 2  ;;  %v671_v45 = vsel %vm669_vm12, %v5961_v31, %v670_v39 }
 0x1b2   : > { %v674_v20 = vsel %vm672_vm13, %v673_v24, %v5963_v61  ;;  %v979_v8 = vand.u32 3, %v978_v22  ;;  %v5971_v54 = vpop.eup %5970  ;;  %v7122_v33 = vsel %vm460_vm4, %v463_v56, %v466_v13  ;;  %v982_v12 = vxor.u32 2147483648, %v7067_v38 }
 0x1b3   : > { %v1187_v48 = vand.u32 3, %v1186_v57  ;;  %v870_v11 = vsel %vm6943_vm2, 0, %v868_v6  ;;  %v5973_v14 = vpop.eup %5972  ;;  %vm564_vm7 = vcmp.lt.s32.totalorder %v7102_v21, 2  ;;  %vm668_vm5 = vcmp.lt.s32.totalorder %v667_v4, 2 }
 0x1b4   : > { %v1190_v51 = vxor.u32 2147483648, %v5967_v52  ;;  %v1193_v55 = vxor.u32 2147483648, %v5965_v36  ;;  %v1082_v5 = vadd.s32 3, %v1078_v9  ;;  %v5975_v37 = vpop.eup %5974  ;;  %vm776_vm14 = vcmp.eq.s32.totalorder %v7113_v19, 2 }
 0x1b5   : > { %v675_v41 = vsel %vm668_vm5, %v671_v45, %v674_v20  ;;  %v985_v59 = vxor.u32 2147483648, %v7054_v27  ;;  %vm1185_vm6 = vweird.f32 %v10258_v34  ;;  %v566_v63 = vxor.u32 2147483648, %v5971_v54 }
 0x1b6   : > { %v569_v28 = vxor.u32 2147483648, %v5969_v58  ;;  %vm772_vm2 = vcmp.lt.s32.totalorder %v7113_v19, 2  ;;  %vm980_vm3 = vcmp.lt.s32.totalorder %v979_v8, 2  ;;  %v874_v50 = vadd.s32 3, %v870_v11 }
 0x1b7   : > { %vm561_vm8 = vweird.f32 %v10251_v42  ;;  %vm769_vm12 = vweird.f32 %v6414_v35  ;;  %vm977_vm13 = vweird.f32 %v10238_v30  ;;  %vm981_vm4 = vcmp.eq.s32.totalorder %v979_v8, 0 }
 0x1b8   : > { %vm984_vm1 = vcmp.eq.s32.totalorder %v979_v8, 2  ;;  %vm1189_vm0 = vcmp.eq.s32.totalorder %v1187_v48, 0  ;;  %vm1192_vm5 = vcmp.eq.s32.totalorder %v1187_v48, 2  ;;  %v676_v43 = vsel %vm665_vm10, nan, %v675_v41  ;;  %v1200_v8 = vld [vmem:[%s10106_s2 + $0x18] sm:$0xff] }
 0x1b9   : > { %v1191_v31 = vsel %vm1189_vm0, %v5965_v36, %v1190_v51  ;;  %v1194_v60 = vsel %vm1192_vm5, %v1193_v55, %v5967_v52  ;;  %v1083_v32 = vand.u32 3, %v1082_v5  ;;  %v983_v61 = vsel %vm981_vm4, %v7054_v27, %v982_v12  ;;  %v5977_v47 = vpop.eup %5976  ;;  %v1214_v55 = vpop.permute.xlu1 %1213 }
 0x1ba   : > { %v986_v49 = vsel %vm984_vm1, %v985_v59, %v7067_v38  ;;  %v1086_v15 = vxor.u32 2147483648, %v5975_v37  ;;  %v1089_v0 = vxor.u32 2147483648, %v5973_v14  ;;  %v567_v16 = vsel %vm565_vm9, %v5969_v58, %v566_v63  ;;  %v5979_v18 = vpop.eup %5978 }
 0x1bb   : > { %v570_v10 = vsel %vm568_vm11, %v569_v28, %v5971_v54  ;;  %vm1188_vm15 = vcmp.lt.s32.totalorder %v1187_v48, 2  ;;  %v875_v62 = vand.u32 3, %v874_v50  ;;  %v777_v3 = vxor.u32 2147483648, %v5977_v47  ;;  %v1209_v54 = vpop.permute.xlu0 %1208 }
 0x1bc   : > { %v1195_v4 = vsel %vm1188_vm15, %v1191_v31, %v1194_v60  ;;  %v878_v24 = vxor.u32 2147483648, %v7039_v23  ;;  %v881_v27 = vxor.u32 2147483648, %v7030_v7  ;;  %v774_v40 = vxor.u32 2147483648, %v5979_v18 }
 0x1bd   : > { %v987_v38 = vsel %vm980_vm3, %v983_v61, %v986_v49  ;;  %vm1085_vm0 = vcmp.eq.s32.totalorder %v1083_v32, 0  ;;  %vm1088_vm1 = vcmp.eq.s32.totalorder %v1083_v32, 2  ;;  %v571_v39 = vsel %vm564_vm7, %v567_v16, %v570_v10 }
 0x1be   : > { %v778_v22 = vsel %vm776_vm14, %v777_v3, %v5979_v18  ;;  %v1087_v17 = vsel %vm1085_vm0, %v5973_v14, %v1086_v15  ;;  %v1090_v46 = vsel %vm1088_vm1, %v1089_v0, %v5975_v37  ;;  %vm10270_vm10 = vcmp.eq.s32.totalorder %v7113_v19, 0 }
 0x1bf   : > { %v775_v13 = vsel %vm10270_vm10, %v5977_v47, %v774_v40  ;;  %v1196_v57 = vsel %vm1185_vm6, nan, %v1195_v4  ;;  %vm877_vm9 = vcmp.eq.s32.totalorder %v875_v62, 0  ;;  %vm880_vm11 = vcmp.eq.s32.totalorder %v875_v62, 2 }
 0x1c0   : > { %v779_v36 = vsel %vm772_vm2, %v775_v13, %v778_v22  ;;  %v879_v56 = vsel %vm877_vm9, %v7030_v7, %v878_v24  ;;  %v882_v21 = vsel %vm880_vm11, %v881_v27, %v7039_v23  ;;  %vm1084_vm7 = vcmp.lt.s32.totalorder %v1083_v32, 2 }
 0x1c1   : > { %v572_v6 = vsel %vm561_vm8, nan, %v571_v39  ;;  %v780_v52 = vsel %vm769_vm12, nan, %v779_v36  ;;  %v988_v34 = vsel %vm977_vm13, nan, %v987_v38  ;;  %v1091_v9 = vsel %vm1084_vm7, %v1087_v17, %v1090_v46 }
 0x1c2   : > { %v5678_v58 = vpack.c.bf16 %v780_v52, %v572_v6  ;;  %vm10271_vm15 = vweird.f32 %v10241_v2  ;;  %v5682_v45 = vpack.c.bf16 %v1196_v57, %v988_v34  ;;  %vm876_vm14 = vcmp.lt.s32.totalorder %v875_v62, 2  ;;  %v1197_v2 = vld [vmem:[%s10106_s2] sm:$0xff] }
 0x1c3   : > { %v468_v19 = vsel %vm10271_vm15, nan, %v7122_v33  ;;  %v883_v23 = vsel %vm876_vm14, %v879_v56, %v882_v21  ;;  %vm1081_vm6 = vweird.f32 %v10250_v44  ;;  %vm873_vm2 = vweird.f32 %v10234_v29  ;;  %v1198_v44 = vld [vmem:[%s10106_s2 + $0x8] sm:$0xff]  ;;  %v1199_v29 = vld [vmem:[%s10106_s2 + $0x10] sm:$0xff] }
 0x1c4   : > { %v5680_v7 = vpack.c.bf16 %v676_v43, %v468_v19  ;;  %5679 = vmatprep.subr.bf16.mxu1 %v5678_v58  ;;  %v1092_v42 = vsel %vm1081_vm6, nan, %v1091_v9  ;;  %v884_v35 = vsel %vm873_vm2, nan, %v883_v23  ;;  %vm10204_vm3 = vcmask 261120  }
 0x1c5   : > { %v5684_v30 = vpack.c.bf16 %v1092_v42, %v884_v35  ;;  %v10272_v20 = vmov 0.0   ;;  %v10273_v9 = vmov 920167782   ;;  %v10274_v35 = vmov 1326507024  }
 0x1c6   : > { %5681 = vmatpush1.bf16.msra.mxu1 %v5680_v7 }
 0x1c7   : > { %5683 = vmatprep.subr.bf16.mxu1 %v5682_v45 }
 0x1ca   : > { %5685 = vmatpush1.bf16.msra.mxu1 %v5684_v30 }
 0x1cd   : > { %5488 = vmatmul.mubr.msk.f32.vlgmr.msra.gmra.mrb[0].mxu1 %vm10204_vm3, %v1197_v2 }
 0x1ce   : > { %1309 = vmatprep.mubr.f32.mxu1 %v10272_v20 }
 0x1d1   : > { %5489 = vmatmul.mubr.msk.f32.gmra.mrb[2].mxu1 %vm10204_vm3, %v1198_v44 }
 0x1d2   : > { %1315 = vmatprep.mubr.f32.mxu1 %v10272_v20 }
 0x1d5   : > { %5490 = vmatmul.mubr.msk.f32.gmra.mrb[4].mxu1 %vm10204_vm3, %v1199_v29 }
 0x1d6   : > { %1321 = vmatprep.mubr.f32.mxu1 %v10272_v20 }
 0x1d9   : > { %5491 = vmatmul.mubr.msk.f32.gmra.mrb[6].mxu1 %vm10204_vm3, %v1200_v8 }
 0x1da   : > { %3229 = vmatprep.mubr.f32.mxu1 %v10272_v20 }
 0x2a0   : > { %v1305_v33 = vpop.f32.mrb[0].mxu1 }
 0x2a1   : > { %v7191_v12 = vadd.f32 %v1305_v33, %v1209_v54  ;;  %v1307_v48 = vpop.f32.mrb[1].mxu1 }
 0x2a2   : > { %v7193_v11 = vadd.f32 %v1307_v48, %v1209_v54 }
 0x2a3   : > { %v1328_v14 = vand.u32 2147483647, %v7191_v12  ;;  %v1331_v51 = vand.u32 2139095040, %v7191_v12 }
 0x2a4   : > { %v1432_v5 = vand.u32 2147483647, %v7193_v11  ;;  %v1435_v37 = vand.u32 2139095040, %v7193_v11  ;;  %v1311_v41 = vpop.f32.mrb[2].mxu1 }
 0x2a5   : > { %v1332_v59 = vshrl.u32 %v1331_v51, 23  ;;  %v7199_v63 = vadd.f32 %v1311_v41, %v1214_v55  ;;  %v1313_v28 = vpop.f32.mrb[3].mxu1  ;;  %v1335_v50 = vand.u32 8388607, %v1328_v14 }
 0x2a6   : > { %v1436_v43 = vshrl.u32 %v1435_v37, 23  ;;  %v1439_v31 = vand.u32 8388607, %v1432_v5  ;;  %v7212_v38 = vadd.f32 %v1313_v28, %v1214_v55 }
 0x2a7   : > { %v5492_v60 = vadd.s32 4294967169, %v1332_v59  ;;  %v1539_v61 = vand.u32 2139095040, %v7199_v63  ;;  %v1336_v0 = vor.u32 8388608, %v1335_v50  ;;  %v10164_v13 = vand.u32 2147483647, %v7199_v63 }
 0x2a8   : > { %v5496_v32 = vadd.s32 4294967169, %v1436_v43  ;;  %v7206_v49 = vpop.f32.mrb[4].mxu1  ;;  %v1440_v47 = vor.u32 8388608, %v1439_v31 }
 0x2a9   : > { %v1338_v15 = vadd.s32 1, %v5492_v60  ;;  %v1540_v10 = vshrl.u32 %v1539_v61, 23  ;;  %v7208_v62 = vpop.f32.mrb[5].mxu1  ;;  %v7216_v22 = vshll.u32 %v1336_v0, 8 }
 0x2aa   : > { %v1442_v16 = vadd.s32 1, %v5496_v32  ;;  %v7220_v46 = vshll.u32 %v1440_v47, 8 }
 0x2ab   : > { %vm1339_vm8 = vcmp.gt.s32.totalorder %v1338_v15, 0  ;;  %v5500_v3 = vadd.s32 4294967169, %v1540_v10 }
 0x2ac   : > { %v1340_v18 = vsel %vm1339_vm8, %v1338_v15, 0  ;;  %vm1443_vm12 = vcmp.gt.s32.totalorder %v1442_v16, 0  ;;  %v7210_v4 = vpop.f32.mrb[6].mxu1 }
 0x2ad   : > { %v1341_v24 = vshrl.u32 %v1340_v18, 5  ;;  %v1342_v27 = vand.u32 31, %v1340_v18  ;;  %v1444_v40 = vsel %vm1443_vm12, %v1442_v16, 0  ;;  %v7214_v39 = vpop.f32.mrb[7].mxu1  ;;  %v7224_v21 = vadd.s32 1, %v5500_v3 }
 0x2ae   : > { %v7218_v17 = vshrl.u32 %v1444_v40, 5  ;;  %v1446_v56 = vand.u32 31, %v1444_v40 }
 0x2af   : > { %v1343_v57 = vsub.s32 32, %v1342_v27  ;;  %v1345_v36 = vshll.u32 %v10229_v1, %v1342_v27  ;;  %v1348_v6 = vshll.u32 %v10226_v26, %v1342_v27  ;;  %v1351_v52 = vshll.u32 %v10227_v53, %v1342_v27 }
 0x2b0   : > { %v1354_v34 = vshll.u32 %v10221_v25, %v1342_v27  ;;  %v1357_v58 = vshll.u32 %v10273_v9, %v1342_v27  ;;  %vm1360_vm13 = vcmp.lt.s32.totalorder %v1341_v24, 1  ;;  %vm1361_vm4 = vcmp.lt.s32.totalorder %v1341_v24, 2 }
 0x2b1   : > { %v1346_v19 = vshrl.u32 %v10226_v26, %v1343_v57  ;;  %v1349_v45 = vshrl.u32 %v10227_v53, %v1343_v57  ;;  %v1352_v7 = vshrl.u32 %v10221_v25, %v1343_v57  ;;  %v1344_v23 = vshrl.u32 %v10229_v1, %v1343_v57 }
 0x2b2   : > { %v1355_v42 = vshrl.u32 %v10273_v9, %v1343_v57  ;;  %v1358_v30 = vshrl.u32 %v10274_v35, %v1343_v57  ;;  %v1447_v8 = vsub.s32 32, %v1446_v56  ;;  %vm1362_vm5 = vcmp.lt.s32.totalorder %v1341_v24, 3 }
 0x2b3   : > { %v1347_v2 = vor.u32 %v1346_v19, %v1345_v36  ;;  %v1350_v44 = vor.u32 %v1349_v45, %v1348_v6  ;;  %v1353_v29 = vor.u32 %v1352_v7, %v1351_v52  ;;  %vm1363_vm0 = vcmp.lt.s32.totalorder %v1341_v24, 4 }
 0x2b4   : > { %v1356_v54 = vor.u32 %v1355_v42, %v1354_v34  ;;  %v1359_v33 = vor.u32 %v1358_v30, %v1357_v58  ;;  %v1449_v50 = vshll.u32 %v10229_v1, %v1446_v56  ;;  %v1450_v60 = vshrl.u32 %v10226_v26, %v1447_v8 }
 0x2b5   : > { %v1364_v48 = vsel %vm1360_vm13, %v1344_v23, %v1347_v2  ;;  %v1365_v51 = vsel %vm1363_vm0, %v1353_v29, 2102212464  ;;  %v1368_v55 = vsel %vm1360_vm13, %v1347_v2, %v1350_v44  ;;  %v1372_v37 = vsel %vm1360_vm13, %v1350_v44, %v1353_v29 }
 0x2b6   : > { %v1366_v41 = vsel %vm1362_vm5, %v1350_v44, %v1365_v51  ;;  %v1369_v59 = vsel %vm1363_vm0, %v1356_v54, 920167782  ;;  %v1373_v28 = vsel %vm1363_vm0, %v1359_v33, 1326507024  ;;  %v1452_v32 = vshll.u32 %v10226_v26, %v1446_v56 }
 0x2b7   : > { %v1370_v43 = vsel %vm1362_vm5, %v1353_v29, %v1369_v59  ;;  %v1374_v31 = vsel %vm1362_vm5, %v1356_v54, %v1373_v28  ;;  %v1367_v61 = vsel %vm1361_vm4, %v1364_v48, %v1366_v41  ;;  %v1453_v47 = vshrl.u32 %v10227_v53, %v1447_v8 }
 0x2b8   : > { %v1371_v15 = vsel %vm1361_vm4, %v1368_v55, %v1370_v43  ;;  %v1375_v0 = vsel %vm1361_vm4, %v1372_v37, %v1374_v31  ;;  %v1451_v27 = vor.u32 %v1450_v60, %v1449_v50  ;;  %v1455_v57 = vshll.u32 %v10227_v53, %v1446_v56 }
 0x2b9   : > { %v7247_v16 = vmul.u32.u64.low %v7216_v22, %v1375_v0  ;;  %v7248_v10 = vmul.u32.u64.high %v7216_v22, %v1375_v0, %v7247_v16  ;;  %v7251_v18 = vmul.u32.u64.low %v7216_v22, %v1371_v15  ;;  %v7252_v3 = vmul.u32.u64.high %v7216_v22, %v1371_v15, %v7251_v18 }
 0x2ba   : > { %v1454_v40 = vor.u32 %v1453_v47, %v1452_v32  ;;  %v1456_v36 = vshrl.u32 %v10221_v25, %v1447_v8  ;;  %v1448_v24 = vshrl.u32 %v10229_v1, %v1447_v8  ;;  %v1458_v6 = vshll.u32 %v10221_v25, %v1446_v56 }
 0x2bb   : > { %v1459_v52 = vshrl.u32 %v10273_v9, %v1447_v8  ;;  %v1462_v34 = vshrl.u32 %v10274_v35, %v1447_v8  ;;  %v1383_v58 = vmul.u32 %v7216_v22, %v1367_v61  ;;  %v1461_v45 = vshll.u32 %v10273_v9, %v1446_v56 }
 0x2bc   : > { %v1457_v19 = vor.u32 %v1456_v36, %v1455_v57  ;;  %vm1464_vm1 = vcmp.lt.s32.totalorder %v7218_v17, 1  ;;  %vm1385_vm10 = vc.u32 %v7248_v10, %v7251_v18  ;;  %v1386_v7 = vadd.s32 1, %v7252_v3 }
 0x2bd   : > { %v1460_v23 = vor.u32 %v1459_v52, %v1458_v6  ;;  %vm1465_vm9 = vcmp.lt.s32.totalorder %v7218_v17, 2  ;;  %v1463_v42 = vor.u32 %v1462_v34, %v1461_v45  ;;  %vm1466_vm11 = vcmp.lt.s32.totalorder %v7218_v17, 3 }
 0x2be   : > { %vm1467_vm7 = vcmp.lt.s32.totalorder %v7218_v17, 4  ;;  %v1472_v30 = vsel %vm1464_vm1, %v1451_v27, %v1454_v40  ;;  %v1387_v22 = vsel %vm1385_vm10, %v1386_v7, %v7252_v3  ;;  %v1476_v44 = vsel %vm1464_vm1, %v1454_v40, %v1457_v19 }
 0x2bf   : > { %v1469_v2 = vsel %vm1467_vm7, %v1457_v19, 2102212464  ;;  %v1473_v56 = vsel %vm1467_vm7, %v1460_v23, 920167782  ;;  %v1388_v29 = vadd.s32 %v1387_v22, %v1383_v58  ;;  %v1468_v8 = vsel %vm1464_vm1, %v1448_v24, %v1451_v27 }
 0x2c0   : > { %v1474_v54 = vsel %vm1466_vm11, %v1457_v19, %v1473_v56  ;;  %v1477_v33 = vsel %vm1467_vm7, %v1463_v42, 1326507024  ;;  %v1470_v48 = vsel %vm1466_vm11, %v1454_v40, %v1469_v2  ;;  %vm1547_vm15 = vcmp.gt.s32.totalorder %v7224_v21, 0 }
 0x2c1   : > { %v1475_v51 = vsel %vm1465_vm9, %v1472_v30, %v1474_v54  ;;  %v1478_v55 = vsel %vm1466_vm11, %v1460_v23, %v1477_v33  ;;  %v1389_v37 = vadd.s32 536870912, %v1388_v29  ;;  %v1543_v31 = vand.u32 8388607, %v10164_v13 }
 0x2c2   : > { %v1479_v41 = vsel %vm1465_vm9, %v1476_v44, %v1478_v55  ;;  %v7277_v59 = vmul.u32.u64.low %v7220_v46, %v1475_v51  ;;  %v7278_v28 = vmul.u32.u64.high %v7220_v46, %v1475_v51, %v7277_v59  ;;  %v1548_v60 = vsel %vm1547_vm15, %v7224_v21, 0 }
 0x2c3   : > { %v7282_v50 = vmul.u32.u64.low %v7220_v46, %v1479_v41  ;;  %v7283_v43 = vmul.u32.u64.high %v7220_v46, %v1479_v41, %v7282_v50  ;;  %v7288_v32 = vshrl.u32 %v1389_v37, 30  ;;  %v1471_v61 = vsel %vm1465_vm9, %v1468_v8, %v1470_v48 }
 0x2c4   : > { %v1550_v15 = vand.u32 31, %v1548_v60  ;;  %v1643_v0 = vand.u32 2139095040, %v7212_v38  ;;  %v1490_v16 = vadd.s32 1, %v7278_v28  ;;  %v1487_v27 = vmul.u32 %v7220_v46, %v1471_v61 }
 0x2c5   : > { %v1391_v47 = vshll.u32 %v7288_v32, 30  ;;  %vm1489_vm14 = vc.u32 %v7283_v43, %v7277_v59  ;;  %v1544_v40 = vor.u32 8388608, %v1543_v31  ;;  %v1549_v58 = vshrl.u32 %v1548_v60, 5 }
 0x2c6   : > { %v1551_v3 = vsub.s32 32, %v1550_v15  ;;  %v1491_v57 = vsel %vm1489_vm14, %v1490_v16, %v7278_v28  ;;  %v1644_v17 = vshrl.u32 %v1643_v0, 23  ;;  %v1553_v24 = vshll.u32 %v10229_v1, %v1550_v15 }
 0x2c7   : > { %v7298_v21 = vsub.s32 %v1388_v29, %v1391_v47  ;;  %v1492_v36 = vadd.s32 %v1491_v57, %v1487_v27  ;;  %v1556_v46 = vshll.u32 %v10226_v26, %v1550_v15  ;;  %v1559_v23 = vshll.u32 %v10227_v53, %v1550_v15 }
 0x2c8   : > { %v1554_v6 = vshrl.u32 %v10226_v26, %v1551_v3  ;;  %v1557_v52 = vshrl.u32 %v10227_v53, %v1551_v3  ;;  %v1560_v19 = vshrl.u32 %v10221_v25, %v1551_v3  ;;  %v1584_v42 = vshll.u32 %v1544_v40, 8 }
 0x2c9   : > { %v1394_v34 = vsub.s32 0, %v7298_v21  ;;  %v1493_v45 = vadd.s32 536870912, %v1492_v36  ;;  %v1562_v2 = vshll.u32 %v10221_v25, %v1550_v15  ;;  %v1563_v56 = vshrl.u32 %v10273_v9, %v1551_v3 }
 0x2ca   : > { %v1555_v7 = vor.u32 %v1554_v6, %v1553_v24  ;;  %v1558_v22 = vor.u32 %v1557_v52, %v1556_v46  ;;  %v1561_v29 = vor.u32 %v1560_v19, %v1559_v23  ;;  %v1565_v8 = vshll.u32 %v10273_v9, %v1550_v15 }
 0x2cb   : > { %v5493_v30 = vmin.u32 %v1394_v34, %v7298_v21  ;;  %v7311_v44 = vshrl.u32 %v1493_v45, 30  ;;  %v1566_v54 = vshrl.u32 %v10274_v35, %v1551_v3  ;;  %v1564_v48 = vor.u32 %v1563_v56, %v1562_v2 }
 0x2cc   : > { %vm1568_vm6 = vcmp.lt.s32.totalorder %v1549_v58, 1  ;;  %v5504_v51 = vadd.s32 4294967169, %v1644_v17  ;;  %vm1569_vm2 = vcmp.lt.s32.totalorder %v1549_v58, 2  ;;  %vm1571_vm8 = vcmp.lt.s32.totalorder %v1549_v58, 4 }
 0x2cd   : > { %v1396_v33 = vclz %v5493_v30  ;;  %v1495_v55 = vshll.u32 %v7311_v44, 30  ;;  %v1567_v37 = vor.u32 %v1566_v54, %v1565_v8  ;;  %vm1570_vm12 = vcmp.lt.s32.totalorder %v1549_v58, 3 }
 0x2ce   : > { %v1576_v28 = vsel %vm1568_vm6, %v1555_v7, %v1558_v22  ;;  %v1577_v50 = vsel %vm1571_vm8, %v1564_v48, 920167782  ;;  %v1573_v60 = vsel %vm1571_vm8, %v1561_v29, 2102212464  ;;  %v1580_v15 = vsel %vm1568_vm6, %v1558_v22, %v1561_v29 }
 0x2cf   : > { %v5494_v41 = vadd.s32 4294967294, %v1396_v33  ;;  %v7317_v31 = vsub.s32 %v1492_v36, %v1495_v55  ;;  %v1578_v61 = vsel %vm1570_vm12, %v1561_v29, %v1577_v50  ;;  %v1552_v0 = vshrl.u32 %v10229_v1, %v1551_v3  ;;  %v1219_v50 = vpop.permute.xlu0 %1218 }
 0x2d0   : > { %v1579_v47 = vsel %vm1569_vm2, %v1576_v28, %v1578_v61  ;;  %v1581_v16 = vsel %vm1571_vm8, %v1567_v37, 1326507024  ;;  %v1650_v17 = vadd.s32 1, %v5504_v51  ;;  %v1574_v6 = vsel %vm1570_vm12, %v1558_v22, %v1573_v60 }
 0x2d1   : > { %vm5495_vm13 = vcmp.lt.s32.totalorder %v5494_v41, 0  ;;  %v1498_v40 = vsub.s32 0, %v7317_v31  ;;  %v1582_v57 = vsel %vm1570_vm12, %v1564_v48, %v1581_v16  ;;  %v1572_v36 = vsel %vm1568_vm6, %v1552_v0, %v1555_v7 }
 0x2d2   : > { %v1399_v27 = vsel %vm5495_vm13, 0, %v5494_v41  ;;  %v1583_v52 = vsel %vm1569_vm2, %v1580_v15, %v1582_v57  ;;  %vm1651_vm4 = vcmp.gt.s32.totalorder %v1650_v17, 0  ;;  %v10163_v30 = vand.u32 2147483647, %v7212_v38 }
 0x2d3   : > { %v1404_v24 = vsub.s32 4294967266, %v1399_v27  ;;  %v5497_v34 = vmin.u32 %v1498_v40, %v7317_v31  ;;  %v7329_v46 = vmul.u32.u64.low %v1584_v42, %v1583_v52  ;;  %v7330_v3 = vmul.u32.u64.high %v1584_v42, %v1583_v52, %v7329_v46 }
 0x2d4   : > { %v7332_v19 = vmul.u32.u64.low %v1584_v42, %v1579_v47  ;;  %v7333_v45 = vmul.u32.u64.high %v1584_v42, %v1579_v47, %v7332_v19  ;;  %v1652_v2 = vsel %vm1651_vm4, %v1650_v17, 0  ;;  %v1400_v56 = vsub.s32 32, %v1399_v27 }
 0x2d5   : > { %v1500_v23 = vclz %v5497_v34  ;;  %v1405_v7 = vadd.s32 127, %v1404_v24  ;;  %v1575_v22 = vsel %vm1569_vm2, %v1572_v36, %v1574_v6  ;;  %v1654_v29 = vand.u32 31, %v1652_v2 }
 0x2d6   : > { %vm1593_vm5 = vc.u32 %v7330_v3, %v7332_v19  ;;  %v1384_v54 = vadd.s32 %v7251_v18, %v7248_v10  ;;  %v1594_v33 = vadd.s32 1, %v7333_v45  ;;  %v1591_v48 = vmul.u32 %v1584_v42, %v1575_v22 }
 0x2d7   : > { %v5498_v8 = vadd.s32 4294967294, %v1500_v23  ;;  %v1647_v51 = vand.u32 8388607, %v10163_v30  ;;  %v1406_v37 = vshll.u32 %v1405_v7, 23  ;;  %v1655_v41 = vsub.s32 32, %v1654_v29 }
 0x2d8   : > { %v1402_v55 = vshrl.u32 %v1384_v54, %v1400_v56  ;;  %v1595_v58 = vsel %vm1593_vm5, %v1594_v33, %v7333_v45  ;;  %v1401_v60 = vshll.u32 %v7298_v21, %v1399_v27  ;;  %v7348_v10 = vadd.f32 %v7206_v49, %v1219_v50 }
 0x2d9   : > { %vm5499_vm0 = vcmp.lt.s32.totalorder %v5498_v8, 0  ;;  %v1596_v28 = vadd.s32 %v1595_v58, %v1591_v48  ;;  %v1648_v0 = vor.u32 8388608, %v1647_v51  ;;  %v1407_v42 = vor.u32 4788187, %v1406_v37 }
 0x2da   : > { %v1503_v61 = vsel %vm5499_vm0, 0, %v5498_v8  ;;  %v1403_v18 = vor.u32 %v1402_v55, %v1401_v60  ;;  %v1658_v47 = vshrl.u32 %v10226_v26, %v1655_v41  ;;  %v1661_v16 = vshrl.u32 %v10227_v53, %v1655_v41 }
 0x2db   : > { %v1597_v15 = vadd.s32 536870912, %v1596_v28  ;;  %v1508_v40 = vsub.s32 4294967266, %v1503_v61  ;;  %v1664_v17 = vshrl.u32 %v10221_v25, %v1655_v41  ;;  %v1667_v24 = vshrl.u32 %v10273_v9, %v1655_v41 }
 0x2dc   : > { %v1657_v21 = vshll.u32 %v10229_v1, %v1654_v29  ;;  %v1660_v27 = vshll.u32 %v10226_v26, %v1654_v29  ;;  %v1666_v49 = vshll.u32 %v10221_v25, %v1654_v29  ;;  %v1670_v36 = vshrl.u32 %v10274_v35, %v1655_v41 }
 0x2dd   : > { %v7352_v57 = vshrl.u32 %v1597_v15, 30  ;;  %v1653_v52 = vshrl.u32 %v1652_v2, 5  ;;  %v1663_v34 = vshll.u32 %v10227_v53, %v1654_v29  ;;  %v7363_v46 = vadd.f32 %v7208_v62, %v1219_v50 }
 0x2de   : > { %v1659_v45 = vor.u32 %v1658_v47, %v1657_v21  ;;  %v1662_v23 = vor.u32 %v1661_v16, %v1660_v27  ;;  %v1668_v56 = vor.u32 %v1667_v24, %v1666_v49  ;;  %v1669_v7 = vshll.u32 %v10273_v9, %v1654_v29 }
 0x2df   : > { %v1599_v6 = vshll.u32 %v7352_v57, 30  ;;  %v1488_v22 = vadd.s32 %v7277_v59, %v7283_v43  ;;  %v1509_v8 = vadd.s32 127, %v1508_v40  ;;  %v1665_v33 = vor.u32 %v1664_v17, %v1663_v34 }
 0x2e0   : > { %v1408_v48 = vand.u32 2147483647, %v1407_v42  ;;  %v1410_v51 = vcvt.s32.f32 %v1403_v18  ;;  %v1671_v2 = vor.u32 %v1670_v36, %v1669_v7  ;;  %v1688_v55 = vshll.u32 %v1648_v0, 8 }
 0x2e1   : > { %v7368_v54 = vsub.s32 %v1596_v28, %v1599_v6  ;;  %v1504_v37 = vsub.s32 32, %v1503_v61  ;;  %vm1672_vm1 = vcmp.lt.s32.totalorder %v1653_v52, 1  ;;  %vm1675_vm10 = vcmp.lt.s32.totalorder %v1653_v52, 4 }
 0x2e2   : > { %v1656_v58 = vshrl.u32 %v10229_v1, %v1655_v41  ;;  %vm1674_vm9 = vcmp.lt.s32.totalorder %v1653_v52, 3  ;;  %v1680_v29 = vsel %vm1672_vm1, %v1659_v45, %v1662_v23  ;;  %v1681_v50 = vsel %vm1675_vm10, %v1668_v56, 920167782 }
 0x2e3   : > { %v1602_v62 = vsub.s32 0, %v7368_v54  ;;  %v1510_v59 = vshll.u32 %v1509_v8, 23  ;;  %vm1673_vm11 = vcmp.lt.s32.totalorder %v1653_v52, 2  ;;  %v1677_v43 = vsel %vm1675_vm10, %v1665_v33, 2102212464 }
 0x2e4   : > { %v1682_v28 = vsel %vm1674_vm9, %v1665_v33, %v1681_v50  ;;  %v1684_v0 = vsel %vm1672_vm1, %v1662_v23, %v1665_v33  ;;  %v1685_v18 = vsel %vm1675_vm10, %v1671_v2, 1326507024  ;;  %v1505_v42 = vshll.u32 %v7317_v31, %v1503_v61 }
 0x2e5   : > { %v5501_v60 = vmin.u32 %v1602_v62, %v7368_v54  ;;  %v1683_v15 = vsel %vm1673_vm11, %v1680_v29, %v1682_v28  ;;  %v1506_v47 = vshrl.u32 %v1488_v22, %v1504_v37  ;;  %v1676_v41 = vsel %vm1672_vm1, %v1656_v58, %v1659_v45 }
 0x2e6   : > { %v1686_v16 = vsel %vm1674_vm9, %v1668_v56, %v1685_v18  ;;  %v1678_v40 = vsel %vm1674_vm9, %v1662_v23, %v1677_v43  ;;  %v7379_v24 = vmul.u32.u64.low %v1688_v55, %v1683_v15  ;;  %v7380_v21 = vmul.u32.u64.high %v1688_v55, %v1683_v15, %v7379_v24 }
 0x2e7   : > { %v1687_v17 = vsel %vm1673_vm11, %v1684_v0, %v1686_v16  ;;  %v1411_v27 = vmul.f32 %v1410_v51, %v1408_v48  ;;  %v1511_v49 = vor.u32 4788187, %v1510_v59  ;;  %v1604_v34 = vclz %v5501_v60  ;;  %v7403_v60 = vpop.permute.xlu1 %1223 }
 0x2e8   : > { %v7383_v36 = vmul.u32.u64.low %v1688_v55, %v1687_v17  ;;  %v7384_v6 = vmul.u32.u64.high %v1688_v55, %v1687_v17, %v7383_v36  ;;  %v1747_v7 = vand.u32 2139095040, %v7348_v10  ;;  %v1507_v31 = vor.u32 %v1506_v47, %v1505_v42 }
 0x2e9   : > { %v1679_v61 = vsel %vm1673_vm11, %v1676_v41, %v1678_v40  ;;  %v1851_v45 = vand.u32 2139095040, %v7363_v46  ;;  %v1698_v23 = vadd.s32 1, %v7380_v21  ;;  %v1412_v22 = vxor.u32 2147483648, %v1411_v27 }
 0x2ea   : > { %v1748_v56 = vshrl.u32 %v1747_v7, 23  ;;  %v1414_v8 = vsub.s32 4, %v7288_v32  ;;  %v1512_v33 = vand.u32 2147483647, %v1511_v49  ;;  %v10161_v48 = vand.u32 2147483647, %v7348_v10 }
 0x2eb   : > { %v5502_v51 = vadd.s32 4294967294, %v1604_v34  ;;  %v1695_v2 = vmul.u32 %v1688_v55, %v1679_v61  ;;  %vm1697_vm7 = vc.u32 %v7384_v6, %v7379_v24  ;;  %v1514_v62 = vcvt.s32.f32 %v1507_v31 }
 0x2ec   : > { %v5508_v37 = vadd.s32 4294967169, %v1748_v56  ;;  %v1699_v52 = vsel %vm1697_vm7, %v1698_v23, %v7380_v21  ;;  %v1852_v58 = vshrl.u32 %v1851_v45, 23  ;;  %vm1330_vm15 = vcmp.lt.s32.totalorder %v7191_v12, 0 }
 0x2ed   : > { %v1700_v29 = vadd.s32 %v1699_v52, %v1695_v2  ;;  %v1413_v59 = vsel %vm1330_vm15, %v1412_v22, %v1411_v27  ;;  %v7397_v43 = vsel %vm1330_vm15, %v1414_v8, %v7288_v32  ;;  %v7399_v28 = vmul.f32 %v1514_v62, %v1512_v33 }
 0x2ee   : > { %v1754_v50 = vadd.s32 1, %v5508_v37  ;;  %v1751_v55 = vand.u32 8388607, %v10161_v48  ;;  %vm5503_vm14 = vcmp.lt.s32.totalorder %v5502_v51, 0  ;;  %v5512_v0 = vadd.s32 4294967169, %v1852_v58 }
 0x2ef   : > { %v1701_v15 = vadd.s32 536870912, %v1700_v29  ;;  %vm7407_vm2 = vcmp.le.f32.partialorder %v1328_v14, 0.7853982  ;;  %v7413_v32 = vadd.f32 %v7210_v4, %v7403_v60  ;;  %v7420_v41 = vadd.s32 %v7332_v19, %v7330_v3 }
 0x2f0   : > { %vm1755_vm6 = vcmp.gt.s32.totalorder %v1754_v50, 0  ;;  %v7427_v14 = vsel %vm7407_vm2, %v7191_v12, %v1413_v59  ;;  %v1516_v17 = vxor.u32 2147483648, %v7399_v28  ;;  %v7430_v4 = vsel %vm5503_vm14, 0, %v5502_v51 }
 0x2f1   : > { %v1756_v42 = vsel %vm1755_vm6, %v1754_v50, 0  ;;  %v7422_v16 = vshrl.u32 %v1701_v15, 30  ;;  %v1752_v49 = vor.u32 8388608, %v1751_v55  ;;  %v1858_v3 = vadd.s32 1, %v5512_v0 }
 0x2f2   : > { %v1758_v40 = vand.u32 31, %v1756_v42  ;;  %v1757_v19 = vshrl.u32 %v1756_v42, 5  ;;  %v10162_v52 = vand.u32 2147483647, %v7363_v46  ;;  %vm1434_vm8 = vcmp.lt.s32.totalorder %v7193_v11, 0 }
 0x2f3   : > { %v1703_v27 = vshll.u32 %v7422_v16, 30  ;;  %v1612_v58 = vsub.s32 4294967266, %v7430_v4  ;;  %v1792_v15 = vshll.u32 %v1752_v49, 8  ;;  %vm1859_vm13 = vcmp.gt.s32.totalorder %v1858_v3, 0 }
 0x2f4   : > { %v1759_v36 = vsub.s32 32, %v1758_v40  ;;  %v1761_v34 = vshll.u32 %v10229_v1, %v1758_v40  ;;  %v1764_v7 = vshll.u32 %v10226_v26, %v1758_v40  ;;  %v1767_v31 = vshll.u32 %v10227_v53, %v1758_v40 }
 0x2f5   : > { %v7437_v61 = vsub.s32 %v1700_v29, %v1703_v27  ;;  %v1770_v56 = vshll.u32 %v10221_v25, %v1758_v40  ;;  %v1773_v33 = vshll.u32 %v10273_v9, %v1758_v40  ;;  %vm1776_vm12 = vcmp.lt.s32.totalorder %v1757_v19, 1 }
 0x2f6   : > { %v1762_v45 = vshrl.u32 %v10226_v26, %v1759_v36  ;;  %v1765_v23 = vshrl.u32 %v10227_v53, %v1759_v36  ;;  %v1768_v22 = vshrl.u32 %v10221_v25, %v1759_v36  ;;  %v1771_v8 = vshrl.u32 %v10273_v9, %v1759_v36 }
 0x2f7   : > { %v1774_v51 = vshrl.u32 %v10274_v35, %v1759_v36  ;;  %v1706_v2 = vsub.s32 0, %v7437_v61  ;;  %v1760_v0 = vshrl.u32 %v10229_v1, %v1759_v36  ;;  %vm1777_vm4 = vcmp.lt.s32.totalorder %v1757_v19, 2 }
 0x2f8   : > { %v1763_v37 = vor.u32 %v1762_v45, %v1761_v34  ;;  %v1766_v62 = vor.u32 %v1765_v23, %v1764_v7  ;;  %v1769_v29 = vor.u32 %v1768_v22, %v1767_v31  ;;  %v1772_v50 = vor.u32 %v1771_v8, %v1770_v56 }
 0x2f9   : > { %v1775_v59 = vor.u32 %v1774_v51, %v1773_v33  ;;  %v5505_v55 = vmin.u32 %v1706_v2, %v7437_v61  ;;  %vm1779_vm5 = vcmp.lt.s32.totalorder %v1757_v19, 4  ;;  %vm1778_vm0 = vcmp.lt.s32.totalorder %v1757_v19, 3 }
 0x2fa   : > { %v1784_v42 = vsel %vm1776_vm12, %v1763_v37, %v1766_v62  ;;  %v1781_v27 = vsel %vm1779_vm5, %v1769_v29, 2102212464  ;;  %v1785_v34 = vsel %vm1779_vm5, %v1772_v50, 920167782  ;;  %v1780_v7 = vsel %vm1776_vm12, %v1760_v0, %v1763_v37 }
 0x2fb   : > { %v1708_v40 = vclz %v5505_v55  ;;  %v1786_v45 = vsel %vm1778_vm0, %v1769_v29, %v1785_v34  ;;  %v1788_v23 = vsel %vm1776_vm12, %v1766_v62, %v1769_v29  ;;  %v1789_v31 = vsel %vm1779_vm5, %v1775_v59, 1326507024 }
 0x2fc   : > { %v1782_v22 = vsel %vm1778_vm0, %v1766_v62, %v1781_v27  ;;  %v1787_v8 = vsel %vm1777_vm4, %v1784_v42, %v1786_v45  ;;  %v1790_v33 = vsel %vm1778_vm0, %v1772_v50, %v1789_v31  ;;  %v1613_v49 = vadd.s32 127, %v1612_v58 }
 0x2fd   : > { %v5506_v56 = vadd.s32 4294967294, %v1708_v40  ;;  %v1791_v51 = vsel %vm1777_vm4, %v1788_v23, %v1790_v33  ;;  %v7454_v36 = vmul.u32.u64.low %v1792_v15, %v1787_v8  ;;  %v7455_v2 = vmul.u32.u64.high %v1792_v15, %v1787_v8, %v7454_v36 }
 0x2fe   : > { %v7458_v55 = vmul.u32.u64.low %v1792_v15, %v1791_v51  ;;  %v7459_v48 = vmul.u32.u64.high %v1792_v15, %v1791_v51, %v7458_v55  ;;  %v1860_v37 = vsel %vm1859_vm13, %v1858_v3, 0  ;;  %v1783_v62 = vsel %vm1777_vm4, %v1780_v7, %v1782_v22 }
 0x2ff   : > { %vm5507_vm1 = vcmp.lt.s32.totalorder %v5506_v56, 0  ;;  %v1855_v50 = vand.u32 8388607, %v10162_v52  ;;  %v1862_v58 = vand.u32 31, %v1860_v37  ;;  %v7470_v59 = vsel %vm1434_vm8, %v1516_v17, %v7399_v28 }
 0x300   : > { %v7462_v29 = vsel %vm5507_vm1, 0, %v5506_v56  ;;  %v1608_v0 = vsub.s32 32, %v7430_v4  ;;  %v1955_v40 = vand.u32 2139095040, %v7413_v32  ;;  %v1802_v27 = vadd.s32 1, %v7455_v2 }
 0x301   : > { %v1716_v19 = vsub.s32 4294967266, %v7462_v29  ;;  %v1863_v34 = vsub.s32 32, %v1862_v58  ;;  %v1614_v7 = vshll.u32 %v1613_v49, 23  ;;  %v1696_v45 = vadd.s32 %v7379_v24, %v7384_v6 }
 0x302   : > { %v1799_v28 = vmul.u32 %v1792_v15, %v1783_v62  ;;  %vm1801_vm10 = vc.u32 %v7459_v48, %v7454_v36  ;;  %v1856_v23 = vor.u32 8388608, %v1855_v50  ;;  %v1712_v22 = vsub.s32 32, %v7462_v29 }
 0x303   : > { %v1803_v17 = vsel %vm1801_vm10, %v1802_v27, %v7455_v2  ;;  %v1866_v31 = vshrl.u32 %v10226_v26, %v1863_v34  ;;  %v1869_v56 = vshrl.u32 %v10227_v53, %v1863_v34  ;;  %v1861_v33 = vshrl.u32 %v1860_v37, 5 }
 0x304   : > { %v1804_v8 = vadd.s32 %v1803_v17, %v1799_v28  ;;  %v1956_v51 = vshrl.u32 %v1955_v40, 23  ;;  %v1717_v49 = vadd.s32 127, %v1716_v19  ;;  %v1865_v55 = vshll.u32 %v10229_v1, %v1862_v58 }
 0x305   : > { %v1868_v24 = vshll.u32 %v10226_v26, %v1862_v58  ;;  %v1872_v6 = vshrl.u32 %v10221_v25, %v1863_v34  ;;  %v1871_v2 = vshll.u32 %v10227_v53, %v1862_v58  ;;  %v1874_v62 = vshll.u32 %v10221_v25, %v1862_v58 }
 0x306   : > { %v1805_v15 = vadd.s32 536870912, %v1804_v8  ;;  %v1875_v50 = vshrl.u32 %v10273_v9, %v1863_v34  ;;  %vm7495_vm9 = vcmp.le.f32.partialorder %v1432_v5, 0.7853982  ;;  %v1867_v37 = vor.u32 %v1866_v31, %v1865_v55 }
 0x307   : > { %v1870_v40 = vor.u32 %v1869_v56, %v1868_v24  ;;  %v1877_v19 = vshll.u32 %v10273_v9, %v1862_v58  ;;  %v1878_v28 = vshrl.u32 %v10274_v35, %v1863_v34  ;;  %v1610_v17 = vshrl.u32 %v7420_v41, %v1608_v0 }
 0x308   : > { %v7502_v52 = vshrl.u32 %v1805_v15, 30  ;;  %v1873_v47 = vor.u32 %v1872_v6, %v1871_v2  ;;  %v1876_v30 = vor.u32 %v1875_v50, %v1874_v62  ;;  %v1615_v13 = vor.u32 4788187, %v1614_v7 }
 0x309   : > { %v1879_v21 = vor.u32 %v1878_v28, %v1877_v19  ;;  %v1896_v42 = vshll.u32 %v1856_v23, 8  ;;  %v5516_v3 = vadd.s32 4294967169, %v1956_v51  ;;  %v1718_v5 = vshll.u32 %v1717_v49, 23 }
 0x30a   : > { %v1807_v20 = vshll.u32 %v7502_v52, 30  ;;  %vm1880_vm11 = vcmp.lt.s32.totalorder %v1861_v33, 1  ;;  %vm1883_vm7 = vcmp.lt.s32.totalorder %v1861_v33, 4  ;;  %vm1538_vm15 = vcmp.lt.s32.totalorder %v7199_v63, 0 }
 0x30b   : > { %v1713_v58 = vshll.u32 %v7437_v61, %v7462_v29  ;;  %v1714_v31 = vshrl.u32 %v1696_v45, %v1712_v22  ;;  %v1888_v41 = vsel %vm1880_vm11, %v1867_v37, %v1870_v40  ;;  %v1889_v0 = vsel %vm1883_vm7, %v1876_v30, 920167782 }
 0x30c   : > { %v7509_v56 = vsub.s32 %v1804_v8, %v1807_v20  ;;  %v1864_v7 = vshrl.u32 %v10229_v1, %v1863_v34  ;;  %vm1882_vm14 = vcmp.lt.s32.totalorder %v1861_v33, 3  ;;  %v1885_v23 = vsel %vm1883_vm7, %v1873_v47, 2102212464 }
 0x30d   : > { %vm1881_vm6 = vcmp.lt.s32.totalorder %v1861_v33, 2  ;;  %v1890_v51 = vsel %vm1882_vm14, %v1873_v47, %v1889_v0  ;;  %v1892_v49 = vsel %vm1880_vm11, %v1870_v40, %v1873_v47  ;;  %v1893_v55 = vsel %vm1883_vm7, %v1879_v21, 1326507024 }
 0x30e   : > { %v1719_v24 = vor.u32 4788187, %v1718_v5  ;;  %v1810_v6 = vsub.s32 0, %v7509_v56  ;;  %v1884_v61 = vsel %vm1880_vm11, %v1864_v7, %v1867_v37  ;;  %v1891_v29 = vsel %vm1881_vm6, %v1888_v41, %v1890_v51 }
 0x30f   : > { %v1886_v45 = vsel %vm1882_vm14, %v1870_v40, %v1885_v23  ;;  %v1894_v22 = vsel %vm1882_vm14, %v1876_v30, %v1893_v55  ;;  %v7516_v20 = vmul.u32.u64.low %v1896_v42, %v1891_v29  ;;  %v7517_v8 = vmul.u32.u64.high %v1896_v42, %v1891_v29, %v7516_v20 }
 0x310   : > { %v1520_v34 = vsel %vm7495_vm9, %v7193_v11, %v7470_v59  ;;  %v5509_v47 = vmin.u32 %v1810_v6, %v7509_v56  ;;  %v1895_v21 = vsel %vm1881_vm6, %v1892_v49, %v1894_v22  ;;  %v1962_v15 = vadd.s32 1, %v5516_v3 }
 0x311   : > { %v10279_v2 = vshll.u32 %v7368_v54, %v7430_v4  ;;  %v1715_v50 = vor.u32 %v1714_v31, %v1713_v58  ;;  %v7529_v30 = vmul.u32.u64.low %v1896_v42, %v1895_v21  ;;  %v7530_v37 = vmul.u32.u64.high %v1896_v42, %v1895_v21, %v7529_v30 }
 0x312   : > { %v1616_v40 = vand.u32 2147483647, %v1615_v13  ;;  %v1812_v19 = vclz %v5509_v47  ;;  %v1887_v28 = vsel %vm1881_vm6, %v1884_v61, %v1886_v45  ;;  %vm1963_vm12 = vcmp.gt.s32.totalorder %v1962_v15, 0 }
 0x313   : > { %v1611_v62 = vor.u32 %v1610_v17, %v10279_v2  ;;  %v1720_v5 = vand.u32 2147483647, %v1719_v24  ;;  %v1906_v59 = vadd.s32 1, %v7517_v8  ;;  %v10280_v41 = vand.u32 2147483647, %v7413_v32 }
 0x314   : > { %v1964_v3 = vsel %vm1963_vm12, %v1962_v15, 0  ;;  %5980 = vcosq.f32 %v1520_v34  ;;  %v10281_v54 = vsub.s32 4, %v7352_v57  ;;  %v5510_v13 = vadd.s32 4294967294, %v1812_v19 }
 0x315   : > { %v1959_v0 = vand.u32 8388607, %v10280_v41  ;;  %v1966_v17 = vand.u32 31, %v1964_v3  ;;  %v1618_v33 = vcvt.s32.f32 %v1611_v62  ;;  %v1722_v58 = vcvt.s32.f32 %v1715_v50 }
 0x316   : > { %v7541_v4 = vsel %vm1538_vm15, %v10281_v54, %v7352_v57  ;;  %v1903_v31 = vmul.u32 %v1896_v42, %v1887_v28  ;;  %vm1905_vm13 = vc.u32 %v7530_v37, %v7516_v20  ;;  %5982 = vsinq.f32 %v1520_v34 }
 0x317   : > { %vm5511_vm4 = vcmp.lt.s32.totalorder %v5510_v13, 0  ;;  %v1907_v7 = vsel %vm1905_vm13, %v1906_v59, %v7517_v8  ;;  %v1967_v23 = vsub.s32 32, %v1966_v17  ;;  %v1619_v51 = vmul.f32 %v1618_v33, %v1616_v40 }
 0x318   : > { %v7546_v49 = vmul.f32 %v1722_v58, %v1720_v5  ;;  %v1908_v55 = vadd.s32 %v1907_v7, %v1903_v31  ;;  %v1960_v24 = vor.u32 8388608, %v1959_v0  ;;  %v7548_v57 = vsel %vm5511_vm4, 0, %v5510_v13 }
 0x319   : > { %v7550_v6 = vshrl.u32 %v1964_v3, 5  ;;  %v1975_v61 = vshll.u32 %v10227_v53, %v1966_v17  ;;  %v7555_v42 = vadd.f32 %v7214_v39, %v7403_v60  ;;  %v1970_v45 = vshrl.u32 %v10226_v26, %v1967_v23 }
 0x31a   : > { %v1909_v29 = vadd.s32 536870912, %v1908_v55  ;;  %v1973_v22 = vshrl.u32 %v10227_v53, %v1967_v23  ;;  %v1976_v8 = vshrl.u32 %v10221_v25, %v1967_v23  ;;  %v1969_v34 = vshll.u32 %v10229_v1, %v1966_v17 }
 0x31b   : > { %v1972_v47 = vshll.u32 %v10226_v26, %v1966_v17  ;;  %v1978_v21 = vshll.u32 %v10221_v25, %v1966_v17  ;;  %v1979_v15 = vshrl.u32 %v10273_v9, %v1967_v23  ;;  %v1620_v2 = vxor.u32 2147483648, %v1619_v51 }
 0x31c   : > { %v1724_v62 = vxor.u32 2147483648, %v7546_v49  ;;  %v7565_v39 = vshrl.u32 %v1909_v29, 30  ;;  %v1977_v60 = vor.u32 %v1976_v8, %v1975_v61  ;;  %v1820_v50 = vsub.s32 4294967266, %v7548_v57 }
 0x31d   : > { %v1971_v30 = vor.u32 %v1970_v45, %v1969_v34  ;;  %v1974_v40 = vor.u32 %v1973_v22, %v1972_v47  ;;  %v1980_v19 = vor.u32 %v1979_v15, %v1978_v21  ;;  %v10282_v28 = vand.u32 2147483647, %v7199_v63 }
 0x31e   : > { %v1911_v59 = vshll.u32 %v7565_v39, 30  ;;  %v1981_v41 = vshll.u32 %v10273_v9, %v1966_v17  ;;  %v1982_v0 = vshrl.u32 %v10274_v35, %v1967_v23  ;;  %v2000_v3 = vshll.u32 %v1960_v24, 8  ;;  %v7577_v54 = vpop.eup %5980 }
 0x31f   : > { %vm7570_vm5 = vcmp.le.f32.partialorder %v10282_v28, 0.7853982  ;;  %vm1642_vm0 = vcmp.lt.s32.totalorder %v7212_v38, 0  ;;  %v1816_v13 = vsub.s32 32, %v7548_v57  ;;  %v1968_v33 = vshrl.u32 %v10229_v1, %v1967_v23 }
 0x320   : > { %vm1987_vm1 = vcmp.lt.s32.totalorder %v7550_v6, 4  ;;  %v2059_v58 = vand.u32 2139095040, %v7555_v42  ;;  %v7584_v31 = vsub.s32 %v1908_v55, %v1911_v59  ;;  %v1983_v7 = vor.u32 %v1982_v0, %v1981_v41  ;;  %v7589_v24 = vpop.eup %5982 }
 0x321   : > { %vm1984_vm10 = vcmp.lt.s32.totalorder %v7550_v6, 1  ;;  %v1989_v17 = vsel %vm1987_vm1, %v1977_v60, 2102212464  ;;  %v1821_v61 = vadd.s32 127, %v1820_v50  ;;  %vm1986_vm11 = vcmp.lt.s32.totalorder %v7550_v6, 3 }
 0x322   : > { %v1992_v29 = vsel %vm1984_vm10, %v1971_v30, %v1974_v40  ;;  %v1993_v23 = vsel %vm1987_vm1, %v1980_v19, 920167782  ;;  %v10285_v45 = vand.u32 2147483647, %v7212_v38  ;;  %v1914_v22 = vsub.s32 0, %v7584_v31 }
 0x323   : > { %vm1985_vm14 = vcmp.lt.s32.totalorder %v7550_v6, 2  ;;  %v1994_v8 = vsel %vm1986_vm11, %v1977_v60, %v1993_v23  ;;  %v1996_v34 = vsel %vm1984_vm10, %v1974_v40, %v1977_v60  ;;  %v1988_v47 = vsel %vm1984_vm10, %v1968_v33, %v1971_v30 }
 0x324   : > { %vm7596_vm7 = vcmp.le.f32.partialorder %v10285_v45, 0.7853982  ;;  %v1990_v21 = vsel %vm1986_vm11, %v1974_v40, %v1989_v17  ;;  %v1995_v15 = vsel %vm1985_vm14, %v1992_v29, %v1994_v8  ;;  %v1997_v50 = vsel %vm1987_vm1, %v1983_v7, 1326507024 }
 0x325   : > { %v5513_v28 = vmin.u32 %v1914_v22, %v7584_v31  ;;  %v1998_v59 = vsel %vm1986_vm11, %v1980_v19, %v1997_v50  ;;  %v7607_v41 = vmul.u32.u64.low %v2000_v3, %v1995_v15  ;;  %v7608_v0 = vmul.u32.u64.high %v2000_v3, %v1995_v15, %v7607_v41 }
 0x326   : > { %v10288_v45 = vsel %vm7407_vm2, 0, %v7397_v43  ;;  %v1621_v60 = vsel %vm1538_vm15, %v1620_v2, %v1619_v51  ;;  %v1999_v30 = vsel %vm1985_vm14, %v1996_v34, %v1998_v59  ;;  %v2060_v40 = vshrl.u32 %v2059_v58, 23 }
 0x327   : > { %v7614_v23 = vadd.s32 3, %v10288_v45  ;;  %v1800_v33 = vadd.s32 %v7454_v36, %v7459_v48  ;;  %v1916_v19 = vclz %v5513_v28  ;;  %5984 = vcosq.f32 %v7427_v14 }
 0x328   : > { %v7622_v7 = vmul.u32.u64.low %v2000_v3, %v1999_v30  ;;  %v7623_v17 = vmul.u32.u64.high %v2000_v3, %v1999_v30, %v7622_v7  ;;  %v1625_v43 = vsel %vm7570_vm5, 0, %v7541_v4  ;;  %v1991_v18 = vsel %vm1985_vm14, %v1988_v47, %v1990_v21 }
 0x329   : > { %v5520_v51 = vadd.s32 4294967169, %v2060_v40  ;;  %v1725_v2 = vsel %vm1642_vm0, %v1724_v62, %v7546_v49  ;;  %v1818_v58 = vshrl.u32 %v1800_v33, %v1816_v13  ;;  %v1822_v48 = vshll.u32 %v1821_v61, 23 }
 0x32a   : > { %v2010_v36 = vadd.s32 1, %v7608_v0  ;;  %v1624_v29 = vsel %vm7570_vm5, %v7199_v63, %v1621_v60  ;;  %v10166_v22 = vand.u32 2147483647, %v7555_v42  ;;  %v1518_v4 = vsub.s32 4, %v7311_v44 }
 0x32b   : > { %v2066_v8 = vadd.s32 1, %v5520_v51  ;;  %v1817_v6 = vshll.u32 %v7509_v56, %v7548_v57  ;;  %v5514_v34 = vadd.s32 4294967294, %v1916_v19  ;;  %v2007_v47 = vmul.u32 %v2000_v3, %v1991_v18 }
 0x32c   : > { %vm2009_vm2 = vc.u32 %v7623_v17, %v7607_v41  ;;  %5986 = vsinq.f32 %v7427_v14  ;;  %v1728_v49 = vsel %vm7596_vm7, %v7212_v38, %v1725_v2  ;;  %v7650_v13 = vor.u32 4788187, %v1822_v48 }
 0x32d   : > { %v2011_v62 = vsel %vm2009_vm2, %v2010_v36, %v7608_v0  ;;  %vm2067_vm15 = vcmp.gt.s32.totalorder %v2066_v8, 0  ;;  %5988 = vcosq.f32 %v1624_v29  ;;  %v7648_v5 = vor.u32 %v1818_v58, %v1817_v6 }
 0x32e   : > { %v2012_v61 = vadd.s32 %v2011_v62, %v2007_v47  ;;  %5990 = vsinq.f32 %v1624_v29  ;;  %v7652_v56 = vadd.s32 3, %v1625_v43  ;;  %v2063_v57 = vand.u32 8388607, %v10166_v22 }
 0x32f   : > { %v2068_v14 = vsel %vm2067_vm15, %v2066_v8, 0  ;;  %5992 = vcosq.f32 %v1728_v49  ;;  %vm5515_vm6 = vcmp.lt.s32.totalorder %v5514_v34, 0  ;;  %v1519_v21 = vsel %vm1434_vm8, %v1518_v4, %v7311_v44 }
 0x330   : > { %v2013_v3 = vadd.s32 536870912, %v2012_v61  ;;  %5994 = vsinq.f32 %v1728_v49  ;;  %v7661_v15 = vadd.s32 %v7516_v20, %v7530_v37  ;;  %v2070_v50 = vand.u32 31, %v2068_v14 }
 0x331   : > { %v7669_v30 = vpop.eup %5984  ;;  %v7671_v40 = vsel %vm5515_vm6, 0, %v5514_v34  ;;  %v2064_v44 = vor.u32 8388608, %v2063_v57  ;;  %v1521_v20 = vsel %vm7495_vm9, 0, %v1519_v21  ;;  %v7676_v37 = vadd.s32 %v7607_v41, %v7623_v17 }
 0x332   : > { %v7666_v45 = vshrl.u32 %v2013_v3, 30  ;;  %v2071_v33 = vsub.s32 32, %v2070_v50  ;;  %v2073_v7 = vshll.u32 %v10229_v1, %v2070_v50  ;;  %v1726_v43 = vsub.s32 4, %v7422_v16 }
 0x333   : > { %v2076_v51 = vshll.u32 %v10226_v26, %v2070_v50  ;;  %v1924_v27 = vsub.s32 4294967266, %v7671_v40  ;;  %v2069_v41 = vshrl.u32 %v2068_v14, 5  ;;  %v2079_v17 = vshll.u32 %v10227_v53, %v2070_v50 }
 0x334   : > { %v2015_v19 = vshll.u32 %v7666_v45, 30  ;;  %v2074_v18 = vshrl.u32 %v10226_v26, %v2071_v33  ;;  %v2077_v2 = vshrl.u32 %v10227_v53, %v2071_v33  ;;  %v2080_v58 = vshrl.u32 %v10221_v25, %v2071_v33 }
 0x335   : > { %v1920_v29 = vsub.s32 32, %v7671_v40  ;;  %v7692_v6 = vshll.u32 %v2064_v44, 8  ;;  %v2082_v62 = vshll.u32 %v10221_v25, %v2070_v50  ;;  %v2085_v14 = vshll.u32 %v10273_v9, %v2070_v50 }
 0x336   : > { %v7686_v48 = vsub.s32 %v2012_v61, %v2015_v19  ;;  %v7689_v36 = vpop.eup %5986  ;;  %v2075_v8 = vor.u32 %v2074_v18, %v2073_v7  ;;  %v2078_v4 = vor.u32 %v2077_v2, %v2076_v51  ;;  %v2081_v49 = vor.u32 %v2080_v58, %v2079_v17 }
 0x337   : > { %v7694_v34 = vpop.eup %5988  ;;  %v2083_v61 = vshrl.u32 %v10273_v9, %v2071_v33  ;;  %v2086_v3 = vshrl.u32 %v10274_v35, %v2071_v33  ;;  %v1525_v21 = vadd.s32 3, %v1521_v20  ;;  %v1727_v44 = vsel %vm1642_vm0, %v1726_v43, %v7422_v16 }
 0x338   : > { %v2018_v47 = vsub.s32 0, %v7686_v48  ;;  %v7699_v57 = vpop.eup %5990  ;;  %v1925_v7 = vadd.s32 127, %v1924_v27  ;;  %vm2088_vm8 = vcmp.lt.s32.totalorder %v2069_v41, 1  ;;  %v2072_v58 = vshrl.u32 %v10229_v1, %v2071_v33 }
 0x339   : > { %v7706_v19 = vpop.eup %5992  ;;  %v2084_v51 = vor.u32 %v2083_v61, %v2082_v62  ;;  %v2087_v17 = vor.u32 %v2086_v3, %v2085_v14  ;;  %vm2091_vm9 = vcmp.lt.s32.totalorder %v2069_v41, 4  ;;  %v2096_v50 = vsel %vm2088_vm8, %v2075_v8, %v2078_v4 }
 0x33a   : > { %v5517_v18 = vmin.u32 %v2018_v47, %v7686_v48  ;;  %v5995_v2 = vpop.eup %5994  ;;  %vm2090_vm12 = vcmp.lt.s32.totalorder %v2069_v41, 3  ;;  %v2093_v20 = vsel %vm2091_vm9, %v2081_v49, 2102212464  ;;  %vm2089_vm13 = vcmp.lt.s32.totalorder %v2069_v41, 2 }
 0x33b   : > { %v2097_v0 = vsel %vm2091_vm9, %v2084_v51, 920167782  ;;  %v2100_v16 = vsel %vm2088_vm8, %v2078_v4, %v2081_v49  ;;  %v1526_v43 = vand.u32 3, %v1525_v21  ;;  %v2092_v27 = vsel %vm2088_vm8, %v2072_v58, %v2075_v8 }
 0x33c   : > { %v2020_v22 = vclz %v5517_v18  ;;  %v2098_v59 = vsel %vm2090_vm12, %v2081_v49, %v2097_v0  ;;  %v2101_v62 = vsel %vm2091_vm9, %v2087_v17, 1326507024  ;;  %v2094_v61 = vsel %vm2090_vm12, %v2078_v4, %v2093_v20 }
 0x33d   : > { %v2099_v47 = vsel %vm2089_vm13, %v2096_v50, %v2098_v59  ;;  %v2102_v28 = vsel %vm2090_vm12, %v2084_v51, %v2101_v62  ;;  %v1921_v3 = vshll.u32 %v7584_v31, %v7671_v40  ;;  %v1922_v8 = vshrl.u32 %v7661_v15, %v1920_v29 }
 0x33e   : > { %v5518_v60 = vadd.s32 4294967294, %v2020_v22  ;;  %v7712_v33 = vmul.u32.u64.low %v7692_v6, %v2099_v47  ;;  %v7713_v14 = vmul.u32.u64.high %v7692_v6, %v2099_v47, %v7712_v33  ;;  %v2103_v0 = vsel %vm2089_vm13, %v2100_v16, %v2102_v28 }
 0x33f   : > { %v1729_v22 = vsel %vm7596_vm7, 0, %v1727_v44  ;;  %v7723_v4 = vmul.u32.u64.low %v7692_v6, %v2103_v0  ;;  %v7724_v49 = vmul.u32.u64.high %v7692_v6, %v2103_v0, %v7723_v4  ;;  %vm1524_vm5 = vweird.f32 %v7193_v11 }
 0x340   : > { %vm5519_vm4 = vcmp.lt.s32.totalorder %v5518_v60, 0  ;;  %vm1732_vm0 = vweird.f32 %v7212_v38  ;;  %v1926_v21 = vshll.u32 %v1925_v7, 23  ;;  %v2095_v31 = vsel %vm2089_vm13, %v2092_v27, %v2094_v61 }
 0x341   : > { %v2023_v59 = vsel %vm5519_vm4, 0, %v5518_v60  ;;  %v1737_v40 = vxor.u32 2147483648, %v5995_v2  ;;  %v2114_v28 = vadd.s32 1, %v7713_v14  ;;  %vm1528_vm1 = vcmp.eq.s32.totalorder %v1526_v43, 0 }
 0x342   : > { %v2028_v18 = vsub.s32 4294967266, %v2023_v59  ;;  %vm1531_vm10 = vcmp.eq.s32.totalorder %v1526_v43, 2  ;;  %v1733_v55 = vadd.s32 3, %v1729_v22  ;;  %v10289_v60 = vxor.u32 2147483648, %v7589_v24 }
 0x343   : > { %v10290_v44 = vxor.u32 2147483648, %v7577_v54  ;;  %v1740_v7 = vxor.u32 2147483648, %v7706_v19  ;;  %v1923_v58 = vor.u32 %v1922_v8, %v1921_v3  ;;  %v2111_v41 = vmul.u32 %v7692_v6, %v2095_v31 }
 0x344   : > { %v2029_v15 = vadd.s32 127, %v2028_v18  ;;  %v1530_v29 = vsel %vm1528_vm1, %v7577_v54, %v10289_v60  ;;  %vm2113_vm11 = vc.u32 %v7724_v49, %v7712_v33  ;;  %v1734_v17 = vand.u32 3, %v1733_v55 }
 0x345   : > { %v1533_v51 = vsel %vm1531_vm10, %v10290_v44, %v7589_v24  ;;  %v1927_v50 = vor.u32 4788187, %v1926_v21  ;;  %v2024_v20 = vsub.s32 32, %v2023_v59  ;;  %v2115_v16 = vsel %vm2113_vm11, %v2114_v28, %v7713_v14 }
 0x346   : > { %vm1527_vm7 = vcmp.lt.s32.totalorder %v1526_v43, 2  ;;  %v2116_v27 = vadd.s32 %v2115_v16, %v2111_v41  ;;  %vm1736_vm14 = vcmp.eq.s32.totalorder %v1734_v17, 0  ;;  %vm1739_vm2 = vcmp.eq.s32.totalorder %v1734_v17, 2 }
 0x347   : > { %v1534_v47 = vsel %vm1527_vm7, %v1530_v29, %v1533_v51  ;;  %v2030_v54 = vshll.u32 %v2029_v15, 23  ;;  %vm1735_vm15 = vcmp.lt.s32.totalorder %v1734_v17, 2  ;;  %v1738_v24 = vsel %vm1736_vm14, %v7706_v19, %v1737_v40 }
 0x348   : > { %v1741_v62 = vsel %vm1739_vm2, %v1740_v7, %v5995_v2  ;;  %v2117_v61 = vadd.s32 536870912, %v2116_v27  ;;  %v1422_v3 = vand.u32 3, %v7614_v23  ;;  %v1425_v0 = vxor.u32 2147483648, %v7689_v36 }
 0x349   : > { %v1742_v6 = vsel %vm1735_vm15, %v1738_v24, %v1741_v62  ;;  %v2026_v22 = vshrl.u32 %v7676_v37, %v2024_v20  ;;  %v1535_v43 = vsel %vm1524_vm5, nan, %v1534_v47  ;;  %v1428_v8 = vxor.u32 2147483648, %v7669_v30 }
 0x34a   : > { %v1743_v14 = vsel %vm1732_vm0, nan, %v1742_v6  ;;  %v2025_v4 = vshll.u32 %v7686_v48, %v2023_v59  ;;  %v7751_v19 = vshrl.u32 %v2117_v61, 30  ;;  %vm1424_vm6 = vcmp.eq.s32.totalorder %v1422_v3, 0 }
 0x34b   : > { %v5686_v2 = vpack.c.bf16 %v1743_v14, %v1535_v43  ;;  %v2031_v21 = vor.u32 4788187, %v2030_v54  ;;  %v1426_v23 = vsel %vm1424_vm6, %v7669_v30, %v1425_v0  ;;  %vm1427_vm8 = vcmp.eq.s32.totalorder %v1422_v3, 2 }
 0x34c   : > { %v1630_v37 = vand.u32 3, %v7652_v56  ;;  %v2119_v11 = vshll.u32 %v7751_v19, 30  ;;  %v1429_v38 = vsel %vm1427_vm8, %v1428_v8, %v7689_v36  ;;  %v1633_v18 = vxor.u32 2147483648, %v7699_v57 }
 0x34d   : > { %5687 = vmatprep.subr.bf16.mxu0 %v5686_v2  ;;  %v1636_v31 = vxor.u32 2147483648, %v7694_v34  ;;  %v1928_v48 = vand.u32 2147483647, %v1927_v50  ;;  %v2027_v59 = vor.u32 %v2026_v22, %v2025_v4  ;;  %vm1423_vm9 = vcmp.lt.s32.totalorder %v1422_v3, 2 }
 0x34e   : > { %vm1632_vm12 = vcmp.eq.s32.totalorder %v1630_v37, 0  ;;  %v2120_v40 = vsub.s32 %v2116_v27, %v2119_v11  ;;  %v1430_v28 = vsel %vm1423_vm9, %v1426_v23, %v1429_v38  ;;  %vm1635_vm13 = vcmp.eq.s32.totalorder %v1630_v37, 2 }
 0x34f   : > { %v1634_v30 = vsel %vm1632_vm12, %v7694_v34, %v1633_v18  ;;  %v1930_v55 = vcvt.s32.f32 %v1923_v58  ;;  %v2032_v56 = vand.u32 2147483647, %v2031_v21  ;;  %vm1631_vm4 = vcmp.lt.s32.totalorder %v1630_v37, 2 }
 0x350   : > { %v1637_v15 = vsel %vm1635_vm13, %v1636_v31, %v7699_v57  ;;  %v2122_v60 = vsub.s32 0, %v2120_v40  ;;  %vm1420_vm5 = vweird.f32 %v7191_v12  ;;  %vm1628_vm0 = vweird.f32 %v7199_v63 }
 0x351   : > { %v1638_v36 = vsel %vm1631_vm4, %v1634_v30, %v1637_v15  ;;  %v10291_v29 = vand.u32 2147483647, %v7650_v13  ;;  %v10292_v44 = vcvt.s32.f32 %v7648_v5  ;;  %v2034_v7 = vcvt.s32.f32 %v2027_v59 }
 0x352   : > { %v1431_v41 = vsel %vm1420_vm5, nan, %v1430_v28  ;;  %v1639_v34 = vsel %vm1628_vm0, nan, %v1638_v36  ;;  %v1931_v17 = vmul.f32 %v1930_v55, %v1928_v48  ;;  %v5521_v58 = vmin.u32 %v2122_v60, %v2120_v40 }
 0x353   : > { %v1827_v51 = vmul.f32 %v10292_v44, %v10291_v29  ;;  %v5688_v50 = vpack.c.bf16 %v1639_v34, %v1431_v41  ;;  %v2035_v20 = vmul.f32 %v2034_v7, %v2032_v56  ;;  %vm1746_vm1 = vcmp.lt.s32.totalorder %v7348_v10, 0 }
 0x354   : > { %v2124_v16 = vclz %v5521_v58  ;;  %v1932_v27 = vxor.u32 2147483648, %v1931_v17  ;;  %vm1850_vm11 = vcmp.lt.s32.totalorder %v7363_v46, 0  ;;  %vm1954_vm7 = vcmp.lt.s32.totalorder %v7413_v32, 0 }
 0x355   : > { %5689 = vmatpush1.bf16.msra.mxu0 %v5688_v50  ;;  %v1828_v57 = vxor.u32 2147483648, %v1827_v51  ;;  %v2036_v47 = vxor.u32 2147483648, %v2035_v20  ;;  %v2112_v54 = vadd.s32 %v7712_v33, %v7724_v49  ;;  %v10293_v61 = vand.u32 2147483647, %v7348_v10 }
 0x356   : > { %v5522_v12 = vadd.s32 4294967294, %v2124_v16  ;;  %v1933_v13 = vsel %vm1850_vm11, %v1932_v27, %v1931_v17  ;;  %v10296_v3 = vand.u32 2147483647, %v7363_v46  ;;  %v10299_v4 = vand.u32 2147483647, %v7413_v32 }
 0x357   : > { %v1829_v63 = vsel %vm1746_vm1, %v1828_v57, %v1827_v51  ;;  %vm7778_vm14 = vcmp.le.f32.partialorder %v10293_v61, 0.7853982  ;;  %v2037_v22 = vsel %vm1954_vm7, %v2036_v47, %v2035_v20  ;;  %v2038_v11 = vsub.s32 4, %v7666_v45 }
 0x358   : > { %vm5523_vm10 = vcmp.lt.s32.totalorder %v5522_v12, 0  ;;  %vm7784_vm2 = vcmp.le.f32.partialorder %v10296_v3, 0.7853982  ;;  %v1832_v33 = vsel %vm7778_vm14, %v7348_v10, %v1829_v63  ;;  %vm7798_vm15 = vcmp.le.f32.partialorder %v10299_v4, 0.7853982 }
 0x359   : > { %v2127_v5 = vsel %vm5523_vm10, 0, %v5522_v12  ;;  %v1936_v8 = vsel %vm7784_vm2, %v7363_v46, %v1933_v13  ;;  %v2040_v21 = vsel %vm7798_vm15, %v7413_v32, %v2037_v22  ;;  %5996 = vcosq.f32 %v1832_v33 }
 0x35a   : > { %v2128_v24 = vsub.s32 32, %v2127_v5  ;;  %v2132_v62 = vsub.s32 4294967266, %v2127_v5  ;;  %v2129_v49 = vshll.u32 %v2120_v40, %v2127_v5  ;;  %5998 = vcosq.f32 %v1936_v8 }
 0x35b   : > { %6000 = vcosq.f32 %v2040_v21  ;;  %v1934_v18 = vsub.s32 4, %v7565_v39  ;;  %v1830_v31 = vsub.s32 4, %v7502_v52  ;;  %v2039_v40 = vsel %vm1954_vm7, %v2038_v11, %v7666_v45 }
 0x35c   : > { %v2130_v43 = vshrl.u32 %v2112_v54, %v2128_v24  ;;  %v2133_v14 = vadd.s32 127, %v2132_v62  ;;  %6002 = vsinq.f32 %v2040_v21  ;;  %v2142_v30 = vsub.s32 4, %v7751_v19 }
 0x35d   : > { %6004 = vsinq.f32 %v1936_v8  ;;  %v1935_v55 = vsel %vm1850_vm11, %v1934_v18, %v7565_v39  ;;  %v1831_v56 = vsel %vm1746_vm1, %v1830_v31, %v7502_v52  ;;  %v2041_v60 = vsel %vm7798_vm15, 0, %v2039_v40 }
 0x35e   : > { %v2131_v23 = vor.u32 %v2130_v43, %v2129_v49  ;;  %v2134_v37 = vshll.u32 %v2133_v14, 23  ;;  %6006 = vsinq.f32 %v1832_v33  ;;  %vm2058_vm6 = vcmp.lt.s32.totalorder %v7555_v42, 0 }
 0x35f   : > { %v10302_v36 = vand.u32 2147483647, %v7555_v42  ;;  %v1937_v39 = vsel %vm7784_vm2, 0, %v1935_v55  ;;  %v2143_v44 = vsel %vm2058_vm6, %v2142_v30, %v7751_v19  ;;  %v1833_v52 = vsel %vm7778_vm14, 0, %v1831_v56  ;;  %v5524_v55 = vld [vmem:[%s10106_s2 + $0x20] sm:$0xff]  ;;  %v2173_v56 = vpop.permute.xlu0 %2172 }
 0x360   : > { %v2135_v38 = vor.u32 4788187, %v2134_v37  ;;  %v2138_v59 = vcvt.s32.f32 %v2131_v23  ;;  %v2045_v34 = vadd.s32 3, %v2041_v60  ;;  %v1941_v58 = vadd.s32 3, %v1937_v39 }
 0x361   : > { %vm7823_vm8 = vcmp.le.f32.partialorder %v10302_v36, 0.7853982  ;;  %v1837_v16 = vadd.s32 3, %v1833_v52  ;;  %vm2044_vm15 = vweird.f32 %v7413_v32  ;;  %v5525_v32 = vld [vmem:[%s10106_s2 + $0x28] sm:$0xff] }
 0x362   : > { %v2136_v48 = vand.u32 2147483647, %v2135_v38  ;;  %v2145_v50 = vsel %vm7823_vm8, 0, %v2143_v44  ;;  %v2046_v12 = vand.u32 3, %v2045_v34  ;;  %v1942_v47 = vand.u32 3, %v1941_v58  ;;  %v2178_v44 = vpop.permute.xlu1 %2177 }
 0x363   : > { %v5997_v51 = vpop.eup %5996  ;;  %v2149_v27 = vadd.s32 3, %v2145_v50  ;;  %v1838_v24 = vand.u32 3, %v1837_v16 }
 0x364   : > { %v2139_v28 = vmul.f32 %v2138_v59, %v2136_v48  ;;  %v5999_v41 = vpop.eup %5998  ;;  %v1844_v61 = vxor.u32 2147483648, %v5997_v51  ;;  %vm2048_vm9 = vcmp.eq.s32.totalorder %v2046_v12, 0  ;;  %vm2051_vm12 = vcmp.eq.s32.totalorder %v2046_v12, 2 }
 0x365   : > { %v6001_v17 = vpop.eup %6000  ;;  %v1948_v54 = vxor.u32 2147483648, %v5999_v41  ;;  %v2150_v6 = vand.u32 3, %v2149_v27  ;;  %vm1944_vm13 = vcmp.eq.s32.totalorder %v1942_v47, 0  ;;  %vm1947_vm4 = vcmp.eq.s32.totalorder %v1942_v47, 2 }
 0x366   : > { %v2140_v15 = vxor.u32 2147483648, %v2139_v28  ;;  %v6003_v20 = vpop.eup %6002  ;;  %v2052_v5 = vxor.u32 2147483648, %v6001_v17  ;;  %vm1840_vm5 = vcmp.eq.s32.totalorder %v1838_v24, 0  ;;  %vm1843_vm0 = vcmp.eq.s32.totalorder %v1838_v24, 2 }
 0x367   : > { %v6005_v19 = vpop.eup %6004  ;;  %v2049_v63 = vxor.u32 2147483648, %v6003_v20  ;;  %vm2047_vm1 = vcmp.lt.s32.totalorder %v2046_v12, 2  ;;  %vm1943_vm10 = vcmp.lt.s32.totalorder %v1942_v47, 2  ;;  %vm2155_vm11 = vcmp.eq.s32.totalorder %v2150_v6, 2 }
 0x368   : > { %v2141_v29 = vsel %vm2058_vm6, %v2140_v15, %v2139_v28  ;;  %v6007_v57 = vpop.eup %6006  ;;  %v1945_v13 = vxor.u32 2147483648, %v6005_v19  ;;  %v2053_v0 = vsel %vm2051_vm12, %v2052_v5, %v6003_v20  ;;  %v1949_v49 = vsel %vm1947_vm4, %v1948_v54, %v6005_v19 }
 0x369   : > { %v2144_v7 = vsel %vm7823_vm8, %v7555_v42, %v2141_v29  ;;  %v1841_v62 = vxor.u32 2147483648, %v6007_v57  ;;  %v2050_v3 = vsel %vm2048_vm9, %v6001_v17, %v2049_v63  ;;  %v1845_v4 = vsel %vm1843_vm0, %v1844_v61, %v6007_v57 }
 0x36a   : > { %6008 = vcosq.f32 %v2144_v7  ;;  %v1946_v33 = vsel %vm1944_vm13, %v5999_v41, %v1945_v13  ;;  %v2054_v21 = vsel %vm2047_vm1, %v2050_v3, %v2053_v0  ;;  %vm2152_vm7 = vcmp.eq.s32.totalorder %v2150_v6, 0 }
 0x36b   : > { %6010 = vsinq.f32 %v2144_v7  ;;  %v1842_v8 = vsel %vm1840_vm5, %v5997_v51, %v1841_v62  ;;  %v1950_v23 = vsel %vm1943_vm10, %v1946_v33, %v1949_v49  ;;  %vm1839_vm14 = vcmp.lt.s32.totalorder %v1838_v24, 2 }
 0x36c   : > { %vm2151_vm2 = vcmp.lt.s32.totalorder %v2150_v6, 2  ;;  %v1846_v38 = vsel %vm1839_vm14, %v1842_v8, %v1845_v4  ;;  %vm1940_vm6 = vweird.f32 %v7363_v46  ;;  %vm2148_vm8 = vweird.f32 %v7555_v42  ;;  %v5527_v42 = vld [vmem:[%s10106_s2 + $0x38] sm:$0xff] }
 0x36d   : > { %v2055_v31 = vsel %vm2044_vm15, nan, %v2054_v21  ;;  %v1951_v48 = vsel %vm1940_vm6, nan, %v1950_v23  ;;  %vm1836_vm9 = vweird.f32 %v7348_v10  ;;  %v10305_v46 = vmov 0.0   ;;  %v5526_v10 = vld [vmem:[%s10106_s2 + $0x30] sm:$0xff] }
 0x36e   : > { %v1847_v28 = vsel %vm1836_vm9, nan, %v1846_v38 }
 0x36f   : > { %v5692_v30 = vpack.c.bf16 %v2055_v31, %v1847_v28 }
 0x374   : > { %v6009_v22 = vpop.eup %6008 }
 0x375   : > { %v6011_v43 = vpop.eup %6010  ;;  %v2156_v14 = vxor.u32 2147483648, %v6009_v22 }
 0x376   : > { %v2153_v2 = vxor.u32 2147483648, %v6011_v43 }
 0x377   : > { %v2157_v37 = vsel %vm2155_vm11, %v2156_v14, %v6011_v43 }
 0x378   : > { %v2154_v11 = vsel %vm2152_vm7, %v6009_v22, %v2153_v2 }
 0x379   : > { %v2158_v18 = vsel %vm2151_vm2, %v2154_v11, %v2157_v37 }
 0x37a   : > { %v2159_v59 = vsel %vm2148_vm8, nan, %v2158_v18 }
 0x37b   : > { %v5690_v40 = vpack.c.bf16 %v2159_v59, %v1951_v48 }
 0x37d   : > { %5691 = vmatprep.subr.bf16.mxu0 %v5690_v40 }
 0x37e   : > { %5693 = vmatpush1.bf16.msra.mxu0 %v5692_v30 }
 0x381   : > { %5532 = vmatmul.mubr.msk.f32.vlgmr.msra.gmra.mrb[8].mxu0 %vm10204_vm3, %v5524_v55 }
 0x382   : > { %2272 = vmatprep.mubr.f32.mxu0 %v10305_v46 }
 0x385   : > { %5533 = vmatmul.mubr.msk.f32.gmra.mrb[10].mxu0 %vm10204_vm3, %v5525_v32 }
 0x386   : > { %2278 = vmatprep.mubr.f32.mxu0 %v10305_v46 }
 0x389   : > { %5534 = vmatmul.mubr.msk.f32.gmra.mrb[12].mxu0 %vm10204_vm3, %v5526_v10 }
 0x38a   : > { %2284 = vmatprep.mubr.f32.mxu0 %v10305_v46 }
 0x38d   : > { %5535 = vmatmul.mubr.msk.f32.gmra.mrb[14].mxu0 %vm10204_vm3, %v5527_v42 }
 0x38e   : > { %4162 = vmatprep.mubr.f32.mxu0 %v10305_v46 }
 0x454   : > { %v2268_v15 = vpop.f32.mrb[8].mxu0 }
 0x455   : > { %v7861_v60 = vadd.f32 %v2268_v15, %v2173_v56  ;;  %v2270_v36 = vpop.f32.mrb[9].mxu0 }
 0x456   : > { %v7863_v45 = vadd.f32 %v2270_v36, %v2173_v56 }
 0x457   : > { %v2291_v29 = vand.u32 2147483647, %v7861_v60  ;;  %v2294_v39 = vand.u32 2139095040, %v7861_v60 }
 0x458   : > { %v2395_v51 = vand.u32 2147483647, %v7863_v45  ;;  %v2398_v52 = vand.u32 2139095040, %v7863_v45  ;;  %v2274_v7 = vpop.f32.mrb[10].mxu0 }
 0x459   : > { %v2295_v41 = vshrl.u32 %v2294_v39, 23  ;;  %v7869_v34 = vadd.f32 %v2274_v7, %v2178_v44  ;;  %v2276_v17 = vpop.f32.mrb[11].mxu0  ;;  %v2298_v58 = vand.u32 8388607, %v2291_v29 }
 0x45a   : > { %v2399_v50 = vshrl.u32 %v2398_v52, 23  ;;  %v2402_v20 = vand.u32 8388607, %v2395_v51  ;;  %v7882_v22 = vadd.f32 %v2276_v17, %v2178_v44 }
 0x45b   : > { %v5536_v16 = vadd.s32 4294967169, %v2295_v41  ;;  %v2502_v57 = vand.u32 2139095040, %v7869_v34  ;;  %v2299_v47 = vor.u32 8388608, %v2298_v58  ;;  %v10170_v8 = vand.u32 2147483647, %v7869_v34 }
 0x45c   : > { %v5540_v19 = vadd.s32 4294967169, %v2399_v50  ;;  %v7876_v27 = vpop.f32.mrb[12].mxu0  ;;  %v2403_v63 = vor.u32 8388608, %v2402_v20 }
 0x45d   : > { %v2301_v12 = vadd.s32 1, %v5536_v16  ;;  %v2503_v13 = vshrl.u32 %v2502_v57, 23  ;;  %v7878_v54 = vpop.f32.mrb[13].mxu0  ;;  %v7886_v49 = vshll.u32 %v2299_v47, 8 }
 0x45e   : > { %v2405_v5 = vadd.s32 1, %v5540_v19  ;;  %v7890_v14 = vshll.u32 %v2403_v63, 8 }
 0x45f   : > { %vm2302_vm12 = vcmp.gt.s32.totalorder %v2301_v12, 0  ;;  %v5544_v62 = vadd.s32 4294967169, %v2503_v13 }
 0x460   : > { %v2303_v24 = vsel %vm2302_vm12, %v2301_v12, 0  ;;  %vm2406_vm13 = vcmp.gt.s32.totalorder %v2405_v5, 0  ;;  %v7880_v61 = vpop.f32.mrb[14].mxu0 }
 0x461   : > { %v2304_v6 = vshrl.u32 %v2303_v24, 5  ;;  %v2305_v3 = vand.u32 31, %v2303_v24  ;;  %v2407_v0 = vsel %vm2406_vm13, %v2405_v5, 0  ;;  %v7884_v33 = vpop.f32.mrb[15].mxu0  ;;  %v7894_v23 = vadd.s32 1, %v5544_v62 }
 0x462   : > { %v7888_v43 = vshrl.u32 %v2407_v0, 5  ;;  %v2409_v21 = vand.u32 31, %v2407_v0 }
 0x463   : > { %v2306_v4 = vsub.s32 32, %v2305_v3  ;;  %v2308_v2 = vshll.u32 %v10229_v1, %v2305_v3  ;;  %v2311_v37 = vshll.u32 %v10226_v26, %v2305_v3  ;;  %v2314_v11 = vshll.u32 %v10227_v53, %v2305_v3 }
 0x464   : > { %v2317_v38 = vshll.u32 %v10221_v25, %v2305_v3  ;;  %v2320_v18 = vshll.u32 %v10273_v9, %v2305_v3  ;;  %vm2323_vm4 = vcmp.lt.s32.totalorder %v2304_v6, 1  ;;  %vm2324_vm5 = vcmp.lt.s32.totalorder %v2304_v6, 2 }
 0x465   : > { %v2309_v31 = vshrl.u32 %v10226_v26, %v2306_v4  ;;  %v2312_v48 = vshrl.u32 %v10227_v53, %v2306_v4  ;;  %v2315_v59 = vshrl.u32 %v10221_v25, %v2306_v4  ;;  %v2307_v40 = vshrl.u32 %v10229_v1, %v2306_v4 }
 0x466   : > { %v2318_v28 = vshrl.u32 %v10273_v9, %v2306_v4  ;;  %v2321_v30 = vshrl.u32 %v10274_v35, %v2306_v4  ;;  %v2410_v42 = vsub.s32 32, %v2409_v21  ;;  %vm2325_vm0 = vcmp.lt.s32.totalorder %v2304_v6, 3 }
 0x467   : > { %v2310_v55 = vor.u32 %v2309_v31, %v2308_v2  ;;  %v2313_v32 = vor.u32 %v2312_v48, %v2311_v37  ;;  %v2316_v10 = vor.u32 %v2315_v59, %v2314_v11  ;;  %vm2326_vm1 = vcmp.lt.s32.totalorder %v2304_v6, 4 }
 0x468   : > { %v2319_v56 = vor.u32 %v2318_v28, %v2317_v38  ;;  %v2322_v15 = vor.u32 %v2321_v30, %v2320_v18  ;;  %v2412_v58 = vshll.u32 %v10229_v1, %v2409_v21  ;;  %v2413_v16 = vshrl.u32 %v10226_v26, %v2410_v42 }
 0x469   : > { %v2327_v36 = vsel %vm2323_vm4, %v2307_v40, %v2310_v55  ;;  %v2328_v39 = vsel %vm2326_vm1, %v2316_v10, 2102212464  ;;  %v2331_v44 = vsel %vm2323_vm4, %v2310_v55, %v2313_v32  ;;  %v2335_v52 = vsel %vm2323_vm4, %v2313_v32, %v2316_v10 }
 0x46a   : > { %v2329_v7 = vsel %vm2325_vm0, %v2313_v32, %v2328_v39  ;;  %v2332_v41 = vsel %vm2326_vm1, %v2319_v56, 920167782  ;;  %v2336_v17 = vsel %vm2326_vm1, %v2322_v15, 1326507024  ;;  %v2415_v19 = vshll.u32 %v10226_v26, %v2409_v21 }
 0x46b   : > { %v2333_v50 = vsel %vm2325_vm0, %v2316_v10, %v2332_v41  ;;  %v2337_v20 = vsel %vm2325_vm0, %v2319_v56, %v2336_v17  ;;  %v2330_v57 = vsel %vm2324_vm5, %v2327_v36, %v2329_v7  ;;  %v2416_v63 = vshrl.u32 %v10227_v53, %v2410_v42 }
 0x46c   : > { %v2334_v12 = vsel %vm2324_vm5, %v2331_v44, %v2333_v50  ;;  %v2338_v47 = vsel %vm2324_vm5, %v2335_v52, %v2337_v20  ;;  %v2414_v3 = vor.u32 %v2413_v16, %v2412_v58  ;;  %v2418_v4 = vshll.u32 %v10227_v53, %v2409_v21 }
 0x46d   : > { %v7917_v5 = vmul.u32.u64.low %v7886_v49, %v2338_v47  ;;  %v7918_v13 = vmul.u32.u64.high %v7886_v49, %v2338_v47, %v7917_v5  ;;  %v7921_v24 = vmul.u32.u64.low %v7886_v49, %v2334_v12  ;;  %v7922_v62 = vmul.u32.u64.high %v7886_v49, %v2334_v12, %v7921_v24 }
 0x46e   : > { %v2417_v0 = vor.u32 %v2416_v63, %v2415_v19  ;;  %v2419_v2 = vshrl.u32 %v10221_v25, %v2410_v42  ;;  %v2411_v6 = vshrl.u32 %v10229_v1, %v2410_v42  ;;  %v2421_v37 = vshll.u32 %v10221_v25, %v2409_v21 }
 0x46f   : > { %v2422_v11 = vshrl.u32 %v10273_v9, %v2410_v42  ;;  %v2425_v38 = vshrl.u32 %v10274_v35, %v2410_v42  ;;  %v2346_v18 = vmul.u32 %v7886_v49, %v2330_v57  ;;  %v2424_v48 = vshll.u32 %v10273_v9, %v2409_v21 }
 0x470   : > { %v2420_v31 = vor.u32 %v2419_v2, %v2418_v4  ;;  %vm2427_vm10 = vcmp.lt.s32.totalorder %v7888_v43, 1  ;;  %vm2348_vm11 = vc.u32 %v7918_v13, %v7921_v24  ;;  %v2349_v59 = vadd.s32 1, %v7922_v62 }
 0x471   : > { %v2423_v40 = vor.u32 %v2422_v11, %v2421_v37  ;;  %vm2428_vm7 = vcmp.lt.s32.totalorder %v7888_v43, 2  ;;  %v2426_v28 = vor.u32 %v2425_v38, %v2424_v48  ;;  %vm2429_vm14 = vcmp.lt.s32.totalorder %v7888_v43, 3 }
 0x472   : > { %vm2430_vm2 = vcmp.lt.s32.totalorder %v7888_v43, 4  ;;  %v2435_v30 = vsel %vm2427_vm10, %v2414_v3, %v2417_v0  ;;  %v2350_v49 = vsel %vm2348_vm11, %v2349_v59, %v7922_v62  ;;  %v2439_v32 = vsel %vm2427_vm10, %v2417_v0, %v2420_v31 }
 0x473   : > { %v2432_v55 = vsel %vm2430_vm2, %v2420_v31, 2102212464  ;;  %v2436_v21 = vsel %vm2430_vm2, %v2423_v40, 920167782  ;;  %v2351_v10 = vadd.s32 %v2350_v49, %v2346_v18  ;;  %v2431_v42 = vsel %vm2427_vm10, %v2411_v6, %v2414_v3 }
 0x474   : > { %v2437_v56 = vsel %vm2429_vm14, %v2420_v31, %v2436_v21  ;;  %v2440_v15 = vsel %vm2430_vm2, %v2426_v28, 1326507024  ;;  %v2433_v36 = vsel %vm2429_vm14, %v2417_v0, %v2432_v55  ;;  %vm2510_vm15 = vcmp.gt.s32.totalorder %v7894_v23, 0 }
 0x475   : > { %v2438_v39 = vsel %vm2428_vm7, %v2435_v30, %v2437_v56  ;;  %v2441_v44 = vsel %vm2429_vm14, %v2423_v40, %v2440_v15  ;;  %v2352_v52 = vadd.s32 536870912, %v2351_v10  ;;  %v2506_v20 = vand.u32 8388607, %v10170_v8 }
 0x476   : > { %v2442_v7 = vsel %vm2428_vm7, %v2439_v32, %v2441_v44  ;;  %v7947_v41 = vmul.u32.u64.low %v7890_v14, %v2438_v39  ;;  %v7948_v17 = vmul.u32.u64.high %v7890_v14, %v2438_v39, %v7947_v41  ;;  %v2511_v16 = vsel %vm2510_vm15, %v7894_v23, 0 }
 0x477   : > { %v7952_v58 = vmul.u32.u64.low %v7890_v14, %v2442_v7  ;;  %v7953_v50 = vmul.u32.u64.high %v7890_v14, %v2442_v7, %v7952_v58  ;;  %v7958_v19 = vshrl.u32 %v2352_v52, 30  ;;  %v2434_v57 = vsel %vm2428_vm7, %v2431_v42, %v2433_v36 }
 0x478   : > { %v2513_v12 = vand.u32 31, %v2511_v16  ;;  %v2606_v47 = vand.u32 2139095040, %v7882_v22  ;;  %v2453_v5 = vadd.s32 1, %v7948_v17  ;;  %v2450_v3 = vmul.u32 %v7890_v14, %v2434_v57 }
 0x479   : > { %v2354_v63 = vshll.u32 %v7958_v19, 30  ;;  %vm2452_vm6 = vc.u32 %v7953_v50, %v7947_v41  ;;  %v2507_v0 = vor.u32 8388608, %v2506_v20  ;;  %v2512_v18 = vshrl.u32 %v2511_v16, 5 }
 0x47a   : > { %v2514_v62 = vsub.s32 32, %v2513_v12  ;;  %v2454_v4 = vsel %vm2452_vm6, %v2453_v5, %v7948_v17  ;;  %v2607_v43 = vshrl.u32 %v2606_v47, 23  ;;  %v2516_v6 = vshll.u32 %v10229_v1, %v2513_v12 }
 0x47b   : > { %v7968_v23 = vsub.s32 %v2351_v10, %v2354_v63  ;;  %v2455_v2 = vadd.s32 %v2454_v4, %v2450_v3  ;;  %v2519_v14 = vshll.u32 %v10226_v26, %v2513_v12  ;;  %v2522_v40 = vshll.u32 %v10227_v53, %v2513_v12 }
 0x47c   : > { %v2517_v37 = vshrl.u32 %v10226_v26, %v2514_v62  ;;  %v2520_v11 = vshrl.u32 %v10227_v53, %v2514_v62  ;;  %v2523_v31 = vshrl.u32 %v10221_v25, %v2514_v62  ;;  %v2547_v28 = vshll.u32 %v2507_v0, 8 }
 0x47d   : > { %v2357_v38 = vsub.s32 0, %v7968_v23  ;;  %v2456_v48 = vadd.s32 536870912, %v2455_v2  ;;  %v2525_v55 = vshll.u32 %v10221_v25, %v2513_v12  ;;  %v2526_v21 = vshrl.u32 %v10273_v9, %v2514_v62 }
 0x47e   : > { %v2518_v59 = vor.u32 %v2517_v37, %v2516_v6  ;;  %v2521_v49 = vor.u32 %v2520_v11, %v2519_v14  ;;  %v2524_v10 = vor.u32 %v2523_v31, %v2522_v40  ;;  %v2528_v42 = vshll.u32 %v10273_v9, %v2513_v12 }
 0x47f   : > { %v5537_v30 = vmin.u32 %v2357_v38, %v7968_v23  ;;  %v7981_v32 = vshrl.u32 %v2456_v48, 30  ;;  %v2529_v56 = vshrl.u32 %v10274_v35, %v2514_v62  ;;  %v2527_v36 = vor.u32 %v2526_v21, %v2525_v55 }
 0x480   : > { %vm2531_vm8 = vcmp.lt.s32.totalorder %v2512_v18, 1  ;;  %v5548_v39 = vadd.s32 4294967169, %v2607_v43  ;;  %vm2532_vm9 = vcmp.lt.s32.totalorder %v2512_v18, 2  ;;  %vm2534_vm12 = vcmp.lt.s32.totalorder %v2512_v18, 4 }
 0x481   : > { %v2359_v15 = vclz %v5537_v30  ;;  %v2458_v44 = vshll.u32 %v7981_v32, 30  ;;  %v2530_v52 = vor.u32 %v2529_v56, %v2528_v42  ;;  %vm2533_vm13 = vcmp.lt.s32.totalorder %v2512_v18, 3 }
 0x482   : > { %v2539_v17 = vsel %vm2531_vm8, %v2518_v59, %v2521_v49  ;;  %v2540_v58 = vsel %vm2534_vm12, %v2527_v36, 920167782  ;;  %v2536_v16 = vsel %vm2534_vm12, %v2524_v10, 2102212464  ;;  %v2543_v12 = vsel %vm2531_vm8, %v2521_v49, %v2524_v10 }
 0x483   : > { %v5538_v7 = vadd.s32 4294967294, %v2359_v15  ;;  %v7987_v20 = vsub.s32 %v2455_v2, %v2458_v44  ;;  %v2541_v57 = vsel %vm2533_vm13, %v2524_v10, %v2540_v58  ;;  %v2515_v47 = vshrl.u32 %v10229_v1, %v2514_v62  ;;  %v2183_v58 = vpop.permute.xlu0 %2182 }
 0x484   : > { %v2542_v63 = vsel %vm2532_vm9, %v2539_v17, %v2541_v57  ;;  %v2544_v5 = vsel %vm2534_vm12, %v2530_v52, 1326507024  ;;  %v2613_v43 = vadd.s32 1, %v5548_v39  ;;  %v2537_v37 = vsel %vm2533_vm13, %v2521_v49, %v2536_v16 }
 0x485   : > { %vm5539_vm4 = vcmp.lt.s32.totalorder %v5538_v7, 0  ;;  %v2461_v0 = vsub.s32 0, %v7987_v20  ;;  %v2545_v4 = vsel %vm2533_vm13, %v2527_v36, %v2544_v5  ;;  %v2535_v2 = vsel %vm2531_vm8, %v2515_v47, %v2518_v59 }
 0x486   : > { %v2362_v3 = vsel %vm5539_vm4, 0, %v5538_v7  ;;  %v2546_v11 = vsel %vm2532_vm9, %v2543_v12, %v2545_v4  ;;  %vm2614_vm5 = vcmp.gt.s32.totalorder %v2613_v43, 0  ;;  %v10169_v30 = vand.u32 2147483647, %v7882_v22 }
 0x487   : > { %v2367_v6 = vsub.s32 4294967266, %v2362_v3  ;;  %v5541_v38 = vmin.u32 %v2461_v0, %v7987_v20  ;;  %v7999_v14 = vmul.u32.u64.low %v2547_v28, %v2546_v11  ;;  %v8000_v62 = vmul.u32.u64.high %v2547_v28, %v2546_v11, %v7999_v14 }
 0x488   : > { %v8002_v31 = vmul.u32.u64.low %v2547_v28, %v2542_v63  ;;  %v8003_v48 = vmul.u32.u64.high %v2547_v28, %v2542_v63, %v8002_v31  ;;  %v2615_v55 = vsel %vm2614_vm5, %v2613_v43, 0  ;;  %v2363_v21 = vsub.s32 32, %v2362_v3 }
 0x489   : > { %v2463_v40 = vclz %v5541_v38  ;;  %v2368_v59 = vadd.s32 127, %v2367_v6  ;;  %v2538_v49 = vsel %vm2532_vm9, %v2535_v2, %v2537_v37  ;;  %v2617_v10 = vand.u32 31, %v2615_v55 }
 0x48a   : > { %vm2556_vm0 = vc.u32 %v8000_v62, %v8002_v31  ;;  %v2347_v56 = vadd.s32 %v7921_v24, %v7918_v13  ;;  %v2557_v15 = vadd.s32 1, %v8003_v48  ;;  %v2554_v36 = vmul.u32 %v2547_v28, %v2538_v49 }
 0x48b   : > { %v5542_v42 = vadd.s32 4294967294, %v2463_v40  ;;  %v2610_v39 = vand.u32 8388607, %v10169_v30  ;;  %v2369_v52 = vshll.u32 %v2368_v59, 23  ;;  %v2618_v7 = vsub.s32 32, %v2617_v10 }
 0x48c   : > { %v2365_v44 = vshrl.u32 %v2347_v56, %v2363_v21  ;;  %v2558_v18 = vsel %vm2556_vm0, %v2557_v15, %v8003_v48  ;;  %v2364_v16 = vshll.u32 %v7968_v23, %v2362_v3  ;;  %v8018_v13 = vadd.f32 %v7876_v27, %v2183_v58 }
 0x48d   : > { %vm5543_vm1 = vcmp.lt.s32.totalorder %v5542_v42, 0  ;;  %v2559_v17 = vadd.s32 %v2558_v18, %v2554_v36  ;;  %v2611_v47 = vor.u32 8388608, %v2610_v39  ;;  %v2370_v28 = vor.u32 4788187, %v2369_v52 }
 0x48e   : > { %v2466_v57 = vsel %vm5543_vm1, 0, %v5542_v42  ;;  %v2366_v24 = vor.u32 %v2365_v44, %v2364_v16  ;;  %v2621_v63 = vshrl.u32 %v10226_v26, %v2618_v7  ;;  %v2624_v5 = vshrl.u32 %v10227_v53, %v2618_v7 }
 0x48f   : > { %v2560_v12 = vadd.s32 536870912, %v2559_v17  ;;  %v2471_v0 = vsub.s32 4294967266, %v2466_v57  ;;  %v2627_v43 = vshrl.u32 %v10221_v25, %v2618_v7  ;;  %v2630_v6 = vshrl.u32 %v10273_v9, %v2618_v7 }
 0x490   : > { %v2620_v23 = vshll.u32 %v10229_v1, %v2617_v10  ;;  %v2623_v3 = vshll.u32 %v10226_v26, %v2617_v10  ;;  %v2629_v27 = vshll.u32 %v10221_v25, %v2617_v10  ;;  %v2633_v2 = vshrl.u32 %v10274_v35, %v2618_v7 }
 0x491   : > { %v8022_v4 = vshrl.u32 %v2560_v12, 30  ;;  %v2616_v11 = vshrl.u32 %v2615_v55, 5  ;;  %v2626_v38 = vshll.u32 %v10227_v53, %v2617_v10  ;;  %v8033_v14 = vadd.f32 %v7878_v54, %v2183_v58 }
 0x492   : > { %v2622_v48 = vor.u32 %v2621_v63, %v2620_v23  ;;  %v2625_v40 = vor.u32 %v2624_v5, %v2623_v3  ;;  %v2631_v21 = vor.u32 %v2630_v6, %v2629_v27  ;;  %v2632_v59 = vshll.u32 %v10273_v9, %v2617_v10 }
 0x493   : > { %v2562_v37 = vshll.u32 %v8022_v4, 30  ;;  %v2451_v49 = vadd.s32 %v7947_v41, %v7953_v50  ;;  %v2472_v42 = vadd.s32 127, %v2471_v0  ;;  %v2628_v15 = vor.u32 %v2627_v43, %v2626_v38 }
 0x494   : > { %v2371_v36 = vand.u32 2147483647, %v2370_v28  ;;  %v2373_v39 = vcvt.s32.f32 %v2366_v24  ;;  %v2634_v55 = vor.u32 %v2633_v2, %v2632_v59  ;;  %v2651_v44 = vshll.u32 %v2611_v47, 8 }
 0x495   : > { %v8038_v56 = vsub.s32 %v2559_v17, %v2562_v37  ;;  %v2467_v52 = vsub.s32 32, %v2466_v57  ;;  %vm2635_vm10 = vcmp.lt.s32.totalorder %v2616_v11, 1  ;;  %vm2638_vm11 = vcmp.lt.s32.totalorder %v2616_v11, 4 }
 0x496   : > { %v2619_v18 = vshrl.u32 %v10229_v1, %v2618_v7  ;;  %vm2637_vm7 = vcmp.lt.s32.totalorder %v2616_v11, 3  ;;  %v2643_v10 = vsel %vm2635_vm10, %v2622_v48, %v2625_v40  ;;  %v2644_v58 = vsel %vm2638_vm11, %v2631_v21, 920167782 }
 0x497   : > { %v2565_v54 = vsub.s32 0, %v8038_v56  ;;  %v2473_v41 = vshll.u32 %v2472_v42, 23  ;;  %vm2636_vm14 = vcmp.lt.s32.totalorder %v2616_v11, 2  ;;  %v2640_v50 = vsel %vm2638_vm11, %v2628_v15, 2102212464 }
 0x498   : > { %v2645_v17 = vsel %vm2637_vm7, %v2628_v15, %v2644_v58  ;;  %v2647_v47 = vsel %vm2635_vm10, %v2625_v40, %v2628_v15  ;;  %v2648_v24 = vsel %vm2638_vm11, %v2634_v55, 1326507024  ;;  %v2468_v28 = vshll.u32 %v7987_v20, %v2466_v57 }
 0x499   : > { %v5545_v16 = vmin.u32 %v2565_v54, %v8038_v56  ;;  %v2646_v12 = vsel %vm2636_vm14, %v2643_v10, %v2645_v17  ;;  %v2469_v63 = vshrl.u32 %v2451_v49, %v2467_v52  ;;  %v2639_v7 = vsel %vm2635_vm10, %v2619_v18, %v2622_v48 }
 0x49a   : > { %v2649_v5 = vsel %vm2637_vm7, %v2631_v21, %v2648_v24  ;;  %v2641_v0 = vsel %vm2637_vm7, %v2625_v40, %v2640_v50  ;;  %v8049_v6 = vmul.u32.u64.low %v2651_v44, %v2646_v12  ;;  %v8050_v23 = vmul.u32.u64.high %v2651_v44, %v2646_v12, %v8049_v6 }
 0x49b   : > { %v2650_v43 = vsel %vm2636_vm14, %v2647_v47, %v2649_v5  ;;  %v2374_v3 = vmul.f32 %v2373_v39, %v2371_v36  ;;  %v2474_v27 = vor.u32 4788187, %v2473_v41  ;;  %v2567_v38 = vclz %v5545_v16  ;;  %v8073_v16 = vpop.permute.xlu1 %2187 }
 0x49c   : > { %v8053_v2 = vmul.u32.u64.low %v2651_v44, %v2650_v43  ;;  %v8054_v37 = vmul.u32.u64.high %v2651_v44, %v2650_v43, %v8053_v2  ;;  %v2710_v59 = vand.u32 2139095040, %v8018_v13  ;;  %v2470_v20 = vor.u32 %v2469_v63, %v2468_v28 }
 0x49d   : > { %v2642_v57 = vsel %vm2636_vm14, %v2639_v7, %v2641_v0  ;;  %v2814_v48 = vand.u32 2139095040, %v8033_v14  ;;  %v2661_v40 = vadd.s32 1, %v8050_v23  ;;  %v2375_v49 = vxor.u32 2147483648, %v2374_v3 }
 0x49e   : > { %v2711_v21 = vshrl.u32 %v2710_v59, 23  ;;  %v2377_v42 = vsub.s32 4, %v7958_v19  ;;  %v2475_v15 = vand.u32 2147483647, %v2474_v27  ;;  %v10167_v36 = vand.u32 2147483647, %v8018_v13 }
 0x49f   : > { %v5546_v39 = vadd.s32 4294967294, %v2567_v38  ;;  %v2658_v55 = vmul.u32 %v2651_v44, %v2642_v57  ;;  %vm2660_vm2 = vc.u32 %v8054_v37, %v8049_v6  ;;  %v2477_v54 = vcvt.s32.f32 %v2470_v20 }
 0x4a0   : > { %v5552_v52 = vadd.s32 4294967169, %v2711_v21  ;;  %v2662_v11 = vsel %vm2660_vm2, %v2661_v40, %v8050_v23  ;;  %v2815_v18 = vshrl.u32 %v2814_v48, 23  ;;  %vm2293_vm15 = vcmp.lt.s32.totalorder %v7861_v60, 0 }
 0x4a1   : > { %v2663_v10 = vadd.s32 %v2662_v11, %v2658_v55  ;;  %v2376_v41 = vsel %vm2293_vm15, %v2375_v49, %v2374_v3  ;;  %v8067_v50 = vsel %vm2293_vm15, %v2377_v42, %v7958_v19  ;;  %v8069_v17 = vmul.f32 %v2477_v54, %v2475_v15 }
 0x4a2   : > { %v2717_v58 = vadd.s32 1, %v5552_v52  ;;  %v2714_v44 = vand.u32 8388607, %v10167_v36  ;;  %vm5547_vm6 = vcmp.lt.s32.totalorder %v5546_v39, 0  ;;  %v5556_v47 = vadd.s32 4294967169, %v2815_v18 }
 0x4a3   : > { %v2664_v12 = vadd.s32 536870912, %v2663_v10  ;;  %vm8077_vm9 = vcmp.le.f32.partialorder %v2291_v29, 0.7853982  ;;  %v8083_v19 = vadd.f32 %v7880_v61, %v8073_v16  ;;  %v8090_v7 = vadd.s32 %v8002_v31, %v8000_v62 }
 0x4a4   : > { %vm2718_vm8 = vcmp.gt.s32.totalorder %v2717_v58, 0  ;;  %v8097_v29 = vsel %vm8077_vm9, %v7861_v60, %v2376_v41  ;;  %v2479_v43 = vxor.u32 2147483648, %v8069_v17  ;;  %v8100_v61 = vsel %vm5547_vm6, 0, %v5546_v39 }
 0x4a5   : > { %v2719_v28 = vsel %vm2718_vm8, %v2717_v58, 0  ;;  %v8092_v5 = vshrl.u32 %v2664_v12, 30  ;;  %v2715_v27 = vor.u32 8388608, %v2714_v44  ;;  %v2821_v62 = vadd.s32 1, %v5556_v47 }
 0x4a6   : > { %v2721_v0 = vand.u32 31, %v2719_v28  ;;  %v2720_v31 = vshrl.u32 %v2719_v28, 5  ;;  %v10168_v11 = vand.u32 2147483647, %v8033_v14  ;;  %vm2397_vm12 = vcmp.lt.s32.totalorder %v7863_v45, 0 }
 0x4a7   : > { %v2666_v3 = vshll.u32 %v8092_v5, 30  ;;  %v2575_v18 = vsub.s32 4294967266, %v8100_v61  ;;  %v2755_v12 = vshll.u32 %v2715_v27, 8  ;;  %vm2822_vm4 = vcmp.gt.s32.totalorder %v2821_v62, 0 }
 0x4a8   : > { %v2722_v2 = vsub.s32 32, %v2721_v0  ;;  %v2724_v38 = vshll.u32 %v10229_v1, %v2721_v0  ;;  %v2727_v59 = vshll.u32 %v10226_v26, %v2721_v0  ;;  %v2730_v20 = vshll.u32 %v10227_v53, %v2721_v0 }
 0x4a9   : > { %v8107_v57 = vsub.s32 %v2663_v10, %v2666_v3  ;;  %v2733_v21 = vshll.u32 %v10221_v25, %v2721_v0  ;;  %v2736_v15 = vshll.u32 %v10273_v9, %v2721_v0  ;;  %vm2739_vm13 = vcmp.lt.s32.totalorder %v2720_v31, 1 }
 0x4aa   : > { %v2725_v48 = vshrl.u32 %v10226_v26, %v2722_v2  ;;  %v2728_v40 = vshrl.u32 %v10227_v53, %v2722_v2  ;;  %v2731_v49 = vshrl.u32 %v10221_v25, %v2722_v2  ;;  %v2734_v42 = vshrl.u32 %v10273_v9, %v2722_v2 }
 0x4ab   : > { %v2737_v39 = vshrl.u32 %v10274_v35, %v2722_v2  ;;  %v2669_v55 = vsub.s32 0, %v8107_v57  ;;  %v2723_v47 = vshrl.u32 %v10229_v1, %v2722_v2  ;;  %vm2740_vm5 = vcmp.lt.s32.totalorder %v2720_v31, 2 }
 0x4ac   : > { %v2726_v52 = vor.u32 %v2725_v48, %v2724_v38  ;;  %v2729_v54 = vor.u32 %v2728_v40, %v2727_v59  ;;  %v2732_v10 = vor.u32 %v2731_v49, %v2730_v20  ;;  %v2735_v58 = vor.u32 %v2734_v42, %v2733_v21 }
 0x4ad   : > { %v2738_v41 = vor.u32 %v2737_v39, %v2736_v15  ;;  %v5549_v44 = vmin.u32 %v2669_v55, %v8107_v57  ;;  %vm2742_vm0 = vcmp.lt.s32.totalorder %v2720_v31, 4  ;;  %vm2741_vm1 = vcmp.lt.s32.totalorder %v2720_v31, 3 }
 0x4ae   : > { %v2747_v28 = vsel %vm2739_vm13, %v2726_v52, %v2729_v54  ;;  %v2744_v3 = vsel %vm2742_vm0, %v2732_v10, 2102212464  ;;  %v2748_v38 = vsel %vm2742_vm0, %v2735_v58, 920167782  ;;  %v2743_v59 = vsel %vm2739_vm13, %v2723_v47, %v2726_v52 }
 0x4af   : > { %v2671_v0 = vclz %v5549_v44  ;;  %v2749_v48 = vsel %vm2741_vm1, %v2732_v10, %v2748_v38  ;;  %v2751_v40 = vsel %vm2739_vm13, %v2729_v54, %v2732_v10  ;;  %v2752_v20 = vsel %vm2742_vm0, %v2738_v41, 1326507024 }
 0x4b0   : > { %v2745_v49 = vsel %vm2741_vm1, %v2729_v54, %v2744_v3  ;;  %v2750_v42 = vsel %vm2740_vm5, %v2747_v28, %v2749_v48  ;;  %v2753_v15 = vsel %vm2741_vm1, %v2735_v58, %v2752_v20  ;;  %v2576_v27 = vadd.s32 127, %v2575_v18 }
 0x4b1   : > { %v5550_v21 = vadd.s32 4294967294, %v2671_v0  ;;  %v2754_v39 = vsel %vm2740_vm5, %v2751_v40, %v2753_v15  ;;  %v8124_v2 = vmul.u32.u64.low %v2755_v12, %v2750_v42  ;;  %v8125_v55 = vmul.u32.u64.high %v2755_v12, %v2750_v42, %v8124_v2 }
 0x4b2   : > { %v8128_v44 = vmul.u32.u64.low %v2755_v12, %v2754_v39  ;;  %v8129_v36 = vmul.u32.u64.high %v2755_v12, %v2754_v39, %v8128_v44  ;;  %v2823_v52 = vsel %vm2822_vm4, %v2821_v62, 0  ;;  %v2746_v54 = vsel %vm2740_vm5, %v2743_v59, %v2745_v49 }
 0x4b3   : > { %vm5551_vm10 = vcmp.lt.s32.totalorder %v5550_v21, 0  ;;  %v2818_v58 = vand.u32 8388607, %v10168_v11  ;;  %v2825_v18 = vand.u32 31, %v2823_v52  ;;  %v8140_v41 = vsel %vm2397_vm12, %v2479_v43, %v8069_v17 }
 0x4b4   : > { %v8132_v10 = vsel %vm5551_vm10, 0, %v5550_v21  ;;  %v2571_v47 = vsub.s32 32, %v8100_v61  ;;  %v2918_v0 = vand.u32 2139095040, %v8083_v19  ;;  %v2765_v3 = vadd.s32 1, %v8125_v55 }
 0x4b5   : > { %v2679_v31 = vsub.s32 4294967266, %v8132_v10  ;;  %v2826_v38 = vsub.s32 32, %v2825_v18  ;;  %v2577_v59 = vshll.u32 %v2576_v27, 23  ;;  %v2659_v48 = vadd.s32 %v8049_v6, %v8054_v37 }
 0x4b6   : > { %v2762_v17 = vmul.u32 %v2755_v12, %v2746_v54  ;;  %vm2764_vm11 = vc.u32 %v8129_v36, %v8124_v2  ;;  %v2819_v40 = vor.u32 8388608, %v2818_v58  ;;  %v2675_v49 = vsub.s32 32, %v8132_v10 }
 0x4b7   : > { %v2766_v43 = vsel %vm2764_vm11, %v2765_v3, %v8125_v55  ;;  %v2829_v20 = vshrl.u32 %v10226_v26, %v2826_v38  ;;  %v2832_v21 = vshrl.u32 %v10227_v53, %v2826_v38  ;;  %v2824_v15 = vshrl.u32 %v2823_v52, 5 }
 0x4b8   : > { %v2767_v42 = vadd.s32 %v2766_v43, %v2762_v17  ;;  %v2919_v39 = vshrl.u32 %v2918_v0, 23  ;;  %v2680_v27 = vadd.s32 127, %v2679_v31  ;;  %v2828_v44 = vshll.u32 %v10229_v1, %v2825_v18 }
 0x4b9   : > { %v2831_v6 = vshll.u32 %v10226_v26, %v2825_v18  ;;  %v2835_v37 = vshrl.u32 %v10221_v25, %v2826_v38  ;;  %v2834_v55 = vshll.u32 %v10227_v53, %v2825_v18  ;;  %v2837_v54 = vshll.u32 %v10221_v25, %v2825_v18 }
 0x4ba   : > { %v2768_v12 = vadd.s32 536870912, %v2767_v42  ;;  %v2838_v58 = vshrl.u32 %v10273_v9, %v2826_v38  ;;  %vm8165_vm7 = vcmp.le.f32.partialorder %v2395_v51, 0.7853982  ;;  %v2830_v52 = vor.u32 %v2829_v20, %v2828_v44 }
 0x4bb   : > { %v2833_v0 = vor.u32 %v2832_v21, %v2831_v6  ;;  %v2840_v31 = vshll.u32 %v10273_v9, %v2825_v18  ;;  %v2841_v17 = vshrl.u32 %v10274_v35, %v2826_v38  ;;  %v2573_v43 = vshrl.u32 %v8090_v7, %v2571_v47 }
 0x4bc   : > { %v8172_v11 = vshrl.u32 %v2768_v12, 30  ;;  %v2836_v63 = vor.u32 %v2835_v37, %v2834_v55  ;;  %v2839_v30 = vor.u32 %v2838_v58, %v2837_v54  ;;  %v2578_v8 = vor.u32 4788187, %v2577_v59 }
 0x4bd   : > { %v2842_v23 = vor.u32 %v2841_v17, %v2840_v31  ;;  %v2859_v28 = vshll.u32 %v2819_v40, 8  ;;  %v5560_v62 = vadd.s32 4294967169, %v2919_v39  ;;  %v2681_v51 = vshll.u32 %v2680_v27, 23 }
 0x4be   : > { %v2770_v46 = vshll.u32 %v8172_v11, 30  ;;  %vm2843_vm14 = vcmp.lt.s32.totalorder %v2824_v15, 1  ;;  %vm2846_vm2 = vcmp.lt.s32.totalorder %v2824_v15, 4  ;;  %vm2501_vm15 = vcmp.lt.s32.totalorder %v7869_v34, 0 }
 0x4bf   : > { %v2676_v18 = vshll.u32 %v8107_v57, %v8132_v10  ;;  %v2677_v20 = vshrl.u32 %v2659_v48, %v2675_v49  ;;  %v2851_v7 = vsel %vm2843_vm14, %v2830_v52, %v2833_v0  ;;  %v2852_v47 = vsel %vm2846_vm2, %v2839_v30, 920167782 }
 0x4c0   : > { %v8179_v21 = vsub.s32 %v2767_v42, %v2770_v46  ;;  %v2827_v59 = vshrl.u32 %v10229_v1, %v2826_v38  ;;  %vm2845_vm6 = vcmp.lt.s32.totalorder %v2824_v15, 3  ;;  %v2848_v40 = vsel %vm2846_vm2, %v2836_v63, 2102212464 }
 0x4c1   : > { %vm2844_vm8 = vcmp.lt.s32.totalorder %v2824_v15, 2  ;;  %v2853_v39 = vsel %vm2845_vm6, %v2836_v63, %v2852_v47  ;;  %v2855_v27 = vsel %vm2843_vm14, %v2833_v0, %v2836_v63  ;;  %v2856_v44 = vsel %vm2846_vm2, %v2842_v23, 1326507024 }
 0x4c2   : > { %v2682_v6 = vor.u32 4788187, %v2681_v51  ;;  %v2773_v37 = vsub.s32 0, %v8179_v21  ;;  %v2847_v57 = vsel %vm2843_vm14, %v2827_v59, %v2830_v52  ;;  %v2854_v10 = vsel %vm2844_vm8, %v2851_v7, %v2853_v39 }
 0x4c3   : > { %v2849_v48 = vsel %vm2845_vm6, %v2833_v0, %v2848_v40  ;;  %v2857_v49 = vsel %vm2845_vm6, %v2839_v30, %v2856_v44  ;;  %v8186_v46 = vmul.u32.u64.low %v2859_v28, %v2854_v10  ;;  %v8187_v42 = vmul.u32.u64.high %v2859_v28, %v2854_v10, %v8186_v46 }
 0x4c4   : > { %v2483_v38 = vsel %vm8165_vm7, %v7863_v45, %v8140_v41  ;;  %v5553_v63 = vmin.u32 %v2773_v37, %v8179_v21  ;;  %v2858_v23 = vsel %vm2844_vm8, %v2855_v27, %v2857_v49  ;;  %v2925_v12 = vadd.s32 1, %v5560_v62 }
 0x4c5   : > { %v10310_v55 = vshll.u32 %v8038_v56, %v8100_v61  ;;  %v2678_v58 = vor.u32 %v2677_v20, %v2676_v18  ;;  %v8199_v30 = vmul.u32.u64.low %v2859_v28, %v2858_v23  ;;  %v8200_v52 = vmul.u32.u64.high %v2859_v28, %v2858_v23, %v8199_v30 }
 0x4c6   : > { %v2579_v0 = vand.u32 2147483647, %v2578_v8  ;;  %v2775_v31 = vclz %v5553_v63  ;;  %v2850_v17 = vsel %vm2844_vm8, %v2847_v57, %v2849_v48  ;;  %vm2926_vm13 = vcmp.gt.s32.totalorder %v2925_v12, 0 }
 0x4c7   : > { %v2574_v54 = vor.u32 %v2573_v43, %v10310_v55  ;;  %v2683_v51 = vand.u32 2147483647, %v2682_v6  ;;  %v2869_v41 = vadd.s32 1, %v8187_v42  ;;  %v10311_v7 = vand.u32 2147483647, %v8083_v19 }
 0x4c8   : > { %v2927_v62 = vsel %vm2926_vm13, %v2925_v12, 0  ;;  %6012 = vcosq.f32 %v2483_v38  ;;  %v10312_v56 = vsub.s32 4, %v8022_v4  ;;  %v5554_v8 = vadd.s32 4294967294, %v2775_v31 }
 0x4c9   : > { %v2922_v47 = vand.u32 8388607, %v10311_v7  ;;  %v2929_v43 = vand.u32 31, %v2927_v62  ;;  %v2581_v15 = vcvt.s32.f32 %v2574_v54  ;;  %v2685_v18 = vcvt.s32.f32 %v2678_v58 }
 0x4ca   : > { %v8211_v61 = vsel %vm2501_vm15, %v10312_v56, %v8022_v4  ;;  %v2866_v20 = vmul.u32 %v2859_v28, %v2850_v17  ;;  %vm2868_vm4 = vc.u32 %v8200_v52, %v8186_v46  ;;  %6014 = vsinq.f32 %v2483_v38 }
 0x4cb   : > { %vm5555_vm5 = vcmp.lt.s32.totalorder %v5554_v8, 0  ;;  %v2870_v59 = vsel %vm2868_vm4, %v2869_v41, %v8187_v42  ;;  %v2930_v40 = vsub.s32 32, %v2929_v43  ;;  %v2582_v39 = vmul.f32 %v2581_v15, %v2579_v0 }
 0x4cc   : > { %v8216_v27 = vmul.f32 %v2685_v18, %v2683_v51  ;;  %v2871_v44 = vadd.s32 %v2870_v59, %v2866_v20  ;;  %v2923_v6 = vor.u32 8388608, %v2922_v47  ;;  %v8218_v4 = vsel %vm5555_vm5, 0, %v5554_v8 }
 0x4cd   : > { %v8220_v37 = vshrl.u32 %v2927_v62, 5  ;;  %v2938_v57 = vshll.u32 %v10227_v53, %v2929_v43  ;;  %v8225_v28 = vadd.f32 %v7884_v33, %v8073_v16  ;;  %v2933_v48 = vshrl.u32 %v10226_v26, %v2930_v40 }
 0x4ce   : > { %v2872_v10 = vadd.s32 536870912, %v2871_v44  ;;  %v2936_v49 = vshrl.u32 %v10227_v53, %v2930_v40  ;;  %v2939_v42 = vshrl.u32 %v10221_v25, %v2930_v40  ;;  %v2932_v38 = vshll.u32 %v10229_v1, %v2929_v43 }
 0x4cf   : > { %v2935_v63 = vshll.u32 %v10226_v26, %v2929_v43  ;;  %v2941_v23 = vshll.u32 %v10221_v25, %v2929_v43  ;;  %v2942_v12 = vshrl.u32 %v10273_v9, %v2930_v40  ;;  %v2583_v55 = vxor.u32 2147483648, %v2582_v39 }
 0x4d0   : > { %v2687_v54 = vxor.u32 2147483648, %v8216_v27  ;;  %v8235_v33 = vshrl.u32 %v2872_v10, 30  ;;  %v2940_v16 = vor.u32 %v2939_v42, %v2938_v57  ;;  %v2783_v58 = vsub.s32 4294967266, %v8218_v4 }
 0x4d1   : > { %v2934_v30 = vor.u32 %v2933_v48, %v2932_v38  ;;  %v2937_v0 = vor.u32 %v2936_v49, %v2935_v63  ;;  %v2943_v31 = vor.u32 %v2942_v12, %v2941_v23  ;;  %v10313_v17 = vand.u32 2147483647, %v7869_v34 }
 0x4d2   : > { %v2874_v41 = vshll.u32 %v8235_v33, 30  ;;  %v2944_v7 = vshll.u32 %v10273_v9, %v2929_v43  ;;  %v2945_v47 = vshrl.u32 %v10274_v35, %v2930_v40  ;;  %v2963_v62 = vshll.u32 %v2923_v6, 8  ;;  %v8247_v56 = vpop.eup %6012 }
 0x4d3   : > { %vm8240_vm0 = vcmp.le.f32.partialorder %v10313_v17, 0.7853982  ;;  %vm2605_vm1 = vcmp.lt.s32.totalorder %v7882_v22, 0  ;;  %v2779_v8 = vsub.s32 32, %v8218_v4  ;;  %v2931_v15 = vshrl.u32 %v10229_v1, %v2930_v40 }
 0x4d4   : > { %vm2950_vm10 = vcmp.lt.s32.totalorder %v8220_v37, 4  ;;  %v3022_v18 = vand.u32 2139095040, %v8225_v28  ;;  %v8254_v20 = vsub.s32 %v2871_v44, %v2874_v41  ;;  %v2946_v59 = vor.u32 %v2945_v47, %v2944_v7  ;;  %v8259_v6 = vpop.eup %6014 }
 0x4d5   : > { %vm2947_vm11 = vcmp.lt.s32.totalorder %v8220_v37, 1  ;;  %v2952_v43 = vsel %vm2950_vm10, %v2940_v16, 2102212464  ;;  %v2784_v57 = vadd.s32 127, %v2783_v58  ;;  %vm2949_vm14 = vcmp.lt.s32.totalorder %v8220_v37, 3 }
 0x4d6   : > { %v2955_v10 = vsel %vm2947_vm11, %v2934_v30, %v2937_v0  ;;  %v2956_v40 = vsel %vm2950_vm10, %v2943_v31, 920167782  ;;  %v10316_v48 = vand.u32 2147483647, %v7882_v22  ;;  %v2877_v49 = vsub.s32 0, %v8254_v20 }
 0x4d7   : > { %vm2948_vm6 = vcmp.lt.s32.totalorder %v8220_v37, 2  ;;  %v2957_v42 = vsel %vm2949_vm14, %v2940_v16, %v2956_v40  ;;  %v2959_v38 = vsel %vm2947_vm11, %v2937_v0, %v2940_v16  ;;  %v2951_v63 = vsel %vm2947_vm11, %v2931_v15, %v2934_v30 }
 0x4d8   : > { %vm8266_vm2 = vcmp.le.f32.partialorder %v10316_v48, 0.7853982  ;;  %v2953_v23 = vsel %vm2949_vm14, %v2937_v0, %v2952_v43  ;;  %v2958_v12 = vsel %vm2948_vm6, %v2955_v10, %v2957_v42  ;;  %v2960_v58 = vsel %vm2950_vm10, %v2946_v59, 1326507024 }
 0x4d9   : > { %v5557_v17 = vmin.u32 %v2877_v49, %v8254_v20  ;;  %v2961_v41 = vsel %vm2949_vm14, %v2943_v31, %v2960_v58  ;;  %v8277_v7 = vmul.u32.u64.low %v2963_v62, %v2958_v12  ;;  %v8278_v47 = vmul.u32.u64.high %v2963_v62, %v2958_v12, %v8277_v7 }
 0x4da   : > { %v10319_v48 = vsel %vm8077_vm9, 0, %v8067_v50  ;;  %v2584_v16 = vsel %vm2501_vm15, %v2583_v55, %v2582_v39  ;;  %v2962_v30 = vsel %vm2948_vm6, %v2959_v38, %v2961_v41  ;;  %v3023_v0 = vshrl.u32 %v3022_v18, 23 }
 0x4db   : > { %v8284_v40 = vadd.s32 3, %v10319_v48  ;;  %v2763_v15 = vadd.s32 %v8124_v2, %v8129_v36  ;;  %v2879_v31 = vclz %v5557_v17  ;;  %6016 = vcosq.f32 %v8097_v29 }
 0x4dc   : > { %v8292_v59 = vmul.u32.u64.low %v2963_v62, %v2962_v30  ;;  %v8293_v43 = vmul.u32.u64.high %v2963_v62, %v2962_v30, %v8292_v59  ;;  %v2588_v50 = vsel %vm8240_vm0, 0, %v8211_v61  ;;  %v2954_v24 = vsel %vm2948_vm6, %v2951_v63, %v2953_v23 }
 0x4dd   : > { %v5564_v39 = vadd.s32 4294967169, %v3023_v0  ;;  %v2688_v55 = vsel %vm2605_vm1, %v2687_v54, %v8216_v27  ;;  %v2781_v18 = vshrl.u32 %v2763_v15, %v2779_v8  ;;  %v2785_v36 = vshll.u32 %v2784_v57, 23 }
 0x4de   : > { %v2973_v2 = vadd.s32 1, %v8278_v47  ;;  %v2587_v10 = vsel %vm8240_vm0, %v7869_v34, %v2584_v16  ;;  %v10172_v49 = vand.u32 2147483647, %v8225_v28  ;;  %v2481_v61 = vsub.s32 4, %v7981_v32 }
 0x4df   : > { %v3029_v42 = vadd.s32 1, %v5564_v39  ;;  %v2780_v37 = vshll.u32 %v8179_v21, %v8218_v4  ;;  %v5558_v38 = vadd.s32 4294967294, %v2879_v31  ;;  %v2970_v63 = vmul.u32 %v2963_v62, %v2954_v24 }
 0x4e0   : > { %vm2972_vm9 = vc.u32 %v8293_v43, %v8277_v7  ;;  %6018 = vsinq.f32 %v8097_v29  ;;  %v2691_v27 = vsel %vm8266_vm2, %v7882_v22, %v2688_v55  ;;  %v8320_v8 = vor.u32 4788187, %v2785_v36 }
 0x4e1   : > { %v2974_v54 = vsel %vm2972_vm9, %v2973_v2, %v8278_v47  ;;  %vm3030_vm15 = vcmp.gt.s32.totalorder %v3029_v42, 0  ;;  %6020 = vcosq.f32 %v2587_v10  ;;  %v8318_v51 = vor.u32 %v2781_v18, %v2780_v37 }
 0x4e2   : > { %v2975_v57 = vadd.s32 %v2974_v54, %v2970_v63  ;;  %6022 = vsinq.f32 %v2587_v10  ;;  %v8322_v21 = vadd.s32 3, %v2588_v50  ;;  %v3026_v4 = vand.u32 8388607, %v10172_v49 }
 0x4e3   : > { %v3031_v29 = vsel %vm3030_vm15, %v3029_v42, 0  ;;  %6024 = vcosq.f32 %v2691_v27  ;;  %vm5559_vm8 = vcmp.lt.s32.totalorder %v5558_v38, 0  ;;  %v2482_v23 = vsel %vm2397_vm12, %v2481_v61, %v7981_v32 }
 0x4e4   : > { %v2976_v62 = vadd.s32 536870912, %v2975_v57  ;;  %6026 = vsinq.f32 %v2691_v27  ;;  %v8331_v12 = vadd.s32 %v8186_v46, %v8200_v52  ;;  %v3033_v58 = vand.u32 31, %v3031_v29 }
 0x4e5   : > { %v8339_v30 = vpop.eup %6016  ;;  %v8341_v0 = vsel %vm5559_vm8, 0, %v5558_v38  ;;  %v3027_v32 = vor.u32 8388608, %v3026_v4  ;;  %v2484_v46 = vsel %vm8165_vm7, 0, %v2482_v23  ;;  %v8346_v52 = vadd.s32 %v8277_v7, %v8293_v43 }
 0x4e6   : > { %v8336_v48 = vshrl.u32 %v2976_v62, 30  ;;  %v3034_v15 = vsub.s32 32, %v3033_v58  ;;  %v3036_v59 = vshll.u32 %v10229_v1, %v3033_v58  ;;  %v2689_v50 = vsub.s32 4, %v8092_v5 }
 0x4e7   : > { %v3039_v39 = vshll.u32 %v10226_v26, %v3033_v58  ;;  %v2887_v3 = vsub.s32 4294967266, %v8341_v0  ;;  %v3032_v7 = vshrl.u32 %v3031_v29, 5  ;;  %v3042_v43 = vshll.u32 %v10227_v53, %v3033_v58 }
 0x4e8   : > { %v2978_v31 = vshll.u32 %v8336_v48, 30  ;;  %v3037_v24 = vshrl.u32 %v10226_v26, %v3034_v15  ;;  %v3040_v55 = vshrl.u32 %v10227_v53, %v3034_v15  ;;  %v3043_v18 = vshrl.u32 %v10221_v25, %v3034_v15 }
 0x4e9   : > { %v2883_v10 = vsub.s32 32, %v8341_v0  ;;  %v8362_v37 = vshll.u32 %v3027_v32, 8  ;;  %v3045_v54 = vshll.u32 %v10221_v25, %v3033_v58  ;;  %v3048_v29 = vshll.u32 %v10273_v9, %v3033_v58 }
 0x4ea   : > { %v8356_v36 = vsub.s32 %v2975_v57, %v2978_v31  ;;  %v8359_v2 = vpop.eup %6018  ;;  %v3038_v42 = vor.u32 %v3037_v24, %v3036_v59  ;;  %v3041_v61 = vor.u32 %v3040_v55, %v3039_v39  ;;  %v3044_v27 = vor.u32 %v3043_v18, %v3042_v43 }
 0x4eb   : > { %v8364_v38 = vpop.eup %6020  ;;  %v3046_v57 = vshrl.u32 %v10273_v9, %v3034_v15  ;;  %v3049_v62 = vshrl.u32 %v10274_v35, %v3034_v15  ;;  %v2488_v23 = vadd.s32 3, %v2484_v46  ;;  %v2690_v32 = vsel %vm2605_vm1, %v2689_v50, %v8092_v5 }
 0x4ec   : > { %v2981_v63 = vsub.s32 0, %v8356_v36  ;;  %v8369_v4 = vpop.eup %6022  ;;  %v2888_v59 = vadd.s32 127, %v2887_v3  ;;  %vm3051_vm12 = vcmp.lt.s32.totalorder %v3032_v7, 1  ;;  %v3035_v18 = vshrl.u32 %v10229_v1, %v3034_v15 }
 0x4ed   : > { %v8376_v31 = vpop.eup %6024  ;;  %v3047_v39 = vor.u32 %v3046_v57, %v3045_v54  ;;  %v3050_v43 = vor.u32 %v3049_v62, %v3048_v29  ;;  %vm3054_vm7 = vcmp.lt.s32.totalorder %v3032_v7, 4  ;;  %v3059_v58 = vsel %vm3051_vm12, %v3038_v42, %v3041_v61 }
 0x4ee   : > { %v5561_v24 = vmin.u32 %v2981_v63, %v8356_v36  ;;  %v6027_v55 = vpop.eup %6026  ;;  %vm3053_vm13 = vcmp.lt.s32.totalorder %v3032_v7, 3  ;;  %v3056_v46 = vsel %vm3054_vm7, %v3044_v27, 2102212464  ;;  %vm3052_vm4 = vcmp.lt.s32.totalorder %v3032_v7, 2 }
 0x4ef   : > { %v3060_v47 = vsel %vm3054_vm7, %v3047_v39, 920167782  ;;  %v3063_v5 = vsel %vm3051_vm12, %v3041_v61, %v3044_v27  ;;  %v2489_v50 = vand.u32 3, %v2488_v23  ;;  %v3055_v3 = vsel %vm3051_vm12, %v3035_v18, %v3038_v42 }
 0x4f0   : > { %v2983_v49 = vclz %v5561_v24  ;;  %v3061_v41 = vsel %vm3053_vm13, %v3044_v27, %v3060_v47  ;;  %v3064_v54 = vsel %vm3054_vm7, %v3050_v43, 1326507024  ;;  %v3057_v57 = vsel %vm3053_vm13, %v3041_v61, %v3056_v46 }
 0x4f1   : > { %v3062_v63 = vsel %vm3052_vm4, %v3059_v58, %v3061_v41  ;;  %v3065_v17 = vsel %vm3053_vm13, %v3047_v39, %v3064_v54  ;;  %v2884_v62 = vshll.u32 %v8254_v20, %v8341_v0  ;;  %v2885_v42 = vshrl.u32 %v8331_v12, %v2883_v10 }
 0x4f2   : > { %v5562_v16 = vadd.s32 4294967294, %v2983_v49  ;;  %v8382_v15 = vmul.u32.u64.low %v8362_v37, %v3062_v63  ;;  %v8383_v29 = vmul.u32.u64.high %v8362_v37, %v3062_v63, %v8382_v15  ;;  %v3066_v47 = vsel %vm3052_vm4, %v3063_v5, %v3065_v17 }
 0x4f3   : > { %v2692_v49 = vsel %vm8266_vm2, 0, %v2690_v32  ;;  %v8393_v61 = vmul.u32.u64.low %v8362_v37, %v3066_v47  ;;  %v8394_v27 = vmul.u32.u64.high %v8362_v37, %v3066_v47, %v8393_v61  ;;  %vm2487_vm0 = vweird.f32 %v7863_v45 }
 0x4f4   : > { %vm5563_vm5 = vcmp.lt.s32.totalorder %v5562_v16, 0  ;;  %vm2695_vm1 = vweird.f32 %v7882_v22  ;;  %v2889_v23 = vshll.u32 %v2888_v59, 23  ;;  %v3058_v20 = vsel %vm3052_vm4, %v3055_v3, %v3057_v57 }
 0x4f5   : > { %v2986_v41 = vsel %vm5563_vm5, 0, %v5562_v16  ;;  %v2700_v0 = vxor.u32 2147483648, %v6027_v55  ;;  %v3077_v17 = vadd.s32 1, %v8383_v29  ;;  %vm2491_vm10 = vcmp.eq.s32.totalorder %v2489_v50, 0 }
 0x4f6   : > { %v2991_v24 = vsub.s32 4294967266, %v2986_v41  ;;  %vm2494_vm11 = vcmp.eq.s32.totalorder %v2489_v50, 2  ;;  %v2696_v44 = vadd.s32 3, %v2692_v49  ;;  %v10320_v16 = vxor.u32 2147483648, %v8259_v6 }
 0x4f7   : > { %v10321_v32 = vxor.u32 2147483648, %v8247_v56  ;;  %v2703_v59 = vxor.u32 2147483648, %v8376_v31  ;;  %v2886_v18 = vor.u32 %v2885_v42, %v2884_v62  ;;  %v3074_v7 = vmul.u32 %v8362_v37, %v3058_v20 }
 0x4f8   : > { %v2992_v12 = vadd.s32 127, %v2991_v24  ;;  %v2493_v10 = vsel %vm2491_vm10, %v8247_v56, %v10320_v16  ;;  %vm3076_vm14 = vc.u32 %v8394_v27, %v8382_v15  ;;  %v2697_v43 = vand.u32 3, %v2696_v44 }
 0x4f9   : > { %v2496_v39 = vsel %vm2494_vm11, %v10321_v32, %v8259_v6  ;;  %v2890_v58 = vor.u32 4788187, %v2889_v23  ;;  %v2987_v46 = vsub.s32 32, %v2986_v41  ;;  %v3078_v5 = vsel %vm3076_vm14, %v3077_v17, %v8383_v29 }
 0x4fa   : > { %vm2490_vm2 = vcmp.lt.s32.totalorder %v2489_v50, 2  ;;  %v3079_v3 = vadd.s32 %v3078_v5, %v3074_v7  ;;  %vm2699_vm6 = vcmp.eq.s32.totalorder %v2697_v43, 0  ;;  %vm2702_vm9 = vcmp.eq.s32.totalorder %v2697_v43, 2 }
 0x4fb   : > { %v2497_v63 = vsel %vm2490_vm2, %v2493_v10, %v2496_v39  ;;  %v2993_v56 = vshll.u32 %v2992_v12, 23  ;;  %vm2698_vm15 = vcmp.lt.s32.totalorder %v2697_v43, 2  ;;  %v2701_v6 = vsel %vm2699_vm6, %v8376_v31, %v2700_v0 }
 0x4fc   : > { %v2704_v54 = vsel %vm2702_vm9, %v2703_v59, %v6027_v55  ;;  %v3080_v57 = vadd.s32 536870912, %v3079_v3  ;;  %v2385_v62 = vand.u32 3, %v8284_v40  ;;  %v2388_v47 = vxor.u32 2147483648, %v8359_v2 }
 0x4fd   : > { %v2705_v37 = vsel %vm2698_vm15, %v2701_v6, %v2704_v54  ;;  %v2989_v49 = vshrl.u32 %v8346_v52, %v2987_v46  ;;  %v2498_v50 = vsel %vm2487_vm0, nan, %v2497_v63  ;;  %v2391_v42 = vxor.u32 2147483648, %v8339_v30 }
 0x4fe   : > { %v2706_v29 = vsel %vm2695_vm1, nan, %v2705_v37  ;;  %v2988_v61 = vshll.u32 %v8356_v36, %v2986_v41  ;;  %v8421_v31 = vshrl.u32 %v3080_v57, 30  ;;  %vm2387_vm8 = vcmp.eq.s32.totalorder %v2385_v62, 0 }
 0x4ff   : > { %v5694_v55 = vpack.c.bf16 %v2706_v29, %v2498_v50  ;;  %v2994_v23 = vor.u32 4788187, %v2993_v56  ;;  %v2389_v40 = vsel %vm2387_vm8, %v8339_v30, %v2388_v47  ;;  %vm2390_vm12 = vcmp.eq.s32.totalorder %v2385_v62, 2 }
 0x500   : > { %v2593_v52 = vand.u32 3, %v8322_v21  ;;  %v3082_v45 = vshll.u32 %v8421_v31, 30  ;;  %v2392_v22 = vsel %vm2390_vm12, %v2391_v42, %v8359_v2  ;;  %v2596_v24 = vxor.u32 2147483648, %v8369_v4 }
 0x501   : > { %5695 = vmatprep.subr.bf16.mxu1 %v5694_v55  ;;  %v2599_v20 = vxor.u32 2147483648, %v8364_v38  ;;  %v2891_v36 = vand.u32 2147483647, %v2890_v58  ;;  %v2990_v41 = vor.u32 %v2989_v49, %v2988_v61  ;;  %vm2386_vm7 = vcmp.lt.s32.totalorder %v2385_v62, 2 }
 0x502   : > { %vm2595_vm13 = vcmp.eq.s32.totalorder %v2593_v52, 0  ;;  %v3083_v0 = vsub.s32 %v3079_v3, %v3082_v45  ;;  %v2393_v17 = vsel %vm2386_vm7, %v2389_v40, %v2392_v22  ;;  %vm2598_vm4 = vcmp.eq.s32.totalorder %v2593_v52, 2 }
 0x503   : > { %v2597_v30 = vsel %vm2595_vm13, %v8364_v38, %v2596_v24  ;;  %v2893_v44 = vcvt.s32.f32 %v2886_v18  ;;  %v2995_v21 = vand.u32 2147483647, %v2994_v23  ;;  %vm2594_vm5 = vcmp.lt.s32.totalorder %v2593_v52, 2 }
 0x504   : > { %v2600_v12 = vsel %vm2598_vm4, %v2599_v20, %v8369_v4  ;;  %v3085_v16 = vsub.s32 0, %v3083_v0  ;;  %vm2383_vm0 = vweird.f32 %v7861_v60  ;;  %vm2591_vm1 = vweird.f32 %v7869_v34 }
 0x505   : > { %v2601_v2 = vsel %vm2594_vm5, %v2597_v30, %v2600_v12  ;;  %v10322_v10 = vand.u32 2147483647, %v8320_v8  ;;  %v10323_v32 = vcvt.s32.f32 %v8318_v51  ;;  %v2997_v59 = vcvt.s32.f32 %v2990_v41 }
 0x506   : > { %v2394_v7 = vsel %vm2383_vm0, nan, %v2393_v17  ;;  %v2602_v38 = vsel %vm2591_vm1, nan, %v2601_v2  ;;  %v2894_v43 = vmul.f32 %v2893_v44, %v2891_v36  ;;  %v5565_v18 = vmin.u32 %v3085_v16, %v3083_v0 }
 0x507   : > { %v2790_v39 = vmul.f32 %v10323_v32, %v10322_v10  ;;  %v5696_v58 = vpack.c.bf16 %v2602_v38, %v2394_v7  ;;  %v2998_v46 = vmul.f32 %v2997_v59, %v2995_v21  ;;  %vm2709_vm10 = vcmp.lt.s32.totalorder %v8018_v13, 0 }
 0x508   : > { %v3087_v5 = vclz %v5565_v18  ;;  %v2895_v3 = vxor.u32 2147483648, %v2894_v43  ;;  %vm2813_vm14 = vcmp.lt.s32.totalorder %v8033_v14, 0  ;;  %vm2917_vm2 = vcmp.lt.s32.totalorder %v8083_v19, 0 }
 0x509   : > { %5697 = vmatpush1.bf16.msra.mxu1 %v5696_v58  ;;  %v2791_v4 = vxor.u32 2147483648, %v2790_v39  ;;  %v2999_v63 = vxor.u32 2147483648, %v2998_v46  ;;  %v3075_v56 = vadd.s32 %v8382_v15, %v8394_v27  ;;  %v10324_v57 = vand.u32 2147483647, %v8018_v13 }
 0x50a   : > { %v5566_v60 = vadd.s32 4294967294, %v3087_v5  ;;  %v2896_v8 = vsel %vm2813_vm14, %v2895_v3, %v2894_v43  ;;  %v10327_v62 = vand.u32 2147483647, %v8033_v14  ;;  %v10330_v61 = vand.u32 2147483647, %v8083_v19 }
 0x50b   : > { %v2792_v34 = vsel %vm2709_vm10, %v2791_v4, %v2790_v39  ;;  %vm8448_vm6 = vcmp.le.f32.partialorder %v10324_v57, 0.7853982  ;;  %v3000_v49 = vsel %vm2917_vm2, %v2999_v63, %v2998_v46  ;;  %v3001_v45 = vsub.s32 4, %v8336_v48 }
 0x50c   : > { %vm5567_vm11 = vcmp.lt.s32.totalorder %v5566_v60, 0  ;;  %vm8454_vm9 = vcmp.le.f32.partialorder %v10327_v62, 0.7853982  ;;  %v2795_v15 = vsel %vm8448_vm6, %v8018_v13, %v2792_v34  ;;  %vm8468_vm15 = vcmp.le.f32.partialorder %v10330_v61, 0.7853982 }
 0x50d   : > { %v3090_v51 = vsel %vm5567_vm11, 0, %v5566_v60  ;;  %v2899_v42 = vsel %vm8454_vm9, %v8033_v14, %v2896_v8  ;;  %v3003_v23 = vsel %vm8468_vm15, %v8083_v19, %v3000_v49  ;;  %6028 = vcosq.f32 %v2795_v15 }
 0x50e   : > { %v3091_v6 = vsub.s32 32, %v3090_v51  ;;  %v3095_v54 = vsub.s32 4294967266, %v3090_v51  ;;  %v3092_v27 = vshll.u32 %v3083_v0, %v3090_v51  ;;  %6030 = vcosq.f32 %v2899_v42 }
 0x50f   : > { %6032 = vcosq.f32 %v3003_v23  ;;  %v2897_v24 = vsub.s32 4, %v8235_v33  ;;  %v2793_v20 = vsub.s32 4, %v8172_v11  ;;  %v3002_v0 = vsel %vm2917_vm2, %v3001_v45, %v8336_v48 }
 0x510   : > { %v3093_v50 = vshrl.u32 %v3075_v56, %v3091_v6  ;;  %v3096_v29 = vadd.s32 127, %v3095_v54  ;;  %6034 = vsinq.f32 %v3003_v23  ;;  %v3105_v30 = vsub.s32 4, %v8421_v31 }
 0x511   : > { %6036 = vsinq.f32 %v2899_v42  ;;  %v2898_v44 = vsel %vm2813_vm14, %v2897_v24, %v8235_v33  ;;  %v2794_v21 = vsel %vm2709_vm10, %v2793_v20, %v8172_v11  ;;  %v3004_v16 = vsel %vm8468_vm15, 0, %v3002_v0 }
 0x512   : > { %v3094_v40 = vor.u32 %v3093_v50, %v3092_v27  ;;  %v3097_v52 = vshll.u32 %v3096_v29, 23  ;;  %6038 = vsinq.f32 %v2795_v15  ;;  %vm3021_vm8 = vcmp.lt.s32.totalorder %v8225_v28, 0 }
 0x513   : > { %v10333_v2 = vand.u32 2147483647, %v8225_v28  ;;  %v2900_v33 = vsel %vm8454_vm9, 0, %v2898_v44  ;;  %v3106_v32 = vsel %vm3021_vm8, %v3105_v30, %v8421_v31  ;;  %v2796_v11 = vsel %vm8448_vm6, 0, %v2794_v21  ;;  %v5568_v44 = vld [vmem:[%s10106_s2 + $0x40] sm:$0xff]  ;;  %v3136_v21 = vpop.permute.xlu0 %3135 }
 0x514   : > { %v3098_v22 = vor.u32 4788187, %v3097_v52  ;;  %v3101_v41 = vcvt.s32.f32 %v3094_v40  ;;  %v3008_v38 = vadd.s32 3, %v3004_v16  ;;  %v2904_v18 = vadd.s32 3, %v2900_v33 }
 0x515   : > { %vm8493_vm12 = vcmp.le.f32.partialorder %v10333_v2, 0.7853982  ;;  %v2800_v5 = vadd.s32 3, %v2796_v11  ;;  %vm3007_vm15 = vweird.f32 %v8083_v19  ;;  %v5569_v19 = vld [vmem:[%s10106_s2 + $0x48] sm:$0xff] }
 0x516   : > { %v3099_v36 = vand.u32 2147483647, %v3098_v22  ;;  %v3108_v58 = vsel %vm8493_vm12, 0, %v3106_v32  ;;  %v3009_v60 = vand.u32 3, %v3008_v38  ;;  %v2905_v63 = vand.u32 3, %v2904_v18  ;;  %v3141_v32 = vpop.permute.xlu1 %3140 }
 0x517   : > { %v6029_v39 = vpop.eup %6028  ;;  %v3112_v3 = vadd.s32 3, %v3108_v58  ;;  %v2801_v6 = vand.u32 3, %v2800_v5 }
 0x518   : > { %v3102_v17 = vmul.f32 %v3101_v41, %v3099_v36  ;;  %v6031_v7 = vpop.eup %6030  ;;  %v2807_v57 = vxor.u32 2147483648, %v6029_v39  ;;  %vm3011_vm7 = vcmp.eq.s32.totalorder %v3009_v60, 0  ;;  %vm3014_vm13 = vcmp.eq.s32.totalorder %v3009_v60, 2 }
 0x519   : > { %v6033_v43 = vpop.eup %6032  ;;  %v2911_v56 = vxor.u32 2147483648, %v6031_v7  ;;  %v3113_v37 = vand.u32 3, %v3112_v3  ;;  %vm2907_vm4 = vcmp.eq.s32.totalorder %v2905_v63, 0  ;;  %vm2910_vm5 = vcmp.eq.s32.totalorder %v2905_v63, 2 }
 0x51a   : > { %v3103_v12 = vxor.u32 2147483648, %v3102_v17  ;;  %v6035_v46 = vpop.eup %6034  ;;  %v3015_v51 = vxor.u32 2147483648, %v6033_v43  ;;  %vm2803_vm0 = vcmp.eq.s32.totalorder %v2801_v6, 0  ;;  %vm2806_vm1 = vcmp.eq.s32.totalorder %v2801_v6, 2 }
 0x51b   : > { %v6037_v31 = vpop.eup %6036  ;;  %v3012_v34 = vxor.u32 2147483648, %v6035_v46  ;;  %vm3010_vm10 = vcmp.lt.s32.totalorder %v3009_v60, 2  ;;  %vm2906_vm11 = vcmp.lt.s32.totalorder %v2905_v63, 2  ;;  %vm3118_vm14 = vcmp.eq.s32.totalorder %v3113_v37, 2 }
 0x51c   : > { %v3104_v10 = vsel %vm3021_vm8, %v3103_v12, %v3102_v17  ;;  %v6039_v4 = vpop.eup %6038  ;;  %v2908_v8 = vxor.u32 2147483648, %v6037_v31  ;;  %v3016_v47 = vsel %vm3014_vm13, %v3015_v51, %v6035_v46  ;;  %v2912_v27 = vsel %vm2910_vm5, %v2911_v56, %v6037_v31 }
 0x51d   : > { %v3107_v59 = vsel %vm8493_vm12, %v8225_v28, %v3104_v10  ;;  %v2804_v54 = vxor.u32 2147483648, %v6039_v4  ;;  %v3013_v62 = vsel %vm3011_vm7, %v6033_v43, %v3012_v34  ;;  %v2808_v61 = vsel %vm2806_vm1, %v2807_v57, %v6039_v4 }
 0x51e   : > { %6040 = vcosq.f32 %v3107_v59  ;;  %v2909_v15 = vsel %vm2907_vm4, %v6031_v7, %v2908_v8  ;;  %v3017_v23 = vsel %vm3010_vm10, %v3013_v62, %v3016_v47  ;;  %vm3115_vm2 = vcmp.eq.s32.totalorder %v3113_v37, 0 }
 0x51f   : > { %6042 = vsinq.f32 %v3107_v59  ;;  %v2805_v42 = vsel %vm2803_vm0, %v6029_v39, %v2804_v54  ;;  %v2913_v40 = vsel %vm2906_vm11, %v2909_v15, %v2912_v27  ;;  %vm2802_vm6 = vcmp.lt.s32.totalorder %v2801_v6, 2 }
 0x520   : > { %vm3114_vm9 = vcmp.lt.s32.totalorder %v3113_v37, 2  ;;  %v2809_v22 = vsel %vm2802_vm6, %v2805_v42, %v2808_v61  ;;  %vm2903_vm8 = vweird.f32 %v8033_v14  ;;  %vm3111_vm12 = vweird.f32 %v8225_v28  ;;  %v5571_v28 = vld [vmem:[%s10106_s2 + $0x58] sm:$0xff] }
 0x521   : > { %v3018_v20 = vsel %vm3007_vm15, nan, %v3017_v23  ;;  %v2914_v36 = vsel %vm2903_vm8, nan, %v2913_v40  ;;  %vm2799_vm7 = vweird.f32 %v8018_v13  ;;  %v10336_v14 = vmov 0.0   ;;  %v5570_v13 = vld [vmem:[%s10106_s2 + $0x50] sm:$0xff] }
 0x522   : > { %v2810_v17 = vsel %vm2799_vm7, nan, %v2809_v22 }
 0x523   : > { %v5700_v30 = vpack.c.bf16 %v3018_v20, %v2810_v17 }
 0x528   : > { %v6041_v49 = vpop.eup %6040 }
 0x529   : > { %v6043_v50 = vpop.eup %6042  ;;  %v3119_v29 = vxor.u32 2147483648, %v6041_v49 }
 0x52a   : > { %v3116_v55 = vxor.u32 2147483648, %v6043_v50 }
 0x52b   : > { %v3120_v52 = vsel %vm3118_vm14, %v3119_v29, %v6043_v50 }
 0x52c   : > { %v3117_v45 = vsel %vm3115_vm2, %v6041_v49, %v3116_v55 }
 0x52d   : > { %v3121_v24 = vsel %vm3114_vm9, %v3117_v45, %v3120_v52 }
 0x52e   : > { %v3122_v41 = vsel %vm3111_vm12, nan, %v3121_v24 }
 0x52f   : > { %v5698_v0 = vpack.c.bf16 %v3122_v41, %v2914_v36 }
 0x531   : > { %5699 = vmatprep.subr.bf16.mxu1 %v5698_v0 }
 0x532   : > { %5701 = vmatpush1.bf16.msra.mxu1 %v5700_v30 }
 0x535   : > { %5576 = vmatmul.mubr.msk.f32.vlgmr.msra.gmra.mrb[8].mxu1 %vm10204_vm3, %v5568_v44 }
 0x536   : > { %3235 = vmatprep.mubr.f32.mxu1 %v10336_v14 }
 0x539   : > { %5577 = vmatmul.mubr.msk.f32.gmra.mrb[10].mxu1 %vm10204_vm3, %v5569_v19 }
 0x53a   : > { %3241 = vmatprep.mubr.f32.mxu1 %v10336_v14 }
 0x53d   : > { %5578 = vmatmul.mubr.msk.f32.gmra.mrb[12].mxu1 %vm10204_vm3, %v5570_v13 }
 0x53e   : > { %3247 = vmatprep.mubr.f32.mxu1 %v10336_v14 }
 0x541   : > { %5579 = vmatmul.mubr.msk.f32.gmra.mrb[14].mxu1 %vm10204_vm3, %v5571_v28 }
 0x542   : > { %4364 = vmatprep.mubr.f32.mxu1 %v10336_v14 }
 0x608   : > { %v3231_v12 = vpop.f32.mrb[8].mxu1 }
 0x609   : > { %v8531_v16 = vadd.f32 %v3231_v12, %v3136_v21  ;;  %v3233_v2 = vpop.f32.mrb[9].mxu1 }
 0x60a   : > { %v8533_v48 = vadd.f32 %v3233_v2, %v3136_v21 }
 0x60b   : > { %v3254_v10 = vand.u32 2147483647, %v8531_v16  ;;  %v3257_v33 = vand.u32 2139095040, %v8531_v16 }
 0x60c   : > { %v3358_v39 = vand.u32 2147483647, %v8533_v48  ;;  %v3361_v11 = vand.u32 2139095040, %v8533_v48  ;;  %v3237_v59 = vpop.f32.mrb[10].mxu1 }
 0x60d   : > { %v3258_v7 = vshrl.u32 %v3257_v33, 23  ;;  %v8539_v38 = vadd.f32 %v3237_v59, %v3141_v32  ;;  %v3239_v43 = vpop.f32.mrb[11].mxu1  ;;  %v3261_v18 = vand.u32 8388607, %v3254_v10 }
 0x60e   : > { %v3362_v58 = vshrl.u32 %v3361_v11, 23  ;;  %v3365_v46 = vand.u32 8388607, %v3358_v39  ;;  %v8552_v49 = vadd.f32 %v3239_v43, %v3141_v32 }
 0x60f   : > { %v5580_v5 = vadd.s32 4294967169, %v3258_v7  ;;  %v3465_v4 = vand.u32 2139095040, %v8539_v38  ;;  %v3262_v63 = vor.u32 8388608, %v3261_v18  ;;  %v10176_v42 = vand.u32 2147483647, %v8539_v38 }
 0x610   : > { %v5584_v31 = vadd.s32 4294967169, %v3362_v58  ;;  %v8546_v3 = vpop.f32.mrb[12].mxu1  ;;  %v3366_v34 = vor.u32 8388608, %v3365_v46 }
 0x611   : > { %v3264_v60 = vadd.s32 1, %v5580_v5  ;;  %v3466_v8 = vshrl.u32 %v3465_v4, 23  ;;  %v8548_v56 = vpop.f32.mrb[13].mxu1  ;;  %v8556_v27 = vshll.u32 %v3262_v63, 8 }
 0x612   : > { %v3368_v51 = vadd.s32 1, %v5584_v31  ;;  %v8560_v29 = vshll.u32 %v3366_v34, 8 }
 0x613   : > { %vm3265_vm13 = vcmp.gt.s32.totalorder %v3264_v60, 0  ;;  %v5588_v54 = vadd.s32 4294967169, %v3466_v8 }
 0x614   : > { %v3266_v6 = vsel %vm3265_vm13, %v3264_v60, 0  ;;  %vm3369_vm4 = vcmp.gt.s32.totalorder %v3368_v51, 0  ;;  %v8550_v57 = vpop.f32.mrb[14].mxu1 }
 0x615   : > { %v3267_v37 = vshrl.u32 %v3266_v6, 5  ;;  %v3268_v62 = vand.u32 31, %v3266_v6  ;;  %v3370_v47 = vsel %vm3369_vm4, %v3368_v51, 0  ;;  %v8554_v15 = vpop.f32.mrb[15].mxu1  ;;  %v8564_v40 = vadd.s32 1, %v5588_v54 }
 0x616   : > { %v8558_v50 = vshrl.u32 %v3370_v47, 5  ;;  %v3372_v23 = vand.u32 31, %v3370_v47 }
 0x617   : > { %v3269_v61 = vsub.s32 32, %v3268_v62  ;;  %v3271_v55 = vshll.u32 %v10229_v1, %v3268_v62  ;;  %v3274_v52 = vshll.u32 %v10226_v26, %v3268_v62  ;;  %v3277_v45 = vshll.u32 %v10227_v53, %v3268_v62 }
 0x618   : > { %v3280_v22 = vshll.u32 %v10221_v25, %v3268_v62  ;;  %v3283_v24 = vshll.u32 %v10273_v9, %v3268_v62  ;;  %vm3286_vm5 = vcmp.lt.s32.totalorder %v3267_v37, 1  ;;  %vm3287_vm0 = vcmp.lt.s32.totalorder %v3267_v37, 2 }
 0x619   : > { %v3272_v20 = vshrl.u32 %v10226_v26, %v3269_v61  ;;  %v3275_v36 = vshrl.u32 %v10227_v53, %v3269_v61  ;;  %v3278_v41 = vshrl.u32 %v10221_v25, %v3269_v61  ;;  %v3270_v0 = vshrl.u32 %v10229_v1, %v3269_v61 }
 0x61a   : > { %v3281_v17 = vshrl.u32 %v10273_v9, %v3269_v61  ;;  %v3284_v30 = vshrl.u32 %v10274_v35, %v3269_v61  ;;  %v3373_v28 = vsub.s32 32, %v3372_v23  ;;  %vm3288_vm1 = vcmp.lt.s32.totalorder %v3267_v37, 3 }
 0x61b   : > { %v3273_v44 = vor.u32 %v3272_v20, %v3271_v55  ;;  %v3276_v19 = vor.u32 %v3275_v36, %v3274_v52  ;;  %v3279_v13 = vor.u32 %v3278_v41, %v3277_v45  ;;  %vm3289_vm10 = vcmp.lt.s32.totalorder %v3267_v37, 4 }
 0x61c   : > { %v3282_v21 = vor.u32 %v3281_v17, %v3280_v22  ;;  %v3285_v12 = vor.u32 %v3284_v30, %v3283_v24  ;;  %v3375_v18 = vshll.u32 %v10229_v1, %v3372_v23  ;;  %v3376_v5 = vshrl.u32 %v10226_v26, %v3373_v28 }
 0x61d   : > { %v3290_v2 = vsel %vm3286_vm5, %v3270_v0, %v3273_v44  ;;  %v3291_v33 = vsel %vm3289_vm10, %v3279_v13, 2102212464  ;;  %v3294_v32 = vsel %vm3286_vm5, %v3273_v44, %v3276_v19  ;;  %v3298_v11 = vsel %vm3286_vm5, %v3276_v19, %v3279_v13 }
 0x61e   : > { %v3292_v59 = vsel %vm3288_vm1, %v3276_v19, %v3291_v33  ;;  %v3295_v7 = vsel %vm3289_vm10, %v3282_v21, 920167782  ;;  %v3299_v43 = vsel %vm3289_vm10, %v3285_v12, 1326507024  ;;  %v3378_v31 = vshll.u32 %v10226_v26, %v3372_v23 }
 0x61f   : > { %v3296_v58 = vsel %vm3288_vm1, %v3279_v13, %v3295_v7  ;;  %v3300_v46 = vsel %vm3288_vm1, %v3282_v21, %v3299_v43  ;;  %v3293_v4 = vsel %vm3287_vm0, %v3290_v2, %v3292_v59  ;;  %v3379_v34 = vshrl.u32 %v10227_v53, %v3373_v28 }
 0x620   : > { %v3297_v60 = vsel %vm3287_vm0, %v3294_v32, %v3296_v58  ;;  %v3301_v63 = vsel %vm3287_vm0, %v3298_v11, %v3300_v46  ;;  %v3377_v62 = vor.u32 %v3376_v5, %v3375_v18  ;;  %v3381_v61 = vshll.u32 %v10227_v53, %v3372_v23 }
 0x621   : > { %v8587_v51 = vmul.u32.u64.low %v8556_v27, %v3301_v63  ;;  %v8588_v8 = vmul.u32.u64.high %v8556_v27, %v3301_v63, %v8587_v51  ;;  %v8591_v6 = vmul.u32.u64.low %v8556_v27, %v3297_v60  ;;  %v8592_v54 = vmul.u32.u64.high %v8556_v27, %v3297_v60, %v8591_v6 }
 0x622   : > { %v3380_v47 = vor.u32 %v3379_v34, %v3378_v31  ;;  %v3382_v55 = vshrl.u32 %v10221_v25, %v3373_v28  ;;  %v3374_v37 = vshrl.u32 %v10229_v1, %v3373_v28  ;;  %v3384_v52 = vshll.u32 %v10221_v25, %v3372_v23 }
 0x623   : > { %v3385_v45 = vshrl.u32 %v10273_v9, %v3373_v28  ;;  %v3388_v22 = vshrl.u32 %v10274_v35, %v3373_v28  ;;  %v3309_v24 = vmul.u32 %v8556_v27, %v3293_v4  ;;  %v3387_v36 = vshll.u32 %v10273_v9, %v3372_v23 }
 0x624   : > { %v3383_v20 = vor.u32 %v3382_v55, %v3381_v61  ;;  %vm3390_vm11 = vcmp.lt.s32.totalorder %v8558_v50, 1  ;;  %vm3311_vm14 = vc.u32 %v8588_v8, %v8591_v6  ;;  %v3312_v41 = vadd.s32 1, %v8592_v54 }
 0x625   : > { %v3386_v0 = vor.u32 %v3385_v45, %v3384_v52  ;;  %vm3391_vm2 = vcmp.lt.s32.totalorder %v8558_v50, 2  ;;  %v3389_v17 = vor.u32 %v3388_v22, %v3387_v36  ;;  %vm3392_vm6 = vcmp.lt.s32.totalorder %v8558_v50, 3 }
 0x626   : > { %vm3393_vm9 = vcmp.lt.s32.totalorder %v8558_v50, 4  ;;  %v3398_v30 = vsel %vm3390_vm11, %v3377_v62, %v3380_v47  ;;  %v3313_v27 = vsel %vm3311_vm14, %v3312_v41, %v8592_v54  ;;  %v3402_v19 = vsel %vm3390_vm11, %v3380_v47, %v3383_v20 }
 0x627   : > { %v3395_v44 = vsel %vm3393_vm9, %v3383_v20, 2102212464  ;;  %v3399_v23 = vsel %vm3393_vm9, %v3386_v0, 920167782  ;;  %v3314_v13 = vadd.s32 %v3313_v27, %v3309_v24  ;;  %v3394_v28 = vsel %vm3390_vm11, %v3374_v37, %v3377_v62 }
 0x628   : > { %v3400_v21 = vsel %vm3392_vm6, %v3383_v20, %v3399_v23  ;;  %v3403_v12 = vsel %vm3393_vm9, %v3389_v17, 1326507024  ;;  %v3396_v2 = vsel %vm3392_vm6, %v3380_v47, %v3395_v44  ;;  %vm3473_vm15 = vcmp.gt.s32.totalorder %v8564_v40, 0 }
 0x629   : > { %v3401_v33 = vsel %vm3391_vm2, %v3398_v30, %v3400_v21  ;;  %v3404_v32 = vsel %vm3392_vm6, %v3386_v0, %v3403_v12  ;;  %v3315_v11 = vadd.s32 536870912, %v3314_v13  ;;  %v3469_v46 = vand.u32 8388607, %v10176_v42 }
 0x62a   : > { %v3405_v59 = vsel %vm3391_vm2, %v3402_v19, %v3404_v32  ;;  %v8617_v7 = vmul.u32.u64.low %v8560_v29, %v3401_v33  ;;  %v8618_v43 = vmul.u32.u64.high %v8560_v29, %v3401_v33, %v8617_v7  ;;  %v3474_v5 = vsel %vm3473_vm15, %v8564_v40, 0 }
 0x62b   : > { %v8622_v18 = vmul.u32.u64.low %v8560_v29, %v3405_v59  ;;  %v8623_v58 = vmul.u32.u64.high %v8560_v29, %v3405_v59, %v8622_v18  ;;  %v8628_v31 = vshrl.u32 %v3315_v11, 30  ;;  %v3397_v4 = vsel %vm3391_vm2, %v3394_v28, %v3396_v2 }
 0x62c   : > { %v3476_v60 = vand.u32 31, %v3474_v5  ;;  %v3569_v63 = vand.u32 2139095040, %v8552_v49  ;;  %v3416_v51 = vadd.s32 1, %v8618_v43  ;;  %v3413_v62 = vmul.u32 %v8560_v29, %v3397_v4 }
 0x62d   : > { %v3317_v34 = vshll.u32 %v8628_v31, 30  ;;  %vm3415_vm8 = vc.u32 %v8623_v58, %v8617_v7  ;;  %v3470_v47 = vor.u32 8388608, %v3469_v46  ;;  %v3475_v24 = vshrl.u32 %v3474_v5, 5 }
 0x62e   : > { %v3477_v54 = vsub.s32 32, %v3476_v60  ;;  %v3417_v61 = vsel %vm3415_vm8, %v3416_v51, %v8618_v43  ;;  %v3570_v50 = vshrl.u32 %v3569_v63, 23  ;;  %v3479_v37 = vshll.u32 %v10229_v1, %v3476_v60 }
 0x62f   : > { %v8638_v40 = vsub.s32 %v3314_v13, %v3317_v34  ;;  %v3418_v55 = vadd.s32 %v3417_v61, %v3413_v62  ;;  %v3482_v29 = vshll.u32 %v10226_v26, %v3476_v60  ;;  %v3485_v0 = vshll.u32 %v10227_v53, %v3476_v60 }
 0x630   : > { %v3480_v52 = vshrl.u32 %v10226_v26, %v3477_v54  ;;  %v3483_v45 = vshrl.u32 %v10227_v53, %v3477_v54  ;;  %v3486_v20 = vshrl.u32 %v10221_v25, %v3477_v54  ;;  %v3510_v17 = vshll.u32 %v3470_v47, 8 }
 0x631   : > { %v3320_v22 = vsub.s32 0, %v8638_v40  ;;  %v3419_v36 = vadd.s32 536870912, %v3418_v55  ;;  %v3488_v44 = vshll.u32 %v10221_v25, %v3476_v60  ;;  %v3489_v23 = vshrl.u32 %v10273_v9, %v3477_v54 }
 0x632   : > { %v3481_v41 = vor.u32 %v3480_v52, %v3479_v37  ;;  %v3484_v27 = vor.u32 %v3483_v45, %v3482_v29  ;;  %v3487_v13 = vor.u32 %v3486_v20, %v3485_v0  ;;  %v3491_v28 = vshll.u32 %v10273_v9, %v3476_v60 }
 0x633   : > { %v5581_v30 = vmin.u32 %v3320_v22, %v8638_v40  ;;  %v8651_v19 = vshrl.u32 %v3419_v36, 30  ;;  %v3492_v21 = vshrl.u32 %v10274_v35, %v3477_v54  ;;  %v3490_v2 = vor.u32 %v3489_v23, %v3488_v44 }
 0x634   : > { %vm3494_vm12 = vcmp.lt.s32.totalorder %v3475_v24, 1  ;;  %v5592_v33 = vadd.s32 4294967169, %v3570_v50  ;;  %vm3495_vm7 = vcmp.lt.s32.totalorder %v3475_v24, 2  ;;  %vm3497_vm13 = vcmp.lt.s32.totalorder %v3475_v24, 4 }
 0x635   : > { %v3322_v12 = vclz %v5581_v30  ;;  %v3421_v32 = vshll.u32 %v8651_v19, 30  ;;  %v3493_v11 = vor.u32 %v3492_v21, %v3491_v28  ;;  %vm3496_vm4 = vcmp.lt.s32.totalorder %v3475_v24, 3 }
 0x636   : > { %v3502_v43 = vsel %vm3494_vm12, %v3481_v41, %v3484_v27  ;;  %v3503_v18 = vsel %vm3497_vm13, %v3490_v2, 920167782  ;;  %v3499_v5 = vsel %vm3497_vm13, %v3487_v13, 2102212464  ;;  %v3506_v60 = vsel %vm3494_vm12, %v3484_v27, %v3487_v13 }
 0x637   : > { %v5582_v59 = vadd.s32 4294967294, %v3322_v12  ;;  %v8657_v46 = vsub.s32 %v3418_v55, %v3421_v32  ;;  %v3504_v4 = vsel %vm3496_vm4, %v3487_v13, %v3503_v18  ;;  %v3478_v63 = vshrl.u32 %v10229_v1, %v3477_v54  ;;  %v3146_v18 = vpop.permute.xlu0 %3145 }
 0x638   : > { %v3505_v34 = vsel %vm3495_vm7, %v3502_v43, %v3504_v4  ;;  %v3507_v51 = vsel %vm3497_vm13, %v3493_v11, 1326507024  ;;  %v3576_v50 = vadd.s32 1, %v5592_v33  ;;  %v3500_v52 = vsel %vm3496_vm4, %v3484_v27, %v3499_v5 }
 0x639   : > { %vm5583_vm5 = vcmp.lt.s32.totalorder %v5582_v59, 0  ;;  %v3424_v47 = vsub.s32 0, %v8657_v46  ;;  %v3508_v61 = vsel %vm3496_vm4, %v3490_v2, %v3507_v51  ;;  %v3498_v55 = vsel %vm3494_vm12, %v3478_v63, %v3481_v41 }
 0x63a   : > { %v3325_v62 = vsel %vm5583_vm5, 0, %v5582_v59  ;;  %v3509_v45 = vsel %vm3495_vm7, %v3506_v60, %v3508_v61  ;;  %vm3577_vm0 = vcmp.gt.s32.totalorder %v3576_v50, 0  ;;  %v10175_v30 = vand.u32 2147483647, %v8552_v49 }
 0x63b   : > { %v3330_v37 = vsub.s32 4294967266, %v3325_v62  ;;  %v5585_v22 = vmin.u32 %v3424_v47, %v8657_v46  ;;  %v8669_v29 = vmul.u32.u64.low %v3510_v17, %v3509_v45  ;;  %v8670_v54 = vmul.u32.u64.high %v3510_v17, %v3509_v45, %v8669_v29 }
 0x63c   : > { %v8672_v20 = vmul.u32.u64.low %v3510_v17, %v3505_v34  ;;  %v8673_v36 = vmul.u32.u64.high %v3510_v17, %v3505_v34, %v8672_v20  ;;  %v3578_v44 = vsel %vm3577_vm0, %v3576_v50, 0  ;;  %v3326_v23 = vsub.s32 32, %v3325_v62 }
 0x63d   : > { %v3426_v0 = vclz %v5585_v22  ;;  %v3331_v41 = vadd.s32 127, %v3330_v37  ;;  %v3501_v27 = vsel %vm3495_vm7, %v3498_v55, %v3500_v52  ;;  %v3580_v13 = vand.u32 31, %v3578_v44 }
 0x63e   : > { %vm3519_vm1 = vc.u32 %v8670_v54, %v8672_v20  ;;  %v3310_v21 = vadd.s32 %v8591_v6, %v8588_v8  ;;  %v3520_v12 = vadd.s32 1, %v8673_v36  ;;  %v3517_v2 = vmul.u32 %v3510_v17, %v3501_v27 }
 0x63f   : > { %v5586_v28 = vadd.s32 4294967294, %v3426_v0  ;;  %v3573_v33 = vand.u32 8388607, %v10175_v30  ;;  %v3332_v11 = vshll.u32 %v3331_v41, 23  ;;  %v3581_v59 = vsub.s32 32, %v3580_v13 }
 0x640   : > { %v3328_v32 = vshrl.u32 %v3310_v21, %v3326_v23  ;;  %v3521_v24 = vsel %vm3519_vm1, %v3520_v12, %v8673_v36  ;;  %v3327_v5 = vshll.u32 %v8638_v40, %v3325_v62  ;;  %v8688_v8 = vadd.f32 %v8546_v3, %v3146_v18 }
 0x641   : > { %vm5587_vm10 = vcmp.lt.s32.totalorder %v5586_v28, 0  ;;  %v3522_v43 = vadd.s32 %v3521_v24, %v3517_v2  ;;  %v3574_v63 = vor.u32 8388608, %v3573_v33  ;;  %v3333_v17 = vor.u32 4788187, %v3332_v11 }
 0x642   : > { %v3429_v4 = vsel %vm5587_vm10, 0, %v5586_v28  ;;  %v3329_v6 = vor.u32 %v3328_v32, %v3327_v5  ;;  %v3584_v34 = vshrl.u32 %v10226_v26, %v3581_v59  ;;  %v3587_v51 = vshrl.u32 %v10227_v53, %v3581_v59 }
 0x643   : > { %v3523_v60 = vadd.s32 536870912, %v3522_v43  ;;  %v3434_v47 = vsub.s32 4294967266, %v3429_v4  ;;  %v3590_v50 = vshrl.u32 %v10221_v25, %v3581_v59  ;;  %v3593_v37 = vshrl.u32 %v10273_v9, %v3581_v59 }
 0x644   : > { %v3583_v40 = vshll.u32 %v10229_v1, %v3580_v13  ;;  %v3586_v62 = vshll.u32 %v10226_v26, %v3580_v13  ;;  %v3592_v3 = vshll.u32 %v10221_v25, %v3580_v13  ;;  %v3596_v55 = vshrl.u32 %v10274_v35, %v3581_v59 }
 0x645   : > { %v8692_v61 = vshrl.u32 %v3523_v60, 30  ;;  %v3579_v45 = vshrl.u32 %v3578_v44, 5  ;;  %v3589_v22 = vshll.u32 %v10227_v53, %v3580_v13  ;;  %v8703_v29 = vadd.f32 %v8548_v56, %v3146_v18 }
 0x646   : > { %v3585_v36 = vor.u32 %v3584_v34, %v3583_v40  ;;  %v3588_v0 = vor.u32 %v3587_v51, %v3586_v62  ;;  %v3594_v23 = vor.u32 %v3593_v37, %v3592_v3  ;;  %v3595_v41 = vshll.u32 %v10273_v9, %v3580_v13 }
 0x647   : > { %v3525_v52 = vshll.u32 %v8692_v61, 30  ;;  %v3414_v27 = vadd.s32 %v8617_v7, %v8623_v58  ;;  %v3435_v28 = vadd.s32 127, %v3434_v47  ;;  %v3591_v12 = vor.u32 %v3590_v50, %v3589_v22 }
 0x648   : > { %v3334_v2 = vand.u32 2147483647, %v3333_v17  ;;  %v3336_v33 = vcvt.s32.f32 %v3329_v6  ;;  %v3597_v44 = vor.u32 %v3596_v55, %v3595_v41  ;;  %v3614_v32 = vshll.u32 %v3574_v63, 8 }
 0x649   : > { %v8708_v21 = vsub.s32 %v3522_v43, %v3525_v52  ;;  %v3430_v11 = vsub.s32 32, %v3429_v4  ;;  %vm3598_vm11 = vcmp.lt.s32.totalorder %v3579_v45, 1  ;;  %vm3601_vm14 = vcmp.lt.s32.totalorder %v3579_v45, 4 }
 0x64a   : > { %v3582_v24 = vshrl.u32 %v10229_v1, %v3581_v59  ;;  %vm3600_vm2 = vcmp.lt.s32.totalorder %v3579_v45, 3  ;;  %v3606_v13 = vsel %vm3598_vm11, %v3585_v36, %v3588_v0  ;;  %v3607_v18 = vsel %vm3601_vm14, %v3594_v23, 920167782 }
 0x64b   : > { %v3528_v56 = vsub.s32 0, %v8708_v21  ;;  %v3436_v7 = vshll.u32 %v3435_v28, 23  ;;  %vm3599_vm6 = vcmp.lt.s32.totalorder %v3579_v45, 2  ;;  %v3603_v58 = vsel %vm3601_vm14, %v3591_v12, 2102212464 }
 0x64c   : > { %v3608_v43 = vsel %vm3600_vm2, %v3591_v12, %v3607_v18  ;;  %v3610_v63 = vsel %vm3598_vm11, %v3588_v0, %v3591_v12  ;;  %v3611_v6 = vsel %vm3601_vm14, %v3597_v44, 1326507024  ;;  %v3431_v17 = vshll.u32 %v8657_v46, %v3429_v4 }
 0x64d   : > { %v5589_v5 = vmin.u32 %v3528_v56, %v8708_v21  ;;  %v3609_v60 = vsel %vm3599_vm6, %v3606_v13, %v3608_v43  ;;  %v3432_v34 = vshrl.u32 %v3414_v27, %v3430_v11  ;;  %v3602_v59 = vsel %vm3598_vm11, %v3582_v24, %v3585_v36 }
 0x64e   : > { %v3612_v51 = vsel %vm3600_vm2, %v3594_v23, %v3611_v6  ;;  %v3604_v47 = vsel %vm3600_vm2, %v3588_v0, %v3603_v58  ;;  %v8719_v37 = vmul.u32.u64.low %v3614_v32, %v3609_v60  ;;  %v8720_v40 = vmul.u32.u64.high %v3614_v32, %v3609_v60, %v8719_v37 }
 0x64f   : > { %v3613_v50 = vsel %vm3599_vm6, %v3610_v63, %v3612_v51  ;;  %v3337_v62 = vmul.f32 %v3336_v33, %v3334_v2  ;;  %v3437_v3 = vor.u32 4788187, %v3436_v7  ;;  %v3530_v22 = vclz %v5589_v5  ;;  %v8743_v5 = vpop.permute.xlu1 %3150 }
 0x650   : > { %v8723_v55 = vmul.u32.u64.low %v3614_v32, %v3613_v50  ;;  %v8724_v52 = vmul.u32.u64.high %v3614_v32, %v3613_v50, %v8723_v55  ;;  %v3673_v41 = vand.u32 2139095040, %v8688_v8  ;;  %v3433_v46 = vor.u32 %v3432_v34, %v3431_v17 }
 0x651   : > { %v3605_v4 = vsel %vm3599_vm6, %v3602_v59, %v3604_v47  ;;  %v3777_v36 = vand.u32 2139095040, %v8703_v29  ;;  %v3624_v0 = vadd.s32 1, %v8720_v40  ;;  %v3338_v27 = vxor.u32 2147483648, %v3337_v62 }
 0x652   : > { %v3674_v23 = vshrl.u32 %v3673_v41, 23  ;;  %v3340_v28 = vsub.s32 4, %v8628_v31  ;;  %v3438_v12 = vand.u32 2147483647, %v3437_v3  ;;  %v10173_v2 = vand.u32 2147483647, %v8688_v8 }
 0x653   : > { %v5590_v33 = vadd.s32 4294967294, %v3530_v22  ;;  %v3621_v44 = vmul.u32 %v3614_v32, %v3605_v4  ;;  %vm3623_vm9 = vc.u32 %v8724_v52, %v8719_v37  ;;  %v3440_v56 = vcvt.s32.f32 %v3433_v46 }
 0x654   : > { %v5596_v11 = vadd.s32 4294967169, %v3674_v23  ;;  %v3625_v45 = vsel %vm3623_vm9, %v3624_v0, %v8720_v40  ;;  %v3778_v24 = vshrl.u32 %v3777_v36, 23  ;;  %vm3256_vm15 = vcmp.lt.s32.totalorder %v8531_v16, 0 }
 0x655   : > { %v3626_v13 = vadd.s32 %v3625_v45, %v3621_v44  ;;  %v3339_v7 = vsel %vm3256_vm15, %v3338_v27, %v3337_v62  ;;  %v8737_v58 = vsel %vm3256_vm15, %v3340_v28, %v8628_v31  ;;  %v8739_v43 = vmul.f32 %v3440_v56, %v3438_v12 }
 0x656   : > { %v3680_v18 = vadd.s32 1, %v5596_v11  ;;  %v3677_v32 = vand.u32 8388607, %v10173_v2  ;;  %vm5591_vm8 = vcmp.lt.s32.totalorder %v5590_v33, 0  ;;  %v5600_v63 = vadd.s32 4294967169, %v3778_v24 }
 0x657   : > { %v3627_v60 = vadd.s32 536870912, %v3626_v13  ;;  %vm8747_vm7 = vcmp.le.f32.partialorder %v3254_v10, 0.7853982  ;;  %v8753_v31 = vadd.f32 %v8550_v57, %v8743_v5  ;;  %v8760_v59 = vadd.s32 %v8672_v20, %v8670_v54 }
 0x658   : > { %vm3681_vm12 = vcmp.gt.s32.totalorder %v3680_v18, 0  ;;  %v8767_v10 = vsel %vm8747_vm7, %v8531_v16, %v3339_v7  ;;  %v3442_v50 = vxor.u32 2147483648, %v8739_v43  ;;  %v8770_v57 = vsel %vm5591_vm8, 0, %v5590_v33 }
 0x659   : > { %v3682_v17 = vsel %vm3681_vm12, %v3680_v18, 0  ;;  %v8762_v51 = vshrl.u32 %v3627_v60, 30  ;;  %v3678_v3 = vor.u32 8388608, %v3677_v32  ;;  %v3784_v54 = vadd.s32 1, %v5600_v63 }
 0x65a   : > { %v3684_v47 = vand.u32 31, %v3682_v17  ;;  %v3683_v20 = vshrl.u32 %v3682_v17, 5  ;;  %v10174_v45 = vand.u32 2147483647, %v8703_v29  ;;  %vm3360_vm13 = vcmp.lt.s32.totalorder %v8533_v48, 0 }
 0x65b   : > { %v3629_v62 = vshll.u32 %v8762_v51, 30  ;;  %v3538_v24 = vsub.s32 4294967266, %v8770_v57  ;;  %v3718_v60 = vshll.u32 %v3678_v3, 8  ;;  %vm3785_vm5 = vcmp.gt.s32.totalorder %v3784_v54, 0 }
 0x65c   : > { %v3685_v55 = vsub.s32 32, %v3684_v47  ;;  %v3687_v22 = vshll.u32 %v10229_v1, %v3684_v47  ;;  %v3690_v41 = vshll.u32 %v10226_v26, %v3684_v47  ;;  %v3693_v46 = vshll.u32 %v10227_v53, %v3684_v47 }
 0x65d   : > { %v8777_v4 = vsub.s32 %v3626_v13, %v3629_v62  ;;  %v3696_v23 = vshll.u32 %v10221_v25, %v3684_v47  ;;  %v3699_v12 = vshll.u32 %v10273_v9, %v3684_v47  ;;  %vm3702_vm4 = vcmp.lt.s32.totalorder %v3683_v20, 1 }
 0x65e   : > { %v3688_v36 = vshrl.u32 %v10226_v26, %v3685_v55  ;;  %v3691_v0 = vshrl.u32 %v10227_v53, %v3685_v55  ;;  %v3694_v27 = vshrl.u32 %v10221_v25, %v3685_v55  ;;  %v3697_v28 = vshrl.u32 %v10273_v9, %v3685_v55 }
 0x65f   : > { %v3700_v33 = vshrl.u32 %v10274_v35, %v3685_v55  ;;  %v3632_v44 = vsub.s32 0, %v8777_v4  ;;  %v3686_v63 = vshrl.u32 %v10229_v1, %v3685_v55  ;;  %vm3703_vm0 = vcmp.lt.s32.totalorder %v3683_v20, 2 }
 0x660   : > { %v3689_v11 = vor.u32 %v3688_v36, %v3687_v22  ;;  %v3692_v56 = vor.u32 %v3691_v0, %v3690_v41  ;;  %v3695_v13 = vor.u32 %v3694_v27, %v3693_v46  ;;  %v3698_v18 = vor.u32 %v3697_v28, %v3696_v23 }
 0x661   : > { %v3701_v7 = vor.u32 %v3700_v33, %v3699_v12  ;;  %v5593_v32 = vmin.u32 %v3632_v44, %v8777_v4  ;;  %vm3705_vm1 = vcmp.lt.s32.totalorder %v3683_v20, 4  ;;  %vm3704_vm10 = vcmp.lt.s32.totalorder %v3683_v20, 3 }
 0x662   : > { %v3710_v17 = vsel %vm3702_vm4, %v3689_v11, %v3692_v56  ;;  %v3707_v62 = vsel %vm3705_vm1, %v3695_v13, 2102212464  ;;  %v3711_v22 = vsel %vm3705_vm1, %v3698_v18, 920167782  ;;  %v3706_v41 = vsel %vm3702_vm4, %v3686_v63, %v3689_v11 }
 0x663   : > { %v3634_v47 = vclz %v5593_v32  ;;  %v3712_v36 = vsel %vm3704_vm10, %v3695_v13, %v3711_v22  ;;  %v3714_v0 = vsel %vm3702_vm4, %v3692_v56, %v3695_v13  ;;  %v3715_v46 = vsel %vm3705_vm1, %v3701_v7, 1326507024 }
 0x664   : > { %v3708_v27 = vsel %vm3704_vm10, %v3692_v56, %v3707_v62  ;;  %v3713_v28 = vsel %vm3703_vm0, %v3710_v17, %v3712_v36  ;;  %v3716_v12 = vsel %vm3704_vm10, %v3698_v18, %v3715_v46  ;;  %v3539_v3 = vadd.s32 127, %v3538_v24 }
 0x665   : > { %v5594_v23 = vadd.s32 4294967294, %v3634_v47  ;;  %v3717_v33 = vsel %vm3703_vm0, %v3714_v0, %v3716_v12  ;;  %v8794_v55 = vmul.u32.u64.low %v3718_v60, %v3713_v28  ;;  %v8795_v44 = vmul.u32.u64.high %v3718_v60, %v3713_v28, %v8794_v55 }
 0x666   : > { %v8798_v32 = vmul.u32.u64.low %v3718_v60, %v3717_v33  ;;  %v8799_v2 = vmul.u32.u64.high %v3718_v60, %v3717_v33, %v8798_v32  ;;  %v3786_v11 = vsel %vm3785_vm5, %v3784_v54, 0  ;;  %v3709_v56 = vsel %vm3703_vm0, %v3706_v41, %v3708_v27 }
 0x667   : > { %vm5595_vm11 = vcmp.lt.s32.totalorder %v5594_v23, 0  ;;  %v3781_v18 = vand.u32 8388607, %v10174_v45  ;;  %v3788_v24 = vand.u32 31, %v3786_v11  ;;  %v8810_v7 = vsel %vm3360_vm13, %v3442_v50, %v8739_v43 }
 0x668   : > { %v8802_v13 = vsel %vm5595_vm11, 0, %v5594_v23  ;;  %v3534_v63 = vsub.s32 32, %v8770_v57  ;;  %v3881_v47 = vand.u32 2139095040, %v8753_v31  ;;  %v3728_v62 = vadd.s32 1, %v8795_v44 }
 0x669   : > { %v3642_v20 = vsub.s32 4294967266, %v8802_v13  ;;  %v3789_v22 = vsub.s32 32, %v3788_v24  ;;  %v3540_v41 = vshll.u32 %v3539_v3, 23  ;;  %v3622_v36 = vadd.s32 %v8719_v37, %v8724_v52 }
 0x66a   : > { %v3725_v43 = vmul.u32 %v3718_v60, %v3709_v56  ;;  %vm3727_vm14 = vc.u32 %v8799_v2, %v8794_v55  ;;  %v3782_v0 = vor.u32 8388608, %v3781_v18  ;;  %v3638_v27 = vsub.s32 32, %v8802_v13 }
 0x66b   : > { %v3729_v50 = vsel %vm3727_vm14, %v3728_v62, %v8795_v44  ;;  %v3792_v46 = vshrl.u32 %v10226_v26, %v3789_v22  ;;  %v3795_v23 = vshrl.u32 %v10227_v53, %v3789_v22  ;;  %v3787_v12 = vshrl.u32 %v3786_v11, 5 }
 0x66c   : > { %v3730_v28 = vadd.s32 %v3729_v50, %v3725_v43  ;;  %v3882_v33 = vshrl.u32 %v3881_v47, 23  ;;  %v3643_v3 = vadd.s32 127, %v3642_v20  ;;  %v3791_v32 = vshll.u32 %v10229_v1, %v3788_v24 }
 0x66d   : > { %v3794_v37 = vshll.u32 %v10226_v26, %v3788_v24  ;;  %v3798_v52 = vshrl.u32 %v10221_v25, %v3789_v22  ;;  %v3797_v44 = vshll.u32 %v10227_v53, %v3788_v24  ;;  %v3800_v56 = vshll.u32 %v10221_v25, %v3788_v24 }
 0x66e   : > { %v3731_v60 = vadd.s32 536870912, %v3730_v28  ;;  %v3801_v18 = vshrl.u32 %v10273_v9, %v3789_v22  ;;  %vm8835_vm2 = vcmp.le.f32.partialorder %v3358_v39, 0.7853982  ;;  %v3793_v11 = vor.u32 %v3792_v46, %v3791_v32 }
 0x66f   : > { %v3796_v47 = vor.u32 %v3795_v23, %v3794_v37  ;;  %v3803_v20 = vshll.u32 %v10273_v9, %v3788_v24  ;;  %v3804_v43 = vshrl.u32 %v10274_v35, %v3789_v22  ;;  %v3536_v50 = vshrl.u32 %v8760_v59, %v3534_v63 }
 0x670   : > { %v8842_v45 = vshrl.u32 %v3731_v60, 30  ;;  %v3799_v34 = vor.u32 %v3798_v52, %v3797_v44  ;;  %v3802_v30 = vor.u32 %v3801_v18, %v3800_v56  ;;  %v3541_v42 = vor.u32 4788187, %v3540_v41 }
 0x671   : > { %v3805_v40 = vor.u32 %v3804_v43, %v3803_v20  ;;  %v3822_v17 = vshll.u32 %v3782_v0, 8  ;;  %v5604_v54 = vadd.s32 4294967169, %v3882_v33  ;;  %v3644_v39 = vshll.u32 %v3643_v3, 23 }
 0x672   : > { %v3733_v14 = vshll.u32 %v8842_v45, 30  ;;  %vm3806_vm6 = vcmp.lt.s32.totalorder %v3787_v12, 1  ;;  %vm3809_vm9 = vcmp.lt.s32.totalorder %v3787_v12, 4  ;;  %vm3464_vm15 = vcmp.lt.s32.totalorder %v8539_v38, 0 }
 0x673   : > { %v3639_v24 = vshll.u32 %v8777_v4, %v8802_v13  ;;  %v3640_v46 = vshrl.u32 %v3622_v36, %v3638_v27  ;;  %v3814_v59 = vsel %vm3806_vm6, %v3793_v11, %v3796_v47  ;;  %v3815_v63 = vsel %vm3809_vm9, %v3802_v30, 920167782 }
 0x674   : > { %v8849_v23 = vsub.s32 %v3730_v28, %v3733_v14  ;;  %v3790_v41 = vshrl.u32 %v10229_v1, %v3789_v22  ;;  %vm3808_vm8 = vcmp.lt.s32.totalorder %v3787_v12, 3  ;;  %v3811_v0 = vsel %vm3809_vm9, %v3799_v34, 2102212464 }
 0x675   : > { %vm3807_vm12 = vcmp.lt.s32.totalorder %v3787_v12, 2  ;;  %v3816_v33 = vsel %vm3808_vm8, %v3799_v34, %v3815_v63  ;;  %v3818_v3 = vsel %vm3806_vm6, %v3796_v47, %v3799_v34  ;;  %v3819_v32 = vsel %vm3809_vm9, %v3805_v40, 1326507024 }
 0x676   : > { %v3645_v37 = vor.u32 4788187, %v3644_v39  ;;  %v3736_v52 = vsub.s32 0, %v8849_v23  ;;  %v3810_v4 = vsel %vm3806_vm6, %v3790_v41, %v3793_v11  ;;  %v3817_v13 = vsel %vm3807_vm12, %v3814_v59, %v3816_v33 }
 0x677   : > { %v3812_v36 = vsel %vm3808_vm8, %v3796_v47, %v3811_v0  ;;  %v3820_v27 = vsel %vm3808_vm8, %v3802_v30, %v3819_v32  ;;  %v8856_v14 = vmul.u32.u64.low %v3822_v17, %v3817_v13  ;;  %v8857_v28 = vmul.u32.u64.high %v3822_v17, %v3817_v13, %v8856_v14 }
 0x678   : > { %v3446_v22 = vsel %vm8835_vm2, %v8533_v48, %v8810_v7  ;;  %v5597_v34 = vmin.u32 %v3736_v52, %v8849_v23  ;;  %v3821_v40 = vsel %vm3807_vm12, %v3818_v3, %v3820_v27  ;;  %v3888_v60 = vadd.s32 1, %v5604_v54 }
 0x679   : > { %v10341_v44 = vshll.u32 %v8708_v21, %v8770_v57  ;;  %v3641_v18 = vor.u32 %v3640_v46, %v3639_v24  ;;  %v8869_v30 = vmul.u32.u64.low %v3822_v17, %v3821_v40  ;;  %v8870_v11 = vmul.u32.u64.high %v3822_v17, %v3821_v40, %v8869_v30 }
 0x67a   : > { %v3542_v47 = vand.u32 2147483647, %v3541_v42  ;;  %v3738_v20 = vclz %v5597_v34  ;;  %v3813_v43 = vsel %vm3807_vm12, %v3810_v4, %v3812_v36  ;;  %vm3889_vm4 = vcmp.gt.s32.totalorder %v3888_v60, 0 }
 0x67b   : > { %v3537_v56 = vor.u32 %v3536_v50, %v10341_v44  ;;  %v3646_v39 = vand.u32 2147483647, %v3645_v37  ;;  %v3832_v7 = vadd.s32 1, %v8857_v28  ;;  %v10342_v59 = vand.u32 2147483647, %v8753_v31 }
 0x67c   : > { %v3890_v54 = vsel %vm3889_vm4, %v3888_v60, 0  ;;  %6044 = vcosq.f32 %v3446_v22  ;;  %v10343_v21 = vsub.s32 4, %v8692_v61  ;;  %v5598_v42 = vadd.s32 4294967294, %v3738_v20 }
 0x67d   : > { %v3885_v63 = vand.u32 8388607, %v10342_v59  ;;  %v3892_v50 = vand.u32 31, %v3890_v54  ;;  %v3544_v12 = vcvt.s32.f32 %v3537_v56  ;;  %v3648_v24 = vcvt.s32.f32 %v3641_v18 }
 0x67e   : > { %v8881_v57 = vsel %vm3464_vm15, %v10343_v21, %v8692_v61  ;;  %v3829_v46 = vmul.u32 %v3822_v17, %v3813_v43  ;;  %vm3831_vm5 = vc.u32 %v8870_v11, %v8856_v14  ;;  %6046 = vsinq.f32 %v3446_v22 }
 0x67f   : > { %vm5599_vm0 = vcmp.lt.s32.totalorder %v5598_v42, 0  ;;  %v3833_v41 = vsel %vm3831_vm5, %v3832_v7, %v8857_v28  ;;  %v3893_v0 = vsub.s32 32, %v3892_v50  ;;  %v3545_v33 = vmul.f32 %v3544_v12, %v3542_v47 }
 0x680   : > { %v8886_v3 = vmul.f32 %v3648_v24, %v3646_v39  ;;  %v3834_v32 = vadd.s32 %v3833_v41, %v3829_v46  ;;  %v3886_v37 = vor.u32 8388608, %v3885_v63  ;;  %v8888_v61 = vsel %vm5599_vm0, 0, %v5598_v42 }
 0x681   : > { %v8890_v52 = vshrl.u32 %v3890_v54, 5  ;;  %v3901_v4 = vshll.u32 %v10227_v53, %v3892_v50  ;;  %v8895_v17 = vadd.f32 %v8554_v15, %v8743_v5  ;;  %v3896_v36 = vshrl.u32 %v10226_v26, %v3893_v0 }
 0x682   : > { %v3835_v13 = vadd.s32 536870912, %v3834_v32  ;;  %v3899_v27 = vshrl.u32 %v10227_v53, %v3893_v0  ;;  %v3902_v28 = vshrl.u32 %v10221_v25, %v3893_v0  ;;  %v3895_v22 = vshll.u32 %v10229_v1, %v3892_v50 }
 0x683   : > { %v3898_v34 = vshll.u32 %v10226_v26, %v3892_v50  ;;  %v3904_v40 = vshll.u32 %v10221_v25, %v3892_v50  ;;  %v3905_v60 = vshrl.u32 %v10273_v9, %v3893_v0  ;;  %v3546_v44 = vxor.u32 2147483648, %v3545_v33 }
 0x684   : > { %v3650_v56 = vxor.u32 2147483648, %v8886_v3  ;;  %v8905_v15 = vshrl.u32 %v3835_v13, 30  ;;  %v3903_v5 = vor.u32 %v3902_v28, %v3901_v4  ;;  %v3746_v18 = vsub.s32 4294967266, %v8888_v61 }
 0x685   : > { %v3897_v30 = vor.u32 %v3896_v36, %v3895_v22  ;;  %v3900_v47 = vor.u32 %v3899_v27, %v3898_v34  ;;  %v3906_v20 = vor.u32 %v3905_v60, %v3904_v40  ;;  %v10344_v43 = vand.u32 2147483647, %v8539_v38 }
 0x686   : > { %v3837_v7 = vshll.u32 %v8905_v15, 30  ;;  %v3907_v59 = vshll.u32 %v10273_v9, %v3892_v50  ;;  %v3908_v63 = vshrl.u32 %v10274_v35, %v3893_v0  ;;  %v3926_v54 = vshll.u32 %v3886_v37, 8  ;;  %v8917_v21 = vpop.eup %6044 }
 0x687   : > { %vm8910_vm1 = vcmp.le.f32.partialorder %v10344_v43, 0.7853982  ;;  %vm3568_vm10 = vcmp.lt.s32.totalorder %v8552_v49, 0  ;;  %v3742_v42 = vsub.s32 32, %v8888_v61  ;;  %v3894_v12 = vshrl.u32 %v10229_v1, %v3893_v0 }
 0x688   : > { %vm3913_vm11 = vcmp.lt.s32.totalorder %v8890_v52, 4  ;;  %v3985_v24 = vand.u32 2139095040, %v8895_v17  ;;  %v8924_v46 = vsub.s32 %v3834_v32, %v3837_v7  ;;  %v3909_v41 = vor.u32 %v3908_v63, %v3907_v59  ;;  %v8929_v37 = vpop.eup %6046 }
 0x689   : > { %vm3910_vm14 = vcmp.lt.s32.totalorder %v8890_v52, 1  ;;  %v3915_v50 = vsel %vm3913_vm11, %v3903_v5, 2102212464  ;;  %v3747_v4 = vadd.s32 127, %v3746_v18  ;;  %vm3912_vm6 = vcmp.lt.s32.totalorder %v8890_v52, 3 }
 0x68a   : > { %v3918_v13 = vsel %vm3910_vm14, %v3897_v30, %v3900_v47  ;;  %v3919_v0 = vsel %vm3913_vm11, %v3906_v20, 920167782  ;;  %v10347_v36 = vand.u32 2147483647, %v8552_v49  ;;  %v3840_v27 = vsub.s32 0, %v8924_v46 }
 0x68b   : > { %vm3911_vm8 = vcmp.lt.s32.totalorder %v8890_v52, 2  ;;  %v3920_v28 = vsel %vm3912_vm6, %v3903_v5, %v3919_v0  ;;  %v3922_v22 = vsel %vm3910_vm14, %v3900_v47, %v3903_v5  ;;  %v3914_v34 = vsel %vm3910_vm14, %v3894_v12, %v3897_v30 }
 0x68c   : > { %vm8936_vm9 = vcmp.le.f32.partialorder %v10347_v36, 0.7853982  ;;  %v3916_v40 = vsel %vm3912_vm6, %v3900_v47, %v3915_v50  ;;  %v3921_v60 = vsel %vm3911_vm8, %v3918_v13, %v3920_v28  ;;  %v3923_v18 = vsel %vm3913_vm11, %v3909_v41, 1326507024 }
 0x68d   : > { %v5601_v43 = vmin.u32 %v3840_v27, %v8924_v46  ;;  %v3924_v7 = vsel %vm3912_vm6, %v3906_v20, %v3923_v18  ;;  %v8947_v59 = vmul.u32.u64.low %v3926_v54, %v3921_v60  ;;  %v8948_v63 = vmul.u32.u64.high %v3926_v54, %v3921_v60, %v8947_v59 }
 0x68e   : > { %v10350_v36 = vsel %vm8747_vm7, 0, %v8737_v58  ;;  %v3547_v5 = vsel %vm3464_vm15, %v3546_v44, %v3545_v33  ;;  %v3925_v30 = vsel %vm3911_vm8, %v3922_v22, %v3924_v7  ;;  %v3986_v47 = vshrl.u32 %v3985_v24, 23 }
 0x68f   : > { %v8954_v0 = vadd.s32 3, %v10350_v36  ;;  %v3726_v12 = vadd.s32 %v8794_v55, %v8799_v2  ;;  %v3842_v20 = vclz %v5601_v43  ;;  %6048 = vcosq.f32 %v8767_v10 }
 0x690   : > { %v8962_v41 = vmul.u32.u64.low %v3926_v54, %v3925_v30  ;;  %v8963_v50 = vmul.u32.u64.high %v3926_v54, %v3925_v30, %v8962_v41  ;;  %v3551_v58 = vsel %vm8910_vm1, 0, %v8881_v57  ;;  %v3917_v6 = vsel %vm3911_vm8, %v3914_v34, %v3916_v40 }
 0x691   : > { %v5608_v33 = vadd.s32 4294967169, %v3986_v47  ;;  %v3651_v44 = vsel %vm3568_vm10, %v3650_v56, %v8886_v3  ;;  %v3744_v24 = vshrl.u32 %v3726_v12, %v3742_v42  ;;  %v3748_v2 = vshll.u32 %v3747_v4, 23 }
 0x692   : > { %v3936_v55 = vadd.s32 1, %v8948_v63  ;;  %v3550_v13 = vsel %vm8910_vm1, %v8539_v38, %v3547_v5  ;;  %v10178_v27 = vand.u32 2147483647, %v8895_v17  ;;  %v3444_v57 = vsub.s32 4, %v8651_v19 }
 0x693   : > { %v3992_v28 = vadd.s32 1, %v5608_v33  ;;  %v3743_v52 = vshll.u32 %v8849_v23, %v8888_v61  ;;  %v5602_v22 = vadd.s32 4294967294, %v3842_v20  ;;  %v3933_v34 = vmul.u32 %v3926_v54, %v3917_v6 }
 0x694   : > { %vm3935_vm7 = vc.u32 %v8963_v50, %v8947_v59  ;;  %6050 = vsinq.f32 %v8767_v10  ;;  %v3654_v3 = vsel %vm8936_vm9, %v8552_v49, %v3651_v44  ;;  %v8990_v42 = vor.u32 4788187, %v3748_v2 }
 0x695   : > { %v3937_v56 = vsel %vm3935_vm7, %v3936_v55, %v8948_v63  ;;  %vm3993_vm15 = vcmp.gt.s32.totalorder %v3992_v28, 0  ;;  %6052 = vcosq.f32 %v3550_v13  ;;  %v8988_v39 = vor.u32 %v3744_v24, %v3743_v52 }
 0x696   : > { %v3938_v4 = vadd.s32 %v3937_v56, %v3933_v34  ;;  %6054 = vsinq.f32 %v3550_v13  ;;  %v8992_v23 = vadd.s32 3, %v3551_v58  ;;  %v3989_v61 = vand.u32 8388607, %v10178_v27 }
 0x697   : > { %v3994_v10 = vsel %vm3993_vm15, %v3992_v28, 0  ;;  %6056 = vcosq.f32 %v3654_v3  ;;  %vm5603_vm12 = vcmp.lt.s32.totalorder %v5602_v22, 0  ;;  %v3445_v40 = vsel %vm3360_vm13, %v3444_v57, %v8651_v19 }
 0x698   : > { %v3939_v54 = vadd.s32 536870912, %v3938_v4  ;;  %6058 = vsinq.f32 %v3654_v3  ;;  %v9001_v60 = vadd.s32 %v8856_v14, %v8870_v11  ;;  %v3996_v18 = vand.u32 31, %v3994_v10 }
 0x699   : > { %v9009_v30 = vpop.eup %6048  ;;  %v9011_v47 = vsel %vm5603_vm12, 0, %v5602_v22  ;;  %v3990_v19 = vor.u32 8388608, %v3989_v61  ;;  %v3447_v14 = vsel %vm8835_vm2, 0, %v3445_v40  ;;  %v9016_v11 = vadd.s32 %v8947_v59, %v8963_v50 }
 0x69a   : > { %v9006_v36 = vshrl.u32 %v3939_v54, 30  ;;  %v3997_v12 = vsub.s32 32, %v3996_v18  ;;  %v3999_v41 = vshll.u32 %v10229_v1, %v3996_v18  ;;  %v3652_v58 = vsub.s32 4, %v8762_v51 }
 0x69b   : > { %v4002_v33 = vshll.u32 %v10226_v26, %v3996_v18  ;;  %v3850_v62 = vsub.s32 4294967266, %v9011_v47  ;;  %v3995_v59 = vshrl.u32 %v3994_v10, 5  ;;  %v4005_v50 = vshll.u32 %v10227_v53, %v3996_v18 }
 0x69c   : > { %v3941_v20 = vshll.u32 %v9006_v36, 30  ;;  %v4000_v6 = vshrl.u32 %v10226_v26, %v3997_v12  ;;  %v4003_v44 = vshrl.u32 %v10227_v53, %v3997_v12  ;;  %v4006_v24 = vshrl.u32 %v10221_v25, %v3997_v12 }
 0x69d   : > { %v3846_v13 = vsub.s32 32, %v9011_v47  ;;  %v9032_v52 = vshll.u32 %v3990_v19, 8  ;;  %v4008_v56 = vshll.u32 %v10221_v25, %v3996_v18  ;;  %v4011_v10 = vshll.u32 %v10273_v9, %v3996_v18 }
 0x69e   : > { %v9026_v2 = vsub.s32 %v3938_v4, %v3941_v20  ;;  %v9029_v55 = vpop.eup %6050  ;;  %v4001_v28 = vor.u32 %v4000_v6, %v3999_v41  ;;  %v4004_v57 = vor.u32 %v4003_v44, %v4002_v33  ;;  %v4007_v3 = vor.u32 %v4006_v24, %v4005_v50 }
 0x69f   : > { %v9034_v22 = vpop.eup %6052  ;;  %v4009_v4 = vshrl.u32 %v10273_v9, %v3997_v12  ;;  %v4012_v54 = vshrl.u32 %v10274_v35, %v3997_v12  ;;  %v3451_v40 = vadd.s32 3, %v3447_v14  ;;  %v3653_v19 = vsel %vm3568_vm10, %v3652_v58, %v8762_v51 }
 0x6a0   : > { %v3944_v34 = vsub.s32 0, %v9026_v2  ;;  %v9039_v61 = vpop.eup %6054  ;;  %v3851_v41 = vadd.s32 127, %v3850_v62  ;;  %vm4014_vm13 = vcmp.lt.s32.totalorder %v3995_v59, 1  ;;  %v3998_v24 = vshrl.u32 %v10229_v1, %v3997_v12 }
 0x6a1   : > { %v9046_v20 = vpop.eup %6056  ;;  %v4010_v33 = vor.u32 %v4009_v4, %v4008_v56  ;;  %v4013_v50 = vor.u32 %v4012_v54, %v4011_v10  ;;  %vm4017_vm2 = vcmp.lt.s32.totalorder %v3995_v59, 4  ;;  %v4022_v18 = vsel %vm4014_vm13, %v4001_v28, %v4004_v57 }
 0x6a2   : > { %v5605_v6 = vmin.u32 %v3944_v34, %v9026_v2  ;;  %v6059_v44 = vpop.eup %6058  ;;  %vm4016_vm4 = vcmp.lt.s32.totalorder %v3995_v59, 3  ;;  %v4019_v14 = vsel %vm4017_vm2, %v4007_v3, 2102212464  ;;  %vm4015_vm5 = vcmp.lt.s32.totalorder %v3995_v59, 2 }
 0x6a3   : > { %v4023_v63 = vsel %vm4017_vm2, %v4010_v33, 920167782  ;;  %v4026_v51 = vsel %vm4014_vm13, %v4004_v57, %v4007_v3  ;;  %v3452_v58 = vand.u32 3, %v3451_v40  ;;  %v4018_v62 = vsel %vm4014_vm13, %v3998_v24, %v4001_v28 }
 0x6a4   : > { %v3946_v27 = vclz %v5605_v6  ;;  %v4024_v7 = vsel %vm4016_vm4, %v4007_v3, %v4023_v63  ;;  %v4027_v56 = vsel %vm4017_vm2, %v4013_v50, 1326507024  ;;  %v4020_v4 = vsel %vm4016_vm4, %v4004_v57, %v4019_v14 }
 0x6a5   : > { %v4025_v34 = vsel %vm4015_vm5, %v4022_v18, %v4024_v7  ;;  %v4028_v43 = vsel %vm4016_vm4, %v4010_v33, %v4027_v56  ;;  %v3847_v54 = vshll.u32 %v8924_v46, %v9011_v47  ;;  %v3848_v28 = vshrl.u32 %v9001_v60, %v3846_v13 }
 0x6a6   : > { %v5606_v5 = vadd.s32 4294967294, %v3946_v27  ;;  %v9052_v12 = vmul.u32.u64.low %v9032_v52, %v4025_v34  ;;  %v9053_v10 = vmul.u32.u64.high %v9032_v52, %v4025_v34, %v9052_v12  ;;  %v4029_v63 = vsel %vm4015_vm5, %v4026_v51, %v4028_v43 }
 0x6a7   : > { %v3655_v27 = vsel %vm8936_vm9, 0, %v3653_v19  ;;  %v9063_v57 = vmul.u32.u64.low %v9032_v52, %v4029_v63  ;;  %v9064_v3 = vmul.u32.u64.high %v9032_v52, %v4029_v63, %v9063_v57  ;;  %vm3450_vm1 = vweird.f32 %v8533_v48 }
 0x6a8   : > { %vm5607_vm0 = vcmp.lt.s32.totalorder %v5606_v5, 0  ;;  %vm3658_vm10 = vweird.f32 %v8552_v49  ;;  %v3852_v40 = vshll.u32 %v3851_v41, 23  ;;  %v4021_v46 = vsel %vm4015_vm5, %v4018_v62, %v4020_v4 }
 0x6a9   : > { %v3949_v7 = vsel %vm5607_vm0, 0, %v5606_v5  ;;  %v3663_v47 = vxor.u32 2147483648, %v6059_v44  ;;  %v4040_v43 = vadd.s32 1, %v9053_v10  ;;  %vm3454_vm11 = vcmp.eq.s32.totalorder %v3452_v58, 0 }
 0x6aa   : > { %v3954_v6 = vsub.s32 4294967266, %v3949_v7  ;;  %vm3457_vm14 = vcmp.eq.s32.totalorder %v3452_v58, 2  ;;  %v3659_v32 = vadd.s32 3, %v3655_v27  ;;  %v10351_v5 = vxor.u32 2147483648, %v8929_v37 }
 0x6ab   : > { %v10352_v19 = vxor.u32 2147483648, %v8917_v21  ;;  %v3666_v41 = vxor.u32 2147483648, %v9046_v20  ;;  %v3849_v24 = vor.u32 %v3848_v28, %v3847_v54  ;;  %v4037_v59 = vmul.u32 %v9032_v52, %v4021_v46 }
 0x6ac   : > { %v3955_v60 = vadd.s32 127, %v3954_v6  ;;  %v3456_v13 = vsel %vm3454_vm11, %v8917_v21, %v10351_v5  ;;  %vm4039_vm6 = vc.u32 %v9064_v3, %v9052_v12  ;;  %v3660_v50 = vand.u32 3, %v3659_v32 }
 0x6ad   : > { %v3459_v33 = vsel %vm3457_vm14, %v10352_v19, %v8929_v37  ;;  %v3853_v18 = vor.u32 4788187, %v3852_v40  ;;  %v3950_v14 = vsub.s32 32, %v3949_v7  ;;  %v4041_v51 = vsel %vm4039_vm6, %v4040_v43, %v9053_v10 }
 0x6ae   : > { %vm3453_vm9 = vcmp.lt.s32.totalorder %v3452_v58, 2  ;;  %v4042_v62 = vadd.s32 %v4041_v51, %v4037_v59  ;;  %vm3662_vm8 = vcmp.eq.s32.totalorder %v3660_v50, 0  ;;  %vm3665_vm7 = vcmp.eq.s32.totalorder %v3660_v50, 2 }
 0x6af   : > { %v3460_v34 = vsel %vm3453_vm9, %v3456_v13, %v3459_v33  ;;  %v3956_v21 = vshll.u32 %v3955_v60, 23  ;;  %vm3661_vm15 = vcmp.lt.s32.totalorder %v3660_v50, 2  ;;  %v3664_v37 = vsel %vm3662_vm8, %v9046_v20, %v3663_v47 }
 0x6b0   : > { %v3667_v56 = vsel %vm3665_vm7, %v3666_v41, %v6059_v44  ;;  %v4043_v4 = vadd.s32 536870912, %v4042_v62  ;;  %v3348_v54 = vand.u32 3, %v8954_v0  ;;  %v3351_v63 = vxor.u32 2147483648, %v9029_v55 }
 0x6b1   : > { %v3668_v52 = vsel %vm3661_vm15, %v3664_v37, %v3667_v56  ;;  %v3952_v27 = vshrl.u32 %v9016_v11, %v3950_v14  ;;  %v3461_v58 = vsel %vm3450_vm1, nan, %v3460_v34  ;;  %v3354_v28 = vxor.u32 2147483648, %v9009_v30 }
 0x6b2   : > { %v3669_v10 = vsel %vm3658_vm10, nan, %v3668_v52  ;;  %v3951_v57 = vshll.u32 %v9026_v2, %v3949_v7  ;;  %v9091_v20 = vshrl.u32 %v4043_v4, 30  ;;  %vm3350_vm12 = vcmp.eq.s32.totalorder %v3348_v54, 0 }
 0x6b3   : > { %v9093_v44 = vpack.c.bf16 %v3669_v10, %v3461_v58  ;;  %v3957_v0 = vor.u32 4788187, %v3956_v21  ;;  %v3352_v40 = vsel %vm3350_vm12, %v9009_v30, %v3351_v63  ;;  %vm3353_vm13 = vcmp.eq.s32.totalorder %v3348_v54, 2 }
 0x6b4   : > { %v3556_v11 = vand.u32 3, %v8992_v23  ;;  %v4045_v48 = vshll.u32 %v9091_v20, 30  ;;  %v3355_v49 = vsel %vm3353_vm13, %v3354_v28, %v9029_v55  ;;  %v3559_v2 = vxor.u32 2147483648, %v9039_v61 }
 0x6b5   : > { %5703 = vmatprep.subr.bf16.mxu0 %v9093_v44  ;;  %5726 = vmatprep.subr.bf16.mxu1 %v9093_v44  ;;  %v3562_v7 = vxor.u32 2147483648, %v9034_v22  ;;  %v3854_v6 = vand.u32 2147483647, %v3853_v18  ;;  %v3953_v46 = vor.u32 %v3952_v27, %v3951_v57  ;;  %vm3349_vm2 = vcmp.lt.s32.totalorder %v3348_v54, 2 }
 0x6b6   : > { %vm3558_vm4 = vcmp.eq.s32.totalorder %v3556_v11, 0  ;;  %v4046_v30 = vsub.s32 %v4042_v62, %v4045_v48  ;;  %v3356_v47 = vsel %vm3349_vm2, %v3352_v40, %v3355_v49  ;;  %vm3561_vm5 = vcmp.eq.s32.totalorder %v3556_v11, 2 }
 0x6b7   : > { %v3560_v23 = vsel %vm3558_vm4, %v9034_v22, %v3559_v2  ;;  %v3856_v43 = vcvt.s32.f32 %v3849_v24  ;;  %v3958_v32 = vand.u32 2147483647, %v3957_v0  ;;  %vm3557_vm0 = vcmp.lt.s32.totalorder %v3556_v11, 2 }
 0x6b8   : > { %v3563_v60 = vsel %vm3561_vm5, %v3562_v7, %v9039_v61  ;;  %v4048_v5 = vsub.s32 0, %v4046_v30  ;;  %vm3346_vm1 = vweird.f32 %v8531_v16  ;;  %vm3554_vm10 = vweird.f32 %v8539_v38 }
 0x6b9   : > { %v3564_v55 = vsel %vm3557_vm0, %v3560_v23, %v3563_v60  ;;  %v10353_v13 = vand.u32 2147483647, %v8990_v42  ;;  %v10354_v19 = vcvt.s32.f32 %v8988_v39  ;;  %v3960_v41 = vcvt.s32.f32 %v3953_v46 }
 0x6ba   : > { %v3357_v59 = vsel %vm3346_vm1, nan, %v3356_v47  ;;  %v3565_v22 = vsel %vm3554_vm10, nan, %v3564_v55  ;;  %v3857_v50 = vmul.f32 %v3856_v43, %v3854_v6  ;;  %v5609_v24 = vmin.u32 %v4048_v5, %v4046_v30 }
 0x6bb   : > { %v3753_v33 = vmul.f32 %v10354_v19, %v10353_v13  ;;  %v9111_v18 = vpack.c.bf16 %v3565_v22, %v3357_v59  ;;  %v3961_v14 = vmul.f32 %v3960_v41, %v3958_v32  ;;  %vm3672_vm11 = vcmp.lt.s32.totalorder %v8688_v8, 0 }
 0x6bc   : > { %v4050_v61 = vclz %v5609_v24  ;;  %v3858_v38 = vxor.u32 2147483648, %v3857_v50  ;;  %vm3776_vm6 = vcmp.lt.s32.totalorder %v8703_v29, 0  ;;  %vm3880_vm9 = vcmp.lt.s32.totalorder %v8753_v31, 0 }
 0x6bd   : > { %5705 = vmatpush1.bf16.msra.mxu0 %v9111_v18  ;;  %5728 = vmatpush1.bf16.msra.mxu1 %v9111_v18  ;;  %v3754_v16 = vxor.u32 2147483648, %v3753_v33  ;;  %v3962_v42 = vxor.u32 2147483648, %v3961_v14  ;;  %v4038_v21 = vadd.s32 %v9052_v12, %v9064_v3  ;;  %v10355_v4 = vand.u32 2147483647, %v8688_v8 }
 0x6be   : > { %v5610_v51 = vadd.s32 4294967294, %v4050_v61  ;;  %v3859_v34 = vsel %vm3776_vm6, %v3858_v38, %v3857_v50  ;;  %v10358_v54 = vand.u32 2147483647, %v8703_v29  ;;  %v10361_v57 = vand.u32 2147483647, %v8753_v31 }
 0x6bf   : > { %v3755_v39 = vsel %vm3672_vm11, %v3754_v16, %v3753_v33  ;;  %vm9126_vm8 = vcmp.le.f32.partialorder %v10355_v4, 0.7853982  ;;  %v3963_v27 = vsel %vm3880_vm9, %v3962_v42, %v3961_v14  ;;  %v3964_v49 = vsub.s32 4, %v9006_v36 }
 0x6c0   : > { %vm5611_vm14 = vcmp.lt.s32.totalorder %v5610_v51, 0  ;;  %vm9132_vm7 = vcmp.le.f32.partialorder %v10358_v54, 0.7853982  ;;  %v3758_v12 = vsel %vm9126_vm8, %v8688_v8, %v3755_v39  ;;  %vm9146_vm15 = vcmp.le.f32.partialorder %v10361_v57, 0.7853982 }
 0x6c1   : > { %v4053_v62 = vsel %vm5611_vm14, 0, %v5610_v51  ;;  %v3862_v28 = vsel %vm9132_vm7, %v8703_v29, %v3859_v34  ;;  %v3966_v40 = vsel %vm9146_vm15, %v8753_v31, %v3963_v27  ;;  %6060 = vcosq.f32 %v3758_v12 }
 0x6c2   : > { %v4054_v37 = vsub.s32 32, %v4053_v62  ;;  %v4058_v56 = vsub.s32 4294967266, %v4053_v62  ;;  %v4055_v3 = vshll.u32 %v4046_v30, %v4053_v62  ;;  %6062 = vcosq.f32 %v3862_v28 }
 0x6c3   : > { %6064 = vcosq.f32 %v3966_v40  ;;  %v3860_v7 = vsub.s32 4, %v8905_v15  ;;  %v3756_v6 = vsub.s32 4, %v8842_v45  ;;  %v3965_v47 = vsel %vm3880_vm9, %v3964_v49, %v9006_v36  ;;  %v5619_v36 = vld [vmem:[%s10105_s1 + $0x28] sm:$0xff] }
 0x6c4   : > { %v4056_v58 = vshrl.u32 %v4038_v21, %v4054_v37  ;;  %v4059_v10 = vadd.s32 127, %v4058_v56  ;;  %6066 = vsinq.f32 %v3966_v40  ;;  %v4068_v43 = vsub.s32 4, %v9091_v20 }
 0x6c5   : > { %6068 = vsinq.f32 %v3862_v28  ;;  %v3861_v32 = vsel %vm3776_vm6, %v3860_v7, %v8905_v15  ;;  %v3757_v60 = vsel %vm3672_vm11, %v3756_v6, %v8842_v45  ;;  %v3967_v55 = vsel %vm9146_vm15, 0, %v3965_v47 }
 0x6c6   : > { %v4057_v11 = vor.u32 %v4056_v58, %v4055_v3  ;;  %v4060_v48 = vshll.u32 %v4059_v10, 23  ;;  %6070 = vsinq.f32 %v3758_v12  ;;  %vm3984_vm12 = vcmp.lt.s32.totalorder %v8895_v17, 0 }
 0x6c7   : > { %v10364_v13 = vand.u32 2147483647, %v8895_v17  ;;  %v3863_v15 = vsel %vm9132_vm7, 0, %v3861_v32  ;;  %v4069_v33 = vsel %vm3984_vm12, %v4068_v43, %v9091_v20  ;;  %v3759_v45 = vsel %vm9126_vm8, 0, %v3757_v60 }
 0x6c8   : > { %v4061_v2 = vor.u32 4788187, %v4060_v48  ;;  %v4064_v30 = vcvt.s32.f32 %v4057_v11  ;;  %v3971_v50 = vadd.s32 3, %v3967_v55  ;;  %v3867_v14 = vadd.s32 3, %v3863_v15  ;;  %v5618_v55 = vld [vmem:[%s10105_s1 + $0x20] sm:$0xff] }
 0x6c9   : > { %vm9171_vm13 = vcmp.le.f32.partialorder %v10364_v13, 0.7853982  ;;  %v3763_v38 = vadd.s32 3, %v3759_v45  ;;  %vm3970_vm15 = vweird.f32 %v8753_v31  ;;  %v5615_v31 = vld [vmem:[%s10106_s2 + $0x68] sm:$0xff]  ;;  %v5616_v13 = vld [vmem:[%s10106_s2 + $0x70] sm:$0xff]  ;;  %v5614_v15 = vld [vmem:[%s10106_s2 + $0x60] sm:$0xff] }
 0x6ca   : > { %v4062_v46 = vand.u32 2147483647, %v4061_v2  ;;  %v4071_v61 = vsel %vm9171_vm13, 0, %v4069_v33  ;;  %v3972_v39 = vand.u32 3, %v3971_v50  ;;  %v3868_v62 = vand.u32 3, %v3867_v14  ;;  %v9239_v33 = vpop.permute.xlu0 %4390 }
 0x6cb   : > { %v6061_v41 = vpop.eup %6060  ;;  %v4075_v42 = vadd.s32 3, %v4071_v61  ;;  %v3764_v4 = vand.u32 3, %v3763_v38 }
 0x6cc   : > { %v4065_v23 = vmul.f32 %v4064_v30, %v4062_v46  ;;  %v6063_v22 = vpop.eup %6062  ;;  %v3770_v54 = vxor.u32 2147483648, %v6061_v41  ;;  %vm3974_vm2 = vcmp.eq.s32.totalorder %v3972_v39, 0  ;;  %vm3977_vm4 = vcmp.eq.s32.totalorder %v3972_v39, 2 }
 0x6cd   : > { %v6065_v24 = vpop.eup %6064  ;;  %v3874_v56 = vxor.u32 2147483648, %v6063_v22  ;;  %v4076_v63 = vand.u32 3, %v4075_v42  ;;  %vm3870_vm5 = vcmp.eq.s32.totalorder %v3868_v62, 0  ;;  %vm3873_vm0 = vcmp.eq.s32.totalorder %v3868_v62, 2 }
 0x6ce   : > { %v4066_v5 = vxor.u32 2147483648, %v4065_v23  ;;  %v6067_v16 = vpop.eup %6066  ;;  %v3978_v21 = vxor.u32 2147483648, %v6065_v24  ;;  %vm3766_vm1 = vcmp.eq.s32.totalorder %v3764_v4, 0  ;;  %vm3769_vm10 = vcmp.eq.s32.totalorder %v3764_v4, 2 }
 0x6cf   : > { %v6069_v20 = vpop.eup %6068  ;;  %v3975_v34 = vxor.u32 2147483648, %v6067_v16  ;;  %vm3973_vm11 = vcmp.lt.s32.totalorder %v3972_v39, 2  ;;  %vm3869_vm14 = vcmp.lt.s32.totalorder %v3868_v62, 2  ;;  %vm4081_vm6 = vcmp.eq.s32.totalorder %v4076_v63, 2 }
 0x6d0   : > { %v4067_v19 = vsel %vm3984_vm12, %v4066_v5, %v4065_v23  ;;  %v6071_v51 = vpop.eup %6070  ;;  %v3871_v37 = vxor.u32 2147483648, %v6069_v20  ;;  %v3979_v12 = vsel %vm3977_vm4, %v3978_v21, %v6067_v16  ;;  %v3875_v10 = vsel %vm3873_vm0, %v3874_v56, %v6069_v20 }
 0x6d1   : > { %v4070_v59 = vsel %vm9171_vm13, %v8895_v17, %v4067_v19  ;;  %v3767_v52 = vxor.u32 2147483648, %v6071_v51  ;;  %v3976_v27 = vsel %vm3974_vm2, %v6065_v24, %v3975_v34  ;;  %v3771_v40 = vsel %vm3769_vm10, %v3770_v54, %v6071_v51  ;;  %v5617_v19 = vld [vmem:[%s10106_s2 + $0x78] sm:$0xff] }
 0x6d2   : > { %6072 = vcosq.f32 %v4070_v59  ;;  %v3872_v58 = vsel %vm3870_vm5, %v6063_v22, %v3871_v37  ;;  %v3980_v48 = vsel %vm3973_vm11, %v3976_v27, %v3979_v12  ;;  %vm4078_vm9 = vcmp.eq.s32.totalorder %v4076_v63, 0 }
 0x6d3   : > { %6074 = vsinq.f32 %v4070_v59  ;;  %v3768_v0 = vsel %vm3766_vm1, %v6061_v41, %v3767_v52  ;;  %v3876_v49 = vsel %vm3869_vm14, %v3872_v58, %v3875_v10  ;;  %vm3765_vm8 = vcmp.lt.s32.totalorder %v3764_v4, 2  ;;  %v9241_v41 = vpop.permute.xlu0 %4400  ;;  %v4396_v4 = vpop.permute.xlu1 %4395 }
 0x6d4   : > { %vm4077_vm7 = vcmp.lt.s32.totalorder %v4076_v63, 2  ;;  %v3772_v6 = vsel %vm3765_vm8, %v3768_v0, %v3771_v40  ;;  %vm3866_vm12 = vweird.f32 %v8703_v29  ;;  %vm4074_vm13 = vweird.f32 %v8895_v17  ;;  %v4088_v29 = vld [vmem:[%s10108_s4 + $0x3] sm:$0x1]  ;;  %v6116_v17 = vld [vmem:[%s6288_s17 + $0x8] sm:$0x3f] }
 0x6d5   : > { %v3981_v30 = vsel %vm3970_vm15, nan, %v3980_v48  ;;  %v3877_v47 = vsel %vm3866_vm12, nan, %v3876_v49  ;;  %vm3762_vm2 = vweird.f32 %v8688_v8  ;;  %vm10367_vm4 = vcmask 1045504   ;;  %v6117_v8 = vld [vmem:[%s6288_s17] sm:$0x3f]  ;;  %s5380_s17 = sshll.u32 %s9955_s12, 4  ;;  %s10061_s17 = int_to_ptr.vmem [resolvable:$true] %s5380_s17 }
 0x6d6   : > { %v3773_v32 = vsel %vm3762_vm2, nan, %v3772_v6  ;;  %vm10368_vm5 = vmmov %vm10367_vm4  ;;  %v10369_v5 = vmov 0.0   ;;  %vm10370_vm0 = vcmask 48128   ;;  %s6118_s30 = scalar_lea.vmem %s10061_s17, 128  ;;  %p6125_p0 = scmp.lt.s32.totalorder %s10061_s17, %s6123_s6 }
 0x6d7   : > { %v5708_v60 = vpack.c.bf16 %v3981_v30, %v3773_v32  ;;  %vm10371_vm1 = vmmov %vm10370_vm0  ;;  %v9243_v45 = vpop.permute.xlu0 %4091  ;;  %p6119_p11 = scmp.ne.s32.totalorder %s10061_s17, %s6118_s30  ;;  %p6126_p1 = scmp.lt.s32.totalorder %s6124_s7, %s6118_s30 }
 0x6d8   : > { %vm10372_vm10 = vmmov %vm10370_vm0  ;;  %10374 = vst [vmem:[#allocation18_spill] sm:$0xff] %v9243_v45  ;;  %v4093_v59 = vrot.slane %v9243_v45, 3 }
 0x6d9   : > { %vm10373_vm11 = vmmov %vm10370_vm0  ;;  %p6120_p12 = pnand %p6119_p11, %p6260_p5  ;;  %p6127_p2 = por %p6126_p1, %p6125_p0 }
 0x6db   : > { %p6121_p13 = pneg %p6120_p12 }
 0x6dc   : > { %v6073_v3 = vpop.eup %6072 }
 0x6dd   : > { %v6075_v28 = vpop.eup %6074  ;;  %v4082_v57 = vxor.u32 2147483648, %v6073_v3  ;;  %p6128_p3 = pnand %p6127_p2, %p6121_p13 }
 0x6de   : > { %v4079_v11 = vxor.u32 2147483648, %v6075_v28 }
 0x6df   : > { %v4083_v2 = vsel %vm4081_vm6, %v4082_v57, %v6075_v28 }
 0x6e0   : > { %v4080_v7 = vsel %vm4078_vm9, %v6073_v3, %v4079_v11 }
 0x6e1   : > { %v4084_v46 = vsel %vm4077_vm7, %v4080_v7, %v4083_v2 }
 0x6e2   : > { %v4085_v23 = vsel %vm4074_vm13, nan, %v4084_v46 }
 0x6e3   : > { %v5706_v43 = vpack.c.bf16 %v4085_v23, %v3877_v47 }
 0x6e5   : > { %5707 = vmatprep.subr.bf16.mxu0 %v5706_v43  ;;  %5727 = vmatprep.subr.bf16.mxu1 %v5706_v43 }
 0x6e6   : > { %5709 = vmatpush1.bf16.msra.mxu0 %v5708_v60  ;;  %5729 = vmatpush1.bf16.msra.mxu1 %v5708_v60 }
 0x6e7   : > { %5622 = vmatprep.subr.msk.mxu0 %vm10367_vm4, %v6116_v17 }
 0x6e9   : > { %5613 = vmatmul.mubr.msk.f32.vlgmr.msra.gmra.mrb[16].mxu0 %vm10204_vm3, %v4088_v29  ;;  %5629 = vmatmul.mubr.msk.f32.vlgmr.msra.gmra.mrb[16].mxu1 %vm10204_vm3, %v5615_v31 }
 0x6ea   : > { %5623 = vmatpush1.msk.msra.mxu0 %vm10368_vm5, %v6117_v8  ;;  %4257 = vmatprep.mubr.f32.mxu0 %v10369_v5 }
 0x6eb   : > { %5711 = vmatprep.subr.bf16.mxu0 %v9093_v44  ;;  %4370 = vmatprep.mubr.f32.mxu1 %v10369_v5  ;;  %v5620_v44 = vld [vmem:[%s10105_s1 + $0x30] sm:$0xff] }
 0x6ed   : > { %5624 = vmatmul.mubr.msk.f32.vlgmr.msra.gmra.mrb[18].mxu0 %vm10370_vm0, %v5618_v55  ;;  %5630 = vmatmul.mubr.msk.f32.gmra.mrb[18].mxu1 %vm10204_vm3, %v5616_v13 }
 0x6ee   : > { %5713 = vmatpush1.bf16.msra.mxu0 %v9111_v18  ;;  %4263 = vmatprep.mubr.f32.mxu0 %v10369_v5  ;;  %v5621_v18 = vld [vmem:[%s10105_s1 + $0x38] sm:$0xff] }
 0x6ef   : > { %5715 = vmatprep.subr.bf16.mxu0 %v5706_v43  ;;  %4376 = vmatprep.mubr.f32.mxu1 %v10369_v5 }
 0x6f1   : > { %5625 = vmatmul.mubr.msk.f32.gmra.mrb[20].mxu0 %vm10371_vm1, %v5619_v36  ;;  %5631 = vmatmul.mubr.msk.f32.gmra.mrb[20].mxu1 %vm10204_vm3, %v5617_v19 }
 0x6f2   : > { %5717 = vmatpush1.bf16.msra.mxu0 %v5708_v60  ;;  %4269 = vmatprep.mubr.f32.mxu0 %v10369_v5 }
 0x6f3   : > { %5317 = vmatprep.mubr.f32.mxu1 %v10369_v5 }
 0x6f5   : > { %5626 = vmatmul.mubr.msk.f32.gmra.mrb[22].mxu0 %vm10372_vm10, %v5620_v44 }
 0x6f6   : > { %4275 = vmatprep.mubr.f32.mxu0 %v10369_v5 }
 0x6f9   : > { %5627 = vmatmul.mubr.msk.f32.gmra.mrb[24].mxu0 %vm10373_vm11, %v5621_v18 }
 0x6fa   : > { %4358 = vmatprep.mubr.f32.mxu0 %v10369_v5 }
 0x6fd   : > { %5628 = vmatmul.mubr.msk.f32.vlgmr.msra.gmra.mrb[18].mxu0 %vm10204_vm3, %v5614_v15 }
 0x7bc   : > { %v4164_v22 = vpop.f32.mrb[16].mxu0  ;;  %v4366_v50 = vpop.f32.mrb[16].mxu1 }
 0x7bd   : > { %v4165_v24 = vadd.f32 %v4164_v22, %v4093_v59  ;;  %v4166_v14 = vpop.f32.mrb[17].mxu0  ;;  %v4368_v61 = vpop.f32.mrb[17].mxu1 }
 0x7be   : > { %v4167_v16 = vadd.f32 %v4166_v14, %v4093_v59 }
 0x7bf   : > { %v4169_v38 = vmax.f32 %v4165_v24, 0.0 }
 0x7c0   : > { %v4170_v20 = vmax.f32 %v4167_v16, 0.0  ;;  %v4372_v51 = vpop.f32.mrb[18].mxu1 }
 0x7c1   : > { %v4374_v42 = vpop.f32.mrb[19].mxu1 }
 0x7c2   : > { %v9246_v39 = vcombine.low %v4169_v38, %v4170_v20 }
 0x7c4   : > { %v4265_v62 = vpop.f32.mrb[20].mxu0  ;;  %v4378_v34 = vpop.f32.mrb[20].mxu1 }
 0x7c5   : > { %v4367_v21 = vadd.f32 %v4366_v50, %v4265_v62  ;;  %v4267_v37 = vpop.f32.mrb[21].mxu0  ;;  %v9248_v56 = vpop.f32.mrb[21].mxu1 }
 0x7c6   : > { %v4369_v52 = vadd.f32 %v4368_v61, %v4267_v37 }
 0x7c7   : > { %v9250_v54 = vadd.f32 %v4396_v4, %v4367_v21 }
 0x7c8   : > { %v9252_v63 = vadd.f32 %v4396_v4, %v4369_v52  ;;  %v4271_v27 = vpop.f32.mrb[22].mxu0 }
 0x7c9   : > { %v4627_v12 = vand.u32 2139095040, %v9250_v54  ;;  %v4373_v3 = vadd.f32 %v4372_v51, %v4271_v27  ;;  %v4273_v58 = vpop.f32.mrb[23].mxu0  ;;  %v10183_v6 = vand.u32 2147483647, %v9250_v54 }
 0x7ca   : > { %v4731_v10 = vand.u32 2139095040, %v9252_v63  ;;  %v9256_v28 = vadd.f32 %v4374_v42, %v4273_v58 }
 0x7cb   : > { %v4628_v57 = vshrl.u32 %v4627_v12, 23  ;;  %v9264_v46 = vadd.f32 %v9241_v41, %v4373_v3  ;;  %v4631_v60 = vand.u32 8388607, %v10183_v6 }
 0x7cc   : > { %v4732_v0 = vshrl.u32 %v4731_v10, 23  ;;  %v4277_v40 = vpop.f32.mrb[24].mxu0 }
 0x7cd   : > { %v5644_v11 = vadd.s32 4294967169, %v4628_v57  ;;  %v9258_v48 = vpop.f32.mrb[25].mxu0  ;;  %v9268_v43 = vadd.f32 %v4378_v34, %v4277_v40  ;;  %v4835_v31 = vand.u32 2139095040, %v9264_v46  ;;  %v4632_v38 = vor.u32 8388608, %v4631_v60 }
 0x7ce   : > { %v5648_v49 = vadd.s32 4294967169, %v4732_v0 }
 0x7cf   : > { %v4634_v2 = vadd.s32 1, %v5644_v11  ;;  %v4836_v20 = vshrl.u32 %v4835_v31, 23  ;;  %v4672_v3 = vshll.u32 %v4632_v38, 8 }
 0x7d0   : > { %v9260_v7 = vpop.f32.mrb[18].mxu0  ;;  %v4738_v23 = vadd.s32 1, %v5648_v49 }
 0x7d1   : > { %vm4635_vm14 = vcmp.gt.s32.totalorder %v4634_v2, 0  ;;  %v9266_v30 = vpop.f32.mrb[19].mxu0  ;;  %v5652_v27 = vadd.s32 4294967169, %v4836_v20 }
 0x7d2   : > { %v4636_v47 = vsel %vm4635_vm14, %v4634_v2, 0  ;;  %vm4739_vm6 = vcmp.gt.s32.totalorder %v4738_v23, 0 }
 0x7d3   : > { %v4638_v32 = vand.u32 31, %v4636_v47  ;;  %v9273_v17 = vshrl.u32 %v4636_v47, 5  ;;  %v4740_v16 = vsel %vm4739_vm6, %v4738_v23, 0  ;;  %v4842_v11 = vadd.s32 1, %v5652_v27 }
 0x7d4   : > { %v4742_v4 = vand.u32 31, %v4740_v16  ;;  %v10181_v23 = vand.u32 2147483647, %v9252_v63 }
 0x7d5   : > { %v4639_v29 = vsub.s32 32, %v4638_v32  ;;  %v4641_v8 = vshll.u32 %v10229_v1, %v4638_v32  ;;  %v4644_v5 = vshll.u32 %v10226_v26, %v4638_v32  ;;  %v4647_v36 = vshll.u32 %v10227_v53, %v4638_v32 }
 0x7d6   : > { %v4650_v44 = vshll.u32 %v10221_v25, %v4638_v32  ;;  %v4653_v15 = vshll.u32 %v10273_v9, %v4638_v32  ;;  %vm4656_vm9 = vcmp.lt.s32.totalorder %v9273_v17, 1  ;;  %vm4659_vm8 = vcmp.lt.s32.totalorder %v9273_v17, 4 }
 0x7d7   : > { %v4642_v55 = vshrl.u32 %v10226_v26, %v4639_v29  ;;  %v4645_v13 = vshrl.u32 %v10227_v53, %v4639_v29  ;;  %v4648_v19 = vshrl.u32 %v10221_v25, %v4639_v29  ;;  %v4651_v18 = vshrl.u32 %v10273_v9, %v4639_v29 }
 0x7d8   : > { %v4654_v59 = vshrl.u32 %v10274_v35, %v4639_v29  ;;  %vm4658_vm7 = vcmp.lt.s32.totalorder %v9273_v17, 3  ;;  %vm4657_vm15 = vcmp.lt.s32.totalorder %v9273_v17, 2  ;;  %v9305_v58 = vsub.s32 32, %v4742_v4 }
 0x7d9   : > { %v4643_v22 = vor.u32 %v4642_v55, %v4641_v8  ;;  %v4646_v50 = vor.u32 %v4645_v13, %v4644_v5  ;;  %v4649_v24 = vor.u32 %v4648_v19, %v4647_v36  ;;  %v4652_v14 = vor.u32 %v4651_v18, %v4650_v44 }
 0x7da   : > { %v4655_v61 = vor.u32 %v4654_v59, %v4653_v15  ;;  %v4640_v2 = vshrl.u32 %v10229_v1, %v4639_v29  ;;  %v4755_v47 = vshrl.u32 %v10273_v9, %v9305_v58  ;;  %v9320_v32 = vshrl.u32 %v4740_v16, 5 }
 0x7db   : > { %v4664_v51 = vsel %vm4656_vm9, %v4643_v22, %v4646_v50  ;;  %v4665_v42 = vsel %vm4659_vm8, %v4652_v14, 920167782  ;;  %v4668_v21 = vsel %vm4656_vm9, %v4646_v50, %v4649_v24  ;;  %v4661_v49 = vsel %vm4659_vm8, %v4649_v24, 2102212464 }
 0x7dc   : > { %v4669_v62 = vsel %vm4659_vm8, %v4655_v61, 1326507024  ;;  %v4666_v34 = vsel %vm4658_vm7, %v4649_v24, %v4665_v42  ;;  %v4758_v60 = vshrl.u32 %v10274_v35, %v9305_v58  ;;  %v4660_v31 = vsel %vm4656_vm9, %v4640_v2, %v4643_v22 }
 0x7dd   : > { %v4670_v37 = vsel %vm4658_vm7, %v4652_v14, %v4669_v62  ;;  %v4667_v52 = vsel %vm4657_vm15, %v4664_v51, %v4666_v34  ;;  %v4662_v8 = vsel %vm4658_vm7, %v4646_v50, %v4661_v49  ;;  %v4754_v5 = vshll.u32 %v10221_v25, %v4742_v4 }
 0x7de   : > { %v4671_v12 = vsel %vm4657_vm15, %v4668_v21, %v4670_v37  ;;  %v9307_v10 = vmul.u32.u64.low %v4672_v3, %v4667_v52  ;;  %v9308_v57 = vmul.u32.u64.high %v4672_v3, %v4667_v52, %v9307_v10  ;;  %vm4843_vm12 = vcmp.gt.s32.totalorder %v4842_v11, 0 }
 0x7df   : > { %v9311_v0 = vmul.u32.u64.low %v4672_v3, %v4671_v12  ;;  %v9312_v40 = vmul.u32.u64.high %v4672_v3, %v4671_v12, %v9311_v0  ;;  %v4746_v29 = vshrl.u32 %v10226_v26, %v9305_v58  ;;  %v4749_v55 = vshrl.u32 %v10227_v53, %v9305_v58 }
 0x7e0   : > { %v4752_v13 = vshrl.u32 %v10221_v25, %v9305_v58  ;;  %v4757_v36 = vshll.u32 %v10273_v9, %v4742_v4  ;;  %v4745_v19 = vshll.u32 %v10229_v1, %v4742_v4  ;;  %v4748_v44 = vshll.u32 %v10226_v26, %v4742_v4 }
 0x7e1   : > { %v4756_v18 = vor.u32 %v4755_v47, %v4754_v5  ;;  %v9340_v15 = vadd.f32 %v9241_v41, %v9256_v28  ;;  %v4682_v59 = vadd.s32 1, %v9308_v57  ;;  %v4751_v22 = vshll.u32 %v10227_v53, %v4742_v4 }
 0x7e2   : > { %v4759_v50 = vor.u32 %v4758_v60, %v4757_v36  ;;  %v4844_v24 = vsel %vm4843_vm12, %v4842_v11, 0  ;;  %v4663_v14 = vsel %vm4657_vm15, %v4660_v31, %v4662_v8  ;;  %vm4681_vm13 = vc.u32 %v9312_v40, %v9307_v10 }
 0x7e3   : > { %10375 = vst [vmem:[#allocation20_spill] sm:$0xff] %v9340_v15  ;;  %v4735_v61 = vand.u32 8388607, %v10181_v23  ;;  %v9352_v16 = vadd.f32 %v9248_v56, %v9258_v48  ;;  %v4747_v41 = vor.u32 %v4746_v29, %v4745_v19  ;;  %v4750_v28 = vor.u32 %v4749_v55, %v4748_v44 }
 0x7e4   : > { %v4753_v38 = vor.u32 %v4752_v13, %v4751_v22  ;;  %vm4763_vm2 = vcmp.lt.s32.totalorder %v9320_v32, 4  ;;  %v4846_v17 = vand.u32 31, %v4844_v24  ;;  %v4683_v51 = vsel %vm4681_vm13, %v4682_v59, %v9308_v57 }
 0x7e5   : > { %v4769_v20 = vsel %vm4763_vm2, %v4756_v18, 920167782  ;;  %v4773_v42 = vsel %vm4763_vm2, %v4759_v50, 1326507024  ;;  %v4939_v62 = vand.u32 2139095040, %v9340_v15  ;;  %v4679_v34 = vmul.u32 %v4672_v3, %v4663_v14 }
 0x7e6   : > { %vm4760_vm4 = vcmp.lt.s32.totalorder %v9320_v32, 1  ;;  %vm4762_vm5 = vcmp.lt.s32.totalorder %v9320_v32, 3  ;;  %v4736_v56 = vor.u32 8388608, %v4735_v61  ;;  %v9371_v27 = vsub.s32 32, %v4846_v17 }
 0x7e7   : > { %v4768_v48 = vsel %vm4760_vm4, %v4747_v41, %v4750_v28  ;;  %v4770_v21 = vsel %vm4762_vm5, %v4753_v38, %v4769_v20  ;;  %v4684_v37 = vadd.s32 %v4683_v51, %v4679_v34  ;;  %v4772_v4 = vsel %vm4760_vm4, %v4750_v28, %v4753_v38 }
 0x7e8   : > { %v4774_v52 = vsel %vm4762_vm5, %v4756_v18, %v4773_v42  ;;  %vm4761_vm0 = vcmp.lt.s32.totalorder %v9320_v32, 2  ;;  %v4940_v12 = vshrl.u32 %v4939_v62, 23  ;;  %v4776_v0 = vshll.u32 %v4736_v56, 8 }
 0x7e9   : > { %v4771_v3 = vsel %vm4761_vm0, %v4768_v48, %v4770_v21  ;;  %v4775_v57 = vsel %vm4761_vm0, %v4772_v4, %v4774_v52  ;;  %v4685_v11 = vadd.s32 536870912, %v4684_v37  ;;  %v10182_v49 = vand.u32 2147483647, %v9264_v46 }
 0x7ea   : > { %v4859_v2 = vshrl.u32 %v10273_v9, %v9371_v27  ;;  %v9381_v47 = vmul.u32.u64.low %v4776_v0, %v4771_v3  ;;  %v9382_v60 = vmul.u32.u64.high %v4776_v0, %v4771_v3, %v9381_v47  ;;  %v4862_v31 = vshrl.u32 %v10274_v35, %v9371_v27 }
 0x7eb   : > { %v5656_v8 = vadd.s32 4294967169, %v4940_v12  ;;  %v9387_v5 = vmul.u32.u64.low %v4776_v0, %v4775_v57  ;;  %v9388_v29 = vmul.u32.u64.high %v4776_v0, %v4775_v57, %v9387_v5  ;;  %v4850_v55 = vshrl.u32 %v10226_v26, %v9371_v27 }
 0x7ec   : > { %v4858_v13 = vshll.u32 %v10221_v25, %v4846_v17  ;;  %v9393_v36 = vshrl.u32 %v4844_v24, 5  ;;  %v4853_v19 = vshrl.u32 %v10227_v53, %v9371_v27  ;;  %v4856_v44 = vshrl.u32 %v10221_v25, %v9371_v27 }
 0x7ed   : > { %v4861_v18 = vshll.u32 %v10273_v9, %v4846_v17  ;;  %v9400_v59 = vshrl.u32 %v4685_v11, 30  ;;  %v4765_v22 = vsel %vm4763_vm2, %v4753_v38, 2102212464  ;;  %v4849_v50 = vshll.u32 %v10229_v1, %v4846_v17 }
 0x7ee   : > { %v4860_v14 = vor.u32 %v4859_v2, %v4858_v13  ;;  %v4852_v61 = vshll.u32 %v10226_v26, %v4846_v17  ;;  %v4855_v24 = vshll.u32 %v10227_v53, %v4846_v17  ;;  %v4946_v51 = vadd.s32 1, %v5656_v8 }
 0x7ef   : > { %v4863_v20 = vor.u32 %v4862_v31, %v4861_v18  ;;  %v4744_v42 = vshrl.u32 %v10229_v1, %v9305_v58  ;;  %v4839_v62 = vand.u32 8388607, %v10182_v49  ;;  %v4851_v34 = vor.u32 %v4850_v55, %v4849_v50 }
 0x7f0   : > { %v4854_v56 = vor.u32 %v4853_v19, %v4852_v61  ;;  %v4857_v48 = vor.u32 %v4856_v44, %v4855_v24  ;;  %vm4867_vm1 = vcmp.lt.s32.totalorder %v9393_v36, 4  ;;  %vm4947_vm10 = vcmp.gt.s32.totalorder %v4946_v51, 0  ;;  %v4406_v61 = vpop.permute.xlu1 %4405 }
 0x7f1   : > { %v4764_v38 = vsel %vm4760_vm4, %v4744_v42, %v4747_v41  ;;  %v4766_v17 = vsel %vm4762_vm5, %v4750_v28, %v4765_v22  ;;  %v4873_v21 = vsel %vm4867_vm1, %v4860_v14, 920167782  ;;  %v4687_v58 = vshll.u32 %v9400_v59, 30 }
 0x7f2   : > { %v4786_v4 = vadd.s32 1, %v9382_v60  ;;  %v4877_v52 = vsel %vm4867_vm1, %v4863_v20, 1326507024  ;;  %v4948_v12 = vsel %vm4947_vm10, %v4946_v51, 0  ;;  %vm4785_vm11 = vc.u32 %v9388_v29, %v9381_v47 }
 0x7f3   : > { %vm4864_vm14 = vcmp.lt.s32.totalorder %v9393_v36, 1  ;;  %vm4866_vm6 = vcmp.lt.s32.totalorder %v9393_v36, 3  ;;  %v4767_v41 = vsel %vm4761_vm0, %v4764_v38, %v4766_v17  ;;  %v4840_v28 = vor.u32 8388608, %v4839_v62 }
 0x7f4   : > { %v4872_v3 = vsel %vm4864_vm14, %v4851_v34, %v4854_v56  ;;  %v4874_v57 = vsel %vm4866_vm6, %v4857_v48, %v4873_v21  ;;  %v4876_v11 = vsel %vm4864_vm14, %v4854_v56, %v4857_v48  ;;  %v4878_v2 = vsel %vm4866_vm6, %v4860_v14, %v4877_v52 }
 0x7f5   : > { %v4950_v31 = vand.u32 31, %v4948_v12  ;;  %v9436_v8 = vsub.s32 %v4684_v37, %v4687_v58  ;;  %v4787_v5 = vsel %vm4785_vm11, %v4786_v4, %v9382_v60  ;;  %vm4865_vm9 = vcmp.lt.s32.totalorder %v9393_v36, 2 }
 0x7f6   : > { %v4783_v32 = vmul.u32 %v4776_v0, %v4767_v41  ;;  %v4875_v55 = vsel %vm4865_vm9, %v4872_v3, %v4874_v57  ;;  %v4879_v13 = vsel %vm4865_vm9, %v4876_v11, %v4878_v2  ;;  %v4880_v19 = vshll.u32 %v4840_v28, 8 }
 0x7f7   : > { %v4951_v18 = vsub.s32 32, %v4950_v31  ;;  %v4690_v22 = vsub.s32 0, %v9436_v8  ;;  %v4869_v0 = vsel %vm4867_vm1, %v4857_v48, 2102212464  ;;  %v4848_v20 = vshrl.u32 %v10229_v1, %v9371_v27 }
 0x7f8   : > { %v4788_v44 = vadd.s32 %v4787_v5, %v4783_v32  ;;  %v9445_v50 = vmul.u32.u64.low %v4880_v19, %v4875_v55  ;;  %v9446_v14 = vmul.u32.u64.high %v4880_v19, %v4875_v55, %v9445_v50  ;;  %v10179_v51 = vand.u32 2147483647, %v9340_v15 }
 0x7f9   : > { %v9449_v37 = vmul.u32.u64.low %v4880_v19, %v4879_v13  ;;  %v9450_v60 = vmul.u32.u64.high %v4880_v19, %v4879_v13, %v9449_v37  ;;  %v4963_v42 = vshrl.u32 %v10273_v9, %v4951_v18  ;;  %v5645_v62 = vmin.u32 %v4690_v22, %v9436_v8 }
 0x7fa   : > { %v4789_v24 = vadd.s32 536870912, %v4788_v44  ;;  %v4966_v38 = vshrl.u32 %v10274_v35, %v4951_v18  ;;  %v9461_v17 = vadd.f32 %v4406_v61, %v9268_v43  ;;  %v4868_v21 = vsel %vm4864_vm14, %v4848_v20, %v4851_v34 }
 0x7fb   : > { %v4870_v48 = vsel %vm4866_vm6, %v4854_v56, %v4869_v0  ;;  %v4954_v58 = vshrl.u32 %v10226_v26, %v4951_v18  ;;  %v4962_v27 = vshll.u32 %v10221_v25, %v4950_v31  ;;  %v9469_v4 = vshrl.u32 %v4948_v12, 5 }
 0x7fc   : > { %10376 = vst [vmem:[#allocation13_spill] sm:$0xff] %v9461_v17  ;;  %v4957_v52 = vshrl.u32 %v10227_v53, %v4951_v18  ;;  %v4960_v41 = vshrl.u32 %v10221_v25, %v4951_v18  ;;  %v4965_v28 = vshll.u32 %v10273_v9, %v4950_v31  ;;  %v9474_v43 = vshrl.u32 %v4789_v24, 30 }
 0x7fd   : > { %v4943_v34 = vand.u32 8388607, %v10179_v51  ;;  %v4953_v3 = vshll.u32 %v10229_v1, %v4950_v31  ;;  %v4964_v56 = vor.u32 %v4963_v42, %v4962_v27  ;;  %v4890_v57 = vadd.s32 1, %v9446_v14 }
 0x7fe   : > { %10377 = vst [vmem:[#allocation8_spill] sm:$0xff] %v9474_v43  ;;  %v4956_v11 = vshll.u32 %v10226_v26, %v4950_v31  ;;  %v4959_v12 = vshll.u32 %v10227_v53, %v4950_v31  ;;  %v4967_v2 = vor.u32 %v4966_v38, %v4965_v28  ;;  %v4692_v5 = vclz %v5645_v62 }
 0x7ff   : > { %v4871_v32 = vsel %vm4865_vm9, %v4868_v21, %v4870_v48  ;;  %vm4889_vm8 = vc.u32 %v9450_v60, %v9445_v50  ;;  %v4955_v55 = vor.u32 %v4954_v58, %v4953_v3  ;;  %vm4971_vm7 = vcmp.lt.s32.totalorder %v9469_v4, 4 }
 0x800   : > { %v4958_v13 = vor.u32 %v4957_v52, %v4956_v11  ;;  %v4961_v22 = vor.u32 %v4960_v41, %v4959_v12  ;;  %v5043_v37 = vand.u32 2139095040, %v9461_v17  ;;  %v4977_v0 = vsel %vm4971_vm7, %v4964_v56, 920167782 }
 0x801   : > { %v4891_v31 = vsel %vm4889_vm8, %v4890_v57, %v9446_v14  ;;  %v4944_v24 = vor.u32 8388608, %v4943_v34  ;;  %v4981_v36 = vsel %vm4971_vm7, %v4967_v2, 1326507024  ;;  %v4887_v20 = vmul.u32 %v4880_v19, %v4871_v32 }
 0x802   : > { %vm4968_vm15 = vcmp.lt.s32.totalorder %v9469_v4, 1  ;;  %vm4970_vm12 = vcmp.lt.s32.totalorder %v9469_v4, 3  ;;  %v5044_v42 = vshrl.u32 %v5043_v37, 23  ;;  %v5646_v62 = vadd.s32 4294967294, %v4692_v5 }
 0x803   : > { %v4791_v38 = vshll.u32 %v9474_v43, 30  ;;  %v4976_v21 = vsel %vm4968_vm15, %v4955_v55, %v4958_v13  ;;  %v4978_v48 = vsel %vm4970_vm12, %v4961_v22, %v4977_v0  ;;  %v9500_v14 = vadd.s32 %v4891_v31, %v4887_v20 }
 0x804   : > { %v4980_v58 = vsel %vm4968_vm15, %v4958_v13, %v4961_v22  ;;  %v4982_v19 = vsel %vm4970_vm12, %v4964_v56, %v4981_v36  ;;  %v5660_v27 = vadd.s32 4294967169, %v5044_v42  ;;  %vm4969_vm13 = vcmp.lt.s32.totalorder %v9469_v4, 2 }
 0x805   : > { %v10180_v52 = vand.u32 2147483647, %v9461_v17  ;;  %v4952_v41 = vshrl.u32 %v10229_v1, %v4951_v18  ;;  %v4979_v28 = vsel %vm4969_vm13, %v4976_v21, %v4978_v48  ;;  %v9512_v3 = vadd.f32 %v4406_v61, %v9352_v16 }
 0x806   : > { %v5050_v34 = vadd.s32 1, %v5660_v27  ;;  %v9514_v57 = vsub.s32 %v4788_v44, %v4791_v38  ;;  %v4973_v11 = vsel %vm4971_vm7, %v4961_v22, 2102212464  ;;  %v4983_v56 = vsel %vm4969_vm13, %v4980_v58, %v4982_v19 }
 0x807   : > { %10378 = vst [vmem:[#allocation10_spill] sm:$0xff] %v9512_v3  ;;  %v9520_v12 = vshll.u32 %v4944_v24, 8  ;;  %vm5647_vm2 = vcmp.lt.s32.totalorder %v5646_v62, 0  ;;  %v4893_v18 = vadd.s32 536870912, %v9500_v14  ;;  %v4972_v2 = vsel %vm4968_vm15, %v4952_v41, %v4955_v55 }
 0x808   : > { %vm5051_vm4 = vcmp.gt.s32.totalorder %v5050_v34, 0  ;;  %v5047_v44 = vand.u32 8388607, %v10180_v52  ;;  %v4974_v32 = vsel %vm4970_vm12, %v4958_v13, %v4973_v11  ;;  %v5147_v0 = vand.u32 2139095040, %v9512_v3 }
 0x809   : > { %v9526_v16 = vmul.u32.u64.low %v9520_v12, %v4979_v28  ;;  %v9527_v61 = vmul.u32.u64.high %v9520_v12, %v4979_v28, %v9526_v16  ;;  %v5052_v5 = vsel %vm5051_vm4, %v5050_v34, 0  ;;  %v6190_v24 = vmov 1966171168  }
 0x80a   : > { %v9535_v22 = vmul.u32.u64.low %v9520_v12, %v4983_v56  ;;  %v9536_v37 = vmul.u32.u64.high %v9520_v12, %v4983_v56, %v9535_v22  ;;  %v5054_v31 = vand.u32 31, %v5052_v5  ;;  %v9539_v36 = vunpack.c.l.s4 %v6190_v24 }
 0x80b   : > { %v9541_v20 = vsel %vm5647_vm2, 0, %v5646_v62  ;;  %v4794_v42 = vsub.s32 0, %v9514_v57  ;;  %v9546_v38 = vadd.f32 %v9239_v33, %v9260_v7  ;;  %v9548_v13 = vshrl.u32 %v4893_v18, 30 }
 0x80c   : > { %v4975_v21 = vsel %vm4969_vm13, %v4972_v2, %v4974_v32  ;;  %v5048_v48 = vor.u32 8388608, %v5047_v44  ;;  %v5055_v58 = vsub.s32 32, %v5054_v31  ;;  %v5053_v19 = vshrl.u32 %v5052_v5, 5 }
 0x80d   : > { %10379 = vst [vmem:[#allocation19_spill] sm:$0xff] %v9546_v38  ;;  %v5057_v27 = vshll.u32 %v10229_v1, %v5054_v31  ;;  %v5060_v41 = vshll.u32 %v10226_v26, %v5054_v31  ;;  %v5148_v62 = vshrl.u32 %v5147_v0, 23  ;;  %v5063_v7 = vshll.u32 %v10227_v53, %v5054_v31 }
 0x80e   : > { %v5058_v28 = vshrl.u32 %v10226_v26, %v5055_v58  ;;  %v5061_v34 = vshrl.u32 %v10227_v53, %v5055_v58  ;;  %v5064_v11 = vshrl.u32 %v10221_v25, %v5055_v58  ;;  %v5066_v56 = vshll.u32 %v10221_v25, %v5054_v31 }
 0x80f   : > { %v5067_v4 = vshrl.u32 %v10273_v9, %v5055_v58  ;;  %v5069_v18 = vshll.u32 %v10273_v9, %v5054_v31  ;;  %v5070_v2 = vshrl.u32 %v10274_v35, %v5055_v58  ;;  %v4994_v44 = vadd.s32 1, %v9527_v61 }
 0x810   : > { %v5059_v5 = vor.u32 %v5058_v28, %v5057_v27  ;;  %v5062_v32 = vor.u32 %v5061_v34, %v5060_v41  ;;  %v5065_v22 = vor.u32 %v5064_v11, %v5063_v7  ;;  %vm4993_vm5 = vc.u32 %v9536_v37, %v9526_v16 }
 0x811   : > { %v5068_v0 = vor.u32 %v5067_v4, %v5066_v56  ;;  %v5071_v24 = vor.u32 %v5070_v2, %v5069_v18  ;;  %vm5072_vm0 = vcmp.lt.s32.totalorder %v5053_v19, 1  ;;  %vm5075_vm1 = vcmp.lt.s32.totalorder %v5053_v19, 4 }
 0x812   : > { %v5080_v51 = vsel %vm5072_vm0, %v5059_v5, %v5062_v32  ;;  %v5088_v52 = vshll.u32 %v5048_v48, 8  ;;  %v5664_v23 = vadd.s32 4294967169, %v5148_v62  ;;  %v5056_v49 = vshrl.u32 %v10229_v1, %v5055_v58 }
 0x813   : > { %vm5074_vm10 = vcmp.lt.s32.totalorder %v5053_v19, 3  ;;  %v5077_v31 = vsel %vm5075_vm1, %v5065_v22, 2102212464  ;;  %v5081_v6 = vsel %vm5075_vm1, %v5068_v0, 920167782  ;;  %v4995_v55 = vsel %vm4993_vm5, %v4994_v44, %v9527_v61 }
 0x814   : > { %vm5073_vm11 = vcmp.lt.s32.totalorder %v5053_v19, 2  ;;  %v5082_v27 = vsel %vm5074_vm10, %v5065_v22, %v5081_v6  ;;  %v5084_v41 = vsel %vm5072_vm0, %v5062_v32, %v5065_v22  ;;  %v4991_v28 = vmul.u32 %v9520_v12, %v4975_v21 }
 0x815   : > { %v5076_v34 = vsel %vm5072_vm0, %v5056_v49, %v5059_v5  ;;  %v5083_v7 = vsel %vm5073_vm11, %v5080_v51, %v5082_v27  ;;  %v5085_v11 = vsel %vm5075_vm1, %v5071_v24, 1326507024  ;;  %v5078_v56 = vsel %vm5074_vm10, %v5062_v32, %v5077_v31 }
 0x816   : > { %v5086_v4 = vsel %vm5074_vm10, %v5068_v0, %v5085_v11  ;;  %v9569_v48 = vmul.u32.u64.low %v5088_v52, %v5083_v7  ;;  %v9570_v62 = vmul.u32.u64.high %v5088_v52, %v5083_v7, %v9569_v48  ;;  %v9573_v58 = vadd.s32 %v4995_v55, %v4991_v28 }
 0x817   : > { %v5087_v18 = vsel %vm5073_vm11, %v5084_v41, %v5086_v4  ;;  %v5154_v61 = vadd.s32 1, %v5664_v23  ;;  %v4419_v6 = vand.u32 2139095040, %v9546_v38  ;;  %v5346_v2 = vunpack.c.0.s8 %v9539_v36 }
 0x818   : > { %v10380_v12 = vlaneseq  ;;  %v9579_v21 = vmul.u32.u64.low %v5088_v52, %v5087_v18  ;;  %v9580_v51 = vmul.u32.u64.high %v5088_v52, %v5087_v18, %v9579_v21  ;;  %v4700_v44 = vsub.s32 4294967266, %v9541_v20 }
 0x819   : > { %v5079_v5 = vsel %vm5073_vm11, %v5076_v34, %v5078_v56  ;;  %vm5155_vm14 = vcmp.gt.s32.totalorder %v5154_v61, 0  ;;  %v5649_v55 = vmin.u32 %v4794_v42, %v9514_v57  ;;  %v5098_v32 = vadd.s32 1, %v9570_v62 }
 0x81a   : > { %v5348_v49 = vshrl.u32 %v10380_v12, 7  ;;  %v10185_v23 = vand.u32 2147483647, %v9512_v3  ;;  %v5156_v22 = vsel %vm5155_vm14, %v5154_v61, 0  ;;  %v4895_v0 = vshll.u32 %v9548_v13, 30 }
 0x81b   : > { %v4997_v36 = vadd.s32 536870912, %v9573_v58  ;;  %v4420_v24 = vshrl.u32 %v4419_v6, 23  ;;  %v5095_v27 = vmul.u32 %v5088_v52, %v5079_v5  ;;  %vm5097_vm6 = vc.u32 %v9580_v51, %v9569_v48 }
 0x81c   : > { %v9589_v31 = vsub.s32 %v5346_v2, %v5348_v49  ;;  %v5158_v19 = vand.u32 31, %v5156_v22  ;;  %v9595_v42 = vadd.s32 %v9307_v10, %v9312_v40  ;;  %v9598_v28 = vadd.s32 127, %v4700_v44 }
 0x81d   : > { %v5099_v34 = vsel %vm5097_vm6, %v5098_v32, %v9570_v62  ;;  %v4796_v7 = vclz %v5649_v55  ;;  %v5151_v52 = vand.u32 8388607, %v10185_v23  ;;  %v9606_v4 = vsub.s32 %v9500_v14, %v4895_v0 }
 0x81e   : > { %v9601_v11 = vadd.s32 %v5099_v34, %v5095_v27  ;;  %v5159_v56 = vsub.s32 32, %v5158_v19  ;;  %v9608_v18 = vshrl.u32 %v4997_v36, 30  ;;  %v5157_v10 = vshrl.u32 %v5156_v22, 5 }
 0x81f   : > { %v5636_v40 = vadd.s32 4294967169, %v4420_v24  ;;  %v5161_v61 = vshll.u32 %v10229_v1, %v5158_v19  ;;  %v5164_v62 = vshll.u32 %v10226_v26, %v5158_v19  ;;  %v5167_v49 = vshll.u32 %v10227_v53, %v5158_v19 }
 0x820   : > { %10381 = vst [vmem:[#allocation17_spill] sm:$0xff] %v9608_v18  ;;  %v5162_v6 = vshrl.u32 %v10226_v26, %v5159_v56  ;;  %v5165_v2 = vshrl.u32 %v10227_v53, %v5159_v56  ;;  %v5168_v21 = vshrl.u32 %v10221_v25, %v5159_v56  ;;  %v5170_v44 = vshll.u32 %v10221_v25, %v5158_v19 }
 0x821   : > { %v5171_v14 = vshrl.u32 %v10273_v9, %v5159_v56  ;;  %v5101_v5 = vadd.s32 536870912, %v9601_v11  ;;  %v5152_v55 = vor.u32 8388608, %v5151_v52  ;;  %v5173_v24 = vshll.u32 %v10273_v9, %v5158_v19 }
 0x822   : > { %v5163_v32 = vor.u32 %v5162_v6, %v5161_v61  ;;  %v5166_v22 = vor.u32 %v5165_v2, %v5164_v62  ;;  %v5169_v0 = vor.u32 %v5168_v21, %v5167_v49  ;;  %v5174_v27 = vshrl.u32 %v10274_v35, %v5159_v56 }
 0x823   : > { %v5172_v36 = vor.u32 %v5171_v14, %v5170_v44  ;;  %v5650_v34 = vadd.s32 4294967294, %v4796_v7  ;;  %v4898_v23 = vsub.s32 0, %v9606_v4  ;;  %v4426_v45 = vadd.s32 1, %v5636_v40 }
 0x824   : > { %v4999_v12 = vshll.u32 %v9608_v18, 30  ;;  %v5175_v3 = vor.u32 %v5174_v27, %v5173_v24  ;;  %vm5176_vm9 = vcmp.lt.s32.totalorder %v5157_v10, 1  ;;  %vm5179_vm8 = vcmp.lt.s32.totalorder %v5157_v10, 4 }
 0x825   : > { %v9624_v52 = vshrl.u32 %v5101_v5, 30  ;;  %v5181_v61 = vsel %vm5179_vm8, %v5169_v0, 2102212464  ;;  %v5184_v6 = vsel %vm5176_vm9, %v5163_v32, %v5166_v22  ;;  %v5192_v62 = vshll.u32 %v5152_v55, 8 }
 0x826   : > { %v5160_v19 = vshrl.u32 %v10229_v1, %v5159_v56  ;;  %vm5178_vm7 = vcmp.lt.s32.totalorder %v5157_v10, 3  ;;  %v5185_v2 = vsel %vm5179_vm8, %v5172_v36, 920167782  ;;  %v5188_v7 = vsel %vm5176_vm9, %v5166_v22, %v5169_v0 }
 0x827   : > { %10382 = vst [vmem:[#allocation5_spill] sm:$0xff] %v9624_v52  ;;  %vm5177_vm15 = vcmp.lt.s32.totalorder %v5157_v10, 2  ;;  %v5186_v49 = vsel %vm5178_vm7, %v5169_v0, %v5185_v2  ;;  %v5189_v21 = vsel %vm5179_vm8, %v5175_v3, 1326507024  ;;  %vm4427_vm12 = vcmp.gt.s32.totalorder %v4426_v45, 0 }
 0x828   : > { %v5180_v40 = vsel %vm5176_vm9, %v5160_v19, %v5163_v32  ;;  %v5182_v44 = vsel %vm5178_vm7, %v5166_v22, %v5181_v61  ;;  %v5187_v14 = vsel %vm5177_vm15, %v5184_v6, %v5186_v49  ;;  %v5190_v24 = vsel %vm5178_vm7, %v5172_v36, %v5189_v21 }
 0x829   : > { %v5103_v5 = vshll.u32 %v9624_v52, 30  ;;  %v5191_v27 = vsel %vm5177_vm15, %v5188_v7, %v5190_v24  ;;  %v9630_v41 = vmul.u32.u64.low %v5192_v62, %v5187_v14  ;;  %v9631_v55 = vmul.u32.u64.high %v5192_v62, %v5187_v14, %v9630_v41 }
 0x82a   : > { %vm5651_vm13 = vcmp.lt.s32.totalorder %v5650_v34, 0  ;;  %v9634_v56 = vmul.u32.u64.low %v5192_v62, %v5191_v27  ;;  %v9635_v18 = vmul.u32.u64.high %v5192_v62, %v5191_v27, %v9634_v56  ;;  %v4428_v0 = vsel %vm4427_vm12, %v4426_v45, 0 }
 0x82b   : > { %v5653_v3 = vmin.u32 %v4898_v23, %v9606_v4  ;;  %v9639_v32 = vsub.s32 %v9573_v58, %v4999_v12  ;;  %v5183_v22 = vsel %vm5177_vm15, %v5180_v40, %v5182_v44  ;;  %v4430_v36 = vand.u32 31, %v4428_v0 }
 0x82c   : > { %v10383_v19 = vsub.s32 32, %v9541_v20  ;;  %v9652_v45 = vsub.s32 %v9601_v11, %v5103_v5  ;;  %v5202_v58 = vadd.s32 1, %v9631_v55  ;;  %v10384_v12 = vand.u32 2147483647, %v9546_v38 }
 0x82d   : > { %v4431_v10 = vsub.s32 32, %v4430_v36  ;;  %v9659_v49 = vsel %vm5651_vm13, 0, %v5650_v34  ;;  %v5199_v21 = vmul.u32 %v5192_v62, %v5183_v22  ;;  %vm5201_vm2 = vc.u32 %v9635_v18, %v9630_v41 }
 0x82e   : > { %v9649_v2 = vshrl.u32 %v9595_v42, %v10383_v19  ;;  %v4423_v23 = vand.u32 8388607, %v10384_v12  ;;  %v4900_v42 = vclz %v5653_v3  ;;  %v5002_v40 = vsub.s32 0, %v9639_v32 }
 0x82f   : > { %v5203_v11 = vsel %vm5201_vm2, %v5202_v58, %v9631_v55  ;;  %v4434_v44 = vshrl.u32 %v10226_v26, %v4431_v10  ;;  %v4433_v24 = vshll.u32 %v10229_v1, %v4430_v36  ;;  %v4437_v5 = vshrl.u32 %v10227_v53, %v4431_v10 }
 0x830   : > { %v5204_v14 = vadd.s32 %v5203_v11, %v5199_v21  ;;  %v4440_v27 = vshrl.u32 %v10221_v25, %v4431_v10  ;;  %v5106_v34 = vsub.s32 0, %v9652_v45  ;;  %v4424_v62 = vor.u32 8388608, %v4423_v23 }
 0x831   : > { %v4436_v56 = vshll.u32 %v10226_v26, %v4430_v36  ;;  %v4439_v3 = vshll.u32 %v10227_v53, %v4430_v36  ;;  %v4429_v19 = vshrl.u32 %v4428_v0, 5  ;;  %v4435_v12 = vor.u32 %v4434_v44, %v4433_v24 }
 0x832   : > { %v5205_v22 = vadd.s32 536870912, %v5204_v14  ;;  %v9674_v55 = vadd.f32 %v9239_v33, %v9266_v30  ;;  %v4442_v11 = vshll.u32 %v10221_v25, %v4430_v36  ;;  %v4443_v7 = vshrl.u32 %v10273_v9, %v4431_v10 }
 0x833   : > { %v4438_v58 = vor.u32 %v4437_v5, %v4436_v56  ;;  %v4441_v21 = vor.u32 %v4440_v27, %v4439_v3  ;;  %v5654_v6 = vadd.s32 4294967294, %v4900_v42  ;;  %v4445_v23 = vshll.u32 %v10273_v9, %v4430_v36 }
 0x834   : > { %v9678_v61 = vshrl.u32 %v5205_v22, 30  ;;  %v4446_v52 = vshrl.u32 %v10274_v35, %v4431_v10  ;;  %v5657_v0 = vmin.u32 %v5002_v40, %v9639_v32  ;;  %v5661_v44 = vmin.u32 %v5106_v34, %v9652_v45 }
 0x835   : > { %v4444_v24 = vor.u32 %v4443_v7, %v4442_v11  ;;  %v4464_v33 = vshll.u32 %v4424_v62, 8  ;;  %vm4448_vm4 = vcmp.lt.s32.totalorder %v4429_v19, 1  ;;  %vm4451_vm5 = vcmp.lt.s32.totalorder %v4429_v19, 4 }
 0x836   : > { %10385 = vst [vmem:[#allocation6_spill] sm:$0xff] %v9678_v61  ;;  %v5207_v30 = vshll.u32 %v9678_v61, 30  ;;  %v4447_v5 = vor.u32 %v4446_v52, %v4445_v23  ;;  %v4432_v27 = vshrl.u32 %v10229_v1, %v4431_v10  ;;  %v4453_v42 = vsel %vm4451_vm5, %v4441_v21, 2102212464 }
 0x837   : > { %v4456_v56 = vsel %vm4448_vm4, %v4435_v12, %v4438_v58  ;;  %v4523_v3 = vand.u32 2139095040, %v9674_v55  ;;  %vm4450_vm0 = vcmp.lt.s32.totalorder %v4429_v19, 3  ;;  %v4457_v22 = vsel %vm4451_vm5, %v4444_v24, 920167782 }
 0x838   : > { %v9687_v36 = vsub.s32 %v5204_v14, %v5207_v30  ;;  %v4460_v40 = vsel %vm4448_vm4, %v4438_v58, %v4441_v21  ;;  %vm4449_vm1 = vcmp.lt.s32.totalorder %v4429_v19, 2  ;;  %v4452_v34 = vsel %vm4448_vm4, %v4432_v27, %v4435_v12 }
 0x839   : > { %v4458_v7 = vsel %vm4450_vm0, %v4441_v21, %v4457_v22  ;;  %v4461_v62 = vsel %vm4451_vm5, %v4447_v5, 1326507024  ;;  %v4454_v52 = vsel %vm4450_vm0, %v4438_v58, %v4453_v42  ;;  %vm5655_vm10 = vcmp.lt.s32.totalorder %v5654_v6, 0 }
 0x83a   : > { %v5210_v11 = vsub.s32 0, %v9687_v36  ;;  %v4459_v23 = vsel %vm4449_vm1, %v4456_v56, %v4458_v7  ;;  %v4462_v61 = vsel %vm4450_vm0, %v4444_v24, %v4461_v62  ;;  %v4804_v14 = vsub.s32 4294967266, %v9659_v49 }
 0x83b   : > { %v4463_v10 = vsel %vm4449_vm1, %v4460_v40, %v4462_v61  ;;  %v9690_v38 = vmul.u32.u64.low %v4464_v33, %v4459_v23  ;;  %v9691_v17 = vmul.u32.u64.high %v4464_v33, %v4459_v23, %v9690_v38  ;;  %v5108_v30 = vclz %v5661_v44 }
 0x83c   : > { %v9695_v43 = vmul.u32.u64.low %v4464_v33, %v4463_v10  ;;  %v9696_v15 = vmul.u32.u64.high %v4464_v33, %v4463_v10, %v9695_v43  ;;  %v10386_v19 = vrot.slane %v9246_v39, %v9589_v31  ;;  %v4455_v58 = vsel %vm4449_vm1, %v4452_v34, %v4454_v52 }
 0x83d   : > { %v4524_v21 = vshrl.u32 %v4523_v3, 23  ;;  %v10387_v61 = vshll.u32 %v9436_v8, %v9541_v20  ;;  %v9708_v5 = vsel %vm5655_vm10, 0, %v5654_v6  ;;  %v5004_v27 = vclz %v5657_v0 }
 0x83e   : > { %v9702_v12 = vrot.slane %v10386_v19, %v9589_v31  ;;  %v5665_v44 = vmin.u32 %v5210_v11, %v9687_v36  ;;  %v10388_v43 = vshll.u32 %v9598_v28, 23  ;;  %v4800_v56 = vsub.s32 32, %v9659_v49 }
 0x83f   : > { %v4699_v24 = vor.u32 %v9649_v2, %v10387_v61  ;;  %v4474_v39 = vadd.s32 1, %v9691_v17  ;;  %v5640_v31 = vadd.s32 4294967169, %v4524_v21  ;;  %v4805_v22 = vadd.s32 127, %v4804_v14 }
 0x840   : > { %v4703_v42 = vor.u32 4788187, %v10388_v43  ;;  %v5662_v3 = vadd.s32 4294967294, %v5108_v30  ;;  %v4471_v40 = vmul.u32 %v4464_v33, %v4455_v58  ;;  %vm4473_vm11 = vc.u32 %v9696_v15, %v9690_v38 }
 0x841   : > { %v4784_v8 = vadd.s32 %v9381_v47, %v9388_v29  ;;  %v4908_v20 = vsub.s32 4294967266, %v9708_v5  ;;  %v4475_v6 = vsel %vm4473_vm11, %v4474_v39, %v9691_v17  ;;  %v4530_v28 = vadd.s32 1, %v5640_v31 }
 0x842   : > { %v5658_v2 = vadd.s32 4294967294, %v5004_v27  ;;  %v5212_v0 = vclz %v5665_v44  ;;  %v4476_v34 = vadd.s32 %v4475_v6, %v4471_v40  ;;  %v4520_v7 = vand.u32 2147483647, %v9674_v55 }
 0x843   : > { %v4704_v62 = vand.u32 2147483647, %v4703_v42  ;;  %v4706_v11 = vcvt.s32.f32 %v4699_v24  ;;  %v4710_v33 = vsub.s32 4, %v9400_v59  ;;  %vm4531_vm14 = vcmp.gt.s32.totalorder %v4530_v28, 0 }
 0x844   : > { %v4802_v52 = vshrl.u32 %v4784_v8, %v4800_v56  ;;  %v4806_v23 = vshll.u32 %v4805_v22, 23  ;;  %vm5663_vm6 = vcmp.lt.s32.totalorder %v5662_v3, 0  ;;  %v4477_v10 = vadd.s32 536870912, %v4476_v34 }
 0x845   : > { %v4801_v47 = vshll.u32 %v9514_v57, %v9659_v49  ;;  %v4904_v29 = vsub.s32 32, %v9708_v5  ;;  %v9726_v17 = vadd.s32 127, %v4908_v20  ;;  %v4532_v14 = vsel %vm4531_vm14, %v4530_v28, 0 }
 0x846   : > { %vm5659_vm9 = vcmp.lt.s32.totalorder %v5658_v2, 0  ;;  %v5666_v30 = vadd.s32 4294967294, %v5212_v0  ;;  %v9728_v19 = vshrl.u32 %v4477_v10, 30  ;;  %v4527_v58 = vand.u32 8388607, %v4520_v7 }
 0x847   : > { %v9732_v21 = vmul.f32 %v4706_v11, %v4704_v62  ;;  %v4888_v61 = vadd.s32 %v9445_v50, %v9450_v60  ;;  %v9736_v24 = vsel %vm5663_vm6, 0, %v5662_v3  ;;  %v4534_v57 = vand.u32 31, %v4532_v14 }
 0x848   : > { %v9738_v49 = vor.u32 %v4802_v52, %v4801_v47  ;;  %v9740_v27 = vor.u32 4788187, %v4806_v23  ;;  %v4905_v44 = vshll.u32 %v9606_v4, %v9708_v5  ;;  %v4479_v43 = vshll.u32 %v9728_v19, 30 }
 0x849   : > { %v4906_v42 = vshrl.u32 %v4888_v61, %v4904_v29  ;;  %v4910_v56 = vshll.u32 %v9726_v17, 23  ;;  %v9746_v39 = vsel %vm5659_vm9, 0, %v5658_v2  ;;  %v4535_v31 = vsub.s32 32, %v4534_v57 }
 0x84a   : > { %v5116_v50 = vsub.s32 4294967266, %v9736_v24  ;;  %vm5667_vm8 = vcmp.lt.s32.totalorder %v5666_v30, 0  ;;  %v9749_v60 = vsub.s32 %v4476_v34, %v4479_v43  ;;  %v4528_v22 = vor.u32 8388608, %v4527_v58 }
 0x84b   : > { %v4537_v3 = vshll.u32 %v10229_v1, %v4534_v57  ;;  %v4538_v40 = vshrl.u32 %v10226_v26, %v4535_v31  ;;  %v4540_v4 = vshll.u32 %v10226_v26, %v4534_v57  ;;  %v4541_v5 = vshrl.u32 %v10227_v53, %v4535_v31 }
 0x84c   : > { %v4482_v8 = vsub.s32 0, %v9749_v60  ;;  %v4533_v20 = vshrl.u32 %v4532_v14, 5  ;;  %v4543_v6 = vshll.u32 %v10227_v53, %v4534_v57  ;;  %v4544_v28 = vshrl.u32 %v10221_v25, %v4535_v31 }
 0x84d   : > { %v4539_v2 = vor.u32 %v4538_v40, %v4537_v3  ;;  %v4542_v0 = vor.u32 %v4541_v5, %v4540_v4  ;;  %v4546_v34 = vshll.u32 %v10221_v25, %v4534_v57  ;;  %v4547_v62 = vshrl.u32 %v10273_v9, %v4535_v31 }
 0x84e   : > { %v5012_v11 = vsub.s32 4294967266, %v9746_v39  ;;  %v5117_v52 = vadd.s32 127, %v5116_v50  ;;  %v5637_v26 = vmin.u32 %v4482_v8, %v9749_v60  ;;  %v4545_v23 = vor.u32 %v4544_v28, %v4543_v6 }
 0x84f   : > { %v4548_v10 = vor.u32 %v4547_v62, %v4546_v34  ;;  %v4549_v47 = vshll.u32 %v10273_v9, %v4534_v57  ;;  %v4550_v29 = vshrl.u32 %v10274_v35, %v4535_v31  ;;  %v4568_v53 = vshll.u32 %v4528_v22, 8 }
 0x850   : > { %v9765_v17 = vsel %vm5667_vm8, 0, %v5666_v30  ;;  %v4484_v14 = vclz %v5637_v26  ;;  %vm4552_vm7 = vcmp.lt.s32.totalorder %v4533_v20, 1  ;;  %vm4555_vm15 = vcmp.lt.s32.totalorder %v4533_v20, 4 }
 0x851   : > { %v4536_v25 = vshrl.u32 %v10229_v1, %v4535_v31  ;;  %v4551_v58 = vor.u32 %v4550_v29, %v4549_v47  ;;  %v4557_v61 = vsel %vm4555_vm15, %v4545_v23, 2102212464  ;;  %v4560_v43 = vsel %vm4552_vm7, %v4539_v2, %v4542_v0 }
 0x852   : > { %v5638_v50 = vadd.s32 4294967294, %v4484_v14  ;;  %vm4553_vm12 = vcmp.lt.s32.totalorder %v4533_v20, 2  ;;  %vm4554_vm13 = vcmp.lt.s32.totalorder %v4533_v20, 3  ;;  %v4561_v3 = vsel %vm4555_vm15, %v4548_v10, 920167782 }
 0x853   : > { %v4556_v40 = vsel %vm4552_vm7, %v4536_v25, %v4539_v2  ;;  %v4562_v9 = vsel %vm4554_vm13, %v4545_v23, %v4561_v3  ;;  %v4564_v57 = vsel %vm4552_vm7, %v4542_v0, %v4545_v23  ;;  %v4565_v35 = vsel %vm4555_vm15, %v4551_v58, 1326507024 }
 0x854   : > { %vm5639_vm2 = vcmp.lt.s32.totalorder %v5638_v50, 0  ;;  %v4558_v22 = vsel %vm4554_vm13, %v4542_v0, %v4557_v61  ;;  %v4563_v30 = vsel %vm4553_vm12, %v4560_v43, %v4562_v9  ;;  %v4566_v4 = vsel %vm4554_vm13, %v4548_v10, %v4565_v35 }
 0x855   : > { %v9769_v5 = vsel %vm5639_vm2, 0, %v5638_v50  ;;  %v4567_v1 = vsel %vm4553_vm12, %v4564_v57, %v4566_v4  ;;  %v9772_v31 = vmul.u32.u64.low %v4568_v53, %v4563_v30  ;;  %v9773_v8 = vmul.u32.u64.high %v4568_v53, %v4563_v30, %v9772_v31 }
 0x856   : > { %v4907_v6 = vor.u32 %v4906_v42, %v4905_v44  ;;  %v4911_v28 = vor.u32 4788187, %v4910_v56  ;;  %v5220_v2 = vsub.s32 4294967266, %v9765_v17  ;;  %v4492_v34 = vsub.s32 4294967266, %v9769_v5 }
 0x857   : > { %v4810_v62 = vcvt.s32.f32 %v9738_v49  ;;  %v5112_v0 = vsub.s32 32, %v9736_v24  ;;  %v9780_v26 = vmul.u32.u64.low %v4568_v53, %v4567_v1  ;;  %v9781_v23 = vmul.u32.u64.high %v4568_v53, %v4567_v1, %v9780_v26 }
 0x858   : > { %v4808_v10 = vand.u32 2147483647, %v9740_v27  ;;  %v4992_v47 = vadd.s32 %v9526_v16, %v9536_v37  ;;  %v5013_v29 = vadd.s32 127, %v5012_v11  ;;  %v4559_v44 = vsel %vm4553_vm12, %v4556_v40, %v4558_v22 }
 0x859   : > { %v5096_v42 = vadd.s32 %v9569_v48, %v9580_v51  ;;  %v5118_v56 = vshll.u32 %v5117_v52, 23  ;;  %v4493_v14 = vadd.s32 127, %v4492_v34  ;;  %v4578_v49 = vadd.s32 1, %v9773_v8 }
 0x85a   : > { %v4912_v25 = vand.u32 2147483647, %v4911_v28  ;;  %v4914_v58 = vcvt.s32.f32 %v4907_v6  ;;  %v5008_v61 = vsub.s32 32, %v9746_v39  ;;  %v5221_v43 = vadd.s32 127, %v5220_v2 }
 0x85b   : > { %vm4626_vm4 = vcmp.lt.s32.totalorder %v9250_v54, 0  ;;  %v5114_v27 = vshrl.u32 %v5096_v42, %v5112_v0  ;;  %v4488_v16 = vsub.s32 32, %v9769_v5  ;;  %v4575_v37 = vmul.u32 %v4568_v53, %v4559_v44 }
 0x85c   : > { %vm4577_vm5 = vc.u32 %v9781_v23, %v9772_v31  ;;  %v5014_v20 = vshll.u32 %v5013_v29, 23  ;;  %v5113_v48 = vshll.u32 %v9652_v45, %v9736_v24  ;;  %v5216_v51 = vsub.s32 32, %v9765_v17 }
 0x85d   : > { %v4579_v11 = vsel %vm4577_vm5, %v4578_v49, %v9773_v8  ;;  %vm4730_vm0 = vcmp.lt.s32.totalorder %v9252_v63, 0  ;;  %v5119_v52 = vor.u32 4788187, %v5118_v56  ;;  %v4472_v50 = vadd.s32 %v9690_v38, %v9696_v15 }
 0x85e   : > { %v4494_v3 = vshll.u32 %v4493_v14, 23  ;;  %v4580_v40 = vadd.s32 %v4579_v11, %v4575_v37  ;;  %v10389_v53 = vand.u32 2147483647, %v9250_v54  ;;  %v4811_v57 = vmul.f32 %v4810_v62, %v4808_v10 }
 0x85f   : > { %vm4834_vm10 = vcmp.lt.s32.totalorder %v9264_v46, 0  ;;  %v5010_v45 = vshrl.u32 %v4992_v47, %v5008_v61  ;;  %v5200_v24 = vadd.s32 %v9630_v41, %v9635_v18  ;;  %v5222_v35 = vshll.u32 %v5221_v43, 23 }
 0x860   : > { %vm9804_vm1 = vcmp.le.f32.partialorder %v10389_v53, 0.7853982  ;;  %v4915_v22 = vmul.f32 %v4914_v58, %v4912_v25  ;;  %v5115_v30 = vor.u32 %v5114_v27, %v5113_v48  ;;  %v4490_v4 = vshrl.u32 %v4472_v50, %v4488_v16  ;;  %v10400_v53 = vld [vmem:[#allocation13_spill] sm:$0xff] }
 0x861   : > { %v4581_v15 = vadd.s32 536870912, %v4580_v40  ;;  %v4708_v38 = vxor.u32 2147483648, %v9732_v21  ;;  %v5009_v1 = vshll.u32 %v9639_v32, %v9746_v39  ;;  %v5015_v8 = vor.u32 4788187, %v5014_v20 }
 0x862   : > { %v5218_v6 = vshrl.u32 %v5200_v24, %v5216_v51  ;;  %v5120_v28 = vand.u32 2147483647, %v5119_v52  ;;  %v4489_v2 = vshll.u32 %v9749_v60, %v9769_v5  ;;  %v4495_v34 = vor.u32 4788187, %v4494_v3  ;;  %v10399_v51 = vld [vmem:[#allocation8_spill] sm:$0xff] }
 0x863   : > { %v9816_v62 = vshrl.u32 %v4581_v15, 30  ;;  %v4812_v41 = vxor.u32 2147483648, %v4811_v57  ;;  %v5011_v18 = vor.u32 %v5010_v45, %v5009_v1  ;;  %v5217_v0 = vshll.u32 %v9687_v36, %v9765_v17  ;;  %v10404_v15 = vld [vmem:[#allocation19_spill] sm:$0xff] }
 0x864   : > { %v5223_v26 = vor.u32 4788187, %v5222_v35  ;;  %v4916_v10 = vxor.u32 2147483648, %v4915_v22  ;;  %v5122_v47 = vcvt.s32.f32 %v5115_v30  ;;  %v4491_v29 = vor.u32 %v4490_v4, %v4489_v2 }
 0x865   : > { %v4583_v32 = vshll.u32 %v9816_v62, 30  ;;  %v4709_v39 = vsel %vm4626_vm4, %v4708_v38, %v9732_v21  ;;  %v10392_v60 = vand.u32 2147483647, %v9264_v46  ;;  %v5016_v44 = vand.u32 2147483647, %v5015_v8 }
 0x866   : > { %v5219_v42 = vor.u32 %v5218_v6, %v5217_v0  ;;  %v9835_v36 = vsel %vm4626_vm4, %v4710_v33, %v9400_v59  ;;  %v5123_v17 = vmul.f32 %v5122_v47, %v5120_v28  ;;  %v4496_v56 = vand.u32 2147483647, %v4495_v34  ;;  %v10395_v59 = vld [vmem:[#allocation20_spill] sm:$0xff] }
 0x867   : > { %vm9826_vm11 = vcmp.le.f32.partialorder %v10392_v60, 0.7853982  ;;  %v9837_v14 = vsub.s32 %v4580_v40, %v4583_v32  ;;  %v4813_v21 = vsel %vm4730_vm0, %v4812_v41, %v4811_v57  ;;  %v4918_v49 = vsub.s32 4, %v9548_v13 }
 0x868   : > { %v5018_v25 = vcvt.s32.f32 %v5011_v18  ;;  %v5224_v58 = vand.u32 2147483647, %v5223_v26  ;;  %v4712_v61 = vsel %vm9804_vm1, %v9250_v54, %v4709_v39  ;;  %v4917_v43 = vsel %vm4834_vm10, %v4916_v10, %v4915_v22  ;;  %v10409_v26 = vld [vmem:[#allocation5_spill] sm:$0xff] }
 0x869   : > { %vm4938_vm14 = vcmp.lt.s32.totalorder %v10395_v59, 0  ;;  %v4498_v33 = vcvt.s32.f32 %v4491_v29  ;;  %v4586_v27 = vsub.s32 0, %v9837_v14  ;;  %v5226_v37 = vcvt.s32.f32 %v5219_v42 }
 0x86a   : > { %v5019_v16 = vmul.f32 %v5018_v25, %v5016_v44  ;;  %v10396_v20 = vand.u32 2147483647, %v9252_v63  ;;  %v4814_v11 = vsub.s32 4, %v10399_v51  ;;  %v5124_v52 = vxor.u32 2147483648, %v5123_v17 }
 0x86b   : > { %v4499_v50 = vmul.f32 %v4498_v33, %v4496_v56  ;;  %v5641_v3 = vmin.u32 %v4586_v27, %v9837_v14  ;;  %6076 = vcosq.f32 %v4712_v61  ;;  %v10401_v57 = vand.u32 2147483647, %v10400_v53  ;;  %v10413_v33 = vld [vmem:[#allocation17_spill] sm:$0xff] }
 0x86c   : > { %vm9851_vm6 = vcmp.le.f32.partialorder %v10396_v20, 0.7853982  ;;  %vm5042_vm8 = vcmp.lt.s32.totalorder %v10400_v53, 0  ;;  %v5227_v24 = vmul.f32 %v5226_v37, %v5224_v58  ;;  %6078 = vsinq.f32 %v4712_v61 }
 0x86d   : > { %v4816_v40 = vsel %vm9851_vm6, %v9252_v63, %v4813_v21  ;;  %vm9862_vm9 = vcmp.le.f32.partialorder %v10401_v57, 0.7853982  ;;  %v9870_v35 = vsel %vm4834_vm10, %v4918_v49, %v9548_v13  ;;  %v4920_v22 = vsel %vm9826_vm11, %v9264_v46, %v4917_v43  ;;  %v10405_v13 = vld [vmem:[#allocation10_spill] sm:$0xff] }
 0x86e   : > { %v4588_v30 = vclz %v5641_v3  ;;  %v5020_v4 = vxor.u32 2147483648, %v5019_v16  ;;  %vm4418_vm7 = vcmp.lt.s32.totalorder %v10404_v15, 0  ;;  %v4815_v38 = vsel %vm4730_vm0, %v4814_v11, %v10399_v51 }
 0x86f   : > { %6080 = vcosq.f32 %v4816_v40  ;;  %v5125_v1 = vsel %vm5042_vm8, %v5124_v52, %v5123_v17  ;;  %v4500_v8 = vxor.u32 2147483648, %v4499_v50  ;;  %vm5146_vm15 = vcmp.lt.s32.totalorder %v10405_v13, 0 }
 0x870   : > { %v5642_v6 = vadd.s32 4294967294, %v4588_v30  ;;  %6082 = vsinq.f32 %v4816_v40  ;;  %v5228_v28 = vxor.u32 2147483648, %v5227_v24  ;;  %v4502_v2 = vsub.s32 4, %v9728_v19  ;;  %v10417_v40 = vld [vmem:[#allocation6_spill] sm:$0xff] }
 0x871   : > { %6084 = vcosq.f32 %v4920_v22  ;;  %v10406_v34 = vand.u32 2147483647, %v10404_v15  ;;  %v4817_v18 = vsel %vm9851_vm6, 0, %v4815_v38  ;;  %v5021_v0 = vsel %vm4938_vm14, %v5020_v4, %v5019_v16 }
 0x872   : > { %6086 = vsinq.f32 %v4920_v22  ;;  %vm5643_vm13 = vcmp.lt.s32.totalorder %v5642_v6, 0  ;;  %v5126_v10 = vsub.s32 4, %v10409_v26  ;;  %v5128_v47 = vsel %vm9862_vm9, %v10400_v53, %v5125_v1 }
 0x873   : > { %vm9885_vm12 = vcmp.le.f32.partialorder %v10406_v34, 0.7853982  ;;  %v4591_v29 = vsel %vm5643_vm13, 0, %v5642_v6  ;;  %v4501_v32 = vsel %vm4418_vm7, %v4500_v8, %v4499_v50  ;;  %v4576_v39 = vadd.s32 %v9772_v31, %v9781_v23 }
 0x874   : > { %v4592_v60 = vsub.s32 32, %v4591_v29  ;;  %v4596_v44 = vsub.s32 4294967266, %v4591_v29  ;;  %v5229_v42 = vsel %vm5146_vm15, %v5228_v28, %v5227_v24  ;;  %v4503_v17 = vsel %vm4418_vm7, %v4502_v2, %v9728_v19 }
 0x875   : > { %v4821_v56 = vadd.s32 3, %v4817_v18  ;;  %v10410_v21 = vand.u32 2147483647, %v10395_v59  ;;  %v4593_v31 = vshll.u32 %v9837_v14, %v4591_v29  ;;  %v9917_v61 = vpop.eup %6076  ;;  %6088 = vcosq.f32 %v5128_v47 }
 0x876   : > { %v4594_v23 = vshrl.u32 %v4576_v39, %v4592_v60  ;;  %v4597_v25 = vadd.s32 127, %v4596_v44  ;;  %v4504_v19 = vsel %vm9885_vm12, %v10404_v15, %v4501_v32  ;;  %v4713_v43 = vsel %vm9804_vm1, 0, %v9835_v36  ;;  %v9928_v14 = vpop.eup %6078 }
 0x877   : > { %vm9909_vm2 = vcmp.le.f32.partialorder %v10410_v21, 0.7853982  ;;  %v5022_v27 = vsub.s32 4, %v10413_v33  ;;  %v4505_v16 = vsel %vm9885_vm12, 0, %v4503_v17  ;;  %v10414_v48 = vand.u32 2147483647, %v10405_v13 }
 0x878   : > { %v5024_v58 = vsel %vm9909_vm2, %v10395_v59, %v5021_v0  ;;  %v4595_v37 = vor.u32 %v4594_v23, %v4593_v31  ;;  %v4598_v20 = vshll.u32 %v4597_v25, 23  ;;  %vm4522_vm5 = vcmp.lt.s32.totalorder %v9674_v55, 0 }
 0x879   : > { %vm9934_vm4 = vcmp.le.f32.partialorder %v10414_v48, 0.7853982  ;;  %v6081_v11 = vpop.eup %6080  ;;  %v4606_v9 = vsub.s32 4, %v9816_v62  ;;  %6090 = vcosq.f32 %v5024_v58  ;;  %v4822_v3 = vand.u32 3, %v4821_v56 }
 0x87a   : > { %v5232_v36 = vsel %vm9934_vm4, %v10405_v13, %v5229_v42  ;;  %v6083_v52 = vpop.eup %6082  ;;  %6092 = vcosq.f32 %v4504_v19  ;;  %v4599_v50 = vor.u32 4788187, %v4598_v20  ;;  %v5230_v57 = vsub.s32 4, %v10417_v40 }
 0x87b   : > { %v9944_v24 = vpop.eup %6084  ;;  %6094 = vsinq.f32 %v4504_v19  ;;  %v4509_v22 = vadd.s32 3, %v4505_v16  ;;  %v4717_v30 = vadd.s32 3, %v4713_v43  ;;  %v5023_v4 = vsel %vm4938_vm14, %v5022_v27, %v10413_v33 }
 0x87c   : > { %v9949_v38 = vpop.eup %6086  ;;  %v4600_v1 = vand.u32 2147483647, %v4599_v50  ;;  %v4602_v8 = vcvt.s32.f32 %v4595_v37  ;;  %6096 = vcosq.f32 %v5232_v36  ;;  %v10418_v6 = vlaneseq }
 0x87d   : > { %v4607_v28 = vsel %vm4522_vm5, %v4606_v9, %v9816_v62  ;;  %v4825_v2 = vxor.u32 2147483648, %v6083_v52  ;;  %v4828_v34 = vxor.u32 2147483648, %v6081_v11  ;;  %6098 = vsinq.f32 %v5232_v36 }
 0x87e   : > { %vm5361_vm0 = vcmp.lt.s32.totalorder %v10418_v6, 256  ;;  %v4603_v41 = vmul.f32 %v4602_v8, %v4600_v1  ;;  %v5025_v18 = vsel %vm9909_vm2, 0, %v5023_v4  ;;  %6100 = vsinq.f32 %v5024_v58 }
 0x87f   : > { %5671 = vst.msk [vmem:[%s9955_s12 + $0x3] ss:$4 sm:$0x3] %vm5361_vm0, %v9702_v12  ;;  %v5231_v0 = vsel %vm5146_vm15, %v5230_v57, %v10417_v40  ;;  %v5127_v62 = vsel %vm5042_vm8, %v5126_v10, %v10409_v26  ;;  %6102 = vsinq.f32 %v5128_v47  ;;  %vm9969_vm1 = vcmp.le.f32.partialorder %v4520_v7, 0.7853982  ;;  %v9976_v44 = vpop.eup %6088 }
 0x880   : > { %v4718_v12 = vand.u32 3, %v4717_v30  ;;  %v4604_v32 = vxor.u32 2147483648, %v4603_v41  ;;  %v4609_v39 = vsel %vm9969_vm1, 0, %v4607_v28  ;;  %vm4824_vm10 = vcmp.eq.s32.totalorder %v4822_v3, 0 }
 0x881   : > { %v4721_v60 = vxor.u32 2147483648, %v9928_v14  ;;  %vm4827_vm14 = vcmp.eq.s32.totalorder %v4822_v3, 2  ;;  %v4724_v26 = vxor.u32 2147483648, %v9917_v61  ;;  %v5029_v10 = vadd.s32 3, %v5025_v18 }
 0x882   : > { %v5233_v7 = vsel %vm9934_vm4, 0, %v5231_v0  ;;  %v4605_v47 = vsel %vm4522_vm5, %v4604_v32, %v4603_v41  ;;  %v4826_v42 = vsel %vm4824_vm10, %v6081_v11, %v4825_v2  ;;  %v4829_v17 = vsel %vm4827_vm14, %v4828_v34, %v6083_v52 }
 0x883   : > { %v9983_v56 = vand.u32 3, %v4509_v22  ;;  %v9985_v21 = vpop.eup %6090  ;;  %v4608_v49 = vsel %vm9969_vm1, %v9674_v55, %v4605_v47  ;;  %v4613_v31 = vadd.s32 3, %v4609_v39  ;;  %vm4720_vm6 = vcmp.eq.s32.totalorder %v4718_v12, 0 }
 0x884   : > { %vm4723_vm8 = vcmp.eq.s32.totalorder %v4718_v12, 2  ;;  %v6093_v23 = vpop.eup %6092  ;;  %6104 = vcosq.f32 %v4608_v49  ;;  %v4722_v25 = vsel %vm4720_vm6, %v9917_v61, %v4721_v60  ;;  %v5237_v58 = vadd.s32 3, %v5233_v7 }
 0x885   : > { %v4921_v19 = vsel %vm9826_vm11, 0, %v9870_v35  ;;  %v6095_v43 = vpop.eup %6094  ;;  %6106 = vsinq.f32 %v4608_v49  ;;  %v4725_v33 = vsel %vm4723_vm8, %v4724_v26, %v9928_v14  ;;  %v9995_v27 = vand.u32 3, %v5029_v10 }
 0x886   : > { %v5129_v16 = vsel %vm9862_vm9, 0, %v5127_v62  ;;  %v6097_v37 = vpop.eup %6096  ;;  %vm4823_vm7 = vcmp.lt.s32.totalorder %v4822_v3, 2  ;;  %vm4512_vm15 = vcmp.eq.s32.totalorder %v9983_v56, 0  ;;  %v4614_v61 = vand.u32 3, %v4613_v31 }
 0x887   : > { %v6099_v20 = vpop.eup %6098  ;;  %v10000_v48 = vsel %vm4823_vm7, %v4826_v42, %v4829_v17  ;;  %vm4511_vm12 = vcmp.lt.s32.totalorder %v9983_v56, 2  ;;  %vm4719_vm11 = vcmp.lt.s32.totalorder %v4718_v12, 2  ;;  %v4925_v5 = vadd.s32 3, %v4921_v19 }
 0x888   : > { %v6101_v35 = vpop.eup %6100  ;;  %vm4515_vm13 = vcmp.eq.s32.totalorder %v9983_v56, 2  ;;  %v4726_v14 = vsel %vm4719_vm11, %v4722_v25, %v4725_v33  ;;  %v5238_v51 = vand.u32 3, %v5237_v58  ;;  %v5133_v11 = vadd.s32 3, %v5129_v16 }
 0x889   : > { %v6103_v45 = vpop.eup %6102  ;;  %v4513_v9 = vxor.u32 2147483648, %v6095_v43  ;;  %v4516_v36 = vxor.u32 2147483648, %v6093_v23  ;;  %vm5031_vm9 = vcmp.lt.s32.totalorder %v9995_v27, 2  ;;  %vm5032_vm2 = vcmp.eq.s32.totalorder %v9995_v27, 0 }
 0x88a   : > { %vm5035_vm4 = vcmp.eq.s32.totalorder %v9995_v27, 2  ;;  %vm4508_vm5 = vweird.f32 %v10404_v15  ;;  %v5036_v52 = vxor.u32 2147483648, %v9985_v21  ;;  %v5241_v50 = vxor.u32 2147483648, %v6099_v20 }
 0x88b   : > { %v5244_v3 = vxor.u32 2147483648, %v6097_v37  ;;  %v4929_v40 = vxor.u32 2147483648, %v9949_v38  ;;  %vm4612_vm0 = vweird.f32 %v9674_v55  ;;  %vm4615_vm1 = vcmp.lt.s32.totalorder %v4614_v61, 2 }
 0x88c   : > { %vm4820_vm10 = vweird.f32 %v9252_v63  ;;  %v5033_v57 = vxor.u32 2147483648, %v6101_v35  ;;  %v4926_v22 = vand.u32 3, %v4925_v5  ;;  %v4932_v30 = vxor.u32 2147483648, %v9944_v24 }
 0x88d   : > { %vm4616_vm6 = vcmp.eq.s32.totalorder %v4614_v61, 0  ;;  %vm5240_vm7 = vcmp.eq.s32.totalorder %v5238_v51, 0  ;;  %v5134_v4 = vand.u32 3, %v5133_v11  ;;  %v5137_v1 = vxor.u32 2147483648, %v6103_v45 }
 0x88e   : > { %v4514_v8 = vsel %vm4512_vm15, %v6093_v23, %v4513_v9  ;;  %v4517_v6 = vsel %vm4515_vm13, %v4516_v36, %v6095_v43  ;;  %vm5243_vm11 = vcmp.eq.s32.totalorder %v5238_v51, 2  ;;  %v5140_v28 = vxor.u32 2147483648, %v9976_v44  ;;  %v6105_v2 = vpop.eup %6104 }
 0x88f   : > { %vm4619_vm3 = vcmp.eq.s32.totalorder %v4614_v61, 2  ;;  %v5037_v34 = vsel %vm5035_vm4, %v5036_v52, %v6101_v35  ;;  %v5242_v41 = vsel %vm5240_vm7, %v6097_v37, %v5241_v50  ;;  %v5245_v18 = vsel %vm5243_vm11, %v5244_v3, %v6099_v20  ;;  %v6107_v0 = vpop.eup %6106 }
 0x890   : > { %v4620_v62 = vxor.u32 2147483648, %v6105_v2  ;;  %v5034_v29 = vsel %vm5032_vm2, %v9985_v21, %v5033_v57  ;;  %vm5239_vm15 = vcmp.lt.s32.totalorder %v5238_v51, 2  ;;  %vm4928_vm8 = vcmp.eq.s32.totalorder %v4926_v22, 0 }
 0x891   : > { %v4617_v12 = vxor.u32 2147483648, %v6107_v0  ;;  %v4518_v32 = vsel %vm4511_vm12, %v4514_v8, %v4517_v6  ;;  %vm5136_vm13 = vcmp.eq.s32.totalorder %v5134_v4, 0  ;;  %vm5139_vm14 = vcmp.eq.s32.totalorder %v5134_v4, 2 }
 0x892   : > { %v4621_v39 = vsel %vm4619_vm3, %v4620_v62, %v6107_v0  ;;  %v5246_v60 = vsel %vm5239_vm15, %v5242_v41, %v5245_v18  ;;  %v5138_v26 = vsel %vm5136_vm13, %v9976_v44, %v5137_v1  ;;  %v5141_v10 = vsel %vm5139_vm14, %v5140_v28, %v6103_v45 }
 0x893   : > { %v4618_v7 = vsel %vm4616_vm6, %v6105_v2, %v4617_v12  ;;  %v5038_v47 = vsel %vm5031_vm9, %v5034_v29, %v5037_v34  ;;  %v4930_v42 = vsel %vm4928_vm8, %v9944_v24, %v4929_v40  ;;  %vm4931_vm2 = vcmp.eq.s32.totalorder %v4926_v22, 2 }
 0x894   : > { %v4622_v17 = vsel %vm4615_vm1, %v4618_v7, %v4621_v39  ;;  %v4519_v56 = vsel %vm4508_vm5, nan, %v4518_v32  ;;  %v4933_v21 = vsel %vm4931_vm2, %v4932_v30, %v9949_v38  ;;  %vm5135_vm3 = vcmp.lt.s32.totalorder %v5134_v4, 2 }
 0x895   : > { %v4623_v44 = vsel %vm4612_vm0, nan, %v4622_v17  ;;  %v4831_v49 = vsel %vm4820_vm10, nan, %v10000_v48  ;;  %vm10421_vm12 = vweird.f32 %v10405_v13  ;;  %v5142_v24 = vsel %vm5135_vm3, %v5138_v26, %v5141_v10 }
 0x896   : > { %v5247_v31 = vsel %vm10421_vm12, nan, %v5246_v60  ;;  %v5718_v23 = vpack.c.bf16 %v4831_v49, %v4623_v44  ;;  %vm10422_vm9 = vweird.f32 %v9250_v54  ;;  %vm5028_vm4 = vweird.f32 %v10395_v59  ;;  %v5248_v54 = vld [vmem:[%s10108_s4] sm:$0x7] }
 0x897   : > { %v4727_v25 = vsel %vm10422_vm9, nan, %v4726_v14  ;;  %vm4927_vm5 = vcmp.lt.s32.totalorder %v4926_v22, 2  ;;  %v5039_v38 = vsel %vm5028_vm4, nan, %v5038_v47  ;;  %vm5132_vm0 = vweird.f32 %v10400_v53  ;;  %v10424_v53 = vld [vmem:[#allocation18_spill] sm:$0xff] }
 0x898   : > { %v5720_v15 = vpack.c.bf16 %v4727_v25, %v4519_v56  ;;  %v4934_v58 = vsel %vm4927_vm5, %v4930_v42, %v4933_v21  ;;  %5719 = vmatprep.subr.bf16.mxu1 %v5718_v23  ;;  %v5722_v55 = vpack.c.bf16 %v5247_v31, %v5039_v38  ;;  %v5143_v63 = vsel %vm5132_vm0, nan, %v5142_v24 }
 0x899   : > { %vm4924_vm1 = vweird.f32 %v9264_v46  ;;  %vm10423_vm10 = vcmask 261120  }
 0x89a   : > { %5721 = vmatpush1.bf16.msra.mxu1 %v5720_v15  ;;  %v4935_v13 = vsel %vm4924_vm1, nan, %v4934_v58 }
 0x89b   : > { %5723 = vmatprep.subr.bf16.mxu1 %v5722_v55  ;;  %v5724_v19 = vpack.c.bf16 %v5143_v63, %v4935_v13 }
 0x89e   : > { %5725 = vmatpush1.bf16.msra.mxu1 %v5724_v19 }
 0x8a1   : > { %5668 = vmatmul.mubr.msk.f32.vlgmr.msra.gmra.mrb[22].mxu1 %vm10423_vm10, %v5248_v54 }
 0x974   : > { %v5319_v59 = vpop.f32.mrb[22].mxu1 }
 0x975   : > { %v5320_v43 = vadd.f32 %v5319_v59, %v10424_v53  ;;  %v5321_v33 = vpop.f32.mrb[23].mxu1 }
 0x976   : > { %v5322_v27 = vadd.f32 %v5321_v33, %v10424_v53 }
 0x977   : > { %v5669_v16 = vmul.f32 -1.442695, %v5320_v43 }
 0x978   : > { %v5670_v46 = vmul.f32 -1.442695, %v5322_v27 }
 0x979   : > { %6108 = vpow2.f32 %v5669_v16 }
 0x97a   : > { %6110 = vpow2.f32 %v5670_v46 }
 0x983   : > { %v6109_v37 = vpop.eup %6108 }
 0x984   : > { %v6111_v20 = vpop.eup %6110  ;;  %v5330_v61 = vadd.f32 1.0, %v6109_v37 }
 0x985   : > { %v5331_v48 = vadd.f32 1.0, %v6111_v20 }
 0x986   : > { %6112 = vrcp.f32 %v5330_v61 }
 0x987   : > { %6114 = vrcp.f32 %v5331_v48 }
 0x990   : > { %v6113_v5 = vpop.eup %6112 }
 0x991   : > { %v6115_v35 = vpop.eup %6114 }
 0x992   : > { %v5338_v14 = vcombine.low %v6113_v5, %v6115_v35 }
 0x994   : > { %5340 = vst [vmem:[%s9955_s12] sm:$0x77] %v5338_v14 }
 0x995   : > { %6131 = shalt.err (!%p6128_p3)
}
 0x996   : > { %s6132_s8 = scalar_lea.hbm %s10059_s25, 128  ;;  %s6136_s11 = scalar_lea.hbm %s10109_s5, 256 }
 0x997   : > { %p6133_p4 = scmp.ne.s32.totalorder %s10059_s25, %s6132_s8  ;;  %p6137_p9 = scmp.lt.u32.totalorder %s10059_s25, %s10109_s5 }
 0x998   : > { %p6138_p10 = scmp.lt.u32.totalorder %s6136_s11, %s6132_s8  ;;  %p6140_p12 = scmp.lt.u32.totalorder %s6132_s8, %s10059_s25 }
 0x999   : > { %p6134_p7 = pnand %p6133_p4, %p6260_p5 }
 0x99a   : > { %p6139_p11 = por %p6138_p10, %p6137_p9 }
 0x99b   : > { %p6135_p8 = pneg %p6134_p7 }
 0x99c   : > { %p6141_p13 = por %p6140_p12, %p6139_p11 }
 0x99e   : > { %p6142_p0 = pnand %p6141_p13, %p6135_p8 }
 0x9a0   : > { %6145 = shalt.err (!%p6142_p0)
}
 0x9a1   : > { %5898 = dma.vmem_to_hbm [thread:$0]  (%p6260_p5), %s10061_s17, 128, %s10059_s25, %s5366_s26  }
 0x9a2 PF: > { %p5904_p1 = scmp.ge.s32.totalorder %s6180_s21, 2  ;;  %s5392_s14 = sand.u32 1, %s6168_s18  }
 0x9a3   : > { %s5393_s15 = scalar_lea.sflag [#allocation3], %s5392_s14 }
 0x9a4   : > { %p5901_p2 = pnand %p5904_p1, %p6264_p6 }
 0x9a6   : > { %6163 = dma.done.wait (!%p5901_p2), %s5393_s15, 128  }
 0x9a7   : > { %6165 = vsyncadd (!%p5901_p2), %s5393_s15, 4294967168  ;;  %p15_p3 = scmp.ge.s32.totalorder %s6247_s24, 4   ;;  %s10425_s18 = smov %s6172_s19 }
 0x9a8   : > { %s10426_s19 = smov %s6176_s20  ;;  %s10427_s20 = smov %s6258_s27 }
 0x9a9   : > { %s10428_s21 = smov %s6247_s24  ;;  %17 = sbr.rel (!%p15_p3) target bundleno = 3 (0x3), region = 85 }
 0x9b0   :  { %5398 = vsyncpa [#allocation3], 1 }
 0x9b1   :  { %5400 = vsyncpa [#allocation3 + $0x1], 1 }

</bundles_post_ra>
